<compile_context>
chip_gen: v6e
topology: v6e:2x2x1
jax: 0.10.0
libtpu: 0.0.40
codegen_flags: <defaults>
</compile_context>

<pallas_src>
import jax
import jax.numpy as jnp
from jax.experimental import pallas as pl
from jax.experimental.pallas import tpu as pltpu

IN_FEATURES = 2048
HIDDEN = 1024


def _round_up(n, m):
    return ((n + m - 1) // m) * m


def _fc_kernel(x_ref, w1_ref, b1_ref, w2_ref, b2_ref, fc1_ref, fc2_ref):
    # x_ref:  (TM, 2048) native dtype   w1_ref: (2048, 1024) bf16  b1_ref: (1, 1024) f32
    # w2_ref: (1024, 1024) bf16         b2_ref: (1, 1024) f32
    # fc1_ref / fc2_ref: (TM, 1024) f32
    x = x_ref[...].astype(jnp.bfloat16)
    h1 = jnp.dot(x, w1_ref[...], preferred_element_type=jnp.float32) + b1_ref[...]
    h1 = jnp.maximum(h1, 0.0)                                   # ReLU
    fc1_ref[...] = h1.astype(fc1_ref.dtype)

    h2 = jnp.dot(h1.astype(jnp.bfloat16), w2_ref[...],
                 preferred_element_type=jnp.float32) + b2_ref[...]
    fc2_ref[...] = jnp.maximum(h2, 0.0).astype(fc2_ref.dtype)   # ReLU


def prepare_params(w1, b1, w2, b2):
    """One-time preprocessing (do NOT call per forward): transpose to
    (in, out) layout and cast weights to bf16 for the MXU."""
    w1_t = jnp.asarray(w1).T.astype(jnp.bfloat16)                # (2048, 1024)
    w2_t = jnp.asarray(w2).T.astype(jnp.bfloat16)                # (1024, 1024)
    b1_2d = jnp.asarray(b1, jnp.float32).reshape(1, HIDDEN)      # (1, 1024)
    b2_2d = jnp.asarray(b2, jnp.float32).reshape(1, HIDDEN)      # (1, 1024)
    return w1_t, b1_2d, w2_t, b2_2d


@jax.jit
def fully_connected_layer(x, w1_t, b1_2d, w2_t, b2_2d):
    """x: (B, C, H, W) or (B, 2048), any float dtype. Weights from prepare_params."""
    B = x.shape[0]
    x2d = x.reshape(B, -1)                                       # x.view(B, -1); native dtype
    assert x2d.shape[1] == IN_FEATURES, (
        f"expected {IN_FEATURES} features, got {x2d.shape[1]}")

    # Batch tiling: pad small/odd batches to a multiple of 8 rows; for large
    # batches use 512-row tiles (multiple of 8/128 granularity) so the
    # x / output tiles pipeline while the weights stay VMEM-resident.
    TM = _round_up(B, 8) if B <= 512 else 512
    Bp = _round_up(B, TM)
    if Bp != B:
        x2d = jnp.pad(x2d, ((0, Bp - B), (0, 0)))
    grid = (Bp // TM,)

    out_shape = (
        jax.ShapeDtypeStruct((Bp, HIDDEN), jnp.float32),  # fc1 (post-ReLU)
        jax.ShapeDtypeStruct((Bp, HIDDEN), jnp.float32),  # fc2 (post-ReLU)
    )

    x_bytes = x2d.dtype.itemsize
    cost = pl.CostEstimate(
        flops=2 * Bp * (IN_FEATURES * HIDDEN + HIDDEN * HIDDEN),
        transcendentals=0,
        bytes_accessed=(
            IN_FEATURES * HIDDEN * 2 + HIDDEN * HIDDEN * 2       # bf16 weights
            + 2 * HIDDEN * 4                                     # biases
            + Bp * IN_FEATURES * x_bytes                         # x
            + 2 * Bp * HIDDEN * 4                                # fc1 + fc2
        ),
    )

    fc1, fc2 = pl.pallas_call(
        _fc_kernel,
        out_shape=out_shape,
        grid=grid,
        in_specs=[
            pl.BlockSpec((TM, IN_FEATURES), lambda i: (i, 0)),       # x tile
            pl.BlockSpec((IN_FEATURES, HIDDEN), lambda i: (0, 0),
                         pipeline_mode=pl.Buffered(1)),              # w1 (resident, single-buffered)
            pl.BlockSpec((1, HIDDEN), lambda i: (0, 0)),             # b1 (resident)
            pl.BlockSpec((HIDDEN, HIDDEN), lambda i: (0, 0),
                         pipeline_mode=pl.Buffered(1)),              # w2 (resident, single-buffered)
            pl.BlockSpec((1, HIDDEN), lambda i: (0, 0)),             # b2 (resident)
        ],
        out_specs=(
            pl.BlockSpec((TM, HIDDEN), lambda i: (i, 0)),            # fc1 tile
            pl.BlockSpec((TM, HIDDEN), lambda i: (i, 0)),            # fc2 tile
        ),
        compiler_params=pltpu.CompilerParams(
            dimension_semantics=("parallel",),      # megacore-shard batch on v7x
            vmem_limit_bytes=48 * 1024 * 1024,      # ~22-28 MiB footprint at TM=512
        ),
        cost_estimate=cost,
    )(x2d, w1_t, b1_2d, w2_t, b2_2d)

    if Bp != B:
        fc1 = fc1[:B]
        fc2 = fc2[:B]
    return fc1, fc2


def _init_params(key):
    # Deterministic synthetic init, shapes matching nn.Linear(2048,1024)/(1024,1024).
    k1, k2, k3, k4 = jax.random.split(key, 4)
    lim1 = 1.0 / jnp.sqrt(float(IN_FEATURES))
    lim2 = 1.0 / jnp.sqrt(float(HIDDEN))
    w1 = jax.random.uniform(k1, (HIDDEN, IN_FEATURES), jnp.float32, -lim1, lim1)
    b1 = jax.random.uniform(k2, (HIDDEN,), jnp.float32, -lim1, lim1)
    w2 = jax.random.uniform(k3, (HIDDEN, HIDDEN), jnp.float32, -lim2, lim2)
    b2 = jax.random.uniform(k4, (HIDDEN,), jnp.float32, -lim2, lim2)
    return w1, b1, w2, b2


if __name__ == "__main__":
    key = jax.random.PRNGKey(0)
    kx, kp = jax.random.split(key)

    # Small NCHW input whose flattened feature dim is 2048: (2, 128, 4, 4).
    x = jax.random.normal(kx, (2, 128, 4, 4), jnp.float32)
    w1, b1, w2, b2 = _init_params(kp)

    # One-time parameter preprocessing (hoisted out of the forward).
    params = prepare_params(w1, b1, w2, b2)

    fc1, fc2 = fully_connected_layer(x, *params)
    jax.block_until_ready((fc1, fc2))

    # Reference: same math with bf16-quantized inputs/weights (f32 accumulate),
    # mirroring what the MXU computes.
    def q(a):
        return a.astype(jnp.bfloat16).astype(jnp.float32)

    x2d = x.reshape(x.shape[0], -1)
    ref1 = jnp.maximum(q(x2d) @ q(w1).T + b1, 0.0)
    ref2 = jnp.maximum(q(ref1) @ q(w2).T + b2, 0.0)
    assert jnp.allclose(fc1, ref1, atol=2e-3, rtol=2e-3)
    assert jnp.allclose(fc2, ref2, atol=2e-3, rtol=2e-3)

    # Loose sanity check against the full-f32 reference (bf16 weight quant error).
    ref1_f32 = jnp.maximum(x2d @ w1.T + b1, 0.0)
    ref2_f32 = jnp.maximum(ref1_f32 @ w2.T + b2, 0.0)
    assert jnp.allclose(fc1, ref1_f32, atol=1e-1, rtol=1e-1)
    assert jnp.allclose(fc2, ref2_f32, atol=1e-1, rtol=1e-1)

    assert fc1.shape == (2, 1024) and fc2.shape == (2, 1024)
    print("KERNEL_OK")
</pallas_src>

<mosaic_0001>
module attributes {stable_mosaic.version = 11 : i64} {
  func.func @_fc_kernel(%arg0: i32, %arg1: memref<8x2048xf32, #tpu.memory_space<vmem>>, %arg2: memref<2048x1024xbf16, #tpu.memory_space<vmem>>, %arg3: memref<1x1024xf32, #tpu.memory_space<vmem>>, %arg4: memref<1024x1024xbf16, #tpu.memory_space<vmem>>, %arg5: memref<1x1024xf32, #tpu.memory_space<vmem>>, %arg6: memref<8x1024xf32, #tpu.memory_space<vmem>>, %arg7: memref<8x1024xf32, #tpu.memory_space<vmem>>) attributes {dimension_semantics = [#tpu.dimension_semantics<parallel>], iteration_bounds = array<i64: 1>, scalar_prefetch = 0 : i64, scratch_operands = 0 : i64, tpu.core_type = #tpu.core_type<tc>, window_params = [{transform_indices = @transform_0, window_bounds = array<i64: 8, 2048>}, {pipeline_mode = #tpu.pipeline_mode<synchronous>, transform_indices = @transform_1, window_bounds = array<i64: 2048, 1024>}, {pipeline_mode = #tpu.pipeline_mode<synchronous>, transform_indices = @transform_2, window_bounds = array<i64: 1, 1024>}, {pipeline_mode = #tpu.pipeline_mode<synchronous>, transform_indices = @transform_3, window_bounds = array<i64: 1024, 1024>}, {pipeline_mode = #tpu.pipeline_mode<synchronous>, transform_indices = @transform_4, window_bounds = array<i64: 1, 1024>}, {transform_indices = @transform_5, window_bounds = array<i64: 8, 1024>}, {transform_indices = @transform_6, window_bounds = array<i64: 8, 1024>}]} {
    %c0 = arith.constant 0 : index
    %c0_0 = arith.constant 0 : index
    %0 = vector.load %arg1[%c0, %c0_0] : memref<8x2048xf32, #tpu.memory_space<vmem>>, vector<8x2048xf32>
    %1 = arith.truncf %0 : vector<8x2048xf32> to vector<8x2048xbf16>
    %c0_1 = arith.constant 0 : index
    %c0_2 = arith.constant 0 : index
    %2 = vector.load %arg2[%c0_1, %c0_2] : memref<2048x1024xbf16, #tpu.memory_space<vmem>>, vector<2048x1024xbf16>
    %cst = arith.constant dense<0.000000e+00> : vector<8x1024xf32>
    %3 = tpu.matmul %1, %2, %cst {dimension_numbers = #tpu.dot_dimension_numbers<[1], [0], [0], [1], [0, 0, 1, 1], [], []>} : vector<8x2048xbf16>, vector<2048x1024xbf16>, vector<8x1024xf32> -> vector<8x1024xf32>
    %c0_3 = arith.constant 0 : index
    %c0_4 = arith.constant 0 : index
    %4 = vector.load %arg3[%c0_3, %c0_4] : memref<1x1024xf32, #tpu.memory_space<vmem>>, vector<1x1024xf32>
    %5 = vector.broadcast %4 : vector<1x1024xf32> to vector<8x1024xf32>
    %6 = arith.addf %3, %5 : vector<8x1024xf32>
    %cst_5 = arith.constant 0.000000e+00 : f32
    %7 = vector.broadcast %cst_5 : f32 to vector<8x1024xf32>
    %8 = arith.maximumf %6, %7 : vector<8x1024xf32>
    %c0_6 = arith.constant 0 : index
    %c0_7 = arith.constant 0 : index
    %9 = vector.load %arg6[%c0_6, %c0_7] : memref<8x1024xf32, #tpu.memory_space<vmem>>, vector<8x1024xf32>
    tpu.vector_store %arg6[%c0_6, %c0_7], %8 {strides = array<i32>} : memref<8x1024xf32, #tpu.memory_space<vmem>>, vector<8x1024xf32>,
    %10 = arith.truncf %8 : vector<8x1024xf32> to vector<8x1024xbf16>
    %c0_8 = arith.constant 0 : index
    %c0_9 = arith.constant 0 : index
    %11 = vector.load %arg4[%c0_8, %c0_9] : memref<1024x1024xbf16, #tpu.memory_space<vmem>>, vector<1024x1024xbf16>
    %cst_10 = arith.constant dense<0.000000e+00> : vector<8x1024xf32>
    %12 = tpu.matmul %10, %11, %cst_10 {dimension_numbers = #tpu.dot_dimension_numbers<[1], [0], [0], [1], [0, 0, 1, 1], [], []>} : vector<8x1024xbf16>, vector<1024x1024xbf16>, vector<8x1024xf32> -> vector<8x1024xf32>
    %c0_11 = arith.constant 0 : index
    %c0_12 = arith.constant 0 : index
    %13 = vector.load %arg5[%c0_11, %c0_12] : memref<1x1024xf32, #tpu.memory_space<vmem>>, vector<1x1024xf32>
    %14 = vector.broadcast %13 : vector<1x1024xf32> to vector<8x1024xf32>
    %15 = arith.addf %12, %14 : vector<8x1024xf32>
    %cst_13 = arith.constant 0.000000e+00 : f32
    %16 = vector.broadcast %cst_13 : f32 to vector<8x1024xf32>
    %17 = arith.maximumf %15, %16 : vector<8x1024xf32>
    %c0_14 = arith.constant 0 : index
    %c0_15 = arith.constant 0 : index
    %18 = vector.load %arg7[%c0_14, %c0_15] : memref<8x1024xf32, #tpu.memory_space<vmem>>, vector<8x1024xf32>
    tpu.vector_store %arg7[%c0_14, %c0_15], %17 {strides = array<i32>} : memref<8x1024xf32, #tpu.memory_space<vmem>>, vector<8x1024xf32>,
    return
  }
  func.func @transform_0(%arg0: i32) -> (i32, i32) {
    %c0_i32 = arith.constant 0 : i32
    %c0_i32_0 = arith.constant 0 : i32
    return %arg0, %c0_i32 : i32, i32
  }
  func.func @transform_1(%arg0: i32) -> (i32, i32) {
    %c0_i32 = arith.constant 0 : i32
    %c0_i32_0 = arith.constant 0 : i32
    %c0_i32_1 = arith.constant 0 : i32
    return %c0_i32, %c0_i32_0 : i32, i32
  }
  func.func @transform_2(%arg0: i32) -> (i32, i32) {
    %c0_i32 = arith.constant 0 : i32
    %c0_i32_0 = arith.constant 0 : i32
    %c0_i32_1 = arith.constant 0 : i32
    return %c0_i32, %c0_i32_0 : i32, i32
  }
  func.func @transform_3(%arg0: i32) -> (i32, i32) {
    %c0_i32 = arith.constant 0 : i32
    %c0_i32_0 = arith.constant 0 : i32
    %c0_i32_1 = arith.constant 0 : i32
    return %c0_i32, %c0_i32_0 : i32, i32
  }
  func.func @transform_4(%arg0: i32) -> (i32, i32) {
    %c0_i32 = arith.constant 0 : i32
    %c0_i32_0 = arith.constant 0 : i32
    %c0_i32_1 = arith.constant 0 : i32
    return %c0_i32, %c0_i32_0 : i32, i32
  }
  func.func @transform_5(%arg0: i32) -> (i32, i32) {
    %c0_i32 = arith.constant 0 : i32
    %c0_i32_0 = arith.constant 0 : i32
    return %arg0, %c0_i32 : i32, i32
  }
  func.func @transform_6(%arg0: i32) -> (i32, i32) {
    %c0_i32 = arith.constant 0 : i32
    %c0_i32_0 = arith.constant 0 : i32
    return %arg0, %c0_i32 : i32, i32
  }
}

</mosaic_0001>

<bundles_post_ra>
// kernel: fully_connected_layer.1
= control target key start
LH: loop header
LB: loop body
LE: loop exit
PB: predicated region body
PF: predicated region fallthrough
CT: control target
= control target key end

     0   :  { %12 = vsyncpa [#allocation3], 0  ;;  %s13564_s0 = inlined_call_operand.vmem [shape: f32[8,2048], index: 0, kind: input, shape index: {}]   ;;  %s13565_s1 = inlined_call_operand.hbm [shape: bf16[2048,1024], index: 1, kind: input, shape index: {}]   ;;  %s13566_s2 = inlined_call_operand.hbm [shape: f32[1,1024], index: 2, kind: input, shape index: {}]   ;;  %s13567_s3 = inlined_call_operand.hbm [shape: bf16[1024,1024], index: 3, kind: input, shape index: {}]   ;;  %s13568_s4 = inlined_call_operand.hbm [shape: f32[1,1024], index: 4, kind: input, shape index: {}]   ;;  %s13569_s5 = inlined_call_operand.vmem [shape: f32[8,1024], index: 5, kind: output, shape index: {0}]   ;;  %s13570_s6 = inlined_call_operand.vmem [shape: f32[8,1024], index: 6, kind: output, shape index: {1}]  }
   0x1   :  { %13 = vsyncpa [#allocation5], 0 }
   0x2   :  { %14 = vsyncpa [#allocation8], 0  ;;  %s13061_s21 = smov [#allocation4]   ;;  %s13062_s23 = smov [#allocation2]  }
   0x3   :  { %s35_s22 = sshll.u32 %s13061_s21, 4  ;;  %s22_s24 = sshll.u32 %s13062_s23, 4  ;;  %s36_s22 = int_to_ptr.vmem [resolvable:$true] %s35_s22  ;;  %s23_s24 = int_to_ptr.vmem [resolvable:$true] %s22_s24 }
   0x4   :  { %s12983_s25 = scalar_lea.vmem %s36_s22, 128  ;;  %p12988_p1 = scmp.lt.s32.totalorder %s36_s22, %s36_s22 }
   0x5   :  { %p12984_p0 = scmp.ne.s32.totalorder %s36_s22, %s12983_s25  ;;  %p12989_p2 = scmp.lt.s32.totalorder %s12983_s25, %s12983_s25 }
   0x7   :  { %p12990_p3 = por %p12989_p2, %p12988_p1 }
   0x9   :  { %p12991_p4 = pnand %p12990_p3, %p12984_p0 }
   0xb   :  { %12994 = shalt.err (!%p12991_p4)
}
   0xc   :  { %38 = dma.hbm_to_vmem [thread:$0]  %s13566_s2, 128, %s36_s22, [#allocation5]  }
   0xd   :  { %s13003_s28 = scalar_lea.vmem %s23_s24, 131072  ;;  %p13008_p6 = scmp.lt.s32.totalorder %s23_s24, %s23_s24 }
   0xe   :  { %p13004_p5 = scmp.ne.s32.totalorder %s23_s24, %s13003_s28  ;;  %p13009_p7 = scmp.lt.s32.totalorder %s13003_s28, %s13003_s28 }
  0x10   :  { %p13010_p8 = por %p13009_p7, %p13008_p6 }
  0x12   :  { %p13011_p9 = pnand %p13010_p8, %p13004_p5 }
  0x14   :  { %13014 = shalt.err (!%p13011_p9)
}
  0x15   :  { %s13063_s29 = smov 512   ;;  %s13064_s30 = smov 32  }
  0x16   :  { %28 = dma.hbm_to_vmem [thread:$0]  %s13565_s1, 131072, %s23_s24, [#allocation3], %s13063_s29, %s13063_s29, %s13064_s30  }
  0x17   :  { %s13065_s9 = smov [#allocation6]   ;;  %s13066_s11 = smov [#allocation7]  }
  0x18   :  { %s44_s10 = sshll.u32 %s13065_s9, 4  ;;  %s57_s12 = sshll.u32 %s13066_s11, 4  ;;  %s45_s10 = int_to_ptr.vmem [resolvable:$true] %s44_s10  ;;  %s58_s12 = int_to_ptr.vmem [resolvable:$true] %s57_s12 }
  0x19   :  { %s13023_s2 = scalar_lea.vmem %s45_s10, 65536  ;;  %p13028_p11 = scmp.lt.s32.totalorder %s45_s10, %s45_s10 }
  0x1a   :  { %p13024_p10 = scmp.ne.s32.totalorder %s45_s10, %s13023_s2  ;;  %p13029_p12 = scmp.lt.s32.totalorder %s13023_s2, %s13023_s2 }
  0x1c   :  { %p13030_p13 = por %p13029_p12, %p13028_p11 }
  0x1e   :  { %p13031_p0 = pnand %p13030_p13, %p13024_p10 }
  0x20   :  { %13034 = shalt.err (!%p13031_p0)
}
  0x21   :  { %50 = dma.hbm_to_vmem [thread:$0]  %s13567_s3, 65536, %s45_s10, [#allocation5], %s13063_s29, %s13063_s29, %s13064_s30  }
  0x22   :  { %s13043_s15 = scalar_lea.vmem %s58_s12, 128  ;;  %p13048_p2 = scmp.lt.s32.totalorder %s58_s12, %s58_s12 }
  0x23   :  { %p13044_p1 = scmp.ne.s32.totalorder %s58_s12, %s13043_s15  ;;  %p13049_p3 = scmp.lt.s32.totalorder %s13043_s15, %s13043_s15 }
  0x25   :  { %p13050_p4 = por %p13049_p3, %p13048_p2 }
  0x27   :  { %p13051_p5 = pnand %p13050_p4, %p13044_p1 }
  0x29   :  { %13054 = shalt.err (!%p13051_p5)
}
  0x2a   :  { %60 = dma.hbm_to_vmem [thread:$0]  %s13568_s4, 128, %s58_s12, [#allocation8]  }
  0x2b   :  { %13055 = dma.done.wait [#allocation3], 131072  }
  0x2c   :  { %13056 = vsyncadd [#allocation3], 4294836224 }
  0x2d   :  { %13057 = dma.done.wait [#allocation5], 65664  }
  0x2e   :  { %13058 = vsyncadd [#allocation5], 4294901632 }
  0x2f   :  { %13059 = dma.done.wait [#allocation8], 128  }
  0x30   :  { %13060 = vsyncadd [#allocation8], 4294967168  ;;  %v161_v0 = vld [vmem:[#allocation2 + $0x1c0] sm:$0xff]  ;;  %v74_v53 = vld [vmem:[%s13564_s0 + $0x8] sm:$0xff] }
  0x31   :  { %v165_v1 = vld [vmem:[#allocation2 + $0x1e0] sm:$0xff]  ;;  %v76_v54 = vld [vmem:[%s13564_s0 + $0x18] sm:$0xff]  ;;  %v13120_v58 = vpack.c.bf16 %v74_v53, %v74_v53 }
  0x32   :  { %v289_v2 = vld [vmem:[#allocation2 + $0x5c0] sm:$0xff]  ;;  %v11481_v3 = vcombine.high %v161_v0, %v165_v1  ;;  %v11480_v5 = vcombine.low %v161_v0, %v165_v1  ;;  %v13122_v59 = vpack.c.bf16 %v76_v54, %v76_v54 }
  0x33   :  { %v293_v4 = vld [vmem:[#allocation2 + $0x5e0] sm:$0xff]  ;;  %6323 = vmatprep.mubr.bf16.mxu0 %v13120_v58 }
  0x34   :  { %v153_v6 = vld [vmem:[#allocation2 + $0x180] sm:$0xff]  ;;  %v11609_v8 = vcombine.high %v289_v2, %v293_v4  ;;  %v11608_v9 = vcombine.low %v289_v2, %v293_v4  ;;  %6291 = vmatprep.subr.bf16.mxu0 %v11481_v3  ;;  %6364 = vmatprep.mubr.bf16.mxu1 %v13122_v59 }
  0x35   :  { %v157_v7 = vld [vmem:[#allocation2 + $0x1a0] sm:$0xff]  ;;  %6292 = vmatpush1.bf16.msra.mxu0 %v11480_v5 }
  0x36   :  { %v11473_v10 = vcombine.high %v153_v6, %v157_v7  ;;  %v281_v11 = vld [vmem:[#allocation2 + $0x580] sm:$0xff]  ;;  %6332 = vmatprep.subr.bf16.mxu1 %v11609_v8  ;;  %v11472_v18 = vcombine.low %v153_v6, %v157_v7 }
  0x37   :  { %v285_v12 = vld [vmem:[#allocation2 + $0x5a0] sm:$0xff]  ;;  %6333 = vmatpush1.bf16.msra.mxu1 %v11608_v9 }
  0x38   :  { %v145_v13 = vld [vmem:[#allocation2 + $0x140] sm:$0xff]  ;;  %v11601_v14 = vcombine.high %v281_v11, %v285_v12  ;;  %6293 = vmatprep.subr.bf16.mxu0 %v11473_v10  ;;  %v11600_v19 = vcombine.low %v281_v11, %v285_v12 }
  0x39   :  { %v149_v15 = vld [vmem:[#allocation2 + $0x160] sm:$0xff]  ;;  %6294 = vmatpush1.bf16.msra.mxu0 %v11472_v18 }
  0x3a   :  { %v273_v16 = vld [vmem:[#allocation2 + $0x540] sm:$0xff]  ;;  %v11465_v20 = vcombine.high %v145_v13, %v149_v15  ;;  %6334 = vmatprep.subr.bf16.mxu1 %v11601_v14  ;;  %v11464_v26 = vcombine.low %v145_v13, %v149_v15 }
  0x3b   :  { %v277_v17 = vld [vmem:[#allocation2 + $0x560] sm:$0xff]  ;;  %6335 = vmatpush1.bf16.msra.mxu1 %v11600_v19 }
  0x3c   :  { %v11593_v21 = vcombine.high %v273_v16, %v277_v17  ;;  %v137_v22 = vld [vmem:[#allocation2 + $0x100] sm:$0xff]  ;;  %6295 = vmatprep.subr.bf16.mxu0 %v11465_v20  ;;  %v11592_v27 = vcombine.low %v273_v16, %v277_v17 }
  0x3d   :  { %v141_v23 = vld [vmem:[#allocation2 + $0x120] sm:$0xff]  ;;  %6296 = vmatpush1.bf16.msra.mxu0 %v11464_v26 }
  0x3e   :  { %v265_v24 = vld [vmem:[#allocation2 + $0x500] sm:$0xff]  ;;  %v11457_v28 = vcombine.high %v137_v22, %v141_v23  ;;  %6336 = vmatprep.subr.bf16.mxu1 %v11593_v21  ;;  %v11456_v34 = vcombine.low %v137_v22, %v141_v23 }
  0x3f   :  { %v269_v25 = vld [vmem:[#allocation2 + $0x520] sm:$0xff]  ;;  %6337 = vmatpush1.bf16.msra.mxu1 %v11592_v27 }
  0x40   :  { %v11585_v29 = vcombine.high %v265_v24, %v269_v25  ;;  %v129_v30 = vld [vmem:[#allocation2 + $0xc0] sm:$0xff]  ;;  %6297 = vmatprep.subr.bf16.mxu0 %v11457_v28  ;;  %v11584_v35 = vcombine.low %v265_v24, %v269_v25 }
  0x41   :  { %v133_v31 = vld [vmem:[#allocation2 + $0xe0] sm:$0xff]  ;;  %6298 = vmatpush1.bf16.msra.mxu0 %v11456_v34 }
  0x42   :  { %v257_v32 = vld [vmem:[#allocation2 + $0x4c0] sm:$0xff]  ;;  %v11449_v36 = vcombine.high %v129_v30, %v133_v31  ;;  %6338 = vmatprep.subr.bf16.mxu1 %v11585_v29  ;;  %v11448_v42 = vcombine.low %v129_v30, %v133_v31 }
  0x43   :  { %v261_v33 = vld [vmem:[#allocation2 + $0x4e0] sm:$0xff]  ;;  %6339 = vmatpush1.bf16.msra.mxu1 %v11584_v35 }
  0x44   :  { %v11577_v37 = vcombine.high %v257_v32, %v261_v33  ;;  %v121_v38 = vld [vmem:[#allocation2 + $0x80] sm:$0xff]  ;;  %6299 = vmatprep.subr.bf16.mxu0 %v11449_v36  ;;  %v11576_v43 = vcombine.low %v257_v32, %v261_v33 }
  0x45   :  { %v125_v39 = vld [vmem:[#allocation2 + $0xa0] sm:$0xff]  ;;  %6300 = vmatpush1.bf16.msra.mxu0 %v11448_v42 }
  0x46   :  { %v249_v40 = vld [vmem:[#allocation2 + $0x480] sm:$0xff]  ;;  %v11441_v44 = vcombine.high %v121_v38, %v125_v39  ;;  %6340 = vmatprep.subr.bf16.mxu1 %v11577_v37  ;;  %v11440_v50 = vcombine.low %v121_v38, %v125_v39 }
  0x47   :  { %v253_v41 = vld [vmem:[#allocation2 + $0x4a0] sm:$0xff]  ;;  %6341 = vmatpush1.bf16.msra.mxu1 %v11576_v43 }
  0x48   :  { %v11569_v45 = vcombine.high %v249_v40, %v253_v41  ;;  %v113_v46 = vld [vmem:[#allocation2 + $0x40] sm:$0xff]  ;;  %6301 = vmatprep.subr.bf16.mxu0 %v11441_v44  ;;  %v11568_v51 = vcombine.low %v249_v40, %v253_v41 }
  0x49   :  { %v117_v47 = vld [vmem:[#allocation2 + $0x60] sm:$0xff]  ;;  %6302 = vmatpush1.bf16.msra.mxu0 %v11440_v50 }
  0x4a   :  { %v241_v48 = vld [vmem:[#allocation2 + $0x440] sm:$0xff]  ;;  %v11433_v52 = vcombine.high %v113_v46, %v117_v47  ;;  %6342 = vmatprep.subr.bf16.mxu1 %v11569_v45  ;;  %v11432_v62 = vcombine.low %v113_v46, %v117_v47 }
  0x4b   :  { %v245_v49 = vld [vmem:[#allocation2 + $0x460] sm:$0xff]  ;;  %6343 = vmatpush1.bf16.msra.mxu1 %v11568_v51 }
  0x4c   :  { %v11561_v55 = vcombine.high %v241_v48, %v245_v49  ;;  %v105_v56 = vld [vmem:[#allocation2] sm:$0xff]  ;;  %6303 = vmatprep.subr.bf16.mxu0 %v11433_v52  ;;  %v11560_v63 = vcombine.low %v241_v48, %v245_v49 }
  0x4d   :  { %v109_v57 = vld [vmem:[#allocation2 + $0x20] sm:$0xff]  ;;  %6304 = vmatpush1.bf16.msra.mxu0 %v11432_v62 }
  0x4e   :  { %v233_v60 = vld [vmem:[#allocation2 + $0x400] sm:$0xff]  ;;  %v11425_v0 = vcombine.high %v105_v56, %v109_v57  ;;  %6344 = vmatprep.subr.bf16.mxu1 %v11561_v55  ;;  %v11424_v6 = vcombine.low %v105_v56, %v109_v57 }
  0x4f   :  { %v237_v61 = vld [vmem:[#allocation2 + $0x420] sm:$0xff]  ;;  %6345 = vmatpush1.bf16.msra.mxu1 %v11560_v63 }
  0x50   :  { %v11553_v1 = vcombine.high %v233_v60, %v237_v61  ;;  %v225_v2 = vld [vmem:[#allocation2 + $0x3c0] sm:$0xff]  ;;  %6305 = vmatprep.subr.bf16.mxu0 %v11425_v0  ;;  %v11552_v7 = vcombine.low %v233_v60, %v237_v61 }
  0x51   :  { %v229_v3 = vld [vmem:[#allocation2 + $0x3e0] sm:$0xff]  ;;  %6306 = vmatpush1.bf16.msra.mxu0 %v11424_v6 }
  0x52   :  { %v353_v4 = vld [vmem:[#allocation2 + $0x7c0] sm:$0xff]  ;;  %v11545_v8 = vcombine.high %v225_v2, %v229_v3  ;;  %6346 = vmatprep.subr.bf16.mxu1 %v11553_v1  ;;  %v11544_v14 = vcombine.low %v225_v2, %v229_v3 }
  0x53   :  { %v357_v5 = vld [vmem:[#allocation2 + $0x7e0] sm:$0xff]  ;;  %6347 = vmatpush1.bf16.msra.mxu1 %v11552_v7 }
  0x54   :  { %v11673_v9 = vcombine.high %v353_v4, %v357_v5  ;;  %v217_v10 = vld [vmem:[#allocation2 + $0x380] sm:$0xff]  ;;  %6307 = vmatprep.subr.bf16.mxu0 %v11545_v8  ;;  %v11672_v15 = vcombine.low %v353_v4, %v357_v5 }
  0x55   :  { %v221_v11 = vld [vmem:[#allocation2 + $0x3a0] sm:$0xff]  ;;  %6308 = vmatpush2.bf16.msra.mxu0 %v11544_v14 }
  0x56   :  { %v345_v12 = vld [vmem:[#allocation2 + $0x780] sm:$0xff]  ;;  %v11537_v16 = vcombine.high %v217_v10, %v221_v11  ;;  %6348 = vmatprep.subr.bf16.mxu1 %v11673_v9  ;;  %v11536_v22 = vcombine.low %v217_v10, %v221_v11  ;;  %v75_v11 = vld [vmem:[%s13564_s0 + $0x10] sm:$0xff] }
  0x57   :  { %v349_v13 = vld [vmem:[#allocation2 + $0x7a0] sm:$0xff]  ;;  %6349 = vmatpush2.bf16.msra.mxu1 %v11672_v15 }
  0x58   :  { %v11665_v17 = vcombine.high %v345_v12, %v349_v13  ;;  %v209_v18 = vld [vmem:[#allocation2 + $0x340] sm:$0xff]  ;;  %6309 = vmatprep.subr.bf16.mxu0 %v11537_v16  ;;  %v11664_v23 = vcombine.low %v345_v12, %v349_v13 }
  0x59   :  { %v213_v19 = vld [vmem:[#allocation2 + $0x360] sm:$0xff]  ;;  %6310 = vmatpush2.bf16.msra.mxu0 %v11536_v22  ;;  %v80_v22 = vld [vmem:[%s13564_s0 + $0x38] sm:$0xff] }
  0x5a   :  { %v337_v20 = vld [vmem:[#allocation2 + $0x740] sm:$0xff]  ;;  %v11529_v24 = vcombine.high %v209_v18, %v213_v19  ;;  %6350 = vmatprep.subr.bf16.mxu1 %v11665_v17  ;;  %v11528_v30 = vcombine.low %v209_v18, %v213_v19  ;;  %v78_v19 = vld [vmem:[%s13564_s0 + $0x28] sm:$0xff] }
  0x5b   :  { %v341_v21 = vld [vmem:[#allocation2 + $0x760] sm:$0xff]  ;;  %6351 = vmatpush2.bf16.msra.mxu1 %v11664_v23 }
  0x5c   :  { %v11657_v25 = vcombine.high %v337_v20, %v341_v21  ;;  %v201_v26 = vld [vmem:[#allocation2 + $0x300] sm:$0xff]  ;;  %6311 = vmatprep.subr.bf16.mxu0 %v11529_v24  ;;  %v11656_v31 = vcombine.low %v337_v20, %v341_v21  ;;  %v13137_v20 = vpack.c.bf16 %v75_v11, %v75_v11 }
  0x5d   :  { %v205_v27 = vld [vmem:[#allocation2 + $0x320] sm:$0xff]  ;;  %6312 = vmatpush2.bf16.msra.mxu0 %v11528_v30 }
  0x5e   :  { %v329_v28 = vld [vmem:[#allocation2 + $0x700] sm:$0xff]  ;;  %v11521_v32 = vcombine.high %v201_v26, %v205_v27  ;;  %6352 = vmatprep.subr.bf16.mxu1 %v11657_v25  ;;  %v11520_v38 = vcombine.low %v201_v26, %v205_v27 }
  0x5f   :  { %v333_v29 = vld [vmem:[#allocation2 + $0x720] sm:$0xff]  ;;  %6353 = vmatpush2.bf16.msra.mxu1 %v11656_v31  ;;  %v13145_v31 = vpack.c.bf16 %v80_v22, %v80_v22 }
  0x60   :  { %v11649_v33 = vcombine.high %v329_v28, %v333_v29  ;;  %v193_v34 = vld [vmem:[#allocation2 + $0x2c0] sm:$0xff]  ;;  %6313 = vmatprep.subr.bf16.mxu0 %v11521_v32  ;;  %v11648_v39 = vcombine.low %v329_v28, %v333_v29  ;;  %v13142_v28 = vpack.c.bf16 %v78_v19, %v78_v19 }
  0x61   :  { %v197_v35 = vld [vmem:[#allocation2 + $0x2e0] sm:$0xff]  ;;  %6314 = vmatpush2.bf16.msra.mxu0 %v11520_v38 }
  0x62   :  { %v321_v36 = vld [vmem:[#allocation2 + $0x6c0] sm:$0xff]  ;;  %v11513_v40 = vcombine.high %v193_v34, %v197_v35  ;;  %6354 = vmatprep.subr.bf16.mxu1 %v11649_v33  ;;  %v11512_v46 = vcombine.low %v193_v34, %v197_v35 }
  0x63   :  { %v325_v37 = vld [vmem:[#allocation2 + $0x6e0] sm:$0xff]  ;;  %6355 = vmatpush2.bf16.msra.mxu1 %v11648_v39 }
  0x64   :  { %v11641_v41 = vcombine.high %v321_v36, %v325_v37  ;;  %v185_v42 = vld [vmem:[#allocation2 + $0x280] sm:$0xff]  ;;  %6315 = vmatprep.subr.bf16.mxu0 %v11513_v40  ;;  %v11640_v47 = vcombine.low %v321_v36, %v325_v37 }
  0x65   :  { %v189_v43 = vld [vmem:[#allocation2 + $0x2a0] sm:$0xff]  ;;  %6316 = vmatpush2.bf16.msra.mxu0 %v11512_v46 }
  0x66   :  { %v313_v44 = vld [vmem:[#allocation2 + $0x680] sm:$0xff]  ;;  %v11505_v48 = vcombine.high %v185_v42, %v189_v43  ;;  %6356 = vmatprep.subr.bf16.mxu1 %v11641_v41  ;;  %v11504_v54 = vcombine.low %v185_v42, %v189_v43 }
  0x67   :  { %v317_v45 = vld [vmem:[#allocation2 + $0x6a0] sm:$0xff]  ;;  %6357 = vmatpush2.bf16.msra.mxu1 %v11640_v47 }
  0x68   :  { %v11633_v49 = vcombine.high %v313_v44, %v317_v45  ;;  %v177_v50 = vld [vmem:[#allocation2 + $0x240] sm:$0xff]  ;;  %6317 = vmatprep.subr.bf16.mxu0 %v11505_v48  ;;  %v11632_v55 = vcombine.low %v313_v44, %v317_v45 }
  0x69   :  { %v181_v51 = vld [vmem:[#allocation2 + $0x260] sm:$0xff]  ;;  %6318 = vmatpush2.bf16.msra.mxu0 %v11504_v54 }
  0x6a   :  { %v305_v52 = vld [vmem:[#allocation2 + $0x640] sm:$0xff]  ;;  %v11497_v56 = vcombine.high %v177_v50, %v181_v51  ;;  %6358 = vmatprep.subr.bf16.mxu1 %v11633_v49  ;;  %v11496_v0 = vcombine.low %v177_v50, %v181_v51 }
  0x6b   :  { %v309_v53 = vld [vmem:[#allocation2 + $0x660] sm:$0xff]  ;;  %6359 = vmatpush2.bf16.msra.mxu1 %v11632_v55 }
  0x6c   :  { %v11625_v57 = vcombine.high %v305_v52, %v309_v53  ;;  %v169_v60 = vld [vmem:[#allocation2 + $0x200] sm:$0xff]  ;;  %6319 = vmatprep.subr.bf16.mxu0 %v11497_v56  ;;  %v11624_v1 = vcombine.low %v305_v52, %v309_v53 }
  0x6d   :  { %v173_v61 = vld [vmem:[#allocation2 + $0x220] sm:$0xff]  ;;  %6320 = vmatpush2.bf16.msra.mxu0 %v11496_v0 }
  0x6e   :  { %v297_v62 = vld [vmem:[#allocation2 + $0x600] sm:$0xff]  ;;  %v11489_v2 = vcombine.high %v169_v60, %v173_v61  ;;  %6360 = vmatprep.subr.bf16.mxu1 %v11625_v57  ;;  %v11488_v8 = vcombine.low %v169_v60, %v173_v61 }
  0x6f   :  { %v301_v63 = vld [vmem:[#allocation2 + $0x620] sm:$0xff]  ;;  %6361 = vmatpush2.bf16.msra.mxu1 %v11624_v1 }
  0x70   :  { %v11617_v3 = vcombine.high %v297_v62, %v301_v63  ;;  %v417_v4 = vld [vmem:[#allocation2 + $0x9c0] sm:$0xff]  ;;  %6321 = vmatprep.subr.bf16.mxu0 %v11489_v2  ;;  %v11616_v10 = vcombine.low %v297_v62, %v301_v63 }
  0x71   :  { %v421_v5 = vld [vmem:[#allocation2 + $0x9e0] sm:$0xff]  ;;  %6322 = vmatpush2.bf16.msra.mxu0 %v11488_v8 }
  0x72   :  { %v545_v6 = vld [vmem:[#allocation2 + $0xdc0] sm:$0xff]  ;;  %v11737_v12 = vcombine.high %v417_v4, %v421_v5  ;;  %6362 = vmatprep.subr.bf16.mxu1 %v11617_v3  ;;  %v11736_v21 = vcombine.low %v417_v4, %v421_v5 }
  0x73   :  { %v549_v7 = vld [vmem:[#allocation2 + $0xde0] sm:$0xff]  ;;  %6363 = vmatpush2.bf16.msra.mxu1 %v11616_v10 }
  0x74   :  { %v73_v9 = vld [vmem:[%s13564_s0] sm:$0xff]  ;;  %v11865_v13 = vcombine.high %v545_v6, %v549_v7  ;;  %6373 = vmatprep.subr.bf16.mxu0 %v11737_v12  ;;  %v11864_v23 = vcombine.low %v545_v6, %v549_v7 }
  0x75   :  { %v409_v14 = vld [vmem:[#allocation2 + $0x980] sm:$0xff]  ;;  %v13132_v16 = vpack.c.bf16 %v73_v9, %v73_v9 }
  0x76   :  { %v413_v15 = vld [vmem:[#allocation2 + $0x9a0] sm:$0xff]  ;;  %6414 = vmatprep.subr.bf16.mxu1 %v11865_v13  ;;  %6365 = vmatmul.mubr.bf16.vlgmr.msra.gmra.mxu1 %v13137_v20 }
  0x77   :  { %v537_v17 = vld [vmem:[#allocation2 + $0xd80] sm:$0xff]  ;;  %v11729_v24 = vcombine.high %v409_v14, %v413_v15  ;;  %6324 = vmatmul.mubr.bf16.vlgmr.msra.gmra.mxu0 %v13132_v16  ;;  %v11728_v32 = vcombine.low %v409_v14, %v413_v15  ;;  %6415 = vmatpush1.bf16.msra.mxu1 %v11864_v23 }
  0x78   :  { %v541_v18 = vld [vmem:[#allocation2 + $0xda0] sm:$0xff]  ;;  %6374 = vmatpush1.bf16.msra.mxu0 %v11736_v21  ;;  %6405 = vmatprep.mubr.bf16.mxu0 %v13142_v28 }
  0x79   :  { %v11857_v25 = vcombine.high %v537_v17, %v541_v18  ;;  %v401_v26 = vld [vmem:[#allocation2 + $0x940] sm:$0xff]  ;;  %6375 = vmatprep.subr.bf16.mxu0 %v11729_v24  ;;  %v11856_v33 = vcombine.low %v537_v17, %v541_v18  ;;  %6446 = vmatprep.mubr.bf16.mxu1 %v13145_v31 }
  0x7a   :  { %v405_v27 = vld [vmem:[#allocation2 + $0x960] sm:$0xff] }
  0x7b   :  { %v529_v29 = vld [vmem:[#allocation2 + $0xd40] sm:$0xff]  ;;  %v11721_v34 = vcombine.high %v401_v26, %v405_v27  ;;  %6416 = vmatprep.subr.bf16.mxu1 %v11857_v25  ;;  %v11720_v40 = vcombine.low %v401_v26, %v405_v27 }
  0x7c   :  { %v533_v30 = vld [vmem:[#allocation2 + $0xd60] sm:$0xff]  ;;  %6376 = vmatpush1.bf16.msra.mxu0 %v11728_v32  ;;  %6417 = vmatpush1.bf16.msra.mxu1 %v11856_v33 }
  0x7d   :  { %v11849_v35 = vcombine.high %v529_v29, %v533_v30  ;;  %v393_v36 = vld [vmem:[#allocation2 + $0x900] sm:$0xff]  ;;  %6377 = vmatprep.subr.bf16.mxu0 %v11721_v34  ;;  %v11848_v41 = vcombine.low %v529_v29, %v533_v30 }
  0x7e   :  { %v397_v37 = vld [vmem:[#allocation2 + $0x920] sm:$0xff] }
  0x7f   :  { %v521_v38 = vld [vmem:[#allocation2 + $0xd00] sm:$0xff]  ;;  %v11713_v42 = vcombine.high %v393_v36, %v397_v37  ;;  %6418 = vmatprep.subr.bf16.mxu1 %v11849_v35  ;;  %v11712_v48 = vcombine.low %v393_v36, %v397_v37 }
  0x80   :  { %v525_v39 = vld [vmem:[#allocation2 + $0xd20] sm:$0xff]  ;;  %6378 = vmatpush1.bf16.msra.mxu0 %v11720_v40  ;;  %6419 = vmatpush1.bf16.msra.mxu1 %v11848_v41 }
  0x81   :  { %v11841_v43 = vcombine.high %v521_v38, %v525_v39  ;;  %v385_v44 = vld [vmem:[#allocation2 + $0x8c0] sm:$0xff]  ;;  %6379 = vmatprep.subr.bf16.mxu0 %v11713_v42  ;;  %v11840_v49 = vcombine.low %v521_v38, %v525_v39 }
  0x82   :  { %v389_v45 = vld [vmem:[#allocation2 + $0x8e0] sm:$0xff] }
  0x83   :  { %v513_v46 = vld [vmem:[#allocation2 + $0xcc0] sm:$0xff]  ;;  %v11705_v50 = vcombine.high %v385_v44, %v389_v45  ;;  %6420 = vmatprep.subr.bf16.mxu1 %v11841_v43  ;;  %v11704_v56 = vcombine.low %v385_v44, %v389_v45 }
  0x84   :  { %v517_v47 = vld [vmem:[#allocation2 + $0xce0] sm:$0xff]  ;;  %6380 = vmatpush1.bf16.msra.mxu0 %v11712_v48  ;;  %6421 = vmatpush1.bf16.msra.mxu1 %v11840_v49 }
  0x85   :  { %v11833_v51 = vcombine.high %v513_v46, %v517_v47  ;;  %v377_v52 = vld [vmem:[#allocation2 + $0x880] sm:$0xff]  ;;  %6381 = vmatprep.subr.bf16.mxu0 %v11705_v50  ;;  %v11832_v57 = vcombine.low %v513_v46, %v517_v47 }
  0x86   :  { %v381_v53 = vld [vmem:[#allocation2 + $0x8a0] sm:$0xff] }
  0x87   :  { %v505_v54 = vld [vmem:[#allocation2 + $0xc80] sm:$0xff]  ;;  %v11697_v60 = vcombine.high %v377_v52, %v381_v53  ;;  %6422 = vmatprep.subr.bf16.mxu1 %v11833_v51  ;;  %v11696_v2 = vcombine.low %v377_v52, %v381_v53 }
  0x88   :  { %v509_v55 = vld [vmem:[#allocation2 + $0xca0] sm:$0xff]  ;;  %6382 = vmatpush1.bf16.msra.mxu0 %v11704_v56  ;;  %6423 = vmatpush1.bf16.msra.mxu1 %v11832_v57 }
  0x89   :  { %v11825_v61 = vcombine.high %v505_v54, %v509_v55  ;;  %v369_v62 = vld [vmem:[#allocation2 + $0x840] sm:$0xff]  ;;  %6383 = vmatprep.subr.bf16.mxu0 %v11697_v60  ;;  %v11824_v3 = vcombine.low %v505_v54, %v509_v55 }
  0x8a   :  { %v373_v63 = vld [vmem:[#allocation2 + $0x860] sm:$0xff] }
  0x8b   :  { %v497_v0 = vld [vmem:[#allocation2 + $0xc40] sm:$0xff]  ;;  %v11689_v4 = vcombine.high %v369_v62, %v373_v63  ;;  %6424 = vmatprep.subr.bf16.mxu1 %v11825_v61  ;;  %v11688_v10 = vcombine.low %v369_v62, %v373_v63 }
  0x8c   :  { %v501_v1 = vld [vmem:[#allocation2 + $0xc60] sm:$0xff]  ;;  %6384 = vmatpush1.bf16.msra.mxu0 %v11696_v2  ;;  %6425 = vmatpush1.bf16.msra.mxu1 %v11824_v3 }
  0x8d   :  { %v11817_v5 = vcombine.high %v497_v0, %v501_v1  ;;  %v361_v6 = vld [vmem:[#allocation2 + $0x800] sm:$0xff]  ;;  %6385 = vmatprep.subr.bf16.mxu0 %v11689_v4  ;;  %v11816_v11 = vcombine.low %v497_v0, %v501_v1 }
  0x8e   :  { %v365_v7 = vld [vmem:[#allocation2 + $0x820] sm:$0xff] }
  0x8f   :  { %v489_v8 = vld [vmem:[#allocation2 + $0xc00] sm:$0xff]  ;;  %v11681_v12 = vcombine.high %v361_v6, %v365_v7  ;;  %6426 = vmatprep.subr.bf16.mxu1 %v11817_v5  ;;  %v11680_v19 = vcombine.low %v361_v6, %v365_v7 }
  0x90   :  { %v493_v9 = vld [vmem:[#allocation2 + $0xc20] sm:$0xff]  ;;  %6386 = vmatpush1.bf16.msra.mxu0 %v11688_v10  ;;  %6427 = vmatpush1.bf16.msra.mxu1 %v11816_v11 }
  0x91   :  { %v11809_v13 = vcombine.high %v489_v8, %v493_v9  ;;  %v481_v14 = vld [vmem:[#allocation2 + $0xbc0] sm:$0xff]  ;;  %6387 = vmatprep.subr.bf16.mxu0 %v11681_v12  ;;  %v11808_v21 = vcombine.low %v489_v8, %v493_v9 }
  0x92   :  { %v485_v15 = vld [vmem:[#allocation2 + $0xbe0] sm:$0xff] }
  0x93   :  { %v609_v17 = vld [vmem:[#allocation2 + $0xfc0] sm:$0xff]  ;;  %v11801_v22 = vcombine.high %v481_v14, %v485_v15  ;;  %6428 = vmatprep.subr.bf16.mxu1 %v11809_v13  ;;  %v11800_v29 = vcombine.low %v481_v14, %v485_v15 }
  0x94   :  { %v613_v18 = vld [vmem:[#allocation2 + $0xfe0] sm:$0xff]  ;;  %6388 = vmatpush1.bf16.msra.mxu0 %v11680_v19  ;;  %6429 = vmatpush1.bf16.msra.mxu1 %v11808_v21 }
  0x95   :  { %v11929_v23 = vcombine.high %v609_v17, %v613_v18  ;;  %v473_v24 = vld [vmem:[#allocation2 + $0xb80] sm:$0xff]  ;;  %6389 = vmatprep.subr.bf16.mxu0 %v11801_v22  ;;  %v11928_v30 = vcombine.low %v609_v17, %v613_v18 }
  0x96   :  { %v477_v25 = vld [vmem:[#allocation2 + $0xba0] sm:$0xff] }
  0x97   :  { %v601_v26 = vld [vmem:[#allocation2 + $0xf80] sm:$0xff]  ;;  %v11793_v32 = vcombine.high %v473_v24, %v477_v25  ;;  %6430 = vmatprep.subr.bf16.mxu1 %v11929_v23  ;;  %v11792_v38 = vcombine.low %v473_v24, %v477_v25 }
  0x98   :  { %v605_v27 = vld [vmem:[#allocation2 + $0xfa0] sm:$0xff]  ;;  %6390 = vmatpush2.bf16.msra.mxu0 %v11800_v29  ;;  %6431 = vmatpush2.bf16.msra.mxu1 %v11928_v30  ;;  %v79_v30 = vld [vmem:[%s13564_s0 + $0x30] sm:$0xff] }
  0x99   :  { %v11921_v33 = vcombine.high %v601_v26, %v605_v27  ;;  %v465_v34 = vld [vmem:[#allocation2 + $0xb40] sm:$0xff]  ;;  %6391 = vmatprep.subr.bf16.mxu0 %v11793_v32  ;;  %v11920_v39 = vcombine.low %v601_v26, %v605_v27 }
  0x9a   :  { %v469_v35 = vld [vmem:[#allocation2 + $0xb60] sm:$0xff] }
  0x9b   :  { %v593_v36 = vld [vmem:[#allocation2 + $0xf40] sm:$0xff]  ;;  %v11785_v40 = vcombine.high %v465_v34, %v469_v35  ;;  %6432 = vmatprep.subr.bf16.mxu1 %v11921_v33  ;;  %v11784_v46 = vcombine.low %v465_v34, %v469_v35 }
  0x9c   :  { %v597_v37 = vld [vmem:[#allocation2 + $0xf60] sm:$0xff]  ;;  %6392 = vmatpush2.bf16.msra.mxu0 %v11792_v38  ;;  %6433 = vmatpush2.bf16.msra.mxu1 %v11920_v39  ;;  %v82_v39 = vld [vmem:[%s13564_s0 + $0x48] sm:$0xff] }
  0x9d   :  { %v11913_v41 = vcombine.high %v593_v36, %v597_v37  ;;  %v457_v42 = vld [vmem:[#allocation2 + $0xb00] sm:$0xff]  ;;  %6393 = vmatprep.subr.bf16.mxu0 %v11785_v40  ;;  %v11912_v47 = vcombine.low %v593_v36, %v597_v37  ;;  %v13161_v40 = vpack.c.bf16 %v79_v30, %v79_v30 }
  0x9e   :  { %v461_v43 = vld [vmem:[#allocation2 + $0xb20] sm:$0xff] }
  0x9f   :  { %v585_v44 = vld [vmem:[#allocation2 + $0xf00] sm:$0xff]  ;;  %v11777_v48 = vcombine.high %v457_v42, %v461_v43  ;;  %6434 = vmatprep.subr.bf16.mxu1 %v11913_v41  ;;  %v11776_v54 = vcombine.low %v457_v42, %v461_v43  ;;  %v84_v42 = vld [vmem:[%s13564_s0 + $0x58] sm:$0xff] }
  0xa0   :  { %v589_v45 = vld [vmem:[#allocation2 + $0xf20] sm:$0xff]  ;;  %6394 = vmatpush2.bf16.msra.mxu0 %v11784_v46  ;;  %6435 = vmatpush2.bf16.msra.mxu1 %v11912_v47 }
  0xa1   :  { %v11905_v49 = vcombine.high %v585_v44, %v589_v45  ;;  %v449_v50 = vld [vmem:[#allocation2 + $0xac0] sm:$0xff]  ;;  %6395 = vmatprep.subr.bf16.mxu0 %v11777_v48  ;;  %v11904_v55 = vcombine.low %v585_v44, %v589_v45  ;;  %v13166_v48 = vpack.c.bf16 %v82_v39, %v82_v39 }
  0xa2   :  { %v453_v51 = vld [vmem:[#allocation2 + $0xae0] sm:$0xff] }
  0xa3   :  { %v577_v52 = vld [vmem:[#allocation2 + $0xec0] sm:$0xff]  ;;  %v11769_v56 = vcombine.high %v449_v50, %v453_v51  ;;  %6436 = vmatprep.subr.bf16.mxu1 %v11905_v49  ;;  %v11768_v0 = vcombine.low %v449_v50, %v453_v51  ;;  %v13169_v51 = vpack.c.bf16 %v84_v42, %v84_v42 }
  0xa4   :  { %v581_v53 = vld [vmem:[#allocation2 + $0xee0] sm:$0xff]  ;;  %6396 = vmatpush2.bf16.msra.mxu0 %v11776_v54  ;;  %6437 = vmatpush2.bf16.msra.mxu1 %v11904_v55 }
  0xa5   :  { %v11897_v57 = vcombine.high %v577_v52, %v581_v53  ;;  %v441_v60 = vld [vmem:[#allocation2 + $0xa80] sm:$0xff]  ;;  %6397 = vmatprep.subr.bf16.mxu0 %v11769_v56  ;;  %v11896_v1 = vcombine.low %v577_v52, %v581_v53 }
  0xa6   :  { %v445_v61 = vld [vmem:[#allocation2 + $0xaa0] sm:$0xff] }
  0xa7   :  { %v569_v62 = vld [vmem:[#allocation2 + $0xe80] sm:$0xff]  ;;  %v11761_v2 = vcombine.high %v441_v60, %v445_v61  ;;  %6438 = vmatprep.subr.bf16.mxu1 %v11897_v57  ;;  %v11760_v8 = vcombine.low %v441_v60, %v445_v61 }
  0xa8   :  { %v573_v63 = vld [vmem:[#allocation2 + $0xea0] sm:$0xff]  ;;  %6398 = vmatpush2.bf16.msra.mxu0 %v11768_v0  ;;  %6439 = vmatpush2.bf16.msra.mxu1 %v11896_v1 }
  0xa9   :  { %v11889_v3 = vcombine.high %v569_v62, %v573_v63  ;;  %v433_v4 = vld [vmem:[#allocation2 + $0xa40] sm:$0xff]  ;;  %6399 = vmatprep.subr.bf16.mxu0 %v11761_v2  ;;  %v11888_v9 = vcombine.low %v569_v62, %v573_v63 }
  0xaa   :  { %v437_v5 = vld [vmem:[#allocation2 + $0xa60] sm:$0xff] }
  0xab   :  { %v561_v6 = vld [vmem:[#allocation2 + $0xe40] sm:$0xff]  ;;  %v11753_v10 = vcombine.high %v433_v4, %v437_v5  ;;  %6440 = vmatprep.subr.bf16.mxu1 %v11889_v3  ;;  %v11752_v17 = vcombine.low %v433_v4, %v437_v5 }
  0xac   :  { %v565_v7 = vld [vmem:[#allocation2 + $0xe60] sm:$0xff]  ;;  %6400 = vmatpush2.bf16.msra.mxu0 %v11760_v8  ;;  %6441 = vmatpush2.bf16.msra.mxu1 %v11888_v9 }
  0xad   :  { %v11881_v11 = vcombine.high %v561_v6, %v565_v7  ;;  %v425_v12 = vld [vmem:[#allocation2 + $0xa00] sm:$0xff]  ;;  %6401 = vmatprep.subr.bf16.mxu0 %v11753_v10  ;;  %v11880_v18 = vcombine.low %v561_v6, %v565_v7 }
  0xae   :  { %v429_v13 = vld [vmem:[#allocation2 + $0xa20] sm:$0xff] }
  0xaf   :  { %v553_v14 = vld [vmem:[#allocation2 + $0xe00] sm:$0xff]  ;;  %v11745_v19 = vcombine.high %v425_v12, %v429_v13  ;;  %6442 = vmatprep.subr.bf16.mxu1 %v11881_v11  ;;  %v11744_v26 = vcombine.low %v425_v12, %v429_v13 }
  0xb0   :  { %v557_v15 = vld [vmem:[#allocation2 + $0xe20] sm:$0xff]  ;;  %6402 = vmatpush2.bf16.msra.mxu0 %v11752_v17  ;;  %6443 = vmatpush2.bf16.msra.mxu1 %v11880_v18 }
  0xb1   :  { %v11873_v21 = vcombine.high %v553_v14, %v557_v15  ;;  %v673_v22 = vld [vmem:[#allocation2 + $0x11c0] sm:$0xff]  ;;  %6403 = vmatprep.subr.bf16.mxu0 %v11745_v19  ;;  %v11872_v29 = vcombine.low %v553_v14, %v557_v15 }
  0xb2   :  { %v677_v23 = vld [vmem:[#allocation2 + $0x11e0] sm:$0xff] }
  0xb3   :  { %v801_v24 = vld [vmem:[#allocation2 + $0x15c0] sm:$0xff]  ;;  %v11993_v32 = vcombine.high %v673_v22, %v677_v23  ;;  %6444 = vmatprep.subr.bf16.mxu1 %v11873_v21  ;;  %v11992_v41 = vcombine.low %v673_v22, %v677_v23 }
  0xb4   :  { %v805_v25 = vld [vmem:[#allocation2 + $0x15e0] sm:$0xff]  ;;  %6404 = vmatpush2.bf16.msra.mxu0 %v11744_v26  ;;  %6445 = vmatpush2.bf16.msra.mxu1 %v11872_v29 }
  0xb5   :  { %v77_v27 = vld [vmem:[%s13564_s0 + $0x20] sm:$0xff]  ;;  %v12121_v33 = vcombine.high %v801_v24, %v805_v25  ;;  %6455 = vmatprep.subr.bf16.mxu0 %v11993_v32  ;;  %v12120_v43 = vcombine.low %v801_v24, %v805_v25 }
  0xb6   :  { %v665_v34 = vld [vmem:[#allocation2 + $0x1180] sm:$0xff]  ;;  %v13156_v36 = vpack.c.bf16 %v77_v27, %v77_v27 }
  0xb7   :  { %v669_v35 = vld [vmem:[#allocation2 + $0x11a0] sm:$0xff]  ;;  %6496 = vmatprep.subr.bf16.mxu1 %v12121_v33  ;;  %6447 = vmatmul.mubr.bf16.vlgmr.msra.gmra.mxu1 %v13161_v40 }
  0xb8   :  { %v793_v37 = vld [vmem:[#allocation2 + $0x1580] sm:$0xff]  ;;  %v11985_v44 = vcombine.high %v665_v34, %v669_v35  ;;  %6406 = vmatmul.mubr.bf16.vlgmr.msra.gmra.mxu0 %v13156_v36  ;;  %v11984_v52 = vcombine.low %v665_v34, %v669_v35  ;;  %6497 = vmatpush1.bf16.msra.mxu1 %v12120_v43 }
  0xb9   :  { %v797_v38 = vld [vmem:[#allocation2 + $0x15a0] sm:$0xff]  ;;  %6456 = vmatpush1.bf16.msra.mxu0 %v11992_v41  ;;  %6487 = vmatprep.mubr.bf16.mxu0 %v13166_v48 }
  0xba   :  { %v12113_v45 = vcombine.high %v793_v37, %v797_v38  ;;  %v657_v46 = vld [vmem:[#allocation2 + $0x1140] sm:$0xff]  ;;  %6457 = vmatprep.subr.bf16.mxu0 %v11985_v44  ;;  %v12112_v53 = vcombine.low %v793_v37, %v797_v38  ;;  %6528 = vmatprep.mubr.bf16.mxu1 %v13169_v51 }
  0xbb   :  { %v661_v47 = vld [vmem:[#allocation2 + $0x1160] sm:$0xff] }
  0xbc   :  { %v785_v49 = vld [vmem:[#allocation2 + $0x1540] sm:$0xff]  ;;  %v11977_v54 = vcombine.high %v657_v46, %v661_v47  ;;  %6498 = vmatprep.subr.bf16.mxu1 %v12113_v45  ;;  %v11976_v62 = vcombine.low %v657_v46, %v661_v47 }
  0xbd   :  { %v789_v50 = vld [vmem:[#allocation2 + $0x1560] sm:$0xff]  ;;  %6458 = vmatpush1.bf16.msra.mxu0 %v11984_v52  ;;  %6499 = vmatpush1.bf16.msra.mxu1 %v12112_v53 }
  0xbe   :  { %v12105_v55 = vcombine.high %v785_v49, %v789_v50  ;;  %v649_v56 = vld [vmem:[#allocation2 + $0x1100] sm:$0xff]  ;;  %6459 = vmatprep.subr.bf16.mxu0 %v11977_v54  ;;  %v12104_v63 = vcombine.low %v785_v49, %v789_v50 }
  0xbf   :  { %v653_v57 = vld [vmem:[#allocation2 + $0x1120] sm:$0xff] }
  0xc0   :  { %v777_v60 = vld [vmem:[#allocation2 + $0x1500] sm:$0xff]  ;;  %v11969_v0 = vcombine.high %v649_v56, %v653_v57  ;;  %6500 = vmatprep.subr.bf16.mxu1 %v12105_v55  ;;  %v11968_v6 = vcombine.low %v649_v56, %v653_v57 }
  0xc1   :  { %v781_v61 = vld [vmem:[#allocation2 + $0x1520] sm:$0xff]  ;;  %6460 = vmatpush1.bf16.msra.mxu0 %v11976_v62  ;;  %6501 = vmatpush1.bf16.msra.mxu1 %v12104_v63 }
  0xc2   :  { %v12097_v1 = vcombine.high %v777_v60, %v781_v61  ;;  %v641_v2 = vld [vmem:[#allocation2 + $0x10c0] sm:$0xff]  ;;  %6461 = vmatprep.subr.bf16.mxu0 %v11969_v0  ;;  %v12096_v7 = vcombine.low %v777_v60, %v781_v61 }
  0xc3   :  { %v645_v3 = vld [vmem:[#allocation2 + $0x10e0] sm:$0xff] }
  0xc4   :  { %v769_v4 = vld [vmem:[#allocation2 + $0x14c0] sm:$0xff]  ;;  %v11961_v8 = vcombine.high %v641_v2, %v645_v3  ;;  %6502 = vmatprep.subr.bf16.mxu1 %v12097_v1  ;;  %v11960_v14 = vcombine.low %v641_v2, %v645_v3 }
  0xc5   :  { %v773_v5 = vld [vmem:[#allocation2 + $0x14e0] sm:$0xff]  ;;  %6462 = vmatpush1.bf16.msra.mxu0 %v11968_v6  ;;  %6503 = vmatpush1.bf16.msra.mxu1 %v12096_v7 }
  0xc6   :  { %v12089_v9 = vcombine.high %v769_v4, %v773_v5  ;;  %v633_v10 = vld [vmem:[#allocation2 + $0x1080] sm:$0xff]  ;;  %6463 = vmatprep.subr.bf16.mxu0 %v11961_v8  ;;  %v12088_v15 = vcombine.low %v769_v4, %v773_v5 }
  0xc7   :  { %v637_v11 = vld [vmem:[#allocation2 + $0x10a0] sm:$0xff] }
  0xc8   :  { %v761_v12 = vld [vmem:[#allocation2 + $0x1480] sm:$0xff]  ;;  %v11953_v17 = vcombine.high %v633_v10, %v637_v11  ;;  %6504 = vmatprep.subr.bf16.mxu1 %v12089_v9  ;;  %v11952_v24 = vcombine.low %v633_v10, %v637_v11 }
  0xc9   :  { %v765_v13 = vld [vmem:[#allocation2 + $0x14a0] sm:$0xff]  ;;  %6464 = vmatpush1.bf16.msra.mxu0 %v11960_v14  ;;  %6505 = vmatpush1.bf16.msra.mxu1 %v12088_v15 }
  0xca   :  { %v12081_v18 = vcombine.high %v761_v12, %v765_v13  ;;  %v625_v19 = vld [vmem:[#allocation2 + $0x1040] sm:$0xff]  ;;  %6465 = vmatprep.subr.bf16.mxu0 %v11953_v17  ;;  %v12080_v25 = vcombine.low %v761_v12, %v765_v13 }
  0xcb   :  { %v629_v21 = vld [vmem:[#allocation2 + $0x1060] sm:$0xff] }
  0xcc   :  { %v753_v22 = vld [vmem:[#allocation2 + $0x1440] sm:$0xff]  ;;  %v11945_v26 = vcombine.high %v625_v19, %v629_v21  ;;  %6506 = vmatprep.subr.bf16.mxu1 %v12081_v18  ;;  %v11944_v34 = vcombine.low %v625_v19, %v629_v21 }
  0xcd   :  { %v757_v23 = vld [vmem:[#allocation2 + $0x1460] sm:$0xff]  ;;  %6466 = vmatpush1.bf16.msra.mxu0 %v11952_v24  ;;  %6507 = vmatpush1.bf16.msra.mxu1 %v12080_v25 }
  0xce   :  { %v12073_v27 = vcombine.high %v753_v22, %v757_v23  ;;  %v617_v29 = vld [vmem:[#allocation2 + $0x1000] sm:$0xff]  ;;  %6467 = vmatprep.subr.bf16.mxu0 %v11945_v26  ;;  %v12072_v35 = vcombine.low %v753_v22, %v757_v23 }
  0xcf   :  { %v621_v30 = vld [vmem:[#allocation2 + $0x1020] sm:$0xff] }
  0xd0   :  { %v745_v32 = vld [vmem:[#allocation2 + $0x1400] sm:$0xff]  ;;  %v11937_v37 = vcombine.high %v617_v29, %v621_v30  ;;  %6508 = vmatprep.subr.bf16.mxu1 %v12073_v27  ;;  %v11936_v44 = vcombine.low %v617_v29, %v621_v30 }
  0xd1   :  { %v749_v33 = vld [vmem:[#allocation2 + $0x1420] sm:$0xff]  ;;  %6468 = vmatpush1.bf16.msra.mxu0 %v11944_v34  ;;  %6509 = vmatpush1.bf16.msra.mxu1 %v12072_v35 }
  0xd2   :  { %v12065_v38 = vcombine.high %v745_v32, %v749_v33  ;;  %v737_v39 = vld [vmem:[#allocation2 + $0x13c0] sm:$0xff]  ;;  %6469 = vmatprep.subr.bf16.mxu0 %v11937_v37  ;;  %v12064_v45 = vcombine.low %v745_v32, %v749_v33 }
  0xd3   :  { %v741_v41 = vld [vmem:[#allocation2 + $0x13e0] sm:$0xff] }
  0xd4   :  { %v865_v42 = vld [vmem:[#allocation2 + $0x17c0] sm:$0xff]  ;;  %v12057_v46 = vcombine.high %v737_v39, %v741_v41  ;;  %6510 = vmatprep.subr.bf16.mxu1 %v12065_v38  ;;  %v12056_v54 = vcombine.low %v737_v39, %v741_v41 }
  0xd5   :  { %v869_v43 = vld [vmem:[#allocation2 + $0x17e0] sm:$0xff]  ;;  %6470 = vmatpush1.bf16.msra.mxu0 %v11936_v44  ;;  %6511 = vmatpush1.bf16.msra.mxu1 %v12064_v45 }
  0xd6   :  { %v12185_v47 = vcombine.high %v865_v42, %v869_v43  ;;  %v729_v49 = vld [vmem:[#allocation2 + $0x1380] sm:$0xff]  ;;  %6471 = vmatprep.subr.bf16.mxu0 %v12057_v46  ;;  %v12184_v55 = vcombine.low %v865_v42, %v869_v43 }
  0xd7   :  { %v733_v50 = vld [vmem:[#allocation2 + $0x13a0] sm:$0xff] }
  0xd8   :  { %v857_v52 = vld [vmem:[#allocation2 + $0x1780] sm:$0xff]  ;;  %v12049_v56 = vcombine.high %v729_v49, %v733_v50  ;;  %6512 = vmatprep.subr.bf16.mxu1 %v12185_v47  ;;  %v12048_v0 = vcombine.low %v729_v49, %v733_v50 }
  0xd9   :  { %v861_v53 = vld [vmem:[#allocation2 + $0x17a0] sm:$0xff]  ;;  %6472 = vmatpush2.bf16.msra.mxu0 %v12056_v54  ;;  %6513 = vmatpush2.bf16.msra.mxu1 %v12184_v55 }
  0xda   :  { %v12177_v57 = vcombine.high %v857_v52, %v861_v53  ;;  %v721_v60 = vld [vmem:[#allocation2 + $0x1340] sm:$0xff]  ;;  %6473 = vmatprep.subr.bf16.mxu0 %v12049_v56  ;;  %v12176_v1 = vcombine.low %v857_v52, %v861_v53 }
  0xdb   :  { %v725_v61 = vld [vmem:[#allocation2 + $0x1360] sm:$0xff] }
  0xdc   :  { %v849_v62 = vld [vmem:[#allocation2 + $0x1740] sm:$0xff]  ;;  %v12041_v2 = vcombine.high %v721_v60, %v725_v61  ;;  %6514 = vmatprep.subr.bf16.mxu1 %v12177_v57  ;;  %v12040_v8 = vcombine.low %v721_v60, %v725_v61  ;;  %v83_v61 = vld [vmem:[%s13564_s0 + $0x50] sm:$0xff] }
  0xdd   :  { %v853_v63 = vld [vmem:[#allocation2 + $0x1760] sm:$0xff]  ;;  %6474 = vmatpush2.bf16.msra.mxu0 %v12048_v0  ;;  %6515 = vmatpush2.bf16.msra.mxu1 %v12176_v1 }
  0xde   :  { %v12169_v3 = vcombine.high %v849_v62, %v853_v63  ;;  %v713_v4 = vld [vmem:[#allocation2 + $0x1300] sm:$0xff]  ;;  %6475 = vmatprep.subr.bf16.mxu0 %v12041_v2  ;;  %v12168_v9 = vcombine.low %v849_v62, %v853_v63 }
  0xdf   :  { %v717_v5 = vld [vmem:[#allocation2 + $0x1320] sm:$0xff] }
  0xe0   :  { %v841_v6 = vld [vmem:[#allocation2 + $0x1700] sm:$0xff]  ;;  %v12033_v10 = vcombine.high %v713_v4, %v717_v5  ;;  %6516 = vmatprep.subr.bf16.mxu1 %v12169_v3  ;;  %v12032_v17 = vcombine.low %v713_v4, %v717_v5  ;;  %v86_v5 = vld [vmem:[%s13564_s0 + $0x68] sm:$0xff] }
  0xe1   :  { %v845_v7 = vld [vmem:[#allocation2 + $0x1720] sm:$0xff]  ;;  %6476 = vmatpush2.bf16.msra.mxu0 %v12040_v8  ;;  %6517 = vmatpush2.bf16.msra.mxu1 %v12168_v9  ;;  %v88_v8 = vld [vmem:[%s13564_s0 + $0x78] sm:$0xff] }
  0xe2   :  { %v12161_v11 = vcombine.high %v841_v6, %v845_v7  ;;  %v705_v12 = vld [vmem:[#allocation2 + $0x12c0] sm:$0xff]  ;;  %6477 = vmatprep.subr.bf16.mxu0 %v12033_v10  ;;  %v12160_v18 = vcombine.low %v841_v6, %v845_v7  ;;  %v13185_v6 = vpack.c.bf16 %v83_v61, %v83_v61 }
  0xe3   :  { %v709_v13 = vld [vmem:[#allocation2 + $0x12e0] sm:$0xff] }
  0xe4   :  { %v833_v14 = vld [vmem:[#allocation2 + $0x16c0] sm:$0xff]  ;;  %v12025_v19 = vcombine.high %v705_v12, %v709_v13  ;;  %6518 = vmatprep.subr.bf16.mxu1 %v12161_v11  ;;  %v12024_v26 = vcombine.low %v705_v12, %v709_v13 }
  0xe5   :  { %v837_v15 = vld [vmem:[#allocation2 + $0x16e0] sm:$0xff]  ;;  %6478 = vmatpush2.bf16.msra.mxu0 %v12032_v17  ;;  %6519 = vmatpush2.bf16.msra.mxu1 %v12160_v18  ;;  %v13193_v18 = vpack.c.bf16 %v88_v8, %v88_v8 }
  0xe6   :  { %v12153_v21 = vcombine.high %v833_v14, %v837_v15  ;;  %v697_v22 = vld [vmem:[#allocation2 + $0x1280] sm:$0xff]  ;;  %6479 = vmatprep.subr.bf16.mxu0 %v12025_v19  ;;  %v12152_v27 = vcombine.low %v833_v14, %v837_v15  ;;  %v13190_v14 = vpack.c.bf16 %v86_v5, %v86_v5 }
  0xe7   :  { %v701_v23 = vld [vmem:[#allocation2 + $0x12a0] sm:$0xff] }
  0xe8   :  { %v825_v24 = vld [vmem:[#allocation2 + $0x1680] sm:$0xff]  ;;  %v12017_v29 = vcombine.high %v697_v22, %v701_v23  ;;  %6520 = vmatprep.subr.bf16.mxu1 %v12153_v21  ;;  %v12016_v37 = vcombine.low %v697_v22, %v701_v23 }
  0xe9   :  { %v829_v25 = vld [vmem:[#allocation2 + $0x16a0] sm:$0xff]  ;;  %6480 = vmatpush2.bf16.msra.mxu0 %v12024_v26  ;;  %6521 = vmatpush2.bf16.msra.mxu1 %v12152_v27 }
  0xea   :  { %v12145_v30 = vcombine.high %v825_v24, %v829_v25  ;;  %v689_v32 = vld [vmem:[#allocation2 + $0x1240] sm:$0xff]  ;;  %6481 = vmatprep.subr.bf16.mxu0 %v12017_v29  ;;  %v12144_v38 = vcombine.low %v825_v24, %v829_v25 }
  0xeb   :  { %v693_v33 = vld [vmem:[#allocation2 + $0x1260] sm:$0xff] }
  0xec   :  { %v817_v34 = vld [vmem:[#allocation2 + $0x1640] sm:$0xff]  ;;  %v12009_v39 = vcombine.high %v689_v32, %v693_v33  ;;  %6522 = vmatprep.subr.bf16.mxu1 %v12145_v30  ;;  %v12008_v46 = vcombine.low %v689_v32, %v693_v33 }
  0xed   :  { %v821_v35 = vld [vmem:[#allocation2 + $0x1660] sm:$0xff]  ;;  %6482 = vmatpush2.bf16.msra.mxu0 %v12016_v37  ;;  %6523 = vmatpush2.bf16.msra.mxu1 %v12144_v38 }
  0xee   :  { %v12137_v41 = vcombine.high %v817_v34, %v821_v35  ;;  %v681_v42 = vld [vmem:[#allocation2 + $0x1200] sm:$0xff]  ;;  %6483 = vmatprep.subr.bf16.mxu0 %v12009_v39  ;;  %v12136_v47 = vcombine.low %v817_v34, %v821_v35 }
  0xef   :  { %v685_v43 = vld [vmem:[#allocation2 + $0x1220] sm:$0xff] }
  0xf0   :  { %v809_v44 = vld [vmem:[#allocation2 + $0x1600] sm:$0xff]  ;;  %v12001_v49 = vcombine.high %v681_v42, %v685_v43  ;;  %6524 = vmatprep.subr.bf16.mxu1 %v12137_v41  ;;  %v12000_v56 = vcombine.low %v681_v42, %v685_v43 }
  0xf1   :  { %v813_v45 = vld [vmem:[#allocation2 + $0x1620] sm:$0xff]  ;;  %6484 = vmatpush2.bf16.msra.mxu0 %v12008_v46  ;;  %6525 = vmatpush2.bf16.msra.mxu1 %v12136_v47 }
  0xf2   :  { %v12129_v50 = vcombine.high %v809_v44, %v813_v45  ;;  %v929_v52 = vld [vmem:[#allocation2 + $0x19c0] sm:$0xff]  ;;  %6485 = vmatprep.subr.bf16.mxu0 %v12001_v49  ;;  %v12128_v60 = vcombine.low %v809_v44, %v813_v45 }
  0xf3   :  { %v933_v53 = vld [vmem:[#allocation2 + $0x19e0] sm:$0xff] }
  0xf4   :  { %v1057_v54 = vld [vmem:[#allocation2 + $0x1dc0] sm:$0xff]  ;;  %v12249_v62 = vcombine.high %v929_v52, %v933_v53  ;;  %6526 = vmatprep.subr.bf16.mxu1 %v12129_v50  ;;  %v12248_v7 = vcombine.low %v929_v52, %v933_v53 }
  0xf5   :  { %v1061_v55 = vld [vmem:[#allocation2 + $0x1de0] sm:$0xff]  ;;  %6486 = vmatpush2.bf16.msra.mxu0 %v12000_v56  ;;  %6527 = vmatpush2.bf16.msra.mxu1 %v12128_v60 }
  0xf6   :  { %v81_v57 = vld [vmem:[%s13564_s0 + $0x40] sm:$0xff]  ;;  %v12377_v63 = vcombine.high %v1057_v54, %v1061_v55  ;;  %6537 = vmatprep.subr.bf16.mxu0 %v12249_v62  ;;  %v12376_v9 = vcombine.low %v1057_v54, %v1061_v55 }
  0xf7   :  { %v921_v0 = vld [vmem:[#allocation2 + $0x1980] sm:$0xff]  ;;  %v13180_v2 = vpack.c.bf16 %v81_v57, %v81_v57 }
  0xf8   :  { %v925_v1 = vld [vmem:[#allocation2 + $0x19a0] sm:$0xff]  ;;  %6578 = vmatprep.subr.bf16.mxu1 %v12377_v63  ;;  %6529 = vmatmul.mubr.bf16.vlgmr.msra.gmra.mxu1 %v13185_v6 }
  0xf9   :  { %v1049_v3 = vld [vmem:[#allocation2 + $0x1d80] sm:$0xff]  ;;  %v12241_v10 = vcombine.high %v921_v0, %v925_v1  ;;  %6488 = vmatmul.mubr.bf16.vlgmr.msra.gmra.mxu0 %v13180_v2  ;;  %v12240_v19 = vcombine.low %v921_v0, %v925_v1  ;;  %6579 = vmatpush1.bf16.msra.mxu1 %v12376_v9 }
  0xfa   :  { %v1053_v4 = vld [vmem:[#allocation2 + $0x1da0] sm:$0xff]  ;;  %6538 = vmatpush1.bf16.msra.mxu0 %v12248_v7  ;;  %6569 = vmatprep.mubr.bf16.mxu0 %v13190_v14 }
  0xfb   :  { %v12369_v11 = vcombine.high %v1049_v3, %v1053_v4  ;;  %v913_v12 = vld [vmem:[#allocation2 + $0x1940] sm:$0xff]  ;;  %6539 = vmatprep.subr.bf16.mxu0 %v12241_v10  ;;  %v12368_v21 = vcombine.low %v1049_v3, %v1053_v4  ;;  %6610 = vmatprep.mubr.bf16.mxu1 %v13193_v18 }
  0xfc   :  { %v917_v13 = vld [vmem:[#allocation2 + $0x1960] sm:$0xff] }
  0xfd   :  { %v1041_v15 = vld [vmem:[#allocation2 + $0x1d40] sm:$0xff]  ;;  %v12233_v22 = vcombine.high %v913_v12, %v917_v13  ;;  %6580 = vmatprep.subr.bf16.mxu1 %v12369_v11  ;;  %v12232_v29 = vcombine.low %v913_v12, %v917_v13 }
  0xfe   :  { %v1045_v17 = vld [vmem:[#allocation2 + $0x1d60] sm:$0xff]  ;;  %6540 = vmatpush1.bf16.msra.mxu0 %v12240_v19  ;;  %6581 = vmatpush1.bf16.msra.mxu1 %v12368_v21 }
  0xff   :  { %v12361_v23 = vcombine.high %v1041_v15, %v1045_v17  ;;  %v905_v24 = vld [vmem:[#allocation2 + $0x1900] sm:$0xff]  ;;  %6541 = vmatprep.subr.bf16.mxu0 %v12233_v22  ;;  %v12360_v30 = vcombine.low %v1041_v15, %v1045_v17 }
 0x100   :  { %v909_v25 = vld [vmem:[#allocation2 + $0x1920] sm:$0xff] }
 0x101   :  { %v1033_v26 = vld [vmem:[#allocation2 + $0x1d00] sm:$0xff]  ;;  %v12225_v32 = vcombine.high %v905_v24, %v909_v25  ;;  %6582 = vmatprep.subr.bf16.mxu1 %v12361_v23  ;;  %v12224_v39 = vcombine.low %v905_v24, %v909_v25 }
 0x102   :  { %v1037_v27 = vld [vmem:[#allocation2 + $0x1d20] sm:$0xff]  ;;  %6542 = vmatpush1.bf16.msra.mxu0 %v12232_v29  ;;  %6583 = vmatpush1.bf16.msra.mxu1 %v12360_v30 }
 0x103   :  { %v12353_v33 = vcombine.high %v1033_v26, %v1037_v27  ;;  %v897_v34 = vld [vmem:[#allocation2 + $0x18c0] sm:$0xff]  ;;  %6543 = vmatprep.subr.bf16.mxu0 %v12225_v32  ;;  %v12352_v41 = vcombine.low %v1033_v26, %v1037_v27 }
 0x104   :  { %v901_v35 = vld [vmem:[#allocation2 + $0x18e0] sm:$0xff] }
 0x105   :  { %v1025_v37 = vld [vmem:[#allocation2 + $0x1cc0] sm:$0xff]  ;;  %v12217_v42 = vcombine.high %v897_v34, %v901_v35  ;;  %6584 = vmatprep.subr.bf16.mxu1 %v12353_v33  ;;  %v12216_v49 = vcombine.low %v897_v34, %v901_v35 }
 0x106   :  { %v1029_v38 = vld [vmem:[#allocation2 + $0x1ce0] sm:$0xff]  ;;  %6544 = vmatpush1.bf16.msra.mxu0 %v12224_v39  ;;  %6585 = vmatpush1.bf16.msra.mxu1 %v12352_v41 }
 0x107   :  { %v12345_v43 = vcombine.high %v1025_v37, %v1029_v38  ;;  %v889_v44 = vld [vmem:[#allocation2 + $0x1880] sm:$0xff]  ;;  %6545 = vmatprep.subr.bf16.mxu0 %v12217_v42  ;;  %v12344_v50 = vcombine.low %v1025_v37, %v1029_v38 }
 0x108   :  { %v893_v45 = vld [vmem:[#allocation2 + $0x18a0] sm:$0xff] }
 0x109   :  { %v1017_v46 = vld [vmem:[#allocation2 + $0x1c80] sm:$0xff]  ;;  %v12209_v52 = vcombine.high %v889_v44, %v893_v45  ;;  %6586 = vmatprep.subr.bf16.mxu1 %v12345_v43  ;;  %v12208_v60 = vcombine.low %v889_v44, %v893_v45 }
 0x10a   :  { %v1021_v47 = vld [vmem:[#allocation2 + $0x1ca0] sm:$0xff]  ;;  %6546 = vmatpush1.bf16.msra.mxu0 %v12216_v49  ;;  %6587 = vmatpush1.bf16.msra.mxu1 %v12344_v50 }
 0x10b   :  { %v12337_v53 = vcombine.high %v1017_v46, %v1021_v47  ;;  %v881_v54 = vld [vmem:[#allocation2 + $0x1840] sm:$0xff]  ;;  %6547 = vmatprep.subr.bf16.mxu0 %v12209_v52  ;;  %v12336_v61 = vcombine.low %v1017_v46, %v1021_v47 }
 0x10c   :  { %v885_v55 = vld [vmem:[#allocation2 + $0x1860] sm:$0xff] }
 0x10d   :  { %v1009_v56 = vld [vmem:[#allocation2 + $0x1c40] sm:$0xff]  ;;  %v12201_v62 = vcombine.high %v881_v54, %v885_v55  ;;  %6588 = vmatprep.subr.bf16.mxu1 %v12337_v53  ;;  %v12200_v5 = vcombine.low %v881_v54, %v885_v55 }
 0x10e   :  { %v1013_v57 = vld [vmem:[#allocation2 + $0x1c60] sm:$0xff]  ;;  %6548 = vmatpush1.bf16.msra.mxu0 %v12208_v60  ;;  %6589 = vmatpush1.bf16.msra.mxu1 %v12336_v61 }
 0x10f   :  { %v12329_v63 = vcombine.high %v1009_v56, %v1013_v57  ;;  %v873_v0 = vld [vmem:[#allocation2 + $0x1800] sm:$0xff]  ;;  %6549 = vmatprep.subr.bf16.mxu0 %v12201_v62  ;;  %v12328_v7 = vcombine.low %v1009_v56, %v1013_v57 }
 0x110   :  { %v877_v1 = vld [vmem:[#allocation2 + $0x1820] sm:$0xff] }
 0x111   :  { %v1001_v3 = vld [vmem:[#allocation2 + $0x1c00] sm:$0xff]  ;;  %v12193_v8 = vcombine.high %v873_v0, %v877_v1  ;;  %6590 = vmatprep.subr.bf16.mxu1 %v12329_v63  ;;  %v12192_v15 = vcombine.low %v873_v0, %v877_v1 }
 0x112   :  { %v1005_v4 = vld [vmem:[#allocation2 + $0x1c20] sm:$0xff]  ;;  %6550 = vmatpush1.bf16.msra.mxu0 %v12200_v5  ;;  %6591 = vmatpush1.bf16.msra.mxu1 %v12328_v7 }
 0x113   :  { %v12321_v9 = vcombine.high %v1001_v3, %v1005_v4  ;;  %v993_v10 = vld [vmem:[#allocation2 + $0x1bc0] sm:$0xff]  ;;  %6551 = vmatprep.subr.bf16.mxu0 %v12193_v8  ;;  %v12320_v17 = vcombine.low %v1001_v3, %v1005_v4 }
 0x114   :  { %v997_v11 = vld [vmem:[#allocation2 + $0x1be0] sm:$0xff] }
 0x115   :  { %v1121_v12 = vld [vmem:[#allocation2 + $0x1fc0] sm:$0xff]  ;;  %v12313_v19 = vcombine.high %v993_v10, %v997_v11  ;;  %6592 = vmatprep.subr.bf16.mxu1 %v12321_v9  ;;  %v12312_v26 = vcombine.low %v993_v10, %v997_v11 }
 0x116   :  { %v1125_v13 = vld [vmem:[#allocation2 + $0x1fe0] sm:$0xff]  ;;  %6552 = vmatpush1.bf16.msra.mxu0 %v12192_v15  ;;  %6593 = vmatpush1.bf16.msra.mxu1 %v12320_v17 }
 0x117   :  { %v12441_v21 = vcombine.high %v1121_v12, %v1125_v13  ;;  %v985_v22 = vld [vmem:[#allocation2 + $0x1b80] sm:$0xff]  ;;  %6553 = vmatprep.subr.bf16.mxu0 %v12313_v19  ;;  %v12440_v27 = vcombine.low %v1121_v12, %v1125_v13  ;;  %v1131_v13 = vlaneseq }
 0x118   :  { %v989_v23 = vld [vmem:[#allocation2 + $0x1ba0] sm:$0xff] }
 0x119   :  { %v1113_v24 = vld [vmem:[#allocation2 + $0x1f80] sm:$0xff]  ;;  %v12305_v29 = vcombine.high %v985_v22, %v989_v23  ;;  %6594 = vmatprep.subr.bf16.mxu1 %v12441_v21  ;;  %v12304_v37 = vcombine.low %v985_v22, %v989_v23 }
 0x11a   :  { %v1117_v25 = vld [vmem:[#allocation2 + $0x1fa0] sm:$0xff]  ;;  %6554 = vmatpush2.bf16.msra.mxu0 %v12312_v26  ;;  %6595 = vmatpush2.bf16.msra.mxu1 %v12440_v27  ;;  %v13198_v26 = vshrl.u32 %v1131_v13, 7 }
 0x11b   :  { %v12433_v30 = vcombine.high %v1113_v24, %v1117_v25  ;;  %v977_v32 = vld [vmem:[#allocation2 + $0x1b40] sm:$0xff]  ;;  %6555 = vmatprep.subr.bf16.mxu0 %v12305_v29  ;;  %v12432_v38 = vcombine.low %v1113_v24, %v1117_v25 }
 0x11c   :  { %v981_v33 = vld [vmem:[#allocation2 + $0x1b60] sm:$0xff] }
 0x11d   :  { %v1105_v34 = vld [vmem:[#allocation2 + $0x1f40] sm:$0xff]  ;;  %v12297_v39 = vcombine.high %v977_v32, %v981_v33  ;;  %6596 = vmatprep.subr.bf16.mxu1 %v12433_v30  ;;  %v12296_v46 = vcombine.low %v977_v32, %v981_v33  ;;  %v162_v32 = vld [vmem:[#allocation2 + $0x1c8] sm:$0xff] }
 0x11e   :  { %v1109_v35 = vld [vmem:[#allocation2 + $0x1f60] sm:$0xff]  ;;  %6556 = vmatpush2.bf16.msra.mxu0 %v12304_v37  ;;  %6597 = vmatpush2.bf16.msra.mxu1 %v12432_v38  ;;  %v166_v33 = vld [vmem:[#allocation2 + $0x1e8] sm:$0xff]  ;;  %v1133_v38 = vsub.s32 0, %v13198_v26 }
 0x11f   :  { %v12425_v41 = vcombine.high %v1105_v34, %v1109_v35  ;;  %v969_v42 = vld [vmem:[#allocation2 + $0x1b00] sm:$0xff]  ;;  %6557 = vmatprep.subr.bf16.mxu0 %v12297_v39  ;;  %v12424_v47 = vcombine.low %v1105_v34, %v1109_v35  ;;  %v290_v34 = vld [vmem:[#allocation2 + $0x5c8] sm:$0xff] }
 0x120   :  { %v973_v43 = vld [vmem:[#allocation2 + $0x1b20] sm:$0xff]  ;;  %v294_v35 = vld [vmem:[#allocation2 + $0x5e8] sm:$0xff] }
 0x121   :  { %v1097_v44 = vld [vmem:[#allocation2 + $0x1f00] sm:$0xff]  ;;  %v12289_v49 = vcombine.high %v969_v42, %v973_v43  ;;  %6598 = vmatprep.subr.bf16.mxu1 %v12425_v41  ;;  %v12288_v56 = vcombine.low %v969_v42, %v973_v43  ;;  %v87_v43 = vld [vmem:[%s13564_s0 + $0x70] sm:$0xff] }
 0x122   :  { %v1101_v45 = vld [vmem:[#allocation2 + $0x1f20] sm:$0xff]  ;;  %6558 = vmatpush2.bf16.msra.mxu0 %v12296_v46  ;;  %6599 = vmatpush2.bf16.msra.mxu1 %v12424_v47  ;;  %v1137_v46 = vsub.s32 1, %v13198_v26  ;;  %v154_v47 = vld [vmem:[#allocation2 + $0x188] sm:$0xff] }
 0x123   :  { %v12417_v50 = vcombine.high %v1097_v44, %v1101_v45  ;;  %v961_v52 = vld [vmem:[#allocation2 + $0x1ac0] sm:$0xff]  ;;  %6559 = vmatprep.subr.bf16.mxu0 %v12289_v49  ;;  %v12416_v57 = vcombine.low %v1097_v44, %v1101_v45  ;;  %v11483_v44 = vcombine.high %v162_v32, %v166_v33  ;;  %v11611_v45 = vcombine.high %v290_v34, %v294_v35  ;;  %v158_v49 = vld [vmem:[#allocation2 + $0x1a8] sm:$0xff] }
 0x124   :  { %v965_v53 = vld [vmem:[#allocation2 + $0x1ae0] sm:$0xff] }
 0x125   :  { %v1089_v54 = vld [vmem:[#allocation2 + $0x1ec0] sm:$0xff]  ;;  %v12281_v60 = vcombine.high %v961_v52, %v965_v53  ;;  %6600 = vmatprep.subr.bf16.mxu1 %v12417_v50  ;;  %v12280_v3 = vcombine.low %v961_v52, %v965_v53  ;;  %v282_v52 = vld [vmem:[#allocation2 + $0x588] sm:$0xff] }
 0x126   :  { %v1093_v55 = vld [vmem:[#allocation2 + $0x1ee0] sm:$0xff]  ;;  %6560 = vmatpush2.bf16.msra.mxu0 %v12288_v56  ;;  %6601 = vmatpush2.bf16.msra.mxu1 %v12416_v57  ;;  %v286_v53 = vld [vmem:[#allocation2 + $0x5a8] sm:$0xff]  ;;  %v11482_v56 = vcombine.low %v162_v32, %v166_v33  ;;  %v11610_v57 = vcombine.low %v290_v34, %v294_v35 }
 0x127   :  { %v12409_v61 = vcombine.high %v1089_v54, %v1093_v55  ;;  %v953_v62 = vld [vmem:[#allocation2 + $0x1a80] sm:$0xff]  ;;  %6561 = vmatprep.subr.bf16.mxu0 %v12281_v60  ;;  %v12408_v4 = vcombine.low %v1089_v54, %v1093_v55  ;;  %v13212_v55 = vpack.c.bf16 %v87_v43, %v87_v43  ;;  %v11475_v60 = vcombine.high %v154_v47, %v158_v49 }
 0x128   :  { %v957_v63 = vld [vmem:[#allocation2 + $0x1aa0] sm:$0xff] }
 0x129   :  { %v1081_v0 = vld [vmem:[#allocation2 + $0x1e80] sm:$0xff]  ;;  %v12273_v5 = vcombine.high %v953_v62, %v957_v63  ;;  %6602 = vmatprep.subr.bf16.mxu1 %v12409_v61  ;;  %v12272_v12 = vcombine.low %v953_v62, %v957_v63  ;;  %v11603_v62 = vcombine.high %v282_v52, %v286_v53  ;;  %v146_v63 = vld [vmem:[#allocation2 + $0x148] sm:$0xff] }
 0x12a   :  { %v1085_v1 = vld [vmem:[#allocation2 + $0x1ea0] sm:$0xff]  ;;  %6562 = vmatpush2.bf16.msra.mxu0 %v12280_v3  ;;  %6603 = vmatpush2.bf16.msra.mxu1 %v12408_v4  ;;  %v274_v3 = vld [vmem:[#allocation2 + $0x548] sm:$0xff] }
 0x12b   :  { %v12401_v7 = vcombine.high %v1081_v0, %v1085_v1  ;;  %v945_v8 = vld [vmem:[#allocation2 + $0x1a40] sm:$0xff]  ;;  %6563 = vmatprep.subr.bf16.mxu0 %v12273_v5  ;;  %v12400_v15 = vcombine.low %v1081_v0, %v1085_v1  ;;  %v150_v0 = vld [vmem:[#allocation2 + $0x168] sm:$0xff] }
 0x12c   :  { %v949_v9 = vld [vmem:[#allocation2 + $0x1a60] sm:$0xff]  ;;  %v278_v4 = vld [vmem:[#allocation2 + $0x568] sm:$0xff] }
 0x12d   :  { %v1073_v10 = vld [vmem:[#allocation2 + $0x1e40] sm:$0xff]  ;;  %v12265_v17 = vcombine.high %v945_v8, %v949_v9  ;;  %6604 = vmatprep.subr.bf16.mxu1 %v12401_v7  ;;  %v12264_v25 = vcombine.low %v945_v8, %v949_v9  ;;  %v11474_v8 = vcombine.low %v154_v47, %v158_v49  ;;  %v11594_v32 = vcombine.low %v274_v3, %v278_v4  ;;  %v122_v49 = vld [vmem:[#allocation2 + $0x88] sm:$0xff] }
 0x12e   :  { %v1077_v11 = vld [vmem:[#allocation2 + $0x1e60] sm:$0xff]  ;;  %6564 = vmatpush2.bf16.msra.mxu0 %v12272_v12  ;;  %6605 = vmatpush2.bf16.msra.mxu1 %v12400_v15 }
 0x12f   :  { %v12393_v19 = vcombine.high %v1073_v10, %v1077_v11  ;;  %v937_v21 = vld [vmem:[#allocation2 + $0x1a00] sm:$0xff]  ;;  %6565 = vmatprep.subr.bf16.mxu0 %v12265_v17  ;;  %v12392_v27 = vcombine.low %v1073_v10, %v1077_v11  ;;  %v11602_v10 = vcombine.low %v282_v52, %v286_v53  ;;  %v11467_v11 = vcombine.high %v146_v63, %v150_v0  ;;  %v126_v52 = vld [vmem:[#allocation2 + $0xa8] sm:$0xff] }
 0x130   :  { %v941_v22 = vld [vmem:[#allocation2 + $0x1a20] sm:$0xff]  ;;  %v11595_v17 = vcombine.high %v274_v3, %v278_v4  ;;  %v250_v53 = vld [vmem:[#allocation2 + $0x488] sm:$0xff]  ;;  %v11442_v3 = vcombine.low %v122_v49, %v126_v52 }
 0x131   :  { %v1065_v23 = vld [vmem:[#allocation2 + $0x1e00] sm:$0xff]  ;;  %v12257_v29 = vcombine.high %v937_v21, %v941_v22  ;;  %6606 = vmatprep.subr.bf16.mxu1 %v12393_v19  ;;  %v12256_v37 = vcombine.low %v937_v21, %v941_v22  ;;  %v138_v19 = vld [vmem:[#allocation2 + $0x108] sm:$0xff] }
 0x132   :  { %v1069_v24 = vld [vmem:[#allocation2 + $0x1e20] sm:$0xff]  ;;  %6566 = vmatpush2.bf16.msra.mxu0 %v12264_v25  ;;  %6607 = vmatpush2.bf16.msra.mxu1 %v12392_v27  ;;  %v142_v21 = vld [vmem:[#allocation2 + $0x128] sm:$0xff] }
 0x133   :  { %v12385_v30 = vcombine.high %v1065_v23, %v1069_v24  ;;  %v85_v39 = vld [vmem:[%s13564_s0 + $0x60] sm:$0xff]  ;;  %6567 = vmatprep.subr.bf16.mxu0 %v12257_v29  ;;  %v12384_v41 = vcombine.low %v1065_v23, %v1069_v24  ;;  %v266_v23 = vld [vmem:[#allocation2 + $0x508] sm:$0xff]  ;;  %v11466_v29 = vcombine.low %v146_v63, %v150_v0  ;;  %v11459_v33 = vcombine.high %v138_v19, %v142_v21 }
 0x134   :  { %v1129_v42 = vld [vmem:[#allocation4] sm:$0xff]  ;;  %v13208_v50 = vpack.c.bf16 %v85_v39, %v85_v39  ;;  %v270_v24 = vld [vmem:[#allocation2 + $0x528] sm:$0xff]  ;;  %v11458_v43 = vcombine.low %v138_v19, %v142_v21 }
 0x135   :  { %6608 = vmatprep.subr.bf16.mxu1 %v12385_v30  ;;  %v1134_v54 = vrot.slane %v1129_v42, %v1133_v38  ;;  %v1138_v61 = vrot.slane %v1129_v42, %v1137_v46  ;;  %v11587_v35 = vcombine.high %v266_v23, %v270_v24  ;;  %v134_v39 = vld [vmem:[#allocation2 + $0xe8] sm:$0xff] }
 0x136   :  { %6568 = vmatpush2.bf16.msra.mxu0 %v12256_v37  ;;  %6609 = vmatpush2.bf16.msra.mxu1 %v12384_v41  ;;  %v6366_v7 = vpop.f32.mrf.mxu1  ;;  %v130_v37 = vld [vmem:[#allocation2 + $0xc8] sm:$0xff] }
 0x137   :  { %6619 = vmatprep.subr.bf16.mxu0 %v11483_v44  ;;  %6660 = vmatprep.subr.bf16.mxu1 %v11611_v45  ;;  %v6325_v1 = vpop.f32.mrf.mxu0  ;;  %v258_v41 = vld [vmem:[#allocation2 + $0x4c8] sm:$0xff]  ;;  %v11586_v44 = vcombine.low %v266_v23, %v270_v24  ;;  %v11451_v45 = vcombine.high %v130_v37, %v134_v39 }
 0x138   :  { %v6326_v5 = vadd.f32 %v6325_v1, %v1134_v54  ;;  %v6368_v15 = vpop.f32.mrf.mxu1  ;;  %v262_v42 = vld [vmem:[#allocation2 + $0x4e8] sm:$0xff] }
 0x139   :  { %6570 = vmatmul.mubr.bf16.vlgmr.msra.gmra.mxu0 %v13208_v50  ;;  %6611 = vmatmul.mubr.bf16.vlgmr.msra.gmra.mxu1 %v13212_v55  ;;  %v6327_v9 = vpop.f32.mrf.mxu0  ;;  %v11579_v47 = vcombine.high %v258_v41, %v262_v42  ;;  %v254_v54 = vld [vmem:[#allocation2 + $0x4a8] sm:$0xff] }
 0x13a   :  { %6620 = vmatpush1.bf16.msra.mxu0 %v11482_v56  ;;  %6661 = vmatpush1.bf16.msra.mxu1 %v11610_v57  ;;  %v13218_v12 = vadd.f32 %v6366_v7, %v6326_v5  ;;  %v6328_v13 = vadd.f32 %v6327_v9, %v1138_v61  ;;  %v6370_v27 = vpop.f32.mrf.mxu1  ;;  %v11450_v56 = vcombine.low %v130_v37, %v134_v39  ;;  %v118_v63 = vld [vmem:[#allocation2 + $0x68] sm:$0xff] }
 0x13b   :  { %6621 = vmatprep.subr.bf16.mxu0 %v11475_v60  ;;  %6662 = vmatprep.subr.bf16.mxu1 %v11603_v62  ;;  %v6329_v22 = vpop.f32.mrf.mxu0  ;;  %v11578_v57 = vcombine.low %v258_v41, %v262_v42  ;;  %v11443_v60 = vcombine.high %v122_v49, %v126_v52  ;;  %v11571_v61 = vcombine.high %v250_v53, %v254_v54  ;;  %v114_v62 = vld [vmem:[#allocation2 + $0x48] sm:$0xff] }
 0x13c   :  { %6651 = vmatprep.mubr.bf16.mxu0 %v13120_v58  ;;  %6692 = vmatprep.mubr.bf16.mxu1 %v13122_v59  ;;  %v13222_v25 = vadd.f32 %v6368_v15, %v6328_v13  ;;  %v6371_v34 = vpop.f32.mrf.mxu1  ;;  %v242_v0 = vld [vmem:[#allocation2 + $0x448] sm:$0xff]  ;;  %v11570_v4 = vcombine.low %v250_v53, %v254_v54  ;;  %v11435_v5 = vcombine.high %v114_v62, %v118_v63 }
 0x13d   :  { %v6330_v30 = vpop.f32.mrf.mxu0  ;;  %v246_v1 = vld [vmem:[#allocation2 + $0x468] sm:$0xff]  ;;  %v11434_v13 = vcombine.low %v114_v62, %v118_v63 }
 0x13e   :  { %6622 = vmatpush1.bf16.msra.mxu0 %v11474_v8  ;;  %6663 = vmatpush1.bf16.msra.mxu1 %v11602_v10  ;;  %v11563_v7 = vcombine.high %v242_v0, %v246_v1  ;;  %v106_v8 = vld [vmem:[#allocation2 + $0x8] sm:$0xff]  ;;  %v11562_v15 = vcombine.low %v242_v0, %v246_v1 }
 0x13f   :  { %6623 = vmatprep.subr.bf16.mxu0 %v11467_v11  ;;  %6664 = vmatprep.subr.bf16.mxu1 %v11595_v17  ;;  %v110_v9 = vld [vmem:[#allocation2 + $0x28] sm:$0xff] }
 0x140   :  { %v234_v10 = vld [vmem:[#allocation2 + $0x408] sm:$0xff]  ;;  %v11427_v17 = vcombine.high %v106_v8, %v110_v9  ;;  %v11426_v27 = vcombine.low %v106_v8, %v110_v9 }
 0x141   :  { %v238_v11 = vld [vmem:[#allocation2 + $0x428] sm:$0xff] }
 0x142   :  { %6624 = vmatpush1.bf16.msra.mxu0 %v11466_v29  ;;  %6665 = vmatpush1.bf16.msra.mxu1 %v11594_v32  ;;  %v11555_v19 = vcombine.high %v234_v10, %v238_v11  ;;  %v226_v21 = vld [vmem:[#allocation2 + $0x3c8] sm:$0xff]  ;;  %v11554_v29 = vcombine.low %v234_v10, %v238_v11 }
 0x143   :  { %6625 = vmatprep.subr.bf16.mxu0 %v11459_v33  ;;  %6666 = vmatprep.subr.bf16.mxu1 %v11587_v35  ;;  %v230_v22 = vld [vmem:[#allocation2 + $0x3e8] sm:$0xff] }
 0x144   :  { %v354_v23 = vld [vmem:[#allocation2 + $0x7c8] sm:$0xff]  ;;  %v11547_v30 = vcombine.high %v226_v21, %v230_v22  ;;  %v11546_v39 = vcombine.low %v226_v21, %v230_v22 }
 0x145   :  { %v358_v24 = vld [vmem:[#allocation2 + $0x7e8] sm:$0xff] }
 0x146   :  { %6626 = vmatpush1.bf16.msra.mxu0 %v11458_v43  ;;  %6667 = vmatpush1.bf16.msra.mxu1 %v11586_v44  ;;  %v11675_v32 = vcombine.high %v354_v23, %v358_v24  ;;  %v218_v33 = vld [vmem:[#allocation2 + $0x388] sm:$0xff]  ;;  %v11674_v41 = vcombine.low %v354_v23, %v358_v24 }
 0x147   :  { %6627 = vmatprep.subr.bf16.mxu0 %v11451_v45  ;;  %6668 = vmatprep.subr.bf16.mxu1 %v11579_v47  ;;  %v222_v34 = vld [vmem:[#allocation2 + $0x3a8] sm:$0xff] }
 0x148   :  { %v346_v35 = vld [vmem:[#allocation2 + $0x788] sm:$0xff]  ;;  %v11539_v42 = vcombine.high %v218_v33, %v222_v34  ;;  %v11538_v52 = vcombine.low %v218_v33, %v222_v34 }
 0x149   :  { %v350_v37 = vld [vmem:[#allocation2 + $0x7a8] sm:$0xff] }
 0x14a   :  { %6628 = vmatpush1.bf16.msra.mxu0 %v11450_v56  ;;  %6669 = vmatpush1.bf16.msra.mxu1 %v11578_v57  ;;  %v11667_v43 = vcombine.high %v346_v35, %v350_v37  ;;  %v210_v44 = vld [vmem:[#allocation2 + $0x348] sm:$0xff]  ;;  %v11666_v53 = vcombine.low %v346_v35, %v350_v37 }
 0x14b   :  { %6629 = vmatprep.subr.bf16.mxu0 %v11443_v60  ;;  %6670 = vmatprep.subr.bf16.mxu1 %v11571_v61  ;;  %v214_v45 = vld [vmem:[#allocation2 + $0x368] sm:$0xff] }
 0x14c   :  { %v338_v47 = vld [vmem:[#allocation2 + $0x748] sm:$0xff]  ;;  %v11531_v54 = vcombine.high %v210_v44, %v214_v45  ;;  %v11530_v63 = vcombine.low %v210_v44, %v214_v45 }
 0x14d   :  { %v342_v49 = vld [vmem:[#allocation2 + $0x768] sm:$0xff] }
 0x14e   :  { %6630 = vmatpush1.bf16.msra.mxu0 %v11442_v3  ;;  %6671 = vmatpush1.bf16.msra.mxu1 %v11570_v4  ;;  %v11659_v56 = vcombine.high %v338_v47, %v342_v49  ;;  %v202_v57 = vld [vmem:[#allocation2 + $0x308] sm:$0xff]  ;;  %v11658_v0 = vcombine.low %v338_v47, %v342_v49 }
 0x14f   :  { %6631 = vmatprep.subr.bf16.mxu0 %v11435_v5  ;;  %6672 = vmatprep.subr.bf16.mxu1 %v11563_v7  ;;  %v206_v60 = vld [vmem:[#allocation2 + $0x328] sm:$0xff] }
 0x150   :  { %v330_v61 = vld [vmem:[#allocation2 + $0x708] sm:$0xff]  ;;  %v11523_v1 = vcombine.high %v202_v57, %v206_v60  ;;  %v11522_v9 = vcombine.low %v202_v57, %v206_v60 }
 0x151   :  { %v334_v62 = vld [vmem:[#allocation2 + $0x728] sm:$0xff] }
 0x152   :  { %6632 = vmatpush1.bf16.msra.mxu0 %v11434_v13  ;;  %6673 = vmatpush1.bf16.msra.mxu1 %v11562_v15  ;;  %v11651_v3 = vcombine.high %v330_v61, %v334_v62  ;;  %v194_v4 = vld [vmem:[#allocation2 + $0x2c8] sm:$0xff]  ;;  %v11650_v10 = vcombine.low %v330_v61, %v334_v62 }
 0x153   :  { %6633 = vmatprep.subr.bf16.mxu0 %v11427_v17  ;;  %6674 = vmatprep.subr.bf16.mxu1 %v11555_v19  ;;  %v198_v5 = vld [vmem:[#allocation2 + $0x2e8] sm:$0xff] }
 0x154   :  { %v322_v7 = vld [vmem:[#allocation2 + $0x6c8] sm:$0xff]  ;;  %v11515_v11 = vcombine.high %v194_v4, %v198_v5  ;;  %v11514_v22 = vcombine.low %v194_v4, %v198_v5 }
 0x155   :  { %v326_v8 = vld [vmem:[#allocation2 + $0x6e8] sm:$0xff] }
 0x156   :  { %6634 = vmatpush1.bf16.msra.mxu0 %v11426_v27  ;;  %6675 = vmatpush1.bf16.msra.mxu1 %v11554_v29  ;;  %v11643_v13 = vcombine.high %v322_v7, %v326_v8  ;;  %v186_v15 = vld [vmem:[#allocation2 + $0x288] sm:$0xff]  ;;  %v11642_v23 = vcombine.low %v322_v7, %v326_v8 }
 0x157   :  { %6635 = vmatprep.subr.bf16.mxu0 %v11547_v30  ;;  %6676 = vmatprep.subr.bf16.mxu1 %v11675_v32  ;;  %v190_v17 = vld [vmem:[#allocation2 + $0x2a8] sm:$0xff] }
 0x158   :  { %v314_v19 = vld [vmem:[#allocation2 + $0x688] sm:$0xff]  ;;  %v11507_v24 = vcombine.high %v186_v15, %v190_v17  ;;  %v11506_v34 = vcombine.low %v186_v15, %v190_v17 }
 0x159   :  { %v318_v21 = vld [vmem:[#allocation2 + $0x6a8] sm:$0xff] }
 0x15a   :  { %6636 = vmatpush2.bf16.msra.mxu0 %v11546_v39  ;;  %6677 = vmatpush2.bf16.msra.mxu1 %v11674_v41  ;;  %v11635_v27 = vcombine.high %v314_v19, %v318_v21  ;;  %v178_v29 = vld [vmem:[#allocation2 + $0x248] sm:$0xff]  ;;  %v11634_v35 = vcombine.low %v314_v19, %v318_v21 }
 0x15b   :  { %6637 = vmatprep.subr.bf16.mxu0 %v11539_v42  ;;  %6678 = vmatprep.subr.bf16.mxu1 %v11667_v43  ;;  %v182_v30 = vld [vmem:[#allocation2 + $0x268] sm:$0xff] }
 0x15c   :  { %v306_v32 = vld [vmem:[#allocation2 + $0x648] sm:$0xff]  ;;  %v11499_v37 = vcombine.high %v178_v29, %v182_v30  ;;  %v11498_v45 = vcombine.low %v178_v29, %v182_v30 }
 0x15d   :  { %v310_v33 = vld [vmem:[#allocation2 + $0x668] sm:$0xff] }
 0x15e   :  { %6638 = vmatpush2.bf16.msra.mxu0 %v11538_v52  ;;  %6679 = vmatpush2.bf16.msra.mxu1 %v11666_v53  ;;  %v11627_v39 = vcombine.high %v306_v32, %v310_v33  ;;  %v170_v41 = vld [vmem:[#allocation2 + $0x208] sm:$0xff]  ;;  %v11626_v47 = vcombine.low %v306_v32, %v310_v33 }
 0x15f   :  { %6639 = vmatprep.subr.bf16.mxu0 %v11531_v54  ;;  %6680 = vmatprep.subr.bf16.mxu1 %v11659_v56  ;;  %v174_v42 = vld [vmem:[#allocation2 + $0x228] sm:$0xff] }
 0x160   :  { %v298_v43 = vld [vmem:[#allocation2 + $0x608] sm:$0xff]  ;;  %v11491_v49 = vcombine.high %v170_v41, %v174_v42  ;;  %v11490_v60 = vcombine.low %v170_v41, %v174_v42 }
 0x161   :  { %v302_v44 = vld [vmem:[#allocation2 + $0x628] sm:$0xff] }
 0x162   :  { %6640 = vmatpush2.bf16.msra.mxu0 %v11530_v63  ;;  %6681 = vmatpush2.bf16.msra.mxu1 %v11658_v0  ;;  %v11619_v52 = vcombine.high %v298_v43, %v302_v44  ;;  %v418_v53 = vld [vmem:[#allocation2 + $0x9c8] sm:$0xff]  ;;  %v11618_v61 = vcombine.low %v298_v43, %v302_v44 }
 0x163   :  { %6641 = vmatprep.subr.bf16.mxu0 %v11523_v1  ;;  %6682 = vmatprep.subr.bf16.mxu1 %v11651_v3  ;;  %v422_v54 = vld [vmem:[#allocation2 + $0x9e8] sm:$0xff] }
 0x164   :  { %v546_v56 = vld [vmem:[#allocation2 + $0xdc8] sm:$0xff]  ;;  %v11739_v62 = vcombine.high %v418_v53, %v422_v54  ;;  %v11738_v5 = vcombine.low %v418_v53, %v422_v54 }
 0x165   :  { %v550_v57 = vld [vmem:[#allocation2 + $0xde8] sm:$0xff] }
 0x166   :  { %6642 = vmatpush2.bf16.msra.mxu0 %v11522_v9  ;;  %6683 = vmatpush2.bf16.msra.mxu1 %v11650_v10  ;;  %v11867_v63 = vcombine.high %v546_v56, %v550_v57  ;;  %v410_v0 = vld [vmem:[#allocation2 + $0x988] sm:$0xff]  ;;  %v11866_v7 = vcombine.low %v546_v56, %v550_v57 }
 0x167   :  { %6643 = vmatprep.subr.bf16.mxu0 %v11515_v11  ;;  %6684 = vmatprep.subr.bf16.mxu1 %v11643_v13  ;;  %v414_v1 = vld [vmem:[#allocation2 + $0x9a8] sm:$0xff] }
 0x168   :  { %v538_v3 = vld [vmem:[#allocation2 + $0xd88] sm:$0xff]  ;;  %v11731_v8 = vcombine.high %v410_v0, %v414_v1 }
 0x169   :  { %v542_v4 = vld [vmem:[#allocation2 + $0xda8] sm:$0xff] }
 0x16a   :  { %6644 = vmatpush2.bf16.msra.mxu0 %v11514_v22  ;;  %6685 = vmatpush2.bf16.msra.mxu1 %v11642_v23  ;;  %v11859_v9 = vcombine.high %v538_v3, %v542_v4  ;;  %v402_v10 = vld [vmem:[#allocation2 + $0x948] sm:$0xff]  ;;  %v11730_v22 = vcombine.low %v410_v0, %v414_v1 }
 0x16b   :  { %6645 = vmatprep.subr.bf16.mxu0 %v11507_v24  ;;  %6686 = vmatprep.subr.bf16.mxu1 %v11635_v27  ;;  %v406_v11 = vld [vmem:[#allocation2 + $0x968] sm:$0xff]  ;;  %v11858_v24 = vcombine.low %v538_v3, %v542_v4 }
 0x16c   :  { %v530_v15 = vld [vmem:[#allocation2 + $0xd48] sm:$0xff]  ;;  %v11723_v27 = vcombine.high %v402_v10, %v406_v11  ;;  %v11722_v43 = vcombine.low %v402_v10, %v406_v11 }
 0x16d   :  { %v534_v17 = vld [vmem:[#allocation2 + $0xd68] sm:$0xff] }
 0x16e   :  { %6646 = vmatpush2.bf16.msra.mxu0 %v11506_v34  ;;  %6687 = vmatpush2.bf16.msra.mxu1 %v11634_v35  ;;  %v11851_v33 = vcombine.high %v530_v15, %v534_v17  ;;  %v394_v34 = vld [vmem:[#allocation2 + $0x908] sm:$0xff] }
 0x16f   :  { %6647 = vmatprep.subr.bf16.mxu0 %v11499_v37  ;;  %6688 = vmatprep.subr.bf16.mxu1 %v11627_v39  ;;  %v398_v35 = vld [vmem:[#allocation2 + $0x928] sm:$0xff] }
 0x170   :  { %v522_v37 = vld [vmem:[#allocation2 + $0xd08] sm:$0xff]  ;;  %v11714_v57 = vcombine.low %v394_v34, %v398_v35 }
 0x171   :  { %v526_v39 = vld [vmem:[#allocation2 + $0xd28] sm:$0xff] }
 0x172   :  { %6648 = vmatpush2.bf16.msra.mxu0 %v11498_v45  ;;  %6689 = vmatpush2.bf16.msra.mxu1 %v11626_v47  ;;  %v11715_v45 = vcombine.high %v394_v34, %v398_v35  ;;  %v390_v53 = vld [vmem:[#allocation2 + $0x8e8] sm:$0xff] }
 0x173   :  { %6649 = vmatprep.subr.bf16.mxu0 %v11491_v49  ;;  %6690 = vmatprep.subr.bf16.mxu1 %v11619_v52  ;;  %v11843_v49 = vcombine.high %v522_v37, %v526_v39  ;;  %v386_v52 = vld [vmem:[#allocation2 + $0x8c8] sm:$0xff] }
 0x174   :  { %v514_v54 = vld [vmem:[#allocation2 + $0xcc8] sm:$0xff]  ;;  %v11706_v4 = vcombine.low %v386_v52, %v390_v53 }
 0x175   :  { %v518_v56 = vld [vmem:[#allocation2 + $0xce8] sm:$0xff] }
 0x176   :  { %6650 = vmatpush2.bf16.msra.mxu0 %v11490_v60  ;;  %6691 = vmatpush2.bf16.msra.mxu1 %v11618_v61  ;;  %v11842_v60 = vcombine.low %v522_v37, %v526_v39  ;;  %v11707_v61 = vcombine.high %v386_v52, %v390_v53  ;;  %v382_v0 = vld [vmem:[#allocation2 + $0x8a8] sm:$0xff] }
 0x177   :  { %6701 = vmatprep.subr.bf16.mxu0 %v11739_v62  ;;  %6742 = vmatprep.subr.bf16.mxu1 %v11867_v63  ;;  %v6448_v21 = vpop.f32.mrf.mxu1  ;;  %v11835_v62 = vcombine.high %v514_v54, %v518_v56  ;;  %v378_v63 = vld [vmem:[#allocation2 + $0x888] sm:$0xff] }
 0x178   :  { %v6407_v13 = vpop.f32.mrf.mxu0  ;;  %v506_v1 = vld [vmem:[#allocation2 + $0xc88] sm:$0xff] }
 0x179   :  { %6652 = vmatmul.mubr.bf16.vlgmr.msra.gmra.mxu0 %v13132_v16  ;;  %v6408_v19 = vadd.f32 %v6407_v13, %v13218_v12  ;;  %6693 = vmatmul.mubr.bf16.vlgmr.msra.gmra.mxu1 %v13137_v20  ;;  %v6450_v32 = vpop.f32.mrf.mxu1  ;;  %v510_v3 = vld [vmem:[#allocation2 + $0xca8] sm:$0xff] }
 0x17a   :  { %6702 = vmatpush1.bf16.msra.mxu0 %v11738_v5  ;;  %6743 = vmatpush1.bf16.msra.mxu1 %v11866_v7  ;;  %v6409_v23 = vpop.f32.mrf.mxu0  ;;  %v11834_v5 = vcombine.low %v514_v54, %v518_v56  ;;  %v11699_v7 = vcombine.high %v378_v63, %v382_v0  ;;  %v374_v10 = vld [vmem:[#allocation2 + $0x868] sm:$0xff] }
 0x17b   :  { %6703 = vmatprep.subr.bf16.mxu0 %v11731_v8  ;;  %v13227_v29 = vadd.f32 %v6448_v21, %v6408_v19  ;;  %v6410_v30 = vadd.f32 %v6409_v23, %v13222_v25  ;;  %6744 = vmatprep.subr.bf16.mxu1 %v11859_v9  ;;  %v6452_v42 = vpop.f32.mrf.mxu1  ;;  %v11850_v25 = vcombine.low %v530_v15, %v534_v17  ;;  %v370_v9 = vld [vmem:[#allocation2 + $0x848] sm:$0xff] }
 0x17c   :  { %6733 = vmatprep.mubr.bf16.mxu0 %v13142_v28  ;;  %v6411_v12 = vpop.f32.mrf.mxu0  ;;  %6774 = vmatprep.mubr.bf16.mxu1 %v13145_v31  ;;  %v11827_v8 = vcombine.high %v506_v1, %v510_v3  ;;  %v498_v11 = vld [vmem:[#allocation2 + $0xc48] sm:$0xff]  ;;  %v11698_v15 = vcombine.low %v378_v63, %v382_v0  ;;  %v11826_v17 = vcombine.low %v506_v1, %v510_v3 }
 0x17d   :  { %v13232_v41 = vadd.f32 %v6450_v32, %v6410_v30  ;;  %v6453_v47 = vpop.f32.mrf.mxu1  ;;  %v502_v13 = vld [vmem:[#allocation2 + $0xc68] sm:$0xff]  ;;  %v11691_v19 = vcombine.high %v370_v9, %v374_v10  ;;  %v11690_v30 = vcombine.low %v370_v9, %v374_v10 }
 0x17e   :  { %6704 = vmatpush1.bf16.msra.mxu0 %v11730_v22  ;;  %6745 = vmatpush1.bf16.msra.mxu1 %v11858_v24  ;;  %v6412_v44 = vpop.f32.mrf.mxu0  ;;  %v11819_v21 = vcombine.high %v498_v11, %v502_v13  ;;  %v362_v22 = vld [vmem:[#allocation2 + $0x808] sm:$0xff]  ;;  %v11818_v32 = vcombine.low %v498_v11, %v502_v13 }
 0x17f   :  { %6705 = vmatprep.subr.bf16.mxu0 %v11723_v27  ;;  %6746 = vmatprep.subr.bf16.mxu1 %v11851_v33  ;;  %v366_v23 = vld [vmem:[#allocation2 + $0x828] sm:$0xff] }
 0x180   :  { %v490_v24 = vld [vmem:[#allocation2 + $0xc08] sm:$0xff]  ;;  %v11683_v33 = vcombine.high %v362_v22, %v366_v23  ;;  %v11682_v42 = vcombine.low %v362_v22, %v366_v23 }
 0x181   :  { %v494_v27 = vld [vmem:[#allocation2 + $0xc28] sm:$0xff] }
 0x182   :  { %6706 = vmatpush1.bf16.msra.mxu0 %v11722_v43  ;;  %6747 = vmatpush1.bf16.msra.mxu1 %v11850_v25  ;;  %v11811_v34 = vcombine.high %v490_v24, %v494_v27  ;;  %v482_v35 = vld [vmem:[#allocation2 + $0xbc8] sm:$0xff]  ;;  %v11810_v43 = vcombine.low %v490_v24, %v494_v27 }
 0x183   :  { %6707 = vmatprep.subr.bf16.mxu0 %v11715_v45  ;;  %6748 = vmatprep.subr.bf16.mxu1 %v11843_v49  ;;  %v486_v12 = vld [vmem:[#allocation2 + $0xbe8] sm:$0xff] }
 0x184   :  { %v610_v37 = vld [vmem:[#allocation2 + $0xfc8] sm:$0xff]  ;;  %v11803_v44 = vcombine.high %v482_v35, %v486_v12  ;;  %v11802_v53 = vcombine.low %v482_v35, %v486_v12 }
 0x185   :  { %v614_v39 = vld [vmem:[#allocation2 + $0xfe8] sm:$0xff] }
 0x186   :  { %6708 = vmatpush1.bf16.msra.mxu0 %v11714_v57  ;;  %6749 = vmatpush1.bf16.msra.mxu1 %v11842_v60  ;;  %v11931_v25 = vcombine.high %v610_v37, %v614_v39  ;;  %v474_v45 = vld [vmem:[#allocation2 + $0xb88] sm:$0xff]  ;;  %v11930_v54 = vcombine.low %v610_v37, %v614_v39 }
 0x187   :  { %6709 = vmatprep.subr.bf16.mxu0 %v11707_v61  ;;  %6750 = vmatprep.subr.bf16.mxu1 %v11835_v62  ;;  %v478_v47 = vld [vmem:[#allocation2 + $0xba8] sm:$0xff] }
 0x188   :  { %v602_v49 = vld [vmem:[#allocation2 + $0xf88] sm:$0xff]  ;;  %v11795_v56 = vcombine.high %v474_v45, %v478_v47  ;;  %v11794_v0 = vcombine.low %v474_v45, %v478_v47 }
 0x189   :  { %v606_v52 = vld [vmem:[#allocation2 + $0xfa8] sm:$0xff] }
 0x18a   :  { %6710 = vmatpush1.bf16.msra.mxu0 %v11706_v4  ;;  %6751 = vmatpush1.bf16.msra.mxu1 %v11834_v5  ;;  %v11923_v57 = vcombine.high %v602_v49, %v606_v52  ;;  %v466_v60 = vld [vmem:[#allocation2 + $0xb48] sm:$0xff]  ;;  %v11922_v1 = vcombine.low %v602_v49, %v606_v52 }
 0x18b   :  { %6711 = vmatprep.subr.bf16.mxu0 %v11699_v7  ;;  %6752 = vmatprep.subr.bf16.mxu1 %v11827_v8  ;;  %v470_v61 = vld [vmem:[#allocation2 + $0xb68] sm:$0xff] }
 0x18c   :  { %v594_v62 = vld [vmem:[#allocation2 + $0xf48] sm:$0xff]  ;;  %v11787_v3 = vcombine.high %v466_v60, %v470_v61  ;;  %v11786_v10 = vcombine.low %v466_v60, %v470_v61 }
 0x18d   :  { %v598_v63 = vld [vmem:[#allocation2 + $0xf68] sm:$0xff] }
 0x18e   :  { %6712 = vmatpush1.bf16.msra.mxu0 %v11698_v15  ;;  %6753 = vmatpush1.bf16.msra.mxu1 %v11826_v17  ;;  %v11915_v4 = vcombine.high %v594_v62, %v598_v63  ;;  %v458_v5 = vld [vmem:[#allocation2 + $0xb08] sm:$0xff]  ;;  %v11914_v11 = vcombine.low %v594_v62, %v598_v63 }
 0x18f   :  { %6713 = vmatprep.subr.bf16.mxu0 %v11691_v19  ;;  %6754 = vmatprep.subr.bf16.mxu1 %v11819_v21  ;;  %v462_v7 = vld [vmem:[#allocation2 + $0xb28] sm:$0xff] }
 0x190   :  { %v586_v8 = vld [vmem:[#allocation2 + $0xf08] sm:$0xff]  ;;  %v11779_v13 = vcombine.high %v458_v5, %v462_v7  ;;  %v11778_v23 = vcombine.low %v458_v5, %v462_v7 }
 0x191   :  { %v590_v9 = vld [vmem:[#allocation2 + $0xf28] sm:$0xff] }
 0x192   :  { %6714 = vmatpush1.bf16.msra.mxu0 %v11690_v30  ;;  %6755 = vmatpush1.bf16.msra.mxu1 %v11818_v32  ;;  %v11907_v15 = vcombine.high %v586_v8, %v590_v9  ;;  %v450_v17 = vld [vmem:[#allocation2 + $0xac8] sm:$0xff]  ;;  %v11906_v24 = vcombine.low %v586_v8, %v590_v9 }
 0x193   :  { %6715 = vmatprep.subr.bf16.mxu0 %v11683_v33  ;;  %6756 = vmatprep.subr.bf16.mxu1 %v11811_v34  ;;  %v454_v19 = vld [vmem:[#allocation2 + $0xae8] sm:$0xff] }
 0x194   :  { %v578_v21 = vld [vmem:[#allocation2 + $0xec8] sm:$0xff]  ;;  %v11771_v27 = vcombine.high %v450_v17, %v454_v19  ;;  %v11770_v12 = vcombine.low %v450_v17, %v454_v19 }
 0x195   :  { %v582_v22 = vld [vmem:[#allocation2 + $0xee8] sm:$0xff] }
 0x196   :  { %6716 = vmatpush1.bf16.msra.mxu0 %v11682_v42  ;;  %6757 = vmatpush1.bf16.msra.mxu1 %v11810_v43  ;;  %v11899_v30 = vcombine.high %v578_v21, %v582_v22  ;;  %v442_v32 = vld [vmem:[#allocation2 + $0xa88] sm:$0xff]  ;;  %v11898_v37 = vcombine.low %v578_v21, %v582_v22 }
 0x197   :  { %6717 = vmatprep.subr.bf16.mxu0 %v11803_v44  ;;  %6758 = vmatprep.subr.bf16.mxu1 %v11931_v25  ;;  %v446_v33 = vld [vmem:[#allocation2 + $0xaa8] sm:$0xff] }
 0x198   :  { %v570_v34 = vld [vmem:[#allocation2 + $0xe88] sm:$0xff]  ;;  %v11763_v39 = vcombine.high %v442_v32, %v446_v33  ;;  %v11762_v47 = vcombine.low %v442_v32, %v446_v33 }
 0x199   :  { %v574_v35 = vld [vmem:[#allocation2 + $0xea8] sm:$0xff] }
 0x19a   :  { %6718 = vmatpush2.bf16.msra.mxu0 %v11802_v53  ;;  %6759 = vmatpush2.bf16.msra.mxu1 %v11930_v54  ;;  %v11891_v42 = vcombine.high %v570_v34, %v574_v35  ;;  %v434_v43 = vld [vmem:[#allocation2 + $0xa48] sm:$0xff]  ;;  %v11890_v49 = vcombine.low %v570_v34, %v574_v35 }
 0x19b   :  { %6719 = vmatprep.subr.bf16.mxu0 %v11795_v56  ;;  %6760 = vmatprep.subr.bf16.mxu1 %v11923_v57  ;;  %v438_v44 = vld [vmem:[#allocation2 + $0xa68] sm:$0xff] }
 0x19c   :  { %v562_v25 = vld [vmem:[#allocation2 + $0xe48] sm:$0xff]  ;;  %v11755_v52 = vcombine.high %v434_v43, %v438_v44  ;;  %v11754_v61 = vcombine.low %v434_v43, %v438_v44 }
 0x19d   :  { %v566_v45 = vld [vmem:[#allocation2 + $0xe68] sm:$0xff] }
 0x19e   :  { %6720 = vmatpush2.bf16.msra.mxu0 %v11794_v0  ;;  %6761 = vmatpush2.bf16.msra.mxu1 %v11922_v1  ;;  %v11883_v53 = vcombine.high %v562_v25, %v566_v45  ;;  %v426_v54 = vld [vmem:[#allocation2 + $0xa08] sm:$0xff]  ;;  %v11882_v62 = vcombine.low %v562_v25, %v566_v45 }
 0x19f   :  { %6721 = vmatprep.subr.bf16.mxu0 %v11787_v3  ;;  %6762 = vmatprep.subr.bf16.mxu1 %v11915_v4  ;;  %v430_v56 = vld [vmem:[#allocation2 + $0xa28] sm:$0xff] }
 0x1a0   :  { %v554_v57 = vld [vmem:[#allocation2 + $0xe08] sm:$0xff]  ;;  %v11747_v63 = vcombine.high %v426_v54, %v430_v56  ;;  %v11746_v7 = vcombine.low %v426_v54, %v430_v56 }
 0x1a1   :  { %v558_v60 = vld [vmem:[#allocation2 + $0xe28] sm:$0xff] }
 0x1a2   :  { %6722 = vmatpush2.bf16.msra.mxu0 %v11786_v10  ;;  %6763 = vmatpush2.bf16.msra.mxu1 %v11914_v11  ;;  %v11875_v0 = vcombine.high %v554_v57, %v558_v60  ;;  %v674_v1 = vld [vmem:[#allocation2 + $0x11c8] sm:$0xff]  ;;  %v11874_v8 = vcombine.low %v554_v57, %v558_v60 }
 0x1a3   :  { %6723 = vmatprep.subr.bf16.mxu0 %v11779_v13  ;;  %6764 = vmatprep.subr.bf16.mxu1 %v11907_v15  ;;  %v678_v3 = vld [vmem:[#allocation2 + $0x11e8] sm:$0xff] }
 0x1a4   :  { %v802_v4 = vld [vmem:[#allocation2 + $0x15c8] sm:$0xff]  ;;  %v11995_v9 = vcombine.high %v674_v1, %v678_v3  ;;  %v11994_v19 = vcombine.low %v674_v1, %v678_v3 }
 0x1a5   :  { %v806_v5 = vld [vmem:[#allocation2 + $0x15e8] sm:$0xff] }
 0x1a6   :  { %6724 = vmatpush2.bf16.msra.mxu0 %v11778_v23  ;;  %6765 = vmatpush2.bf16.msra.mxu1 %v11906_v24  ;;  %v12123_v10 = vcombine.high %v802_v4, %v806_v5  ;;  %v666_v11 = vld [vmem:[#allocation2 + $0x1188] sm:$0xff]  ;;  %v12122_v21 = vcombine.low %v802_v4, %v806_v5 }
 0x1a7   :  { %6725 = vmatprep.subr.bf16.mxu0 %v11771_v27  ;;  %6766 = vmatprep.subr.bf16.mxu1 %v11899_v30  ;;  %v670_v13 = vld [vmem:[#allocation2 + $0x11a8] sm:$0xff] }
 0x1a8   :  { %v794_v15 = vld [vmem:[#allocation2 + $0x1588] sm:$0xff]  ;;  %v11987_v22 = vcombine.high %v666_v11, %v670_v13  ;;  %v11986_v35 = vcombine.low %v666_v11, %v670_v13 }
 0x1a9   :  { %v798_v17 = vld [vmem:[#allocation2 + $0x15a8] sm:$0xff] }
 0x1aa   :  { %6726 = vmatpush2.bf16.msra.mxu0 %v11770_v12  ;;  %6767 = vmatpush2.bf16.msra.mxu1 %v11898_v37  ;;  %v12115_v23 = vcombine.high %v794_v15, %v798_v17  ;;  %v658_v24 = vld [vmem:[#allocation2 + $0x1148] sm:$0xff]  ;;  %v12114_v37 = vcombine.low %v794_v15, %v798_v17 }
 0x1ab   :  { %6727 = vmatprep.subr.bf16.mxu0 %v11763_v39  ;;  %6768 = vmatprep.subr.bf16.mxu1 %v11891_v42  ;;  %v662_v27 = vld [vmem:[#allocation2 + $0x1168] sm:$0xff] }
 0x1ac   :  { %v786_v32 = vld [vmem:[#allocation2 + $0x1548] sm:$0xff]  ;;  %v11979_v39 = vcombine.high %v658_v24, %v662_v27 }
 0x1ad   :  { %v790_v33 = vld [vmem:[#allocation2 + $0x1568] sm:$0xff] }
 0x1ae   :  { %6728 = vmatpush2.bf16.msra.mxu0 %v11762_v47  ;;  %6769 = vmatpush2.bf16.msra.mxu1 %v11890_v49  ;;  %v12107_v43 = vcombine.high %v786_v32, %v790_v33  ;;  %v650_v44 = vld [vmem:[#allocation2 + $0x1108] sm:$0xff]  ;;  %v12106_v56 = vcombine.low %v786_v32, %v790_v33 }
 0x1af   :  { %6729 = vmatprep.subr.bf16.mxu0 %v11755_v52  ;;  %6770 = vmatprep.subr.bf16.mxu1 %v11883_v53  ;;  %v654_v25 = vld [vmem:[#allocation2 + $0x1128] sm:$0xff]  ;;  %v11978_v53 = vcombine.low %v658_v24, %v662_v27 }
 0x1b0   :  { %v778_v47 = vld [vmem:[#allocation2 + $0x1508] sm:$0xff]  ;;  %v11971_v57 = vcombine.high %v650_v44, %v654_v25  ;;  %v11970_v3 = vcombine.low %v650_v44, %v654_v25 }
 0x1b1   :  { %v782_v49 = vld [vmem:[#allocation2 + $0x1528] sm:$0xff] }
 0x1b2   :  { %6730 = vmatpush2.bf16.msra.mxu0 %v11754_v61  ;;  %6771 = vmatpush2.bf16.msra.mxu1 %v11882_v62  ;;  %v12099_v61 = vcombine.high %v778_v47, %v782_v49  ;;  %v642_v62 = vld [vmem:[#allocation2 + $0x10c8] sm:$0xff]  ;;  %v12098_v4 = vcombine.low %v778_v47, %v782_v49 }
 0x1b3   :  { %6731 = vmatprep.subr.bf16.mxu0 %v11747_v63  ;;  %6772 = vmatprep.subr.bf16.mxu1 %v11875_v0  ;;  %v646_v63 = vld [vmem:[#allocation2 + $0x10e8] sm:$0xff] }
 0x1b4   :  { %v770_v0 = vld [vmem:[#allocation2 + $0x14c8] sm:$0xff]  ;;  %v11963_v5 = vcombine.high %v642_v62, %v646_v63  ;;  %v11962_v13 = vcombine.low %v642_v62, %v646_v63 }
 0x1b5   :  { %v774_v1 = vld [vmem:[#allocation2 + $0x14e8] sm:$0xff] }
 0x1b6   :  { %6732 = vmatpush2.bf16.msra.mxu0 %v11746_v7  ;;  %6773 = vmatpush2.bf16.msra.mxu1 %v11874_v8  ;;  %v12091_v7 = vcombine.high %v770_v0, %v774_v1  ;;  %v634_v8 = vld [vmem:[#allocation2 + $0x1088] sm:$0xff]  ;;  %v12090_v15 = vcombine.low %v770_v0, %v774_v1 }
 0x1b7   :  { %6783 = vmatprep.subr.bf16.mxu0 %v11995_v9  ;;  %6824 = vmatprep.subr.bf16.mxu1 %v12123_v10  ;;  %v638_v9 = vld [vmem:[#allocation2 + $0x10a8] sm:$0xff] }
 0x1b8   :  { %v13237_v34 = vpop.f32.mrf.mxu1  ;;  %v762_v10 = vld [vmem:[#allocation2 + $0x1488] sm:$0xff]  ;;  %v11955_v17 = vcombine.high %v634_v8, %v638_v9  ;;  %v11954_v27 = vcombine.low %v634_v8, %v638_v9 }
 0x1b9   :  { %v13234_v30 = vpop.f32.mrf.mxu0  ;;  %6734 = vmatmul.mubr.bf16.vlgmr.msra.gmra.mxu0 %v13156_v36  ;;  %6775 = vmatmul.mubr.bf16.vlgmr.msra.gmra.mxu1 %v13161_v40  ;;  %v766_v11 = vld [vmem:[#allocation2 + $0x14a8] sm:$0xff] }
 0x1ba   :  { %6784 = vmatpush1.bf16.msra.mxu0 %v11994_v19  ;;  %6825 = vmatpush1.bf16.msra.mxu1 %v12122_v21  ;;  %v13242_v42 = vpop.f32.mrf.mxu1  ;;  %v12083_v19 = vcombine.high %v762_v10, %v766_v11  ;;  %v626_v21 = vld [vmem:[#allocation2 + $0x1048] sm:$0xff]  ;;  %v12082_v32 = vcombine.low %v762_v10, %v766_v11 }
 0x1bb   :  { %v13240_v12 = vpop.f32.mrf.mxu0  ;;  %6785 = vmatprep.subr.bf16.mxu0 %v11987_v22  ;;  %6826 = vmatprep.subr.bf16.mxu1 %v12115_v23  ;;  %v630_v22 = vld [vmem:[#allocation2 + $0x1068] sm:$0xff] }
 0x1bc   :  { %6815 = vmatprep.mubr.bf16.mxu0 %v13166_v48  ;;  %6856 = vmatprep.mubr.bf16.mxu1 %v13169_v51  ;;  %v6534_v52 = vpop.f32.mrf.mxu1  ;;  %v754_v23 = vld [vmem:[#allocation2 + $0x1448] sm:$0xff]  ;;  %v11947_v33 = vcombine.high %v626_v21, %v630_v22  ;;  %v11946_v25 = vcombine.low %v626_v21, %v630_v22 }
 0x1bd   :  { %v6493_v45 = vpop.f32.mrf.mxu0  ;;  %v758_v24 = vld [vmem:[#allocation2 + $0x1468] sm:$0xff] }
 0x1be   :  { %6786 = vmatpush1.bf16.msra.mxu0 %v11986_v35  ;;  %6827 = vmatpush1.bf16.msra.mxu1 %v12114_v37  ;;  %v6535_v60 = vpop.f32.mrf.mxu1  ;;  %v12075_v35 = vcombine.high %v754_v23, %v758_v24  ;;  %v618_v37 = vld [vmem:[#allocation2 + $0x1008] sm:$0xff]  ;;  %v12074_v45 = vcombine.low %v754_v23, %v758_v24 }
 0x1bf   :  { %v6494_v54 = vpop.f32.mrf.mxu0  ;;  %6787 = vmatprep.subr.bf16.mxu0 %v11979_v39  ;;  %6828 = vmatprep.subr.bf16.mxu1 %v12107_v43  ;;  %v622_v39 = vld [vmem:[#allocation2 + $0x1028] sm:$0xff] }
 0x1c0   :  { %v746_v43 = vld [vmem:[#allocation2 + $0x1408] sm:$0xff]  ;;  %v11939_v47 = vcombine.high %v618_v37, %v622_v39 }
 0x1c1   :  { %v750_v44 = vld [vmem:[#allocation2 + $0x1428] sm:$0xff] }
 0x1c2   :  { %6788 = vmatpush1.bf16.msra.mxu0 %v11978_v53  ;;  %6829 = vmatpush1.bf16.msra.mxu1 %v12106_v56  ;;  %v12067_v49 = vcombine.high %v746_v43, %v750_v44  ;;  %v738_v52 = vld [vmem:[#allocation2 + $0x13c8] sm:$0xff]  ;;  %v12066_v60 = vcombine.low %v746_v43, %v750_v44 }
 0x1c3   :  { %6789 = vmatprep.subr.bf16.mxu0 %v11971_v57  ;;  %6830 = vmatprep.subr.bf16.mxu1 %v12099_v61  ;;  %v742_v53 = vld [vmem:[#allocation2 + $0x13e8] sm:$0xff]  ;;  %v11938_v57 = vcombine.low %v618_v37, %v622_v39 }
 0x1c4   :  { %v866_v54 = vld [vmem:[#allocation2 + $0x17c8] sm:$0xff]  ;;  %v12059_v61 = vcombine.high %v738_v52, %v742_v53 }
 0x1c5   :  { %v870_v56 = vld [vmem:[#allocation2 + $0x17e8] sm:$0xff] }
 0x1c6   :  { %6790 = vmatpush1.bf16.msra.mxu0 %v11970_v3  ;;  %6831 = vmatpush1.bf16.msra.mxu1 %v12098_v4  ;;  %v12187_v62 = vcombine.high %v866_v54, %v870_v56  ;;  %v730_v63 = vld [vmem:[#allocation2 + $0x1388] sm:$0xff]  ;;  %v12058_v4 = vcombine.low %v738_v52, %v742_v53 }
 0x1c7   :  { %6791 = vmatprep.subr.bf16.mxu0 %v11963_v5  ;;  %6832 = vmatprep.subr.bf16.mxu1 %v12091_v7  ;;  %v734_v0 = vld [vmem:[#allocation2 + $0x13a8] sm:$0xff]  ;;  %v12186_v5 = vcombine.low %v866_v54, %v870_v56 }
 0x1c8   :  { %v858_v1 = vld [vmem:[#allocation2 + $0x1788] sm:$0xff]  ;;  %v12051_v7 = vcombine.high %v730_v63, %v734_v0 }
 0x1c9   :  { %v862_v3 = vld [vmem:[#allocation2 + $0x17a8] sm:$0xff] }
 0x1ca   :  { %6792 = vmatpush1.bf16.msra.mxu0 %v11962_v13  ;;  %6833 = vmatpush1.bf16.msra.mxu1 %v12090_v15  ;;  %v12179_v8 = vcombine.high %v858_v1, %v862_v3  ;;  %v722_v9 = vld [vmem:[#allocation2 + $0x1348] sm:$0xff]  ;;  %v12050_v15 = vcombine.low %v730_v63, %v734_v0 }
 0x1cb   :  { %6793 = vmatprep.subr.bf16.mxu0 %v11955_v17  ;;  %6834 = vmatprep.subr.bf16.mxu1 %v12083_v19  ;;  %v726_v10 = vld [vmem:[#allocation2 + $0x1368] sm:$0xff]  ;;  %v12178_v17 = vcombine.low %v858_v1, %v862_v3 }
 0x1cc   :  { %v850_v11 = vld [vmem:[#allocation2 + $0x1748] sm:$0xff]  ;;  %v12043_v19 = vcombine.high %v722_v9, %v726_v10 }
 0x1cd   :  { %v854_v13 = vld [vmem:[#allocation2 + $0x1768] sm:$0xff] }
 0x1ce   :  { %6794 = vmatpush1.bf16.msra.mxu0 %v11954_v27  ;;  %6835 = vmatpush1.bf16.msra.mxu1 %v12082_v32  ;;  %v12171_v21 = vcombine.high %v850_v11, %v854_v13  ;;  %v714_v22 = vld [vmem:[#allocation2 + $0x1308] sm:$0xff]  ;;  %v12042_v32 = vcombine.low %v722_v9, %v726_v10 }
 0x1cf   :  { %6795 = vmatprep.subr.bf16.mxu0 %v11947_v33  ;;  %6836 = vmatprep.subr.bf16.mxu1 %v12075_v35  ;;  %v718_v23 = vld [vmem:[#allocation2 + $0x1328] sm:$0xff]  ;;  %v12170_v33 = vcombine.low %v850_v11, %v854_v13 }
 0x1d0   :  { %v842_v24 = vld [vmem:[#allocation2 + $0x1708] sm:$0xff]  ;;  %v12035_v35 = vcombine.high %v714_v22, %v718_v23 }
 0x1d1   :  { %v846_v27 = vld [vmem:[#allocation2 + $0x1728] sm:$0xff] }
 0x1d2   :  { %6796 = vmatpush1.bf16.msra.mxu0 %v11946_v25  ;;  %6837 = vmatpush1.bf16.msra.mxu1 %v12074_v45  ;;  %v12163_v37 = vcombine.high %v842_v24, %v846_v27  ;;  %v706_v39 = vld [vmem:[#allocation2 + $0x12c8] sm:$0xff]  ;;  %v12034_v45 = vcombine.low %v714_v22, %v718_v23 }
 0x1d3   :  { %6797 = vmatprep.subr.bf16.mxu0 %v11939_v47  ;;  %6838 = vmatprep.subr.bf16.mxu1 %v12067_v49  ;;  %v710_v43 = vld [vmem:[#allocation2 + $0x12e8] sm:$0xff]  ;;  %v12162_v47 = vcombine.low %v842_v24, %v846_v27 }
 0x1d4   :  { %v834_v44 = vld [vmem:[#allocation2 + $0x16c8] sm:$0xff]  ;;  %v12027_v49 = vcombine.high %v706_v39, %v710_v43 }
 0x1d5   :  { %v838_v25 = vld [vmem:[#allocation2 + $0x16e8] sm:$0xff] }
 0x1d6   :  { %6798 = vmatpush1.bf16.msra.mxu0 %v11938_v57  ;;  %6839 = vmatpush1.bf16.msra.mxu1 %v12066_v60  ;;  %v12155_v52 = vcombine.high %v834_v44, %v838_v25  ;;  %v698_v53 = vld [vmem:[#allocation2 + $0x1288] sm:$0xff]  ;;  %v12026_v60 = vcombine.low %v706_v39, %v710_v43  ;;  %v6490_v39 = vadd.f32 %v13234_v30, %v13227_v29 }
 0x1d7   :  { %6799 = vmatprep.subr.bf16.mxu0 %v12059_v61  ;;  %6840 = vmatprep.subr.bf16.mxu1 %v12187_v62  ;;  %v702_v54 = vld [vmem:[#allocation2 + $0x12a8] sm:$0xff]  ;;  %v12154_v61 = vcombine.low %v834_v44, %v838_v25 }
 0x1d8   :  { %v826_v56 = vld [vmem:[#allocation2 + $0x1688] sm:$0xff]  ;;  %v12019_v62 = vcombine.high %v698_v53, %v702_v54 }
 0x1d9   :  { %v830_v57 = vld [vmem:[#allocation2 + $0x16a8] sm:$0xff] }
 0x1da   :  { %6800 = vmatpush2.bf16.msra.mxu0 %v12058_v4  ;;  %6841 = vmatpush2.bf16.msra.mxu1 %v12186_v5  ;;  %v12147_v63 = vcombine.high %v826_v56, %v830_v57  ;;  %v690_v0 = vld [vmem:[#allocation2 + $0x1248] sm:$0xff]  ;;  %v12018_v5 = vcombine.low %v698_v53, %v702_v54 }
 0x1db   :  { %6801 = vmatprep.subr.bf16.mxu0 %v12051_v7  ;;  %6842 = vmatprep.subr.bf16.mxu1 %v12179_v8  ;;  %v694_v1 = vld [vmem:[#allocation2 + $0x1268] sm:$0xff]  ;;  %v12146_v7 = vcombine.low %v826_v56, %v830_v57  ;;  %v6531_v56 = vadd.f32 %v13237_v34, %v6490_v39 }
 0x1dc   :  { %v818_v3 = vld [vmem:[#allocation2 + $0x1648] sm:$0xff]  ;;  %v12011_v8 = vcombine.high %v690_v0, %v694_v1 }
 0x1dd   :  { %v822_v4 = vld [vmem:[#allocation2 + $0x1668] sm:$0xff] }
 0x1de   :  { %6802 = vmatpush2.bf16.msra.mxu0 %v12050_v15  ;;  %6843 = vmatpush2.bf16.msra.mxu1 %v12178_v17  ;;  %v12139_v9 = vcombine.high %v818_v3, %v822_v4  ;;  %v682_v10 = vld [vmem:[#allocation2 + $0x1208] sm:$0xff]  ;;  %v12010_v17 = vcombine.low %v690_v0, %v694_v1 }
 0x1df   :  { %6803 = vmatprep.subr.bf16.mxu0 %v12043_v19  ;;  %6844 = vmatprep.subr.bf16.mxu1 %v12171_v21  ;;  %v686_v11 = vld [vmem:[#allocation2 + $0x1228] sm:$0xff]  ;;  %v12138_v19 = vcombine.low %v818_v3, %v822_v4 }
 0x1e0   :  { %v810_v13 = vld [vmem:[#allocation2 + $0x1608] sm:$0xff]  ;;  %v12003_v21 = vcombine.high %v682_v10, %v686_v11 }
 0x1e1   :  { %v814_v15 = vld [vmem:[#allocation2 + $0x1628] sm:$0xff] }
 0x1e2   :  { %6804 = vmatpush2.bf16.msra.mxu0 %v12042_v32  ;;  %6845 = vmatpush2.bf16.msra.mxu1 %v12170_v33  ;;  %v12131_v22 = vcombine.high %v810_v13, %v814_v15  ;;  %v930_v23 = vld [vmem:[#allocation2 + $0x19c8] sm:$0xff]  ;;  %v12002_v33 = vcombine.low %v682_v10, %v686_v11 }
 0x1e3   :  { %6805 = vmatprep.subr.bf16.mxu0 %v12035_v35  ;;  %6846 = vmatprep.subr.bf16.mxu1 %v12163_v37  ;;  %v934_v24 = vld [vmem:[#allocation2 + $0x19e8] sm:$0xff]  ;;  %v12130_v35 = vcombine.low %v810_v13, %v814_v15 }
 0x1e4   :  { %v1058_v27 = vld [vmem:[#allocation2 + $0x1dc8] sm:$0xff]  ;;  %v12251_v37 = vcombine.high %v930_v23, %v934_v24 }
 0x1e5   :  { %v1062_v32 = vld [vmem:[#allocation2 + $0x1de8] sm:$0xff] }
 0x1e6   :  { %6806 = vmatpush2.bf16.msra.mxu0 %v12034_v45  ;;  %6847 = vmatpush2.bf16.msra.mxu1 %v12162_v47  ;;  %v12379_v43 = vcombine.high %v1058_v27, %v1062_v32  ;;  %v922_v44 = vld [vmem:[#allocation2 + $0x1988] sm:$0xff]  ;;  %v12378_v53 = vcombine.low %v1058_v27, %v1062_v32 }
 0x1e7   :  { %6807 = vmatprep.subr.bf16.mxu0 %v12027_v49  ;;  %6848 = vmatprep.subr.bf16.mxu1 %v12155_v52  ;;  %v926_v25 = vld [vmem:[#allocation2 + $0x19a8] sm:$0xff]  ;;  %v6492_v49 = vadd.f32 %v13240_v12, %v13232_v41  ;;  %v12250_v52 = vcombine.low %v930_v23, %v934_v24 }
 0x1e8   :  { %v1050_v45 = vld [vmem:[#allocation2 + $0x1d88] sm:$0xff]  ;;  %v12243_v54 = vcombine.high %v922_v44, %v926_v25  ;;  %v12242_v0 = vcombine.low %v922_v44, %v926_v25 }
 0x1e9   :  { %v1054_v47 = vld [vmem:[#allocation2 + $0x1da8] sm:$0xff] }
 0x1ea   :  { %6808 = vmatpush2.bf16.msra.mxu0 %v12026_v60  ;;  %6849 = vmatpush2.bf16.msra.mxu1 %v12154_v61  ;;  %v12371_v57 = vcombine.high %v1050_v45, %v1054_v47  ;;  %v914_v29 = vld [vmem:[#allocation2 + $0x1948] sm:$0xff]  ;;  %v12370_v34 = vcombine.low %v1050_v45, %v1054_v47 }
 0x1eb   :  { %6809 = vmatprep.subr.bf16.mxu0 %v12019_v62  ;;  %6850 = vmatprep.subr.bf16.mxu1 %v12147_v63  ;;  %v918_v30 = vld [vmem:[#allocation2 + $0x1968] sm:$0xff]  ;;  %v6533_v63 = vadd.f32 %v13242_v42, %v6492_v49 }
 0x1ec   :  { %v1042_v61 = vld [vmem:[#allocation2 + $0x1d48] sm:$0xff]  ;;  %v12235_v3 = vcombine.high %v914_v29, %v918_v30 }
 0x1ed   :  { %v1046_v62 = vld [vmem:[#allocation2 + $0x1d68] sm:$0xff] }
 0x1ee   :  { %6810 = vmatpush2.bf16.msra.mxu0 %v12018_v5  ;;  %6851 = vmatpush2.bf16.msra.mxu1 %v12146_v7  ;;  %v910_v10 = vld [vmem:[#allocation2 + $0x1928] sm:$0xff]  ;;  %v12362_v23 = vcombine.low %v1042_v61, %v1046_v62 }
 0x1ef   :  { %6811 = vmatprep.subr.bf16.mxu0 %v12011_v8  ;;  %6852 = vmatprep.subr.bf16.mxu1 %v12139_v9  ;;  %v12363_v8 = vcombine.high %v1042_v61, %v1046_v62  ;;  %v906_v9 = vld [vmem:[#allocation2 + $0x1908] sm:$0xff] }
 0x1f0   :  { %v1034_v11 = vld [vmem:[#allocation2 + $0x1d08] sm:$0xff]  ;;  %v12227_v24 = vcombine.high %v906_v9, %v910_v10  ;;  %v12226_v44 = vcombine.low %v906_v9, %v910_v10 }
 0x1f1   :  { %v1038_v13 = vld [vmem:[#allocation2 + $0x1d28] sm:$0xff] }
 0x1f2   :  { %6812 = vmatpush2.bf16.msra.mxu0 %v12010_v17  ;;  %6853 = vmatpush2.bf16.msra.mxu1 %v12138_v19  ;;  %v1026_v39 = vld [vmem:[#allocation2 + $0x1cc8] sm:$0xff]  ;;  %v12354_v25 = vcombine.low %v1034_v11, %v1038_v13 }
 0x1f3   :  { %6813 = vmatprep.subr.bf16.mxu0 %v12003_v21  ;;  %6854 = vmatprep.subr.bf16.mxu1 %v12131_v22  ;;  %v12234_v21 = vcombine.low %v914_v29, %v918_v30  ;;  %v890_v49 = vld [vmem:[#allocation2 + $0x1888] sm:$0xff] }
 0x1f4   :  { %v886_v61 = vld [vmem:[#allocation2 + $0x1868] sm:$0xff] }
 0x1f5   :  { %v1010_v62 = vld [vmem:[#allocation2 + $0x1c48] sm:$0xff] }
 0x1f6   :  { %6814 = vmatpush2.bf16.msra.mxu0 %v12002_v33  ;;  %6855 = vmatpush2.bf16.msra.mxu1 %v12130_v35  ;;  %v12355_v33 = vcombine.high %v1034_v11, %v1038_v13  ;;  %v898_v35 = vld [vmem:[#allocation2 + $0x18c8] sm:$0xff] }
 0x1f7   :  { %6865 = vmatprep.subr.bf16.mxu0 %v12251_v37  ;;  %6906 = vmatprep.subr.bf16.mxu1 %v12379_v43  ;;  %v902_v37 = vld [vmem:[#allocation2 + $0x18e8] sm:$0xff] }
 0x1f8   :  { %v1030_v43 = vld [vmem:[#allocation2 + $0x1ce8] sm:$0xff]  ;;  %v12219_v45 = vcombine.high %v898_v35, %v902_v37 }
 0x1f9   :  { %v6571_v60 = vpop.f32.mrf.mxu0  ;;  %6816 = vmatmul.mubr.bf16.vlgmr.msra.gmra.mxu0 %v13180_v2  ;;  %v6612_v12 = vpop.f32.mrf.mxu1  ;;  %6857 = vmatmul.mubr.bf16.vlgmr.msra.gmra.mxu1 %v13185_v6  ;;  %v12347_v47 = vcombine.high %v1026_v39, %v1030_v43  ;;  %v998_v11 = vld [vmem:[#allocation2 + $0x1be8] sm:$0xff] }
 0x1fa   :  { %v6572_v41 = vadd.f32 %v6571_v60, %v6531_v56  ;;  %6866 = vmatpush1.bf16.msra.mxu0 %v12250_v52  ;;  %6907 = vmatpush1.bf16.msra.mxu1 %v12378_v53  ;;  %v894_v52 = vld [vmem:[#allocation2 + $0x18a8] sm:$0xff]  ;;  %v12218_v56 = vcombine.low %v898_v35, %v902_v37 }
 0x1fb   :  { %v6573_v1 = vpop.f32.mrf.mxu0  ;;  %6867 = vmatprep.subr.bf16.mxu0 %v12243_v54  ;;  %v6614_v7 = vpop.f32.mrf.mxu1  ;;  %6908 = vmatprep.subr.bf16.mxu1 %v12371_v57  ;;  %v1018_v53 = vld [vmem:[#allocation2 + $0x1c88] sm:$0xff]  ;;  %v12346_v57 = vcombine.low %v1026_v39, %v1030_v43  ;;  %v12211_v29 = vcombine.high %v890_v49, %v894_v52 }
 0x1fc   :  { %v6613_v4 = vadd.f32 %v6612_v12, %v6572_v41  ;;  %v6574_v5 = vadd.f32 %v6573_v1, %v6533_v63  ;;  %6897 = vmatprep.mubr.bf16.mxu0 %v13190_v14  ;;  %6938 = vmatprep.mubr.bf16.mxu1 %v13193_v18  ;;  %v1022_v54 = vld [vmem:[#allocation2 + $0x1ca8] sm:$0xff]  ;;  %v12210_v41 = vcombine.low %v890_v49, %v894_v52 }
 0x1fd   :  { %v6575_v42 = vpop.f32.mrf.mxu0  ;;  %v6616_v19 = vpop.f32.mrf.mxu1  ;;  %v12339_v30 = vcombine.high %v1018_v53, %v1022_v54  ;;  %v882_v60 = vld [vmem:[#allocation2 + $0x1848] sm:$0xff]  ;;  %v12338_v12 = vcombine.low %v1018_v53, %v1022_v54 }
 0x1fe   :  { %v7603_v15 = vmax.f32 %v6613_v4, 0.0  ;;  %v6615_v17 = vadd.f32 %v6614_v7, %v6574_v5  ;;  %6868 = vmatpush1.bf16.msra.mxu0 %v12242_v0  ;;  %6909 = vmatpush1.bf16.msra.mxu1 %v12370_v34  ;;  %v1014_v63 = vld [vmem:[#allocation2 + $0x1c68] sm:$0xff]  ;;  %v12203_v0 = vcombine.high %v882_v60, %v886_v61  ;;  %v12202_v7 = vcombine.low %v882_v60, %v886_v61 }
 0x1ff   :  { %v6576_v22 = vpop.f32.mrf.mxu0  ;;  %6869 = vmatprep.subr.bf16.mxu0 %v12235_v3  ;;  %v6617_v32 = vpop.f32.mrf.mxu1  ;;  %6910 = vmatprep.subr.bf16.mxu1 %v12363_v8  ;;  %v12331_v1 = vcombine.high %v1010_v62, %v1014_v63  ;;  %v874_v34 = vld [vmem:[#allocation2 + $0x1808] sm:$0xff]  ;;  %v12330_v8 = vcombine.low %v1010_v62, %v1014_v63 }
 0x200   :  { %7611 = vst [vmem:[%s13569_s5] sm:$0xff] %v7603_v15  ;;  %v7604_v27 = vmax.f32 %v6615_v17, 0.0  ;;  %v878_v3 = vld [vmem:[#allocation2 + $0x1828] sm:$0xff] }
 0x201   :  { %v1002_v4 = vld [vmem:[#allocation2 + $0x1c08] sm:$0xff]  ;;  %v12195_v9 = vcombine.high %v874_v34, %v878_v3  ;;  %v12194_v17 = vcombine.low %v874_v34, %v878_v3 }
 0x202   :  { %7612 = vst [vmem:[%s13569_s5 + $0x8] sm:$0xff] %v7604_v27  ;;  %6870 = vmatpush1.bf16.msra.mxu0 %v12234_v21  ;;  %6911 = vmatpush1.bf16.msra.mxu1 %v12362_v23  ;;  %v1006_v5 = vld [vmem:[#allocation2 + $0x1c28] sm:$0xff] }
 0x203   :  { %6871 = vmatprep.subr.bf16.mxu0 %v12227_v24  ;;  %6912 = vmatprep.subr.bf16.mxu1 %v12355_v33  ;;  %v12323_v10 = vcombine.high %v1002_v4, %v1006_v5  ;;  %v994_v42 = vld [vmem:[#allocation2 + $0x1bc8] sm:$0xff]  ;;  %v12322_v19 = vcombine.low %v1002_v4, %v1006_v5 }
 0x204   :  { %v1122_v13 = vld [vmem:[#allocation2 + $0x1fc8] sm:$0xff]  ;;  %v12315_v21 = vcombine.high %v994_v42, %v998_v11  ;;  %v12314_v33 = vcombine.low %v994_v42, %v998_v11 }
 0x205   :  { %v1126_v15 = vld [vmem:[#allocation2 + $0x1fe8] sm:$0xff] }
 0x206   :  { %6872 = vmatpush1.bf16.msra.mxu0 %v12226_v44  ;;  %6913 = vmatpush1.bf16.msra.mxu1 %v12354_v25  ;;  %v12443_v22 = vcombine.high %v1122_v13, %v1126_v15  ;;  %v986_v23 = vld [vmem:[#allocation2 + $0x1b88] sm:$0xff]  ;;  %v12442_v35 = vcombine.low %v1122_v13, %v1126_v15 }
 0x207   :  { %6873 = vmatprep.subr.bf16.mxu0 %v12219_v45  ;;  %6914 = vmatprep.subr.bf16.mxu1 %v12347_v47  ;;  %v990_v24 = vld [vmem:[#allocation2 + $0x1ba8] sm:$0xff] }
 0x208   :  { %v1114_v27 = vld [vmem:[#allocation2 + $0x1f88] sm:$0xff]  ;;  %v12307_v37 = vcombine.high %v986_v23, %v990_v24  ;;  %v12306_v47 = vcombine.low %v986_v23, %v990_v24 }
 0x209   :  { %v1118_v32 = vld [vmem:[#allocation2 + $0x1fa8] sm:$0xff] }
 0x20a   :  { %6874 = vmatpush1.bf16.msra.mxu0 %v12218_v56  ;;  %6915 = vmatpush1.bf16.msra.mxu1 %v12346_v57  ;;  %v12435_v39 = vcombine.high %v1114_v27, %v1118_v32  ;;  %v978_v43 = vld [vmem:[#allocation2 + $0x1b48] sm:$0xff]  ;;  %v12434_v49 = vcombine.low %v1114_v27, %v1118_v32 }
 0x20b   :  { %6875 = vmatprep.subr.bf16.mxu0 %v12211_v29  ;;  %6916 = vmatprep.subr.bf16.mxu1 %v12339_v30  ;;  %v982_v44 = vld [vmem:[#allocation2 + $0x1b68] sm:$0xff] }
 0x20c   :  { %v1106_v25 = vld [vmem:[#allocation2 + $0x1f48] sm:$0xff]  ;;  %v12299_v52 = vcombine.high %v978_v43, %v982_v44  ;;  %v12298_v30 = vcombine.low %v978_v43, %v982_v44 }
 0x20d   :  { %v1110_v45 = vld [vmem:[#allocation2 + $0x1f68] sm:$0xff] }
 0x20e   :  { %6876 = vmatpush1.bf16.msra.mxu0 %v12210_v41  ;;  %6917 = vmatpush1.bf16.msra.mxu1 %v12338_v12  ;;  %v12427_v53 = vcombine.high %v1106_v25, %v1110_v45  ;;  %v970_v54 = vld [vmem:[#allocation2 + $0x1b08] sm:$0xff]  ;;  %v12426_v60 = vcombine.low %v1106_v25, %v1110_v45  ;;  %v163_v45 = vld [vmem:[#allocation2 + $0x1d0] sm:$0xff] }
 0x20f   :  { %6877 = vmatprep.subr.bf16.mxu0 %v12203_v0  ;;  %6918 = vmatprep.subr.bf16.mxu1 %v12331_v1  ;;  %v974_v56 = vld [vmem:[#allocation2 + $0x1b28] sm:$0xff] }
 0x210   :  { %v1098_v57 = vld [vmem:[#allocation2 + $0x1f08] sm:$0xff]  ;;  %v12291_v61 = vcombine.high %v970_v54, %v974_v56  ;;  %v12290_v1 = vcombine.low %v970_v54, %v974_v56  ;;  %v1141_v54 = vsub.s32 2, %v13198_v26 }
 0x211   :  { %v1102_v29 = vld [vmem:[#allocation2 + $0x1f28] sm:$0xff] }
 0x212   :  { %6878 = vmatpush1.bf16.msra.mxu0 %v12202_v7  ;;  %6919 = vmatpush1.bf16.msra.mxu1 %v12330_v8  ;;  %v12419_v62 = vcombine.high %v1098_v57, %v1102_v29  ;;  %v962_v63 = vld [vmem:[#allocation2 + $0x1ac8] sm:$0xff]  ;;  %v12418_v34 = vcombine.low %v1098_v57, %v1102_v29 }
 0x213   :  { %6879 = vmatprep.subr.bf16.mxu0 %v12195_v9  ;;  %6920 = vmatprep.subr.bf16.mxu1 %v12323_v10  ;;  %v966_v41 = vld [vmem:[#allocation2 + $0x1ae8] sm:$0xff] }
 0x214   :  { %v1090_v12 = vld [vmem:[#allocation2 + $0x1ec8] sm:$0xff]  ;;  %v12283_v3 = vcombine.high %v962_v63, %v966_v41  ;;  %v12282_v10 = vcombine.low %v962_v63, %v966_v41  ;;  %v287_v63 = vld [vmem:[#allocation2 + $0x5b0] sm:$0xff]  ;;  %v12966_v41 = vld [vmem:[#allocation4] sm:$0xff] }
 0x215   :  { %v1094_v0 = vld [vmem:[#allocation2 + $0x1ee8] sm:$0xff] }
 0x216   :  { %6880 = vmatpush1.bf16.msra.mxu0 %v12194_v17  ;;  %6921 = vmatpush1.bf16.msra.mxu1 %v12322_v19  ;;  %v12411_v4 = vcombine.high %v1090_v12, %v1094_v0  ;;  %v954_v5 = vld [vmem:[#allocation2 + $0x1a88] sm:$0xff]  ;;  %v12410_v42 = vcombine.low %v1090_v12, %v1094_v0  ;;  %v1142_v12 = vrot.slane %v12966_v41, %v1141_v54 }
 0x217   :  { %6881 = vmatprep.subr.bf16.mxu0 %v12315_v21  ;;  %6922 = vmatprep.subr.bf16.mxu1 %v12443_v22  ;;  %v958_v7 = vld [vmem:[#allocation2 + $0x1aa8] sm:$0xff] }
 0x218   :  { %v1082_v8 = vld [vmem:[#allocation2 + $0x1e88] sm:$0xff]  ;;  %v12275_v11 = vcombine.high %v954_v5, %v958_v7  ;;  %v12274_v22 = vcombine.low %v954_v5, %v958_v7  ;;  %v147_v5 = vld [vmem:[#allocation2 + $0x150] sm:$0xff] }
 0x219   :  { %v1086_v9 = vld [vmem:[#allocation2 + $0x1ea8] sm:$0xff]  ;;  %v151_v7 = vld [vmem:[#allocation2 + $0x170] sm:$0xff] }
 0x21a   :  { %6882 = vmatpush2.bf16.msra.mxu0 %v12314_v33  ;;  %6923 = vmatpush2.bf16.msra.mxu1 %v12442_v35  ;;  %v12403_v13 = vcombine.high %v1082_v8, %v1086_v9  ;;  %v946_v15 = vld [vmem:[#allocation2 + $0x1a48] sm:$0xff]  ;;  %v12402_v23 = vcombine.low %v1082_v8, %v1086_v9  ;;  %v275_v9 = vld [vmem:[#allocation2 + $0x550] sm:$0xff] }
 0x21b   :  { %6883 = vmatprep.subr.bf16.mxu0 %v12307_v37  ;;  %6924 = vmatprep.subr.bf16.mxu1 %v12435_v39  ;;  %v950_v17 = vld [vmem:[#allocation2 + $0x1a68] sm:$0xff] }
 0x21c   :  { %v1074_v19 = vld [vmem:[#allocation2 + $0x1e48] sm:$0xff]  ;;  %v12267_v24 = vcombine.high %v946_v15, %v950_v17  ;;  %v12266_v39 = vcombine.low %v946_v15, %v950_v17 }
 0x21d   :  { %v1078_v21 = vld [vmem:[#allocation2 + $0x1e68] sm:$0xff] }
 0x21e   :  { %6884 = vmatpush2.bf16.msra.mxu0 %v12306_v47  ;;  %6925 = vmatpush2.bf16.msra.mxu1 %v12434_v49  ;;  %v12395_v27 = vcombine.high %v1074_v19, %v1078_v21  ;;  %v938_v32 = vld [vmem:[#allocation2 + $0x1a08] sm:$0xff]  ;;  %v12394_v43 = vcombine.low %v1074_v19, %v1078_v21  ;;  %v167_v47 = vld [vmem:[#allocation2 + $0x1f0] sm:$0xff]  ;;  %v11469_v19 = vcombine.high %v147_v5, %v151_v7 }
 0x21f   :  { %6885 = vmatprep.subr.bf16.mxu0 %v12299_v52  ;;  %6926 = vmatprep.subr.bf16.mxu1 %v12427_v53  ;;  %v942_v33 = vld [vmem:[#allocation2 + $0x1a28] sm:$0xff]  ;;  %v291_v49 = vld [vmem:[#allocation2 + $0x5d0] sm:$0xff]  ;;  %v11485_v57 = vcombine.high %v163_v45, %v167_v47  ;;  %v11484_v0 = vcombine.low %v163_v45, %v167_v47 }
 0x220   :  { %v1066_v35 = vld [vmem:[#allocation2 + $0x1e08] sm:$0xff]  ;;  %v12259_v44 = vcombine.high %v938_v32, %v942_v33  ;;  %v295_v52 = vld [vmem:[#allocation2 + $0x5f0] sm:$0xff]  ;;  %v12258_v53 = vcombine.low %v938_v32, %v942_v33 }
 0x221   :  { %v1070_v37 = vld [vmem:[#allocation2 + $0x1e28] sm:$0xff]  ;;  %v11613_v29 = vcombine.high %v291_v49, %v295_v52  ;;  %v143_v32 = vld [vmem:[#allocation2 + $0x130] sm:$0xff] }
 0x222   :  { %6886 = vmatpush2.bf16.msra.mxu0 %v12298_v30  ;;  %6927 = vmatpush2.bf16.msra.mxu1 %v12426_v60  ;;  %v12387_v25 = vcombine.high %v1066_v35, %v1070_v37  ;;  %v12386_v56 = vcombine.low %v1066_v35, %v1070_v37  ;;  %v1145_v30 = vsub.s32 3, %v13198_v26  ;;  %v155_v60 = vld [vmem:[#allocation2 + $0x190] sm:$0xff] }
 0x223   :  { %6887 = vmatprep.subr.bf16.mxu0 %v12291_v61  ;;  %6928 = vmatprep.subr.bf16.mxu1 %v12419_v62  ;;  %v159_v61 = vld [vmem:[#allocation2 + $0x1b0] sm:$0xff] }
 0x224   :  { %v283_v62 = vld [vmem:[#allocation2 + $0x590] sm:$0xff] }
 0x225   :  { %v11604_v17 = vcombine.low %v283_v62, %v287_v63  ;;  %v267_v35 = vld [vmem:[#allocation2 + $0x510] sm:$0xff] }
 0x226   :  { %6888 = vmatpush2.bf16.msra.mxu0 %v12290_v1  ;;  %6929 = vmatpush2.bf16.msra.mxu1 %v12418_v34  ;;  %v11612_v1 = vcombine.low %v291_v49, %v295_v52  ;;  %v11477_v34 = vcombine.high %v155_v60, %v159_v61  ;;  %v271_v37 = vld [vmem:[#allocation2 + $0x530] sm:$0xff] }
 0x227   :  { %6889 = vmatprep.subr.bf16.mxu0 %v12283_v3  ;;  %6930 = vmatprep.subr.bf16.mxu1 %v12411_v4  ;;  %v1146_v3 = vrot.slane %v12966_v41, %v1145_v30  ;;  %v11605_v4 = vcombine.high %v283_v62, %v287_v63  ;;  %v11589_v52 = vcombine.high %v267_v35, %v271_v37  ;;  %v123_v41 = vld [vmem:[#allocation2 + $0x90] sm:$0xff] }
 0x22a   :  { %6890 = vmatpush2.bf16.msra.mxu0 %v12282_v10  ;;  %6931 = vmatpush2.bf16.msra.mxu1 %v12410_v42  ;;  %v279_v10 = vld [vmem:[#allocation2 + $0x570] sm:$0xff] }
 0x22b   :  { %6891 = vmatprep.subr.bf16.mxu0 %v12275_v11  ;;  %6932 = vmatprep.subr.bf16.mxu1 %v12403_v13  ;;  %v11476_v13 = vcombine.low %v155_v60, %v159_v61  ;;  %v11596_v45 = vcombine.low %v275_v9, %v279_v10  ;;  %v11588_v61 = vcombine.low %v267_v35, %v271_v37  ;;  %v227_v35 = vld [vmem:[#allocation2 + $0x3d0] sm:$0xff] }
 0x22c   :  { %v231_v37 = vld [vmem:[#allocation2 + $0x3f0] sm:$0xff] }
 0x22e   :  { %6892 = vmatpush2.bf16.msra.mxu0 %v12274_v22  ;;  %6933 = vmatpush2.bf16.msra.mxu1 %v12402_v23 }
 0x22f   :  { %6893 = vmatprep.subr.bf16.mxu0 %v12267_v24  ;;  %6934 = vmatprep.subr.bf16.mxu1 %v12395_v27  ;;  %v11597_v24 = vcombine.high %v275_v9, %v279_v10  ;;  %v139_v27 = vld [vmem:[#allocation2 + $0x110] sm:$0xff] }
 0x230   :  { %v11461_v47 = vcombine.high %v139_v27, %v143_v32  ;;  %v11460_v60 = vcombine.low %v139_v27, %v143_v32  ;;  %v243_v9 = vld [vmem:[#allocation2 + $0x450] sm:$0xff] }
 0x231   :  { %v247_v10 = vld [vmem:[#allocation2 + $0x470] sm:$0xff] }
 0x232   :  { %6894 = vmatpush2.bf16.msra.mxu0 %v12266_v39  ;;  %6935 = vmatpush2.bf16.msra.mxu1 %v12394_v43  ;;  %v11564_v27 = vcombine.low %v243_v9, %v247_v10 }
 0x233   :  { %6895 = vmatprep.subr.bf16.mxu0 %v12259_v44  ;;  %6936 = vmatprep.subr.bf16.mxu1 %v12387_v25  ;;  %v11468_v44 = vcombine.low %v147_v5, %v151_v7  ;;  %v115_v7 = vld [vmem:[#allocation2 + $0x50] sm:$0xff] }
 0x236   :  { %6896 = vmatpush2.bf16.msra.mxu0 %v12258_v53  ;;  %6937 = vmatpush2.bf16.msra.mxu1 %v12386_v56  ;;  %v131_v53 = vld [vmem:[#allocation2 + $0xd0] sm:$0xff] }
 0x237   :  { %6947 = vmatprep.subr.bf16.mxu0 %v11485_v57  ;;  %6988 = vmatprep.subr.bf16.mxu1 %v11613_v29  ;;  %v135_v56 = vld [vmem:[#allocation2 + $0xf0] sm:$0xff] }
 0x238   :  { %v259_v57 = vld [vmem:[#allocation2 + $0x4d0] sm:$0xff]  ;;  %v11453_v62 = vcombine.high %v131_v53, %v135_v56 }
 0x239   :  { %v6653_v8 = vpop.f32.mrf.mxu0  ;;  %6898 = vmatmul.mubr.bf16.vlgmr.msra.gmra.mxu0 %v13208_v50  ;;  %v6694_v11 = vpop.f32.mrf.mxu1  ;;  %6939 = vmatmul.mubr.bf16.vlgmr.msra.gmra.mxu1 %v13212_v55  ;;  %v263_v29 = vld [vmem:[#allocation2 + $0x4f0] sm:$0xff] }
 0x23a   :  { %v6654_v42 = vadd.f32 %v6653_v8, %v1142_v12  ;;  %6948 = vmatpush1.bf16.msra.mxu0 %v11484_v0  ;;  %6989 = vmatpush1.bf16.msra.mxu1 %v11612_v1  ;;  %v11581_v63 = vcombine.high %v259_v57, %v263_v29  ;;  %v127_v12 = vld [vmem:[#allocation2 + $0xb0] sm:$0xff] }
 0x23b   :  { %v6655_v15 = vpop.f32.mrf.mxu0  ;;  %6949 = vmatprep.subr.bf16.mxu0 %v11477_v34  ;;  %v6696_v23 = vpop.f32.mrf.mxu1  ;;  %6990 = vmatprep.subr.bf16.mxu1 %v11605_v4  ;;  %v251_v0 = vld [vmem:[#allocation2 + $0x490] sm:$0xff]  ;;  %v11452_v34 = vcombine.low %v131_v53, %v135_v56  ;;  %v11445_v4 = vcombine.high %v123_v41, %v127_v12 }
 0x23c   :  { %v13270_v21 = vadd.f32 %v6694_v11, %v6654_v42  ;;  %v6656_v22 = vadd.f32 %v6655_v15, %v1146_v3  ;;  %6979 = vmatprep.mubr.bf16.mxu0 %v13120_v58  ;;  %7020 = vmatprep.mubr.bf16.mxu1 %v13122_v59  ;;  %v255_v1 = vld [vmem:[#allocation2 + $0x4b0] sm:$0xff]  ;;  %v11580_v3 = vcombine.low %v259_v57, %v263_v29 }
 0x23d   :  { %v6657_v33 = vpop.f32.mrf.mxu0  ;;  %v6698_v43 = vpop.f32.mrf.mxu1  ;;  %v11573_v5 = vcombine.high %v251_v0, %v255_v1  ;;  %v119_v8 = vld [vmem:[#allocation2 + $0x70] sm:$0xff]  ;;  %v11444_v42 = vcombine.low %v123_v41, %v127_v12  ;;  %v11572_v11 = vcombine.low %v251_v0, %v255_v1  ;;  %v11565_v15 = vcombine.high %v243_v9, %v247_v10 }
 0x23e   :  { %v13274_v39 = vadd.f32 %v6696_v23, %v6656_v22  ;;  %6950 = vmatpush1.bf16.msra.mxu0 %v11476_v13  ;;  %6991 = vmatpush1.bf16.msra.mxu1 %v11604_v17  ;;  %v11437_v13 = vcombine.high %v115_v7, %v119_v8  ;;  %v107_v17 = vld [vmem:[#allocation2 + $0x10] sm:$0xff]  ;;  %v11548_v29 = vcombine.low %v227_v35, %v231_v37 }
 0x23f   :  { %v6658_v25 = vpop.f32.mrf.mxu0  ;;  %6951 = vmatprep.subr.bf16.mxu0 %v11469_v19  ;;  %v6699_v49 = vpop.f32.mrf.mxu1  ;;  %6992 = vmatprep.subr.bf16.mxu1 %v11597_v24  ;;  %v111_v19 = vld [vmem:[#allocation2 + $0x30] sm:$0xff]  ;;  %v11436_v24 = vcombine.low %v115_v7, %v119_v8 }
 0x240   :  { %v235_v22 = vld [vmem:[#allocation2 + $0x410] sm:$0xff]  ;;  %v11429_v32 = vcombine.high %v107_v17, %v111_v19  ;;  %v11428_v25 = vcombine.low %v107_v17, %v111_v19 }
 0x241   :  { %v239_v23 = vld [vmem:[#allocation2 + $0x430] sm:$0xff] }
 0x242   :  { %6952 = vmatpush1.bf16.msra.mxu0 %v11468_v44  ;;  %6993 = vmatpush1.bf16.msra.mxu1 %v11596_v45  ;;  %v11557_v33 = vcombine.high %v235_v22, %v239_v23  ;;  %v355_v43 = vld [vmem:[#allocation2 + $0x7d0] sm:$0xff]  ;;  %v11556_v45 = vcombine.low %v235_v22, %v239_v23 }
 0x243   :  { %6953 = vmatprep.subr.bf16.mxu0 %v11461_v47  ;;  %6994 = vmatprep.subr.bf16.mxu1 %v11589_v52  ;;  %v359_v44 = vld [vmem:[#allocation2 + $0x7f0] sm:$0xff]  ;;  %v11549_v47 = vcombine.high %v227_v35, %v231_v37 }
 0x244   :  { %v11677_v49 = vcombine.high %v355_v43, %v359_v44  ;;  %v219_v52 = vld [vmem:[#allocation2 + $0x390] sm:$0xff] }
 0x245   :  { %v223_v53 = vld [vmem:[#allocation2 + $0x3b0] sm:$0xff] }
 0x246   :  { %6954 = vmatpush1.bf16.msra.mxu0 %v11460_v60  ;;  %6995 = vmatpush1.bf16.msra.mxu1 %v11588_v61  ;;  %v347_v56 = vld [vmem:[#allocation2 + $0x790] sm:$0xff]  ;;  %v11676_v60 = vcombine.low %v355_v43, %v359_v44  ;;  %v11541_v61 = vcombine.high %v219_v52, %v223_v53  ;;  %v11540_v1 = vcombine.low %v219_v52, %v223_v53 }
 0x247   :  { %6955 = vmatprep.subr.bf16.mxu0 %v11453_v62  ;;  %6996 = vmatprep.subr.bf16.mxu1 %v11581_v63  ;;  %v351_v57 = vld [vmem:[#allocation2 + $0x7b0] sm:$0xff] }
 0x248   :  { %v11669_v62 = vcombine.high %v347_v56, %v351_v57  ;;  %v211_v63 = vld [vmem:[#allocation2 + $0x350] sm:$0xff] }
 0x249   :  { %v215_v41 = vld [vmem:[#allocation2 + $0x370] sm:$0xff] }
 0x24a   :  { %6956 = vmatpush1.bf16.msra.mxu0 %v11452_v34  ;;  %6997 = vmatpush1.bf16.msra.mxu1 %v11580_v3  ;;  %v339_v12 = vld [vmem:[#allocation2 + $0x750] sm:$0xff]  ;;  %v11668_v34 = vcombine.low %v347_v56, %v351_v57  ;;  %v11533_v3 = vcombine.high %v211_v63, %v215_v41  ;;  %v11532_v10 = vcombine.low %v211_v63, %v215_v41 }
 0x24b   :  { %6957 = vmatprep.subr.bf16.mxu0 %v11445_v4  ;;  %6998 = vmatprep.subr.bf16.mxu1 %v11573_v5  ;;  %v343_v0 = vld [vmem:[#allocation2 + $0x770] sm:$0xff] }
 0x24c   :  { %v11661_v4 = vcombine.high %v339_v12, %v343_v0  ;;  %v203_v5 = vld [vmem:[#allocation2 + $0x310] sm:$0xff] }
 0x24d   :  { %v207_v7 = vld [vmem:[#allocation2 + $0x330] sm:$0xff] }
 0x24e   :  { %6958 = vmatpush1.bf16.msra.mxu0 %v11444_v42  ;;  %6999 = vmatpush1.bf16.msra.mxu1 %v11572_v11  ;;  %v331_v8 = vld [vmem:[#allocation2 + $0x710] sm:$0xff]  ;;  %v11660_v42 = vcombine.low %v339_v12, %v343_v0  ;;  %v11525_v11 = vcombine.high %v203_v5, %v207_v7  ;;  %v11524_v23 = vcombine.low %v203_v5, %v207_v7 }
 0x24f   :  { %6959 = vmatprep.subr.bf16.mxu0 %v11437_v13  ;;  %7000 = vmatprep.subr.bf16.mxu1 %v11565_v15  ;;  %v335_v9 = vld [vmem:[#allocation2 + $0x730] sm:$0xff] }
 0x250   :  { %v11653_v13 = vcombine.high %v331_v8, %v335_v9  ;;  %v195_v15 = vld [vmem:[#allocation2 + $0x2d0] sm:$0xff] }
 0x251   :  { %v199_v17 = vld [vmem:[#allocation2 + $0x2f0] sm:$0xff] }
 0x252   :  { %6960 = vmatpush1.bf16.msra.mxu0 %v11436_v24  ;;  %7001 = vmatpush1.bf16.msra.mxu1 %v11564_v27  ;;  %v323_v19 = vld [vmem:[#allocation2 + $0x6d0] sm:$0xff]  ;;  %v11652_v24 = vcombine.low %v331_v8, %v335_v9  ;;  %v11517_v27 = vcombine.high %v195_v15, %v199_v17  ;;  %v11516_v44 = vcombine.low %v195_v15, %v199_v17 }
 0x253   :  { %6961 = vmatprep.subr.bf16.mxu0 %v11429_v32  ;;  %7002 = vmatprep.subr.bf16.mxu1 %v11557_v33  ;;  %v327_v22 = vld [vmem:[#allocation2 + $0x6f0] sm:$0xff] }
 0x254   :  { %v11645_v32 = vcombine.high %v323_v19, %v327_v22  ;;  %v187_v33 = vld [vmem:[#allocation2 + $0x290] sm:$0xff] }
 0x255   :  { %v191_v35 = vld [vmem:[#allocation2 + $0x2b0] sm:$0xff] }
 0x256   :  { %6962 = vmatpush1.bf16.msra.mxu0 %v11428_v25  ;;  %7003 = vmatpush1.bf16.msra.mxu1 %v11556_v45  ;;  %v315_v37 = vld [vmem:[#allocation2 + $0x690] sm:$0xff]  ;;  %v11644_v25 = vcombine.low %v323_v19, %v327_v22  ;;  %v11509_v45 = vcombine.high %v187_v33, %v191_v35  ;;  %v11508_v57 = vcombine.low %v187_v33, %v191_v35 }
 0x257   :  { %6963 = vmatprep.subr.bf16.mxu0 %v11549_v47  ;;  %7004 = vmatprep.subr.bf16.mxu1 %v11677_v49  ;;  %v319_v43 = vld [vmem:[#allocation2 + $0x6b0] sm:$0xff] }
 0x258   :  { %v11637_v47 = vcombine.high %v315_v37, %v319_v43  ;;  %v179_v49 = vld [vmem:[#allocation2 + $0x250] sm:$0xff] }
 0x259   :  { %v183_v52 = vld [vmem:[#allocation2 + $0x270] sm:$0xff] }
 0x25a   :  { %6964 = vmatpush2.bf16.msra.mxu0 %v11548_v29  ;;  %7005 = vmatpush2.bf16.msra.mxu1 %v11676_v60  ;;  %v307_v53 = vld [vmem:[#allocation2 + $0x650] sm:$0xff]  ;;  %v11636_v29 = vcombine.low %v315_v37, %v319_v43  ;;  %v11501_v60 = vcombine.high %v179_v49, %v183_v52  ;;  %v11500_v0 = vcombine.low %v179_v49, %v183_v52 }
 0x25b   :  { %6965 = vmatprep.subr.bf16.mxu0 %v11541_v61  ;;  %7006 = vmatprep.subr.bf16.mxu1 %v11669_v62  ;;  %v311_v56 = vld [vmem:[#allocation2 + $0x670] sm:$0xff] }
 0x25c   :  { %v11629_v61 = vcombine.high %v307_v53, %v311_v56  ;;  %v171_v62 = vld [vmem:[#allocation2 + $0x210] sm:$0xff] }
 0x25d   :  { %v175_v63 = vld [vmem:[#allocation2 + $0x230] sm:$0xff] }
 0x25e   :  { %6966 = vmatpush2.bf16.msra.mxu0 %v11540_v1  ;;  %7007 = vmatpush2.bf16.msra.mxu1 %v11668_v34  ;;  %v299_v41 = vld [vmem:[#allocation2 + $0x610] sm:$0xff]  ;;  %v11628_v1 = vcombine.low %v307_v53, %v311_v56  ;;  %v11493_v34 = vcombine.high %v171_v62, %v175_v63  ;;  %v11492_v9 = vcombine.low %v171_v62, %v175_v63 }
 0x25f   :  { %6967 = vmatprep.subr.bf16.mxu0 %v11533_v3  ;;  %7008 = vmatprep.subr.bf16.mxu1 %v11661_v4  ;;  %v303_v12 = vld [vmem:[#allocation2 + $0x630] sm:$0xff] }
 0x260   :  { %v11621_v3 = vcombine.high %v299_v41, %v303_v12  ;;  %v419_v4 = vld [vmem:[#allocation2 + $0x9d0] sm:$0xff] }
 0x261   :  { %v423_v5 = vld [vmem:[#allocation2 + $0x9f0] sm:$0xff] }
 0x262   :  { %6968 = vmatpush2.bf16.msra.mxu0 %v11532_v10  ;;  %7009 = vmatpush2.bf16.msra.mxu1 %v11660_v42  ;;  %v547_v7 = vld [vmem:[#allocation2 + $0xdd0] sm:$0xff]  ;;  %v11620_v10 = vcombine.low %v299_v41, %v303_v12  ;;  %v11741_v42 = vcombine.high %v419_v4, %v423_v5  ;;  %v11740_v22 = vcombine.low %v419_v4, %v423_v5 }
 0x263   :  { %6969 = vmatprep.subr.bf16.mxu0 %v11525_v11  ;;  %7010 = vmatprep.subr.bf16.mxu1 %v11653_v13  ;;  %v551_v8 = vld [vmem:[#allocation2 + $0xdf0] sm:$0xff] }
 0x264   :  { %v11869_v11 = vcombine.high %v547_v7, %v551_v8  ;;  %v411_v13 = vld [vmem:[#allocation2 + $0x990] sm:$0xff] }
 0x265   :  { %v415_v15 = vld [vmem:[#allocation2 + $0x9b0] sm:$0xff] }
 0x266   :  { %6970 = vmatpush2.bf16.msra.mxu0 %v11524_v23  ;;  %7011 = vmatpush2.bf16.msra.mxu1 %v11652_v24  ;;  %v539_v17 = vld [vmem:[#allocation2 + $0xd90] sm:$0xff]  ;;  %v11868_v23 = vcombine.low %v547_v7, %v551_v8  ;;  %v11733_v24 = vcombine.high %v411_v13, %v415_v15 }
 0x267   :  { %6971 = vmatprep.subr.bf16.mxu0 %v11517_v27  ;;  %7012 = vmatprep.subr.bf16.mxu1 %v11645_v32  ;;  %v543_v19 = vld [vmem:[#allocation2 + $0xdb0] sm:$0xff] }
 0x268   :  { %v11861_v27 = vcombine.high %v539_v17, %v543_v19  ;;  %v403_v32 = vld [vmem:[#allocation2 + $0x950] sm:$0xff]  ;;  %v11860_v49 = vcombine.low %v539_v17, %v543_v19 }
 0x269   :  { %v407_v33 = vld [vmem:[#allocation2 + $0x970] sm:$0xff] }
 0x26a   :  { %6972 = vmatpush2.bf16.msra.mxu0 %v11516_v44  ;;  %7013 = vmatpush2.bf16.msra.mxu1 %v11644_v25  ;;  %v531_v37 = vld [vmem:[#allocation2 + $0xd50] sm:$0xff]  ;;  %v11725_v52 = vcombine.high %v403_v32, %v407_v33 }
 0x26b   :  { %6973 = vmatprep.subr.bf16.mxu0 %v11509_v45  ;;  %7014 = vmatprep.subr.bf16.mxu1 %v11637_v47  ;;  %v535_v43 = vld [vmem:[#allocation2 + $0xd70] sm:$0xff]  ;;  %v11732_v45 = vcombine.low %v411_v13, %v415_v15 }
 0x26c   :  { %v523_v62 = vld [vmem:[#allocation2 + $0xd10] sm:$0xff] }
 0x26d   :  { %v527_v63 = vld [vmem:[#allocation2 + $0xd30] sm:$0xff] }
 0x26e   :  { %6974 = vmatpush2.bf16.msra.mxu0 %v11508_v57  ;;  %7015 = vmatpush2.bf16.msra.mxu1 %v11636_v29  ;;  %v11853_v29 = vcombine.high %v531_v37, %v535_v43  ;;  %v11845_v4 = vcombine.high %v523_v62, %v527_v63  ;;  %v387_v5 = vld [vmem:[#allocation2 + $0x8d0] sm:$0xff] }
 0x26f   :  { %6975 = vmatprep.subr.bf16.mxu0 %v11501_v60  ;;  %7016 = vmatprep.subr.bf16.mxu1 %v11629_v61  ;;  %v395_v60 = vld [vmem:[#allocation2 + $0x910] sm:$0xff] }
 0x270   :  { %v399_v61 = vld [vmem:[#allocation2 + $0x930] sm:$0xff] }
 0x271   :  { %v391_v7 = vld [vmem:[#allocation2 + $0x8f0] sm:$0xff] }
 0x272   :  { %6976 = vmatpush2.bf16.msra.mxu0 %v11500_v0  ;;  %7017 = vmatpush2.bf16.msra.mxu1 %v11628_v1  ;;  %v11724_v0 = vcombine.low %v403_v32, %v407_v33  ;;  %v515_v8 = vld [vmem:[#allocation2 + $0xcd0] sm:$0xff] }
 0x273   :  { %6977 = vmatprep.subr.bf16.mxu0 %v11493_v34  ;;  %7018 = vmatprep.subr.bf16.mxu1 %v11621_v3  ;;  %v11717_v34 = vcombine.high %v395_v60, %v399_v61  ;;  %v379_v15 = vld [vmem:[#allocation2 + $0x890] sm:$0xff] }
 0x274   :  { %v383_v17 = vld [vmem:[#allocation2 + $0x8b0] sm:$0xff] }
 0x275   :  { %v507_v19 = vld [vmem:[#allocation2 + $0xc90] sm:$0xff] }
 0x276   :  { %6978 = vmatpush2.bf16.msra.mxu0 %v11492_v9  ;;  %7019 = vmatpush2.bf16.msra.mxu1 %v11620_v10  ;;  %v519_v9 = vld [vmem:[#allocation2 + $0xcf0] sm:$0xff]  ;;  %v11716_v10 = vcombine.low %v395_v60, %v399_v61 }
 0x277   :  { %7029 = vmatprep.subr.bf16.mxu0 %v11741_v42  ;;  %7070 = vmatprep.subr.bf16.mxu1 %v11869_v11  ;;  %v11844_v42 = vcombine.low %v523_v62, %v527_v63  ;;  %v11709_v11 = vcombine.high %v387_v5, %v391_v7  ;;  %v11837_v13 = vcombine.high %v515_v8, %v519_v9  ;;  %v371_v33 = vld [vmem:[#allocation2 + $0x850] sm:$0xff] }
 0x278   :  { %v483_v62 = vld [vmem:[#allocation2 + $0xbd0] sm:$0xff] }
 0x279   :  { %v6735_v35 = vpop.f32.mrf.mxu0  ;;  %6980 = vmatmul.mubr.bf16.vlgmr.msra.gmra.mxu0 %v13132_v16  ;;  %v6776_v25 = vpop.f32.mrf.mxu1  ;;  %7021 = vmatmul.mubr.bf16.vlgmr.msra.gmra.mxu1 %v13137_v20  ;;  %v487_v63 = vld [vmem:[#allocation2 + $0xbf0] sm:$0xff] }
 0x27a   :  { %v6736_v44 = vadd.f32 %v6735_v35, %v13270_v21  ;;  %7030 = vmatpush1.bf16.msra.mxu0 %v11740_v22  ;;  %7071 = vmatpush1.bf16.msra.mxu1 %v11868_v23  ;;  %v511_v22 = vld [vmem:[#allocation2 + $0xcb0] sm:$0xff]  ;;  %v11708_v23 = vcombine.low %v387_v5, %v391_v7 }
 0x27b   :  { %v6737_v47 = vpop.f32.mrf.mxu0  ;;  %7031 = vmatprep.subr.bf16.mxu0 %v11733_v24  ;;  %v6778_v57 = vpop.f32.mrf.mxu1  ;;  %7072 = vmatprep.subr.bf16.mxu1 %v11861_v27  ;;  %v11836_v24 = vcombine.low %v515_v8, %v519_v9  ;;  %v11701_v27 = vcombine.high %v379_v15, %v383_v17  ;;  %v11829_v32 = vcombine.high %v507_v19, %v511_v22  ;;  %v375_v35 = vld [vmem:[#allocation2 + $0x870] sm:$0xff] }
 0x27c   :  { %v13279_v53 = vadd.f32 %v6776_v25, %v6736_v44  ;;  %v6738_v56 = vadd.f32 %v6737_v47, %v13274_v39  ;;  %7061 = vmatprep.mubr.bf16.mxu0 %v13142_v28  ;;  %7102 = vmatprep.mubr.bf16.mxu1 %v13145_v31  ;;  %v11852_v39 = vcombine.low %v531_v37, %v535_v43  ;;  %v499_v37 = vld [vmem:[#allocation2 + $0xc50] sm:$0xff] }
 0x27d   :  { %v6739_v21 = vpop.f32.mrf.mxu0  ;;  %v6780_v12 = vpop.f32.mrf.mxu1  ;;  %v503_v43 = vld [vmem:[#allocation2 + $0xc70] sm:$0xff]  ;;  %v11700_v44 = vcombine.low %v379_v15, %v383_v17  ;;  %v11828_v25 = vcombine.low %v507_v19, %v511_v22  ;;  %v11804_v9 = vcombine.low %v483_v62, %v487_v63 }
 0x27e   :  { %v13284_v41 = vadd.f32 %v6778_v57, %v6738_v56  ;;  %7032 = vmatpush1.bf16.msra.mxu0 %v11732_v45  ;;  %7073 = vmatpush1.bf16.msra.mxu1 %v11860_v49  ;;  %v11693_v45 = vcombine.high %v371_v33, %v375_v35  ;;  %v11821_v47 = vcombine.high %v499_v37, %v503_v43  ;;  %v363_v49 = vld [vmem:[#allocation2 + $0x810] sm:$0xff] }
 0x27f   :  { %v6740_v1 = vpop.f32.mrf.mxu0  ;;  %7033 = vmatprep.subr.bf16.mxu0 %v11725_v52  ;;  %v6781_v3 = vpop.f32.mrf.mxu1  ;;  %7074 = vmatprep.subr.bf16.mxu1 %v11853_v29  ;;  %v367_v52 = vld [vmem:[#allocation2 + $0x830] sm:$0xff]  ;;  %v11692_v29 = vcombine.low %v371_v33, %v375_v35  ;;  %v11820_v60 = vcombine.low %v499_v37, %v503_v43 }
 0x280   :  { %v491_v56 = vld [vmem:[#allocation2 + $0xc10] sm:$0xff]  ;;  %v11685_v61 = vcombine.high %v363_v49, %v367_v52  ;;  %v11684_v1 = vcombine.low %v363_v49, %v367_v52 }
 0x281   :  { %v495_v57 = vld [vmem:[#allocation2 + $0xc30] sm:$0xff] }
 0x282   :  { %7034 = vmatpush1.bf16.msra.mxu0 %v11724_v0  ;;  %7075 = vmatpush1.bf16.msra.mxu1 %v11852_v39  ;;  %v11813_v21 = vcombine.high %v491_v56, %v495_v57  ;;  %v611_v12 = vld [vmem:[#allocation2 + $0xfd0] sm:$0xff]  ;;  %v11812_v39 = vcombine.low %v491_v56, %v495_v57 }
 0x283   :  { %7035 = vmatprep.subr.bf16.mxu0 %v11717_v34  ;;  %7076 = vmatprep.subr.bf16.mxu1 %v11845_v4  ;;  %v615_v0 = vld [vmem:[#allocation2 + $0xff0] sm:$0xff]  ;;  %v11805_v34 = vcombine.high %v483_v62, %v487_v63 }
 0x284   :  { %v11933_v3 = vcombine.high %v611_v12, %v615_v0  ;;  %v475_v4 = vld [vmem:[#allocation2 + $0xb90] sm:$0xff] }
 0x285   :  { %v479_v5 = vld [vmem:[#allocation2 + $0xbb0] sm:$0xff] }
 0x286   :  { %7036 = vmatpush1.bf16.msra.mxu0 %v11716_v10  ;;  %7077 = vmatpush1.bf16.msra.mxu1 %v11844_v42  ;;  %v603_v7 = vld [vmem:[#allocation2 + $0xf90] sm:$0xff]  ;;  %v11932_v10 = vcombine.low %v611_v12, %v615_v0  ;;  %v11797_v42 = vcombine.high %v475_v4, %v479_v5  ;;  %v11796_v22 = vcombine.low %v475_v4, %v479_v5 }
 0x287   :  { %7037 = vmatprep.subr.bf16.mxu0 %v11709_v11  ;;  %7078 = vmatprep.subr.bf16.mxu1 %v11837_v13  ;;  %v607_v8 = vld [vmem:[#allocation2 + $0xfb0] sm:$0xff] }
 0x288   :  { %v11925_v11 = vcombine.high %v603_v7, %v607_v8  ;;  %v467_v13 = vld [vmem:[#allocation2 + $0xb50] sm:$0xff] }
 0x289   :  { %v471_v15 = vld [vmem:[#allocation2 + $0xb70] sm:$0xff] }
 0x28a   :  { %7038 = vmatpush1.bf16.msra.mxu0 %v11708_v23  ;;  %7079 = vmatpush1.bf16.msra.mxu1 %v11836_v24  ;;  %v595_v17 = vld [vmem:[#allocation2 + $0xf50] sm:$0xff]  ;;  %v11924_v23 = vcombine.low %v603_v7, %v607_v8  ;;  %v11789_v24 = vcombine.high %v467_v13, %v471_v15  ;;  %v11788_v43 = vcombine.low %v467_v13, %v471_v15 }
 0x28b   :  { %7039 = vmatprep.subr.bf16.mxu0 %v11701_v27  ;;  %7080 = vmatprep.subr.bf16.mxu1 %v11829_v32  ;;  %v599_v19 = vld [vmem:[#allocation2 + $0xf70] sm:$0xff] }
 0x28c   :  { %v11917_v27 = vcombine.high %v595_v17, %v599_v19  ;;  %v459_v32 = vld [vmem:[#allocation2 + $0xb10] sm:$0xff] }
 0x28d   :  { %v463_v33 = vld [vmem:[#allocation2 + $0xb30] sm:$0xff] }
 0x28e   :  { %7040 = vmatpush1.bf16.msra.mxu0 %v11700_v44  ;;  %7081 = vmatpush1.bf16.msra.mxu1 %v11828_v25  ;;  %v587_v35 = vld [vmem:[#allocation2 + $0xf10] sm:$0xff]  ;;  %v11916_v44 = vcombine.low %v595_v17, %v599_v19  ;;  %v11781_v25 = vcombine.high %v459_v32, %v463_v33  ;;  %v11780_v57 = vcombine.low %v459_v32, %v463_v33 }
 0x28f   :  { %7041 = vmatprep.subr.bf16.mxu0 %v11693_v45  ;;  %7082 = vmatprep.subr.bf16.mxu1 %v11821_v47  ;;  %v591_v37 = vld [vmem:[#allocation2 + $0xf30] sm:$0xff] }
 0x290   :  { %v11909_v45 = vcombine.high %v587_v35, %v591_v37  ;;  %v451_v47 = vld [vmem:[#allocation2 + $0xad0] sm:$0xff] }
 0x291   :  { %v455_v49 = vld [vmem:[#allocation2 + $0xaf0] sm:$0xff] }
 0x292   :  { %7042 = vmatpush1.bf16.msra.mxu0 %v11692_v29  ;;  %7083 = vmatpush1.bf16.msra.mxu1 %v11820_v60  ;;  %v579_v52 = vld [vmem:[#allocation2 + $0xed0] sm:$0xff]  ;;  %v11908_v29 = vcombine.low %v587_v35, %v591_v37  ;;  %v11773_v60 = vcombine.high %v451_v47, %v455_v49  ;;  %v11772_v0 = vcombine.low %v451_v47, %v455_v49 }
 0x293   :  { %7043 = vmatprep.subr.bf16.mxu0 %v11685_v61  ;;  %7084 = vmatprep.subr.bf16.mxu1 %v11813_v21  ;;  %v583_v56 = vld [vmem:[#allocation2 + $0xef0] sm:$0xff] }
 0x294   :  { %v11901_v61 = vcombine.high %v579_v52, %v583_v56  ;;  %v443_v21 = vld [vmem:[#allocation2 + $0xa90] sm:$0xff] }
 0x295   :  { %v447_v62 = vld [vmem:[#allocation2 + $0xab0] sm:$0xff] }
 0x296   :  { %7044 = vmatpush1.bf16.msra.mxu0 %v11684_v1  ;;  %7085 = vmatpush1.bf16.msra.mxu1 %v11812_v39  ;;  %v571_v63 = vld [vmem:[#allocation2 + $0xe90] sm:$0xff]  ;;  %v11900_v1 = vcombine.low %v579_v52, %v583_v56  ;;  %v11765_v39 = vcombine.high %v443_v21, %v447_v62  ;;  %v11764_v8 = vcombine.low %v443_v21, %v447_v62 }
 0x297   :  { %7045 = vmatprep.subr.bf16.mxu0 %v11805_v34  ;;  %7086 = vmatprep.subr.bf16.mxu1 %v11933_v3  ;;  %v575_v12 = vld [vmem:[#allocation2 + $0xeb0] sm:$0xff] }
 0x298   :  { %v11893_v34 = vcombine.high %v571_v63, %v575_v12  ;;  %v435_v3 = vld [vmem:[#allocation2 + $0xa50] sm:$0xff] }
 0x299   :  { %v439_v4 = vld [vmem:[#allocation2 + $0xa70] sm:$0xff] }
 0x29a   :  { %7046 = vmatpush2.bf16.msra.mxu0 %v11804_v9  ;;  %7087 = vmatpush2.bf16.msra.mxu1 %v11932_v10  ;;  %v563_v5 = vld [vmem:[#allocation2 + $0xe50] sm:$0xff]  ;;  %v11892_v9 = vcombine.low %v571_v63, %v575_v12  ;;  %v11757_v10 = vcombine.high %v435_v3, %v439_v4  ;;  %v11756_v19 = vcombine.low %v435_v3, %v439_v4 }
 0x29b   :  { %7047 = vmatprep.subr.bf16.mxu0 %v11797_v42  ;;  %7088 = vmatprep.subr.bf16.mxu1 %v11925_v11  ;;  %v567_v7 = vld [vmem:[#allocation2 + $0xe70] sm:$0xff] }
 0x29c   :  { %v11885_v42 = vcombine.high %v563_v5, %v567_v7  ;;  %v427_v11 = vld [vmem:[#allocation2 + $0xa10] sm:$0xff] }
 0x29d   :  { %v431_v13 = vld [vmem:[#allocation2 + $0xa30] sm:$0xff] }
 0x29e   :  { %7048 = vmatpush2.bf16.msra.mxu0 %v11796_v22  ;;  %7089 = vmatpush2.bf16.msra.mxu1 %v11924_v23  ;;  %v555_v15 = vld [vmem:[#allocation2 + $0xe10] sm:$0xff]  ;;  %v11884_v22 = vcombine.low %v563_v5, %v567_v7  ;;  %v11749_v23 = vcombine.high %v427_v11, %v431_v13  ;;  %v11748_v37 = vcombine.low %v427_v11, %v431_v13 }
 0x29f   :  { %7049 = vmatprep.subr.bf16.mxu0 %v11789_v24  ;;  %7090 = vmatprep.subr.bf16.mxu1 %v11917_v27  ;;  %v559_v17 = vld [vmem:[#allocation2 + $0xe30] sm:$0xff] }
 0x2a0   :  { %v11877_v24 = vcombine.high %v555_v15, %v559_v17  ;;  %v675_v27 = vld [vmem:[#allocation2 + $0x11d0] sm:$0xff] }
 0x2a1   :  { %v679_v32 = vld [vmem:[#allocation2 + $0x11f0] sm:$0xff] }
 0x2a2   :  { %7050 = vmatpush2.bf16.msra.mxu0 %v11788_v43  ;;  %7091 = vmatpush2.bf16.msra.mxu1 %v11916_v44  ;;  %v803_v33 = vld [vmem:[#allocation2 + $0x15d0] sm:$0xff]  ;;  %v11876_v43 = vcombine.low %v555_v15, %v559_v17  ;;  %v11997_v44 = vcombine.high %v675_v27, %v679_v32  ;;  %v11996_v56 = vcombine.low %v675_v27, %v679_v32 }
 0x2a3   :  { %7051 = vmatprep.subr.bf16.mxu0 %v11781_v25  ;;  %7092 = vmatprep.subr.bf16.mxu1 %v11909_v45  ;;  %v807_v35 = vld [vmem:[#allocation2 + $0x15f0] sm:$0xff] }
 0x2a4   :  { %v12125_v25 = vcombine.high %v803_v33, %v807_v35  ;;  %v667_v45 = vld [vmem:[#allocation2 + $0x1190] sm:$0xff] }
 0x2a5   :  { %v671_v47 = vld [vmem:[#allocation2 + $0x11b0] sm:$0xff] }
 0x2a6   :  { %7052 = vmatpush2.bf16.msra.mxu0 %v11780_v57  ;;  %7093 = vmatpush2.bf16.msra.mxu1 %v11908_v29  ;;  %v795_v49 = vld [vmem:[#allocation2 + $0x1590] sm:$0xff]  ;;  %v12124_v57 = vcombine.low %v803_v33, %v807_v35  ;;  %v11989_v29 = vcombine.high %v667_v45, %v671_v47 }
 0x2a7   :  { %7053 = vmatprep.subr.bf16.mxu0 %v11773_v60  ;;  %7094 = vmatprep.subr.bf16.mxu1 %v11901_v61  ;;  %v799_v52 = vld [vmem:[#allocation2 + $0x15b0] sm:$0xff] }
 0x2a8   :  { %v12117_v60 = vcombine.high %v795_v49, %v799_v52  ;;  %v659_v61 = vld [vmem:[#allocation2 + $0x1150] sm:$0xff] }
 0x2a9   :  { %v663_v21 = vld [vmem:[#allocation2 + $0x1170] sm:$0xff] }
 0x2aa   :  { %7054 = vmatpush2.bf16.msra.mxu0 %v11772_v0  ;;  %7095 = vmatpush2.bf16.msra.mxu1 %v11900_v1  ;;  %v787_v63 = vld [vmem:[#allocation2 + $0x1550] sm:$0xff]  ;;  %v11988_v1 = vcombine.low %v667_v45, %v671_v47  ;;  %v11981_v3 = vcombine.high %v659_v61, %v663_v21  ;;  %v11980_v13 = vcombine.low %v659_v61, %v663_v21 }
 0x2ab   :  { %7055 = vmatprep.subr.bf16.mxu0 %v11765_v39  ;;  %7096 = vmatprep.subr.bf16.mxu1 %v11893_v34  ;;  %v791_v12 = vld [vmem:[#allocation2 + $0x1570] sm:$0xff]  ;;  %v12116_v34 = vcombine.low %v795_v49, %v799_v52 }
 0x2ac   :  { %v12109_v5 = vcombine.high %v787_v63, %v791_v12  ;;  %v651_v7 = vld [vmem:[#allocation2 + $0x1110] sm:$0xff]  ;;  %v12108_v17 = vcombine.low %v787_v63, %v791_v12 }
 0x2ad   :  { %v647_v27 = vld [vmem:[#allocation2 + $0x10f0] sm:$0xff] }
 0x2ae   :  { %7056 = vmatpush2.bf16.msra.mxu0 %v11764_v8  ;;  %7097 = vmatpush2.bf16.msra.mxu1 %v11892_v9  ;;  %v655_v8 = vld [vmem:[#allocation2 + $0x1130] sm:$0xff] }
 0x2af   :  { %7057 = vmatprep.subr.bf16.mxu0 %v11757_v10  ;;  %7098 = vmatprep.subr.bf16.mxu1 %v11885_v42  ;;  %v779_v10 = vld [vmem:[#allocation2 + $0x1510] sm:$0xff]  ;;  %v11972_v35 = vcombine.low %v651_v7, %v655_v8 }
 0x2b0   :  { %v783_v42 = vld [vmem:[#allocation2 + $0x1530] sm:$0xff] }
 0x2b1   :  { %v771_v32 = vld [vmem:[#allocation2 + $0x14d0] sm:$0xff] }
 0x2b2   :  { %7058 = vmatpush2.bf16.msra.mxu0 %v11756_v19  ;;  %7099 = vmatpush2.bf16.msra.mxu1 %v11884_v22  ;;  %v11973_v19 = vcombine.high %v651_v7, %v655_v8  ;;  %v775_v33 = vld [vmem:[#allocation2 + $0x14f0] sm:$0xff] }
 0x2b3   :  { %7059 = vmatprep.subr.bf16.mxu0 %v11749_v23  ;;  %7100 = vmatprep.subr.bf16.mxu1 %v11877_v24  ;;  %v12101_v23 = vcombine.high %v779_v10, %v783_v42  ;;  %v643_v24 = vld [vmem:[#allocation2 + $0x10d0] sm:$0xff] }
 0x2b4   :  { %v639_v45 = vld [vmem:[#allocation2 + $0x10b0] sm:$0xff]  ;;  %v11964_v52 = vcombine.low %v643_v24, %v647_v27 }
 0x2b5   :  { %v763_v47 = vld [vmem:[#allocation2 + $0x1490] sm:$0xff] }
 0x2b6   :  { %7060 = vmatpush2.bf16.msra.mxu0 %v11748_v37  ;;  %7101 = vmatpush2.bf16.msra.mxu1 %v11876_v43  ;;  %v12100_v37 = vcombine.low %v779_v10, %v783_v42  ;;  %v11965_v43 = vcombine.high %v643_v24, %v647_v27  ;;  %v767_v49 = vld [vmem:[#allocation2 + $0x14b0] sm:$0xff] }
 0x2b7   :  { %7111 = vmatprep.subr.bf16.mxu0 %v11997_v44  ;;  %7152 = vmatprep.subr.bf16.mxu1 %v12125_v25  ;;  %v12093_v44 = vcombine.high %v771_v32, %v775_v33  ;;  %v635_v25 = vld [vmem:[#allocation2 + $0x1090] sm:$0xff] }
 0x2b8   :  { %v631_v61 = vld [vmem:[#allocation2 + $0x1070] sm:$0xff]  ;;  %v11956_v12 = vcombine.low %v635_v25, %v639_v45 }
 0x2b9   :  { %v13286_v62 = vpop.f32.mrf.mxu0  ;;  %7062 = vmatmul.mubr.bf16.vlgmr.msra.gmra.mxu0 %v13156_v36  ;;  %v13289_v0 = vpop.f32.mrf.mxu1  ;;  %7103 = vmatmul.mubr.bf16.vlgmr.msra.gmra.mxu1 %v13161_v40  ;;  %v755_v21 = vld [vmem:[#allocation2 + $0x1450] sm:$0xff] }
 0x2ba   :  { %7112 = vmatpush1.bf16.msra.mxu0 %v11996_v56  ;;  %7153 = vmatpush1.bf16.msra.mxu1 %v12124_v57  ;;  %v12092_v56 = vcombine.low %v771_v32, %v775_v33  ;;  %v11957_v57 = vcombine.high %v635_v25, %v639_v45  ;;  %v759_v63 = vld [vmem:[#allocation2 + $0x1470] sm:$0xff] }
 0x2bb   :  { %v13292_v39 = vpop.f32.mrf.mxu0  ;;  %7113 = vmatprep.subr.bf16.mxu0 %v11989_v29  ;;  %v13294_v4 = vpop.f32.mrf.mxu1  ;;  %7154 = vmatprep.subr.bf16.mxu1 %v12117_v60  ;;  %v12085_v29 = vcombine.high %v763_v47, %v767_v49  ;;  %v627_v60 = vld [vmem:[#allocation2 + $0x1050] sm:$0xff]  ;;  %v12076_v42 = vcombine.low %v755_v21, %v759_v63 }
 0x2bc   :  { %7143 = vmatprep.mubr.bf16.mxu0 %v13166_v48  ;;  %7184 = vmatprep.mubr.bf16.mxu1 %v13169_v51  ;;  %v623_v7 = vld [vmem:[#allocation2 + $0x1030] sm:$0xff]  ;;  %v11948_v10 = vcombine.low %v627_v60, %v631_v61 }
 0x2bd   :  { %v6821_v9 = vpop.f32.mrf.mxu0  ;;  %v6862_v11 = vpop.f32.mrf.mxu1  ;;  %v747_v8 = vld [vmem:[#allocation2 + $0x1410] sm:$0xff] }
 0x2be   :  { %7114 = vmatpush1.bf16.msra.mxu0 %v11988_v1  ;;  %7155 = vmatpush1.bf16.msra.mxu1 %v12116_v34  ;;  %v12084_v1 = vcombine.low %v763_v47, %v767_v49  ;;  %v11949_v34 = vcombine.high %v627_v60, %v631_v61  ;;  %v751_v9 = vld [vmem:[#allocation2 + $0x1430] sm:$0xff] }
 0x2bf   :  { %v6822_v15 = vpop.f32.mrf.mxu0  ;;  %7115 = vmatprep.subr.bf16.mxu0 %v11981_v3  ;;  %v6863_v22 = vpop.f32.mrf.mxu1  ;;  %7156 = vmatprep.subr.bf16.mxu1 %v12109_v5  ;;  %v12077_v3 = vcombine.high %v755_v21, %v759_v63  ;;  %v619_v5 = vld [vmem:[#allocation2 + $0x1010] sm:$0xff]  ;;  %v12068_v24 = vcombine.low %v747_v8, %v751_v9 }
 0x2c0   :  { %v11941_v11 = vcombine.high %v619_v5, %v623_v7  ;;  %v739_v15 = vld [vmem:[#allocation2 + $0x13d0] sm:$0xff] }
 0x2c1   :  { %v871_v22 = vld [vmem:[#allocation2 + $0x17f0] sm:$0xff] }
 0x2c2   :  { %7116 = vmatpush1.bf16.msra.mxu0 %v11980_v13  ;;  %7157 = vmatpush1.bf16.msra.mxu1 %v12108_v17  ;;  %v12069_v13 = vcombine.high %v747_v8, %v751_v9  ;;  %v743_v17 = vld [vmem:[#allocation2 + $0x13f0] sm:$0xff] }
 0x2c3   :  { %7117 = vmatprep.subr.bf16.mxu0 %v11973_v19  ;;  %7158 = vmatprep.subr.bf16.mxu1 %v12101_v23  ;;  %v867_v19 = vld [vmem:[#allocation2 + $0x17d0] sm:$0xff]  ;;  %v11940_v23 = vcombine.low %v619_v5, %v623_v7  ;;  %v12061_v27 = vcombine.high %v739_v15, %v743_v17 }
 0x2c4   :  { %v12189_v32 = vcombine.high %v867_v19, %v871_v22  ;;  %v731_v33 = vld [vmem:[#allocation2 + $0x1390] sm:$0xff]  ;;  %v12188_v25 = vcombine.low %v867_v19, %v871_v22 }
 0x2c5   :  { %v723_v49 = vld [vmem:[#allocation2 + $0x1350] sm:$0xff] }
 0x2c6   :  { %7118 = vmatpush1.bf16.msra.mxu0 %v11972_v35  ;;  %7159 = vmatpush1.bf16.msra.mxu1 %v12100_v37  ;;  %v735_v35 = vld [vmem:[#allocation2 + $0x13b0] sm:$0xff] }
 0x2c7   :  { %7119 = vmatprep.subr.bf16.mxu0 %v11965_v43  ;;  %7160 = vmatprep.subr.bf16.mxu1 %v12093_v44  ;;  %v859_v37 = vld [vmem:[#allocation2 + $0x1790] sm:$0xff]  ;;  %v12060_v44 = vcombine.low %v739_v15, %v743_v17  ;;  %v12053_v45 = vcombine.high %v731_v33, %v735_v35 }
 0x2c8   :  { %v863_v43 = vld [vmem:[#allocation2 + $0x17b0] sm:$0xff] }
 0x2c9   :  { %v12181_v47 = vcombine.high %v859_v37, %v863_v43  ;;  %v12180_v60 = vcombine.low %v859_v37, %v863_v43  ;;  %v715_v63 = vld [vmem:[#allocation2 + $0x1310] sm:$0xff] }
 0x2ca   :  { %7120 = vmatpush1.bf16.msra.mxu0 %v11964_v52  ;;  %7161 = vmatpush1.bf16.msra.mxu1 %v12092_v56  ;;  %v727_v52 = vld [vmem:[#allocation2 + $0x1370] sm:$0xff] }
 0x2cb   :  { %7121 = vmatprep.subr.bf16.mxu0 %v11957_v57  ;;  %7162 = vmatprep.subr.bf16.mxu1 %v12085_v29  ;;  %v851_v56 = vld [vmem:[#allocation2 + $0x1750] sm:$0xff]  ;;  %v12052_v29 = vcombine.low %v731_v33, %v735_v35  ;;  %v12045_v61 = vcombine.high %v723_v49, %v727_v52 }
 0x2cc   :  { %v855_v57 = vld [vmem:[#allocation2 + $0x1770] sm:$0xff] }
 0x2cd   :  { %v12173_v21 = vcombine.high %v851_v56, %v855_v57  ;;  %v12172_v5 = vcombine.low %v851_v56, %v855_v57  ;;  %v707_v9 = vld [vmem:[#allocation2 + $0x12d0] sm:$0xff] }
 0x2ce   :  { %7122 = vmatpush1.bf16.msra.mxu0 %v11956_v12  ;;  %7163 = vmatpush1.bf16.msra.mxu1 %v12084_v1  ;;  %v719_v12 = vld [vmem:[#allocation2 + $0x1330] sm:$0xff] }
 0x2cf   :  { %7123 = vmatprep.subr.bf16.mxu0 %v11949_v34  ;;  %7164 = vmatprep.subr.bf16.mxu1 %v12077_v3  ;;  %v843_v1 = vld [vmem:[#allocation2 + $0x1710] sm:$0xff]  ;;  %v12044_v3 = vcombine.low %v723_v49, %v727_v52  ;;  %v12037_v7 = vcombine.high %v715_v63, %v719_v12 }
 0x2d0   :  { %v847_v34 = vld [vmem:[#allocation2 + $0x1730] sm:$0xff] }
 0x2d1   :  { %v12165_v8 = vcombine.high %v843_v1, %v847_v34  ;;  %v12164_v15 = vcombine.low %v843_v1, %v847_v34  ;;  %v699_v22 = vld [vmem:[#allocation2 + $0x1290] sm:$0xff] }
 0x2d2   :  { %7124 = vmatpush1.bf16.msra.mxu0 %v11948_v10  ;;  %7165 = vmatpush1.bf16.msra.mxu1 %v12076_v42  ;;  %v711_v10 = vld [vmem:[#allocation2 + $0x12f0] sm:$0xff] }
 0x2d3   :  { %7125 = vmatprep.subr.bf16.mxu0 %v11941_v11  ;;  %7166 = vmatprep.subr.bf16.mxu1 %v12069_v13  ;;  %v835_v42 = vld [vmem:[#allocation2 + $0x16d0] sm:$0xff]  ;;  %v12036_v13 = vcombine.low %v715_v63, %v719_v12  ;;  %v12029_v17 = vcombine.high %v707_v9, %v711_v10 }
 0x2d4   :  { %v839_v11 = vld [vmem:[#allocation2 + $0x16f0] sm:$0xff] }
 0x2d5   :  { %v12157_v19 = vcombine.high %v835_v42, %v839_v11  ;;  %v12156_v33 = vcombine.low %v835_v42, %v839_v11  ;;  %v691_v43 = vld [vmem:[#allocation2 + $0x1250] sm:$0xff]  ;;  %v6818_v42 = vadd.f32 %v13286_v62, %v13279_v53 }
 0x2d6   :  { %7126 = vmatpush1.bf16.msra.mxu0 %v11940_v23  ;;  %7167 = vmatpush1.bf16.msra.mxu1 %v12068_v24  ;;  %v703_v23 = vld [vmem:[#allocation2 + $0x12b0] sm:$0xff] }
 0x2d7   :  { %7127 = vmatprep.subr.bf16.mxu0 %v12061_v27  ;;  %7168 = vmatprep.subr.bf16.mxu1 %v12189_v32  ;;  %v827_v24 = vld [vmem:[#allocation2 + $0x1690] sm:$0xff]  ;;  %v12028_v32 = vcombine.low %v707_v9, %v711_v10  ;;  %v12021_v35 = vcombine.high %v699_v22, %v703_v23 }
 0x2d8   :  { %v831_v27 = vld [vmem:[#allocation2 + $0x16b0] sm:$0xff] }
 0x2d9   :  { %v12149_v37 = vcombine.high %v827_v24, %v831_v27  ;;  %v12148_v49 = vcombine.low %v827_v24, %v831_v27  ;;  %v683_v57 = vld [vmem:[#allocation2 + $0x1210] sm:$0xff] }
 0x2da   :  { %7128 = vmatpush2.bf16.msra.mxu0 %v12060_v44  ;;  %7169 = vmatpush2.bf16.msra.mxu1 %v12188_v25  ;;  %v695_v44 = vld [vmem:[#allocation2 + $0x1270] sm:$0xff] }
 0x2db   :  { %7129 = vmatprep.subr.bf16.mxu0 %v12053_v45  ;;  %7170 = vmatprep.subr.bf16.mxu1 %v12181_v47  ;;  %v819_v25 = vld [vmem:[#allocation2 + $0x1650] sm:$0xff]  ;;  %v12020_v47 = vcombine.low %v699_v22, %v703_v23  ;;  %v12013_v52 = vcombine.high %v691_v43, %v695_v44  ;;  %v6820_v22 = vadd.f32 %v13292_v39, %v13284_v41 }
 0x2dc   :  { %v823_v45 = vld [vmem:[#allocation2 + $0x1670] sm:$0xff] }
 0x2dd   :  { %v12141_v56 = vcombine.high %v819_v25, %v823_v45  ;;  %v12140_v63 = vcombine.low %v819_v25, %v823_v45  ;;  %v931_v34 = vld [vmem:[#allocation2 + $0x19d0] sm:$0xff] }
 0x2de   :  { %7130 = vmatpush2.bf16.msra.mxu0 %v12052_v29  ;;  %7171 = vmatpush2.bf16.msra.mxu1 %v12180_v60  ;;  %v687_v29 = vld [vmem:[#allocation2 + $0x1230] sm:$0xff] }
 0x2df   :  { %7131 = vmatprep.subr.bf16.mxu0 %v12045_v61  ;;  %7172 = vmatprep.subr.bf16.mxu1 %v12173_v21  ;;  %v811_v60 = vld [vmem:[#allocation2 + $0x1610] sm:$0xff]  ;;  %v12012_v21 = vcombine.low %v691_v43, %v695_v44  ;;  %v12005_v12 = vcombine.high %v683_v57, %v687_v29  ;;  %v6861_v44 = vadd.f32 %v13294_v4, %v6820_v22 }
 0x2e0   :  { %v815_v61 = vld [vmem:[#allocation2 + $0x1630] sm:$0xff] }
 0x2e1   :  { %v12133_v1 = vcombine.high %v811_v60, %v815_v61  ;;  %v12132_v9 = vcombine.low %v811_v60, %v815_v61  ;;  %v915_v53 = vld [vmem:[#allocation2 + $0x1950] sm:$0xff] }
 0x2e2   :  { %7132 = vmatpush2.bf16.msra.mxu0 %v12044_v3  ;;  %7173 = vmatpush2.bf16.msra.mxu1 %v12172_v5  ;;  %v935_v3 = vld [vmem:[#allocation2 + $0x19f0] sm:$0xff] }
 0x2e3   :  { %7133 = vmatprep.subr.bf16.mxu0 %v12037_v7  ;;  %7174 = vmatprep.subr.bf16.mxu1 %v12165_v8  ;;  %v1059_v5 = vld [vmem:[#allocation2 + $0x1dd0] sm:$0xff]  ;;  %v12004_v8 = vcombine.low %v683_v57, %v687_v29  ;;  %v12253_v10 = vcombine.high %v931_v34, %v935_v3  ;;  %v12252_v23 = vcombine.low %v931_v34, %v935_v3 }
 0x2e4   :  { %v1063_v7 = vld [vmem:[#allocation2 + $0x1df0] sm:$0xff] }
 0x2e5   :  { %v12381_v11 = vcombine.high %v1059_v5, %v1063_v7  ;;  %v12380_v24 = vcombine.low %v1059_v5, %v1063_v7  ;;  %v919_v62 = vld [vmem:[#allocation2 + $0x1970] sm:$0xff] }
 0x2e6   :  { %7134 = vmatpush2.bf16.msra.mxu0 %v12036_v13  ;;  %7175 = vmatpush2.bf16.msra.mxu1 %v12164_v15  ;;  %v923_v13 = vld [vmem:[#allocation2 + $0x1990] sm:$0xff]  ;;  %v12236_v34 = vcombine.low %v915_v53, %v919_v62 }
 0x2e7   :  { %7135 = vmatprep.subr.bf16.mxu0 %v12029_v17  ;;  %7176 = vmatprep.subr.bf16.mxu1 %v12157_v19  ;;  %v927_v15 = vld [vmem:[#allocation2 + $0x19b0] sm:$0xff] }
 0x2e8   :  { %v1051_v17 = vld [vmem:[#allocation2 + $0x1d90] sm:$0xff]  ;;  %v12245_v27 = vcombine.high %v923_v13, %v927_v15  ;;  %v12244_v25 = vcombine.low %v923_v13, %v927_v15 }
 0x2e9   :  { %v1055_v19 = vld [vmem:[#allocation2 + $0x1db0] sm:$0xff] }
 0x2ea   :  { %7136 = vmatpush2.bf16.msra.mxu0 %v12028_v32  ;;  %7177 = vmatpush2.bf16.msra.mxu1 %v12156_v33  ;;  %v6859_v32 = vadd.f32 %v13289_v0, %v6818_v42  ;;  %v12373_v33 = vcombine.high %v1051_v17, %v1055_v19  ;;  %v1047_v43 = vld [vmem:[#allocation2 + $0x1d70] sm:$0xff]  ;;  %v12372_v0 = vcombine.low %v1051_v17, %v1055_v19 }
 0x2eb   :  { %7137 = vmatprep.subr.bf16.mxu0 %v12021_v35  ;;  %7178 = vmatprep.subr.bf16.mxu1 %v12149_v37  ;;  %v1043_v37 = vld [vmem:[#allocation2 + $0x1d50] sm:$0xff] }
 0x2ec   :  { %v12365_v57 = vcombine.high %v1043_v37, %v1047_v43  ;;  %v907_v29 = vld [vmem:[#allocation2 + $0x1910] sm:$0xff]  ;;  %v12364_v5 = vcombine.low %v1043_v37, %v1047_v43 }
 0x2ed   :  { %v911_v60 = vld [vmem:[#allocation2 + $0x1930] sm:$0xff] }
 0x2ee   :  { %7138 = vmatpush2.bf16.msra.mxu0 %v12020_v47  ;;  %7179 = vmatpush2.bf16.msra.mxu1 %v12148_v49  ;;  %v12237_v47 = vcombine.high %v915_v53, %v919_v62  ;;  %v1035_v61 = vld [vmem:[#allocation2 + $0x1d10] sm:$0xff]  ;;  %v12229_v7 = vcombine.high %v907_v29, %v911_v60  ;;  %v12228_v17 = vcombine.low %v907_v29, %v911_v60 }
 0x2ef   :  { %7139 = vmatprep.subr.bf16.mxu0 %v12013_v52  ;;  %7180 = vmatprep.subr.bf16.mxu1 %v12141_v56  ;;  %v899_v42 = vld [vmem:[#allocation2 + $0x18d0] sm:$0xff] }
 0x2f0   :  { %v1027_v13 = vld [vmem:[#allocation2 + $0x1cd0] sm:$0xff] }
 0x2f1   :  { %v1031_v15 = vld [vmem:[#allocation2 + $0x1cf0] sm:$0xff] }
 0x2f2   :  { %7140 = vmatpush2.bf16.msra.mxu0 %v12012_v21  ;;  %7181 = vmatpush2.bf16.msra.mxu1 %v12140_v63  ;;  %v1039_v21 = vld [vmem:[#allocation2 + $0x1d30] sm:$0xff]  ;;  %v12348_v62 = vcombine.low %v1027_v13, %v1031_v15 }
 0x2f3   :  { %7141 = vmatprep.subr.bf16.mxu0 %v12005_v12  ;;  %7182 = vmatprep.subr.bf16.mxu1 %v12133_v1  ;;  %v12356_v19 = vcombine.low %v1035_v61, %v1039_v21  ;;  %v883_v43 = vld [vmem:[#allocation2 + $0x1850] sm:$0xff] }
 0x2f6   :  { %7142 = vmatpush2.bf16.msra.mxu0 %v12004_v8  ;;  %7183 = vmatpush2.bf16.msra.mxu1 %v12132_v9 }
 0x2f7   :  { %7193 = vmatprep.subr.bf16.mxu0 %v12253_v10  ;;  %7234 = vmatprep.subr.bf16.mxu1 %v12381_v11  ;;  %v12357_v10 = vcombine.high %v1035_v61, %v1039_v21  ;;  %v903_v11 = vld [vmem:[#allocation2 + $0x18f0] sm:$0xff] }
 0x2f8   :  { %v12221_v22 = vcombine.high %v899_v42, %v903_v11  ;;  %v12220_v53 = vcombine.low %v899_v42, %v903_v11  ;;  %v995_v21 = vld [vmem:[#allocation2 + $0x1bd0] sm:$0xff] }
 0x2f9   :  { %v6899_v35 = vpop.f32.mrf.mxu0  ;;  %7144 = vmatmul.mubr.bf16.vlgmr.msra.gmra.mxu0 %v13180_v2  ;;  %v6940_v39 = vpop.f32.mrf.mxu1  ;;  %7185 = vmatmul.mubr.bf16.vlgmr.msra.gmra.mxu1 %v13185_v6  ;;  %v1119_v42 = vld [vmem:[#allocation2 + $0x1fb0] sm:$0xff] }
 0x2fa   :  { %v6900_v41 = vadd.f32 %v6899_v35, %v6859_v32  ;;  %7194 = vmatpush1.bf16.msra.mxu0 %v12252_v23  ;;  %7235 = vmatpush1.bf16.msra.mxu1 %v12380_v24  ;;  %v12349_v23 = vcombine.high %v1027_v13, %v1031_v15  ;;  %v891_v24 = vld [vmem:[#allocation2 + $0x1890] sm:$0xff] }
 0x2fb   :  { %v6901_v45 = vpop.f32.mrf.mxu0  ;;  %7195 = vmatprep.subr.bf16.mxu0 %v12245_v27  ;;  %v6942_v56 = vpop.f32.mrf.mxu1  ;;  %7236 = vmatprep.subr.bf16.mxu1 %v12373_v33  ;;  %v895_v27 = vld [vmem:[#allocation2 + $0x18b0] sm:$0xff] }
 0x2fc   :  { %v6941_v49 = vadd.f32 %v6940_v39, %v6900_v41  ;;  %v6902_v52 = vadd.f32 %v6901_v45, %v6861_v44  ;;  %7225 = vmatprep.mubr.bf16.mxu0 %v13190_v14  ;;  %7266 = vmatprep.mubr.bf16.mxu1 %v13193_v18  ;;  %v1019_v32 = vld [vmem:[#allocation2 + $0x1c90] sm:$0xff]  ;;  %v12213_v35 = vcombine.high %v891_v24, %v895_v27 }
 0x2fd   :  { %v6903_v4 = vpop.f32.mrf.mxu0  ;;  %v6944_v1 = vpop.f32.mrf.mxu1  ;;  %v1023_v33 = vld [vmem:[#allocation2 + $0x1cb0] sm:$0xff] }
 0x2fe   :  { %v7605_v63 = vmax.f32 %v6941_v49, 0.0  ;;  %v6943_v12 = vadd.f32 %v6942_v56, %v6902_v52  ;;  %7196 = vmatpush1.bf16.msra.mxu0 %v12244_v25  ;;  %7237 = vmatpush1.bf16.msra.mxu1 %v12372_v0  ;;  %v12341_v37 = vcombine.high %v1019_v32, %v1023_v33  ;;  %v887_v44 = vld [vmem:[#allocation2 + $0x1870] sm:$0xff]  ;;  %v12212_v25 = vcombine.low %v891_v24, %v895_v27 }
 0x2ff   :  { %v6904_v3 = vpop.f32.mrf.mxu0  ;;  %7197 = vmatprep.subr.bf16.mxu0 %v12237_v47  ;;  %v6945_v9 = vpop.f32.mrf.mxu1  ;;  %7238 = vmatprep.subr.bf16.mxu1 %v12365_v57  ;;  %v1011_v41 = vld [vmem:[#allocation2 + $0x1c50] sm:$0xff]  ;;  %v12340_v45 = vcombine.low %v1019_v32, %v1023_v33  ;;  %v12205_v0 = vcombine.high %v883_v43, %v887_v44  ;;  %v12204_v29 = vcombine.low %v883_v43, %v887_v44 }
 0x300   :  { %7613 = vst [vmem:[%s13569_s5 + $0x10] sm:$0xff] %v7605_v63  ;;  %v7606_v8 = vmax.f32 %v6943_v12, 0.0  ;;  %v1015_v39 = vld [vmem:[#allocation2 + $0x1c70] sm:$0xff] }
 0x301   :  { %v12333_v47 = vcombine.high %v1011_v41, %v1015_v39  ;;  %v875_v49 = vld [vmem:[#allocation2 + $0x1810] sm:$0xff]  ;;  %v12332_v60 = vcombine.low %v1011_v41, %v1015_v39 }
 0x302   :  { %7614 = vst [vmem:[%s13569_s5 + $0x18] sm:$0xff] %v7606_v8  ;;  %7198 = vmatpush1.bf16.msra.mxu0 %v12236_v34  ;;  %7239 = vmatpush1.bf16.msra.mxu1 %v12364_v5  ;;  %v879_v52 = vld [vmem:[#allocation2 + $0x1830] sm:$0xff] }
 0x303   :  { %7199 = vmatprep.subr.bf16.mxu0 %v12229_v7  ;;  %7240 = vmatprep.subr.bf16.mxu1 %v12357_v10  ;;  %v1003_v56 = vld [vmem:[#allocation2 + $0x1c10] sm:$0xff]  ;;  %v12197_v4 = vcombine.high %v875_v49, %v879_v52  ;;  %v12196_v34 = vcombine.low %v875_v49, %v879_v52 }
 0x304   :  { %v1007_v57 = vld [vmem:[#allocation2 + $0x1c30] sm:$0xff] }
 0x305   :  { %v12325_v61 = vcombine.high %v1003_v56, %v1007_v57  ;;  %v999_v63 = vld [vmem:[#allocation2 + $0x1bf0] sm:$0xff]  ;;  %v12324_v3 = vcombine.low %v1003_v56, %v1007_v57 }
 0x306   :  { %7200 = vmatpush1.bf16.msra.mxu0 %v12228_v17  ;;  %7241 = vmatpush1.bf16.msra.mxu1 %v12356_v19  ;;  %v1123_v12 = vld [vmem:[#allocation2 + $0x1fd0] sm:$0xff]  ;;  %v12317_v5 = vcombine.high %v995_v21, %v999_v63  ;;  %v12316_v11 = vcombine.low %v995_v21, %v999_v63 }
 0x307   :  { %7201 = vmatprep.subr.bf16.mxu0 %v12221_v22  ;;  %7242 = vmatprep.subr.bf16.mxu1 %v12349_v23  ;;  %v1127_v1 = vld [vmem:[#allocation2 + $0x1ff0] sm:$0xff] }
 0x308   :  { %v12445_v7 = vcombine.high %v1123_v12, %v1127_v1  ;;  %v987_v8 = vld [vmem:[#allocation2 + $0x1b90] sm:$0xff]  ;;  %v12444_v13 = vcombine.low %v1123_v12, %v1127_v1 }
 0x309   :  { %v991_v9 = vld [vmem:[#allocation2 + $0x1bb0] sm:$0xff] }
 0x30a   :  { %7202 = vmatpush1.bf16.msra.mxu0 %v12220_v53  ;;  %7243 = vmatpush1.bf16.msra.mxu1 %v12348_v62  ;;  %v1115_v10 = vld [vmem:[#allocation2 + $0x1f90] sm:$0xff]  ;;  %v12309_v15 = vcombine.high %v987_v8, %v991_v9  ;;  %v12308_v27 = vcombine.low %v987_v8, %v991_v9 }
 0x30b   :  { %7203 = vmatprep.subr.bf16.mxu0 %v12213_v35  ;;  %7244 = vmatprep.subr.bf16.mxu1 %v12341_v37  ;;  %v12437_v17 = vcombine.high %v1115_v10, %v1119_v42  ;;  %v979_v19 = vld [vmem:[#allocation2 + $0x1b50] sm:$0xff]  ;;  %v12436_v32 = vcombine.low %v1115_v10, %v1119_v42 }
 0x30c   :  { %v983_v22 = vld [vmem:[#allocation2 + $0x1b70] sm:$0xff] }
 0x30d   :  { %v1107_v23 = vld [vmem:[#allocation2 + $0x1f50] sm:$0xff]  ;;  %v12301_v33 = vcombine.high %v979_v19, %v983_v22  ;;  %v12300_v44 = vcombine.low %v979_v19, %v983_v22 }
 0x30e   :  { %7204 = vmatpush1.bf16.msra.mxu0 %v12212_v25  ;;  %7245 = vmatpush1.bf16.msra.mxu1 %v12340_v45  ;;  %v1111_v24 = vld [vmem:[#allocation2 + $0x1f70] sm:$0xff] }
 0x30f   :  { %7205 = vmatprep.subr.bf16.mxu0 %v12205_v0  ;;  %7246 = vmatprep.subr.bf16.mxu1 %v12333_v47  ;;  %v12429_v53 = vcombine.high %v1107_v23, %v1111_v24  ;;  %v971_v62 = vld [vmem:[#allocation2 + $0x1b10] sm:$0xff]  ;;  %v12428_v41 = vcombine.low %v1107_v23, %v1111_v24 }
 0x310   :  { %v975_v35 = vld [vmem:[#allocation2 + $0x1b30] sm:$0xff] }
 0x311   :  { %v1099_v37 = vld [vmem:[#allocation2 + $0x1f10] sm:$0xff]  ;;  %v12293_v39 = vcombine.high %v971_v62, %v975_v35  ;;  %v12292_v52 = vcombine.low %v971_v62, %v975_v35  ;;  %v296_v62 = vld [vmem:[#allocation2 + $0x5f8] sm:$0xff] }
 0x312   :  { %7206 = vmatpush1.bf16.msra.mxu0 %v12204_v29  ;;  %7247 = vmatpush1.bf16.msra.mxu1 %v12332_v60  ;;  %v1103_v43 = vld [vmem:[#allocation2 + $0x1f30] sm:$0xff] }
 0x313   :  { %7207 = vmatprep.subr.bf16.mxu0 %v12197_v4  ;;  %7248 = vmatprep.subr.bf16.mxu1 %v12325_v61  ;;  %v12421_v25 = vcombine.high %v1099_v37, %v1103_v43  ;;  %v963_v45 = vld [vmem:[#allocation2 + $0x1ad0] sm:$0xff]  ;;  %v12420_v56 = vcombine.low %v1099_v37, %v1103_v43  ;;  %v1149_v37 = vsub.s32 4, %v13198_v26 }
 0x314   :  { %v967_v0 = vld [vmem:[#allocation2 + $0x1af0] sm:$0xff] }
 0x315   :  { %v1091_v47 = vld [vmem:[#allocation2 + $0x1ed0] sm:$0xff]  ;;  %v12285_v57 = vcombine.high %v963_v45, %v967_v0  ;;  %v12284_v63 = vcombine.low %v963_v45, %v967_v0  ;;  %v160_v45 = vld [vmem:[#allocation2 + $0x1b8] sm:$0xff] }
 0x316   :  { %7208 = vmatpush1.bf16.msra.mxu0 %v12196_v34  ;;  %7249 = vmatpush1.bf16.msra.mxu1 %v12324_v3  ;;  %v1095_v49 = vld [vmem:[#allocation2 + $0x1ef0] sm:$0xff]  ;;  %v284_v0 = vld [vmem:[#allocation2 + $0x598] sm:$0xff] }
 0x317   :  { %7209 = vmatprep.subr.bf16.mxu0 %v12317_v5  ;;  %7250 = vmatprep.subr.bf16.mxu1 %v12445_v7  ;;  %v12413_v29 = vcombine.high %v1091_v47, %v1095_v49  ;;  %v955_v60 = vld [vmem:[#allocation2 + $0x1a90] sm:$0xff]  ;;  %v12412_v12 = vcombine.low %v1091_v47, %v1095_v49  ;;  %v288_v47 = vld [vmem:[#allocation2 + $0x5b8] sm:$0xff]  ;;  %v12967_v49 = vld [vmem:[#allocation4] sm:$0xff] }
 0x318   :  { %v959_v4 = vld [vmem:[#allocation2 + $0x1ab0] sm:$0xff] }
 0x319   :  { %v1083_v61 = vld [vmem:[#allocation2 + $0x1e90] sm:$0xff]  ;;  %v12277_v1 = vcombine.high %v955_v60, %v959_v4  ;;  %v12276_v9 = vcombine.low %v955_v60, %v959_v4  ;;  %v11607_v4 = vcombine.high %v284_v0, %v288_v47 }
 0x31a   :  { %7210 = vmatpush2.bf16.msra.mxu0 %v12316_v11  ;;  %7251 = vmatpush2.bf16.msra.mxu1 %v12444_v13  ;;  %v1087_v21 = vld [vmem:[#allocation2 + $0x1eb0] sm:$0xff] }
 0x31b   :  { %7211 = vmatprep.subr.bf16.mxu0 %v12309_v15  ;;  %7252 = vmatprep.subr.bf16.mxu1 %v12437_v17  ;;  %v12405_v34 = vcombine.high %v1083_v61, %v1087_v21  ;;  %v947_v3 = vld [vmem:[#allocation2 + $0x1a50] sm:$0xff]  ;;  %v12404_v10 = vcombine.low %v1083_v61, %v1087_v21  ;;  %v148_v61 = vld [vmem:[#allocation2 + $0x158] sm:$0xff] }
 0x31c   :  { %v951_v5 = vld [vmem:[#allocation2 + $0x1a70] sm:$0xff]  ;;  %v152_v21 = vld [vmem:[#allocation2 + $0x178] sm:$0xff] }
 0x31d   :  { %v1075_v7 = vld [vmem:[#allocation2 + $0x1e50] sm:$0xff]  ;;  %v12269_v42 = vcombine.high %v947_v3, %v951_v5  ;;  %v12268_v22 = vcombine.low %v947_v3, %v951_v5 }
 0x31e   :  { %7212 = vmatpush2.bf16.msra.mxu0 %v12308_v27  ;;  %7253 = vmatpush2.bf16.msra.mxu1 %v12436_v32  ;;  %v1079_v8 = vld [vmem:[#allocation2 + $0x1e70] sm:$0xff]  ;;  %v164_v32 = vld [vmem:[#allocation2 + $0x1d8] sm:$0xff] }
 0x31f   :  { %7213 = vmatprep.subr.bf16.mxu0 %v12301_v33  ;;  %7254 = vmatprep.subr.bf16.mxu1 %v12429_v53  ;;  %v12397_v11 = vcombine.high %v1075_v7, %v1079_v8  ;;  %v939_v13 = vld [vmem:[#allocation2 + $0x1a10] sm:$0xff]  ;;  %v12396_v23 = vcombine.low %v1075_v7, %v1079_v8  ;;  %v168_v33 = vld [vmem:[#allocation2 + $0x1f8] sm:$0xff]  ;;  %v11606_v8 = vcombine.low %v284_v0, %v288_v47 }
 0x320   :  { %v943_v15 = vld [vmem:[#allocation2 + $0x1a30] sm:$0xff]  ;;  %v292_v53 = vld [vmem:[#allocation2 + $0x5d8] sm:$0xff] }
 0x321   :  { %v1067_v17 = vld [vmem:[#allocation2 + $0x1e10] sm:$0xff]  ;;  %v12261_v24 = vcombine.high %v939_v13, %v943_v15  ;;  %v12260_v35 = vcombine.low %v939_v13, %v943_v15  ;;  %v140_v15 = vld [vmem:[#allocation2 + $0x118] sm:$0xff] }
 0x322   :  { %7214 = vmatpush2.bf16.msra.mxu0 %v12300_v44  ;;  %7255 = vmatpush2.bf16.msra.mxu1 %v12428_v41  ;;  %v1071_v19 = vld [vmem:[#allocation2 + $0x1e30] sm:$0xff]  ;;  %v11487_v44 = vcombine.high %v164_v32, %v168_v33  ;;  %v11615_v41 = vcombine.high %v292_v53, %v296_v62 }
 0x323   :  { %7215 = vmatprep.subr.bf16.mxu0 %v12293_v39  ;;  %7256 = vmatprep.subr.bf16.mxu1 %v12421_v25  ;;  %v12389_v27 = vcombine.high %v1067_v17, %v1071_v19  ;;  %v12388_v43 = vcombine.low %v1067_v17, %v1071_v19  ;;  %v1153_v39 = vsub.s32 5, %v13198_v26  ;;  %v156_v25 = vld [vmem:[#allocation2 + $0x198] sm:$0xff] }
 0x324   :  { %v11478_v5 = vcombine.low %v156_v25, %v160_v45  ;;  %v144_v17 = vld [vmem:[#allocation2 + $0x138] sm:$0xff] }
 0x325   :  { %v1154_v60 = vrot.slane %v12967_v49, %v1153_v39 }
 0x326   :  { %7216 = vmatpush2.bf16.msra.mxu0 %v12292_v52  ;;  %7257 = vmatpush2.bf16.msra.mxu1 %v12420_v56  ;;  %v1150_v52 = vrot.slane %v12967_v49, %v1149_v37  ;;  %v11486_v56 = vcombine.low %v164_v32, %v168_v33  ;;  %v11470_v32 = vcombine.low %v148_v61, %v152_v21  ;;  %v124_v49 = vld [vmem:[#allocation2 + $0x98] sm:$0xff] }
 0x327   :  { %7217 = vmatprep.subr.bf16.mxu0 %v12285_v57  ;;  %7258 = vmatprep.subr.bf16.mxu1 %v12413_v29  ;;  %v11614_v57 = vcombine.low %v292_v53, %v296_v62  ;;  %v11479_v29 = vcombine.high %v156_v25, %v160_v45  ;;  %v11463_v62 = vcombine.high %v140_v15, %v144_v17  ;;  %v264_v25 = vld [vmem:[#allocation2 + $0x4f8] sm:$0xff] }
 0x328   :  { %v11462_v45 = vcombine.low %v140_v15, %v144_v17 }
 0x32a   :  { %7218 = vmatpush2.bf16.msra.mxu0 %v12284_v63  ;;  %7259 = vmatpush2.bf16.msra.mxu1 %v12412_v12  ;;  %v276_v12 = vld [vmem:[#allocation2 + $0x558] sm:$0xff] }
 0x32b   :  { %7219 = vmatprep.subr.bf16.mxu0 %v12277_v1  ;;  %7260 = vmatprep.subr.bf16.mxu1 %v12405_v34  ;;  %v280_v1 = vld [vmem:[#allocation2 + $0x578] sm:$0xff] }
 0x32c   :  { %v11599_v13 = vcombine.high %v276_v12, %v280_v1  ;;  %v11598_v53 = vcombine.low %v276_v12, %v280_v1  ;;  %v244_v12 = vld [vmem:[#allocation2 + $0x458] sm:$0xff] }
 0x32d   :  { %v248_v1 = vld [vmem:[#allocation2 + $0x478] sm:$0xff] }
 0x32e   :  { %7220 = vmatpush2.bf16.msra.mxu0 %v12276_v9  ;;  %7261 = vmatpush2.bf16.msra.mxu1 %v12404_v10  ;;  %v11471_v9 = vcombine.high %v148_v61, %v152_v21  ;;  %v116_v21 = vld [vmem:[#allocation2 + $0x58] sm:$0xff]  ;;  %v11566_v15 = vcombine.low %v244_v12, %v248_v1 }
 0x32f   :  { %7221 = vmatprep.subr.bf16.mxu0 %v12269_v42  ;;  %7262 = vmatprep.subr.bf16.mxu1 %v12397_v11 }
 0x332   :  { %7222 = vmatpush2.bf16.msra.mxu0 %v12268_v22  ;;  %7263 = vmatpush2.bf16.msra.mxu1 %v12396_v23  ;;  %v268_v22 = vld [vmem:[#allocation2 + $0x518] sm:$0xff] }
 0x333   :  { %7223 = vmatprep.subr.bf16.mxu0 %v12261_v24  ;;  %7264 = vmatprep.subr.bf16.mxu1 %v12389_v27  ;;  %v272_v23 = vld [vmem:[#allocation2 + $0x538] sm:$0xff] }
 0x336   :  { %7224 = vmatpush2.bf16.msra.mxu0 %v12260_v35  ;;  %7265 = vmatpush2.bf16.msra.mxu1 %v12388_v43  ;;  %v11591_v43 = vcombine.high %v268_v22, %v272_v23 }
 0x337   :  { %7275 = vmatprep.subr.bf16.mxu0 %v11487_v44  ;;  %7316 = vmatprep.subr.bf16.mxu1 %v11615_v41  ;;  %v132_v44 = vld [vmem:[#allocation2 + $0xd8] sm:$0xff] }
 0x338   :  { %v260_v41 = vld [vmem:[#allocation2 + $0x4d8] sm:$0xff] }
 0x339   :  { %v6981_v63 = vpop.f32.mrf.mxu0  ;;  %7226 = vmatmul.mubr.bf16.vlgmr.msra.gmra.mxu0 %v13208_v50  ;;  %v7022_v3 = vpop.f32.mrf.mxu1  ;;  %7267 = vmatmul.mubr.bf16.vlgmr.msra.gmra.mxu1 %v13212_v55  ;;  %v11583_v47 = vcombine.high %v260_v41, %v264_v25 }
 0x33a   :  { %v6982_v34 = vadd.f32 %v6981_v63, %v1150_v52  ;;  %7276 = vmatpush1.bf16.msra.mxu0 %v11486_v56  ;;  %7317 = vmatpush1.bf16.msra.mxu1 %v11614_v57  ;;  %v128_v52 = vld [vmem:[#allocation2 + $0xb8] sm:$0xff] }
 0x33b   :  { %v6983_v7 = vpop.f32.mrf.mxu0  ;;  %7277 = vmatprep.subr.bf16.mxu0 %v11479_v29  ;;  %v7024_v11 = vpop.f32.mrf.mxu1  ;;  %7318 = vmatprep.subr.bf16.mxu1 %v11607_v4  ;;  %v252_v56 = vld [vmem:[#allocation2 + $0x498] sm:$0xff]  ;;  %v11447_v4 = vcombine.high %v124_v49, %v128_v52 }
 0x33c   :  { %v13322_v10 = vadd.f32 %v7022_v3, %v6982_v34  ;;  %v6984_v42 = vadd.f32 %v6983_v7, %v1154_v60  ;;  %7307 = vmatprep.mubr.bf16.mxu0 %v13120_v58  ;;  %7348 = vmatprep.mubr.bf16.mxu1 %v13122_v59  ;;  %v136_v58 = vld [vmem:[#allocation2 + $0xf8] sm:$0xff]  ;;  %v11590_v59 = vcombine.low %v268_v22, %v272_v23 }
 0x33d   :  { %v6985_v19 = vpop.f32.mrf.mxu0  ;;  %v7026_v27 = vpop.f32.mrf.mxu1  ;;  %v11455_v0 = vcombine.high %v132_v44, %v136_v58  ;;  %v256_v57 = vld [vmem:[#allocation2 + $0x4b8] sm:$0xff]  ;;  %v11454_v29 = vcombine.low %v132_v44, %v136_v58  ;;  %v11582_v60 = vcombine.low %v260_v41, %v264_v25  ;;  %v11446_v34 = vcombine.low %v124_v49, %v128_v52 }
 0x33e   :  { %v13326_v24 = vadd.f32 %v7024_v11, %v6984_v42  ;;  %7278 = vmatpush1.bf16.msra.mxu0 %v11478_v5  ;;  %7319 = vmatpush1.bf16.msra.mxu1 %v11606_v8  ;;  %v11575_v61 = vcombine.high %v252_v56, %v256_v57  ;;  %v120_v63 = vld [vmem:[#allocation2 + $0x78] sm:$0xff]  ;;  %v11574_v3 = vcombine.low %v252_v56, %v256_v57 }
 0x33f   :  { %v6986_v33 = vpop.f32.mrf.mxu0  ;;  %7279 = vmatprep.subr.bf16.mxu0 %v11471_v9  ;;  %v7027_v35 = vpop.f32.mrf.mxu1  ;;  %7320 = vmatprep.subr.bf16.mxu1 %v11599_v13  ;;  %v11439_v5 = vcombine.high %v116_v21, %v120_v63  ;;  %v11567_v7 = vcombine.high %v244_v12, %v248_v1  ;;  %v108_v8 = vld [vmem:[#allocation2 + $0x18] sm:$0xff]  ;;  %v11438_v13 = vcombine.low %v116_v21, %v120_v63 }
 0x340   :  { %v112_v9 = vld [vmem:[#allocation2 + $0x38] sm:$0xff] }
 0x341   :  { %v236_v42 = vld [vmem:[#allocation2 + $0x418] sm:$0xff]  ;;  %v11431_v17 = vcombine.high %v108_v8, %v112_v9  ;;  %v11430_v33 = vcombine.low %v108_v8, %v112_v9 }
 0x342   :  { %7280 = vmatpush1.bf16.msra.mxu0 %v11470_v32  ;;  %7321 = vmatpush1.bf16.msra.mxu1 %v11598_v53  ;;  %v240_v11 = vld [vmem:[#allocation2 + $0x438] sm:$0xff] }
 0x343   :  { %7281 = vmatprep.subr.bf16.mxu0 %v11463_v62  ;;  %7322 = vmatprep.subr.bf16.mxu1 %v11591_v43  ;;  %v11559_v19 = vcombine.high %v236_v42, %v240_v11  ;;  %v228_v22 = vld [vmem:[#allocation2 + $0x3d8] sm:$0xff]  ;;  %v11558_v53 = vcombine.low %v236_v42, %v240_v11 }
 0x344   :  { %v232_v23 = vld [vmem:[#allocation2 + $0x3f8] sm:$0xff] }
 0x345   :  { %v356_v27 = vld [vmem:[#allocation2 + $0x7d8] sm:$0xff]  ;;  %v11551_v62 = vcombine.high %v228_v22, %v232_v23  ;;  %v11550_v25 = vcombine.low %v228_v22, %v232_v23 }
 0x346   :  { %7282 = vmatpush1.bf16.msra.mxu0 %v11462_v45  ;;  %7323 = vmatpush1.bf16.msra.mxu1 %v11590_v59  ;;  %v360_v32 = vld [vmem:[#allocation2 + $0x7f8] sm:$0xff] }
 0x347   :  { %7283 = vmatprep.subr.bf16.mxu0 %v11455_v0  ;;  %7324 = vmatprep.subr.bf16.mxu1 %v11583_v47  ;;  %v11679_v35 = vcombine.high %v356_v27, %v360_v32  ;;  %v220_v43 = vld [vmem:[#allocation2 + $0x398] sm:$0xff]  ;;  %v11678_v45 = vcombine.low %v356_v27, %v360_v32 }
 0x348   :  { %v224_v44 = vld [vmem:[#allocation2 + $0x3b8] sm:$0xff] }
 0x349   :  { %v348_v58 = vld [vmem:[#allocation2 + $0x798] sm:$0xff]  ;;  %v11543_v59 = vcombine.high %v220_v43, %v224_v44  ;;  %v11542_v57 = vcombine.low %v220_v43, %v224_v44 }
 0x34a   :  { %7284 = vmatpush1.bf16.msra.mxu0 %v11454_v29  ;;  %7325 = vmatpush1.bf16.msra.mxu1 %v11582_v60  ;;  %v352_v41 = vld [vmem:[#allocation2 + $0x7b8] sm:$0xff] }
 0x34b   :  { %7285 = vmatprep.subr.bf16.mxu0 %v11447_v4  ;;  %7326 = vmatprep.subr.bf16.mxu1 %v11575_v61  ;;  %v11671_v0 = vcombine.high %v348_v58, %v352_v41  ;;  %v212_v47 = vld [vmem:[#allocation2 + $0x358] sm:$0xff]  ;;  %v11670_v29 = vcombine.low %v348_v58, %v352_v41 }
 0x34c   :  { %v216_v49 = vld [vmem:[#allocation2 + $0x378] sm:$0xff] }
 0x34d   :  { %v340_v52 = vld [vmem:[#allocation2 + $0x758] sm:$0xff]  ;;  %v11535_v60 = vcombine.high %v212_v47, %v216_v49  ;;  %v11534_v1 = vcombine.low %v212_v47, %v216_v49 }
 0x34e   :  { %7286 = vmatpush1.bf16.msra.mxu0 %v11446_v34  ;;  %7327 = vmatpush1.bf16.msra.mxu1 %v11574_v3  ;;  %v344_v56 = vld [vmem:[#allocation2 + $0x778] sm:$0xff] }
 0x34f   :  { %7287 = vmatprep.subr.bf16.mxu0 %v11439_v5  ;;  %7328 = vmatprep.subr.bf16.mxu1 %v11567_v7  ;;  %v11663_v4 = vcombine.high %v340_v52, %v344_v56  ;;  %v204_v61 = vld [vmem:[#allocation2 + $0x318] sm:$0xff]  ;;  %v11662_v34 = vcombine.low %v340_v52, %v344_v56 }
 0x350   :  { %v208_v21 = vld [vmem:[#allocation2 + $0x338] sm:$0xff] }
 0x351   :  { %v332_v63 = vld [vmem:[#allocation2 + $0x718] sm:$0xff]  ;;  %v11527_v3 = vcombine.high %v204_v61, %v208_v21  ;;  %v11526_v11 = vcombine.low %v204_v61, %v208_v21 }
 0x352   :  { %7288 = vmatpush1.bf16.msra.mxu0 %v11438_v13  ;;  %7329 = vmatpush1.bf16.msra.mxu1 %v11566_v15  ;;  %v336_v12 = vld [vmem:[#allocation2 + $0x738] sm:$0xff] }
 0x353   :  { %7289 = vmatprep.subr.bf16.mxu0 %v11431_v17  ;;  %7330 = vmatprep.subr.bf16.mxu1 %v11559_v19  ;;  %v11655_v5 = vcombine.high %v332_v63, %v336_v12  ;;  %v196_v7 = vld [vmem:[#allocation2 + $0x2d8] sm:$0xff]  ;;  %v11654_v13 = vcombine.low %v332_v63, %v336_v12 }
 0x354   :  { %v200_v8 = vld [vmem:[#allocation2 + $0x2f8] sm:$0xff] }
 0x355   :  { %v324_v9 = vld [vmem:[#allocation2 + $0x6d8] sm:$0xff]  ;;  %v11519_v15 = vcombine.high %v196_v7, %v200_v8  ;;  %v11518_v32 = vcombine.low %v196_v7, %v200_v8 }
 0x356   :  { %7290 = vmatpush1.bf16.msra.mxu0 %v11430_v33  ;;  %7331 = vmatpush1.bf16.msra.mxu1 %v11558_v53  ;;  %v328_v42 = vld [vmem:[#allocation2 + $0x6f8] sm:$0xff] }
 0x357   :  { %7291 = vmatprep.subr.bf16.mxu0 %v11551_v62  ;;  %7332 = vmatprep.subr.bf16.mxu1 %v11679_v35  ;;  %v11647_v17 = vcombine.high %v324_v9, %v328_v42  ;;  %v188_v19 = vld [vmem:[#allocation2 + $0x298] sm:$0xff]  ;;  %v11646_v33 = vcombine.low %v324_v9, %v328_v42 }
 0x358   :  { %v192_v22 = vld [vmem:[#allocation2 + $0x2b8] sm:$0xff] }
 0x359   :  { %v316_v23 = vld [vmem:[#allocation2 + $0x698] sm:$0xff]  ;;  %v11511_v53 = vcombine.high %v188_v19, %v192_v22  ;;  %v11510_v41 = vcombine.low %v188_v19, %v192_v22 }
 0x35a   :  { %7292 = vmatpush2.bf16.msra.mxu0 %v11550_v25  ;;  %7333 = vmatpush2.bf16.msra.mxu1 %v11678_v45  ;;  %v320_v27 = vld [vmem:[#allocation2 + $0x6b8] sm:$0xff] }
 0x35b   :  { %7293 = vmatprep.subr.bf16.mxu0 %v11543_v59  ;;  %7334 = vmatprep.subr.bf16.mxu1 %v11671_v0  ;;  %v11639_v62 = vcombine.high %v316_v23, %v320_v27  ;;  %v180_v35 = vld [vmem:[#allocation2 + $0x258] sm:$0xff]  ;;  %v11638_v25 = vcombine.low %v316_v23, %v320_v27 }
 0x35c   :  { %v184_v43 = vld [vmem:[#allocation2 + $0x278] sm:$0xff] }
 0x35d   :  { %v308_v44 = vld [vmem:[#allocation2 + $0x658] sm:$0xff]  ;;  %v11503_v45 = vcombine.high %v180_v35, %v184_v43  ;;  %v11502_v56 = vcombine.low %v180_v35, %v184_v43 }
 0x35e   :  { %7294 = vmatpush2.bf16.msra.mxu0 %v11542_v57  ;;  %7335 = vmatpush2.bf16.msra.mxu1 %v11670_v29  ;;  %v312_v58 = vld [vmem:[#allocation2 + $0x678] sm:$0xff] }
 0x35f   :  { %7295 = vmatprep.subr.bf16.mxu0 %v11535_v60  ;;  %7336 = vmatprep.subr.bf16.mxu1 %v11663_v4  ;;  %v11631_v59 = vcombine.high %v308_v44, %v312_v58  ;;  %v172_v0 = vld [vmem:[#allocation2 + $0x218] sm:$0xff]  ;;  %v11630_v57 = vcombine.low %v308_v44, %v312_v58 }
 0x360   :  { %v176_v47 = vld [vmem:[#allocation2 + $0x238] sm:$0xff] }
 0x361   :  { %v300_v49 = vld [vmem:[#allocation2 + $0x618] sm:$0xff]  ;;  %v11495_v29 = vcombine.high %v172_v0, %v176_v47  ;;  %v11494_v12 = vcombine.low %v172_v0, %v176_v47 }
 0x362   :  { %7296 = vmatpush2.bf16.msra.mxu0 %v11534_v1  ;;  %7337 = vmatpush2.bf16.msra.mxu1 %v11662_v34  ;;  %v304_v52 = vld [vmem:[#allocation2 + $0x638] sm:$0xff] }
 0x363   :  { %7297 = vmatprep.subr.bf16.mxu0 %v11527_v3  ;;  %7338 = vmatprep.subr.bf16.mxu1 %v11655_v5  ;;  %v11623_v60 = vcombine.high %v300_v49, %v304_v52  ;;  %v420_v4 = vld [vmem:[#allocation2 + $0x9d8] sm:$0xff]  ;;  %v11622_v1 = vcombine.low %v300_v49, %v304_v52 }
 0x364   :  { %v424_v61 = vld [vmem:[#allocation2 + $0x9f8] sm:$0xff] }
 0x365   :  { %v548_v21 = vld [vmem:[#allocation2 + $0xdd8] sm:$0xff]  ;;  %v11743_v34 = vcombine.high %v420_v4, %v424_v61  ;;  %v11742_v42 = vcombine.low %v420_v4, %v424_v61 }
 0x366   :  { %7298 = vmatpush2.bf16.msra.mxu0 %v11526_v11  ;;  %7339 = vmatpush2.bf16.msra.mxu1 %v11654_v13  ;;  %v552_v63 = vld [vmem:[#allocation2 + $0xdf8] sm:$0xff] }
 0x367   :  { %7299 = vmatprep.subr.bf16.mxu0 %v11519_v15  ;;  %7340 = vmatprep.subr.bf16.mxu1 %v11647_v17  ;;  %v11871_v3 = vcombine.high %v548_v21, %v552_v63  ;;  %v412_v5 = vld [vmem:[#allocation2 + $0x998] sm:$0xff]  ;;  %v11870_v11 = vcombine.low %v548_v21, %v552_v63 }
 0x368   :  { %v416_v7 = vld [vmem:[#allocation2 + $0x9b8] sm:$0xff] }
 0x369   :  { %v540_v8 = vld [vmem:[#allocation2 + $0xd98] sm:$0xff]  ;;  %v11735_v13 = vcombine.high %v412_v5, %v416_v7 }
 0x36a   :  { %7300 = vmatpush2.bf16.msra.mxu0 %v11518_v32  ;;  %7341 = vmatpush2.bf16.msra.mxu1 %v11646_v33  ;;  %v544_v9 = vld [vmem:[#allocation2 + $0xdb8] sm:$0xff] }
 0x36b   :  { %7301 = vmatprep.subr.bf16.mxu0 %v11511_v53  ;;  %7342 = vmatprep.subr.bf16.mxu1 %v11639_v62  ;;  %v11863_v15 = vcombine.high %v540_v8, %v544_v9  ;;  %v404_v17 = vld [vmem:[#allocation2 + $0x958] sm:$0xff]  ;;  %v11734_v53 = vcombine.low %v412_v5, %v416_v7  ;;  %v11862_v35 = vcombine.low %v540_v8, %v544_v9 }
 0x36c   :  { %v408_v19 = vld [vmem:[#allocation2 + $0x978] sm:$0xff] }
 0x36d   :  { %v532_v23 = vld [vmem:[#allocation2 + $0xd58] sm:$0xff]  ;;  %v11727_v43 = vcombine.high %v404_v17, %v408_v19  ;;  %v11726_v49 = vcombine.low %v404_v17, %v408_v19 }
 0x36e   :  { %7302 = vmatpush2.bf16.msra.mxu0 %v11510_v41  ;;  %7343 = vmatpush2.bf16.msra.mxu1 %v11638_v25  ;;  %v536_v27 = vld [vmem:[#allocation2 + $0xd78] sm:$0xff] }
 0x36f   :  { %7303 = vmatprep.subr.bf16.mxu0 %v11503_v45  ;;  %7344 = vmatprep.subr.bf16.mxu1 %v11631_v59  ;;  %v396_v25 = vld [vmem:[#allocation2 + $0x918] sm:$0xff] }
 0x370   :  { %v400_v45 = vld [vmem:[#allocation2 + $0x938] sm:$0xff] }
 0x371   :  { %v528_v59 = vld [vmem:[#allocation2 + $0xd38] sm:$0xff]  ;;  %v11718_v21 = vcombine.low %v396_v25, %v400_v45 }
 0x372   :  { %7304 = vmatpush2.bf16.msra.mxu0 %v11502_v56  ;;  %7345 = vmatpush2.bf16.msra.mxu1 %v11630_v57  ;;  %v11719_v56 = vcombine.high %v396_v25, %v400_v45  ;;  %v516_v4 = vld [vmem:[#allocation2 + $0xcd8] sm:$0xff] }
 0x373   :  { %7305 = vmatprep.subr.bf16.mxu0 %v11495_v29  ;;  %7346 = vmatprep.subr.bf16.mxu1 %v11623_v60  ;;  %v388_v60 = vld [vmem:[#allocation2 + $0x8d8] sm:$0xff] }
 0x374   :  { %v520_v61 = vld [vmem:[#allocation2 + $0xcf8] sm:$0xff] }
 0x375   :  { %v512_v5 = vld [vmem:[#allocation2 + $0xcb8] sm:$0xff]  ;;  %v11838_v8 = vcombine.low %v516_v4, %v520_v61 }
 0x376   :  { %7306 = vmatpush2.bf16.msra.mxu0 %v11494_v12  ;;  %7347 = vmatpush2.bf16.msra.mxu1 %v11622_v1  ;;  %v11839_v12 = vcombine.high %v516_v4, %v520_v61  ;;  %v380_v1 = vld [vmem:[#allocation2 + $0x898] sm:$0xff] }
 0x377   :  { %7357 = vmatprep.subr.bf16.mxu0 %v11743_v34  ;;  %7398 = vmatprep.subr.bf16.mxu1 %v11871_v3  ;;  %v384_v34 = vld [vmem:[#allocation2 + $0x8b8] sm:$0xff] }
 0x378   :  { %v508_v3 = vld [vmem:[#allocation2 + $0xc98] sm:$0xff]  ;;  %v11703_v9 = vcombine.high %v380_v1, %v384_v34  ;;  %v11702_v19 = vcombine.low %v380_v1, %v384_v34 }
 0x379   :  { %v7063_v22 = vpop.f32.mrf.mxu0  ;;  %7308 = vmatmul.mubr.bf16.vlgmr.msra.gmra.mxu0 %v13132_v16  ;;  %v7104_v33 = vpop.f32.mrf.mxu1  ;;  %7349 = vmatmul.mubr.bf16.vlgmr.msra.gmra.mxu1 %v13137_v20  ;;  %v11855_v16 = vcombine.high %v532_v23, %v536_v27  ;;  %v524_v20 = vld [vmem:[#allocation2 + $0xd18] sm:$0xff] }
 0x37a   :  { %v7064_v32 = vadd.f32 %v7063_v22, %v13322_v10  ;;  %7358 = vmatpush1.bf16.msra.mxu0 %v11742_v42  ;;  %7399 = vmatpush1.bf16.msra.mxu1 %v11870_v11  ;;  %v11847_v29 = vcombine.high %v524_v20, %v528_v59  ;;  %v11831_v42 = vcombine.high %v508_v3, %v512_v5  ;;  %v372_v11 = vld [vmem:[#allocation2 + $0x858] sm:$0xff] }
 0x37b   :  { %v7065_v62 = vpop.f32.mrf.mxu0  ;;  %7359 = vmatprep.subr.bf16.mxu0 %v11735_v13  ;;  %v7106_v41 = vpop.f32.mrf.mxu1  ;;  %7400 = vmatprep.subr.bf16.mxu1 %v11863_v15  ;;  %v376_v13 = vld [vmem:[#allocation2 + $0x878] sm:$0xff]  ;;  %v11830_v22 = vcombine.low %v508_v3, %v512_v5 }
 0x37c   :  { %v13331_v44 = vadd.f32 %v7104_v33, %v7064_v32  ;;  %v7066_v58 = vadd.f32 %v7065_v62, %v13326_v24  ;;  %7389 = vmatprep.mubr.bf16.mxu0 %v13142_v28  ;;  %7430 = vmatprep.mubr.bf16.mxu1 %v13145_v31  ;;  %v11854_v24 = vcombine.low %v532_v23, %v536_v27  ;;  %v392_v28 = vld [vmem:[#allocation2 + $0x8f8] sm:$0xff] }
 0x37d   :  { %v7067_v10 = vpop.f32.mrf.mxu0  ;;  %v7108_v47 = vpop.f32.mrf.mxu1  ;;  %v11846_v31 = vcombine.low %v524_v20, %v528_v59  ;;  %v11711_v63 = vcombine.high %v388_v60, %v392_v28  ;;  %v11710_v7 = vcombine.low %v388_v60, %v392_v28  ;;  %v500_v15 = vld [vmem:[#allocation2 + $0xc58] sm:$0xff]  ;;  %v11695_v23 = vcombine.high %v372_v11, %v376_v13 }
 0x37e   :  { %v13336_v0 = vadd.f32 %v7106_v41, %v7066_v58  ;;  %7360 = vmatpush1.bf16.msra.mxu0 %v11734_v53  ;;  %7401 = vmatpush1.bf16.msra.mxu1 %v11862_v35  ;;  %v504_v17 = vld [vmem:[#allocation2 + $0xc78] sm:$0xff]  ;;  %v11694_v35 = vcombine.low %v372_v11, %v376_v13 }
 0x37f   :  { %v7068_v52 = vpop.f32.mrf.mxu0  ;;  %7361 = vmatprep.subr.bf16.mxu0 %v11727_v43  ;;  %v7109_v57 = vpop.f32.mrf.mxu1  ;;  %7402 = vmatprep.subr.bf16.mxu1 %v11855_v16  ;;  %v11823_v27 = vcombine.high %v500_v15, %v504_v17  ;;  %v364_v32 = vld [vmem:[#allocation2 + $0x818] sm:$0xff]  ;;  %v11822_v43 = vcombine.low %v500_v15, %v504_v17 }
 0x380   :  { %v368_v33 = vld [vmem:[#allocation2 + $0x838] sm:$0xff] }
 0x381   :  { %v492_v53 = vld [vmem:[#allocation2 + $0xc18] sm:$0xff]  ;;  %v11687_v58 = vcombine.high %v364_v32, %v368_v33  ;;  %v11686_v20 = vcombine.low %v364_v32, %v368_v33 }
 0x382   :  { %7362 = vmatpush1.bf16.msra.mxu0 %v11726_v49  ;;  %7403 = vmatpush1.bf16.msra.mxu1 %v11854_v24  ;;  %v496_v62 = vld [vmem:[#allocation2 + $0xc38] sm:$0xff] }
 0x383   :  { %7363 = vmatprep.subr.bf16.mxu0 %v11719_v56  ;;  %7404 = vmatprep.subr.bf16.mxu1 %v11847_v29  ;;  %v11815_v41 = vcombine.high %v492_v53, %v496_v62  ;;  %v484_v16 = vld [vmem:[#allocation2 + $0xbd8] sm:$0xff]  ;;  %v11814_v59 = vcombine.low %v492_v53, %v496_v62 }
 0x384   :  { %v488_v25 = vld [vmem:[#allocation2 + $0xbf8] sm:$0xff] }
 0x385   :  { %v612_v45 = vld [vmem:[#allocation2 + $0xfd8] sm:$0xff]  ;;  %v11807_v47 = vcombine.high %v484_v16, %v488_v25  ;;  %v11806_v29 = vcombine.low %v484_v16, %v488_v25 }
 0x386   :  { %7364 = vmatpush1.bf16.msra.mxu0 %v11718_v21  ;;  %7405 = vmatpush1.bf16.msra.mxu1 %v11846_v31  ;;  %v616_v10 = vld [vmem:[#allocation2 + $0xff8] sm:$0xff] }
 0x387   :  { %7365 = vmatprep.subr.bf16.mxu0 %v11711_v63  ;;  %7406 = vmatprep.subr.bf16.mxu1 %v11839_v12  ;;  %v11935_v49 = vcombine.high %v612_v45, %v616_v10  ;;  %v476_v52 = vld [vmem:[#allocation2 + $0xb98] sm:$0xff]  ;;  %v11934_v60 = vcombine.low %v612_v45, %v616_v10 }
 0x388   :  { %v480_v24 = vld [vmem:[#allocation2 + $0xbb8] sm:$0xff] }
 0x389   :  { %v604_v56 = vld [vmem:[#allocation2 + $0xf98] sm:$0xff]  ;;  %v11799_v28 = vcombine.high %v476_v52, %v480_v24  ;;  %v11798_v12 = vcombine.low %v476_v52, %v480_v24 }
 0x38a   :  { %7366 = vmatpush1.bf16.msra.mxu0 %v11710_v7  ;;  %7407 = vmatpush1.bf16.msra.mxu1 %v11838_v8  ;;  %v608_v57 = vld [vmem:[#allocation2 + $0xfb8] sm:$0xff] }
 0x38b   :  { %7367 = vmatprep.subr.bf16.mxu0 %v11703_v9  ;;  %7408 = vmatprep.subr.bf16.mxu1 %v11831_v42  ;;  %v11927_v4 = vcombine.high %v604_v56, %v608_v57  ;;  %v468_v61 = vld [vmem:[#allocation2 + $0xb58] sm:$0xff]  ;;  %v11926_v1 = vcombine.low %v604_v56, %v608_v57 }
 0x38c   :  { %v472_v21 = vld [vmem:[#allocation2 + $0xb78] sm:$0xff] }
 0x38d   :  { %v596_v31 = vld [vmem:[#allocation2 + $0xf58] sm:$0xff]  ;;  %v11791_v34 = vcombine.high %v468_v61, %v472_v21  ;;  %v11790_v42 = vcombine.low %v468_v61, %v472_v21 }
 0x38e   :  { %7368 = vmatpush1.bf16.msra.mxu0 %v11702_v19  ;;  %7409 = vmatpush1.bf16.msra.mxu1 %v11830_v22  ;;  %v600_v63 = vld [vmem:[#allocation2 + $0xf78] sm:$0xff] }
 0x38f   :  { %7369 = vmatprep.subr.bf16.mxu0 %v11695_v23  ;;  %7410 = vmatprep.subr.bf16.mxu1 %v11823_v27  ;;  %v11919_v3 = vcombine.high %v596_v31, %v600_v63  ;;  %v460_v5 = vld [vmem:[#allocation2 + $0xb18] sm:$0xff]  ;;  %v11918_v11 = vcombine.low %v596_v31, %v600_v63 }
 0x390   :  { %v464_v7 = vld [vmem:[#allocation2 + $0xb38] sm:$0xff] }
 0x391   :  { %v588_v8 = vld [vmem:[#allocation2 + $0xf18] sm:$0xff]  ;;  %v11783_v13 = vcombine.high %v460_v5, %v464_v7  ;;  %v11782_v27 = vcombine.low %v460_v5, %v464_v7 }
 0x392   :  { %7370 = vmatpush1.bf16.msra.mxu0 %v11694_v35  ;;  %7411 = vmatpush1.bf16.msra.mxu1 %v11822_v43  ;;  %v592_v9 = vld [vmem:[#allocation2 + $0xf38] sm:$0xff] }
 0x393   :  { %7371 = vmatprep.subr.bf16.mxu0 %v11687_v58  ;;  %7412 = vmatprep.subr.bf16.mxu1 %v11815_v41  ;;  %v11911_v15 = vcombine.high %v588_v8, %v592_v9  ;;  %v452_v17 = vld [vmem:[#allocation2 + $0xad8] sm:$0xff]  ;;  %v11910_v32 = vcombine.low %v588_v8, %v592_v9 }
 0x394   :  { %v456_v19 = vld [vmem:[#allocation2 + $0xaf8] sm:$0xff] }
 0x395   :  { %v580_v22 = vld [vmem:[#allocation2 + $0xed8] sm:$0xff]  ;;  %v11775_v33 = vcombine.high %v452_v17, %v456_v19  ;;  %v11774_v41 = vcombine.low %v452_v17, %v456_v19 }
 0x396   :  { %7372 = vmatpush1.bf16.msra.mxu0 %v11686_v20  ;;  %7413 = vmatpush1.bf16.msra.mxu1 %v11814_v59  ;;  %v584_v23 = vld [vmem:[#allocation2 + $0xef8] sm:$0xff] }
 0x397   :  { %7373 = vmatprep.subr.bf16.mxu0 %v11807_v47  ;;  %7414 = vmatprep.subr.bf16.mxu1 %v11935_v49  ;;  %v11903_v53 = vcombine.high %v580_v22, %v584_v23  ;;  %v444_v62 = vld [vmem:[#allocation2 + $0xa98] sm:$0xff]  ;;  %v11902_v16 = vcombine.low %v580_v22, %v584_v23 }
 0x398   :  { %v448_v35 = vld [vmem:[#allocation2 + $0xab8] sm:$0xff] }
 0x399   :  { %v572_v43 = vld [vmem:[#allocation2 + $0xe98] sm:$0xff]  ;;  %v11767_v25 = vcombine.high %v444_v62, %v448_v35  ;;  %v11766_v49 = vcombine.low %v444_v62, %v448_v35 }
 0x39a   :  { %7374 = vmatpush2.bf16.msra.mxu0 %v11806_v29  ;;  %7415 = vmatpush2.bf16.msra.mxu1 %v11934_v60  ;;  %v576_v58 = vld [vmem:[#allocation2 + $0xeb8] sm:$0xff] }
 0x39b   :  { %7375 = vmatprep.subr.bf16.mxu0 %v11799_v28  ;;  %7416 = vmatprep.subr.bf16.mxu1 %v11927_v4  ;;  %v11895_v45 = vcombine.high %v572_v43, %v576_v58  ;;  %v436_v10 = vld [vmem:[#allocation2 + $0xa58] sm:$0xff]  ;;  %v11894_v52 = vcombine.low %v572_v43, %v576_v58 }
 0x39c   :  { %v440_v20 = vld [vmem:[#allocation2 + $0xa78] sm:$0xff] }
 0x39d   :  { %v564_v59 = vld [vmem:[#allocation2 + $0xe58] sm:$0xff]  ;;  %v11759_v24 = vcombine.high %v436_v10, %v440_v20  ;;  %v11758_v4 = vcombine.low %v436_v10, %v440_v20 }
 0x39e   :  { %7376 = vmatpush2.bf16.msra.mxu0 %v11798_v12  ;;  %7417 = vmatpush2.bf16.msra.mxu1 %v11926_v1  ;;  %v568_v47 = vld [vmem:[#allocation2 + $0xe78] sm:$0xff] }
 0x39f   :  { %7377 = vmatprep.subr.bf16.mxu0 %v11791_v34  ;;  %7418 = vmatprep.subr.bf16.mxu1 %v11919_v3  ;;  %v11887_v56 = vcombine.high %v564_v59, %v568_v47  ;;  %v428_v57 = vld [vmem:[#allocation2 + $0xa18] sm:$0xff]  ;;  %v11886_v61 = vcombine.low %v564_v59, %v568_v47 }
 0x3a0   :  { %v432_v29 = vld [vmem:[#allocation2 + $0xa38] sm:$0xff] }
 0x3a1   :  { %v556_v60 = vld [vmem:[#allocation2 + $0xe18] sm:$0xff]  ;;  %v11751_v21 = vcombine.high %v428_v57, %v432_v29  ;;  %v11750_v3 = vcombine.low %v428_v57, %v432_v29 }
 0x3a2   :  { %7378 = vmatpush2.bf16.msra.mxu0 %v11790_v42  ;;  %7419 = vmatpush2.bf16.msra.mxu1 %v11918_v11  ;;  %v560_v28 = vld [vmem:[#allocation2 + $0xe38] sm:$0xff] }
 0x3a3   :  { %7379 = vmatprep.subr.bf16.mxu0 %v11783_v13  ;;  %7420 = vmatprep.subr.bf16.mxu1 %v11911_v15  ;;  %v11879_v31 = vcombine.high %v556_v60, %v560_v28  ;;  %v676_v63 = vld [vmem:[#allocation2 + $0x11d8] sm:$0xff]  ;;  %v11878_v5 = vcombine.low %v556_v60, %v560_v28 }
 0x3a4   :  { %v680_v12 = vld [vmem:[#allocation2 + $0x11f8] sm:$0xff] }
 0x3a5   :  { %v804_v1 = vld [vmem:[#allocation2 + $0x15d8] sm:$0xff]  ;;  %v11999_v7 = vcombine.high %v676_v63, %v680_v12  ;;  %v11998_v15 = vcombine.low %v676_v63, %v680_v12 }
 0x3a6   :  { %7380 = vmatpush2.bf16.msra.mxu0 %v11782_v27  ;;  %7421 = vmatpush2.bf16.msra.mxu1 %v11910_v32  ;;  %v808_v34 = vld [vmem:[#allocation2 + $0x15f8] sm:$0xff] }
 0x3a7   :  { %7381 = vmatprep.subr.bf16.mxu0 %v11775_v33  ;;  %7422 = vmatprep.subr.bf16.mxu1 %v11903_v53  ;;  %v12127_v8 = vcombine.high %v804_v1, %v808_v34  ;;  %v668_v9 = vld [vmem:[#allocation2 + $0x1198] sm:$0xff]  ;;  %v12126_v17 = vcombine.low %v804_v1, %v808_v34 }
 0x3a8   :  { %v672_v42 = vld [vmem:[#allocation2 + $0x11b8] sm:$0xff] }
 0x3a9   :  { %v796_v11 = vld [vmem:[#allocation2 + $0x1598] sm:$0xff]  ;;  %v11991_v19 = vcombine.high %v668_v9, %v672_v42  ;;  %v11990_v35 = vcombine.low %v668_v9, %v672_v42 }
 0x3aa   :  { %7382 = vmatpush2.bf16.msra.mxu0 %v11774_v41  ;;  %7423 = vmatpush2.bf16.msra.mxu1 %v11902_v16  ;;  %v800_v13 = vld [vmem:[#allocation2 + $0x15b8] sm:$0xff] }
 0x3ab   :  { %7383 = vmatprep.subr.bf16.mxu0 %v11767_v25  ;;  %7424 = vmatprep.subr.bf16.mxu1 %v11895_v45  ;;  %v12119_v22 = vcombine.high %v796_v11, %v800_v13  ;;  %v660_v23 = vld [vmem:[#allocation2 + $0x1158] sm:$0xff]  ;;  %v12118_v58 = vcombine.low %v796_v11, %v800_v13 }
 0x3ac   :  { %v664_v27 = vld [vmem:[#allocation2 + $0x1178] sm:$0xff] }
 0x3ad   :  { %v788_v33 = vld [vmem:[#allocation2 + $0x1558] sm:$0xff]  ;;  %v11983_v41 = vcombine.high %v660_v23, %v664_v27  ;;  %v11982_v47 = vcombine.low %v660_v23, %v664_v27 }
 0x3ae   :  { %7384 = vmatpush2.bf16.msra.mxu0 %v11766_v49  ;;  %7425 = vmatpush2.bf16.msra.mxu1 %v11894_v52  ;;  %v792_v53 = vld [vmem:[#allocation2 + $0x1578] sm:$0xff] }
 0x3af   :  { %7385 = vmatprep.subr.bf16.mxu0 %v11759_v24  ;;  %7426 = vmatprep.subr.bf16.mxu1 %v11887_v56  ;;  %v12111_v25 = vcombine.high %v788_v33, %v792_v53  ;;  %v652_v45 = vld [vmem:[#allocation2 + $0x1118] sm:$0xff]  ;;  %v12110_v52 = vcombine.low %v788_v33, %v792_v53 }
 0x3b0   :  { %v780_v20 = vld [vmem:[#allocation2 + $0x1518] sm:$0xff] }
 0x3b1   :  { %v784_v59 = vld [vmem:[#allocation2 + $0x1538] sm:$0xff] }
 0x3b2   :  { %7386 = vmatpush2.bf16.msra.mxu0 %v11758_v4  ;;  %7427 = vmatpush2.bf16.msra.mxu1 %v11886_v61  ;;  %v12103_v57 = vcombine.high %v780_v20, %v784_v59  ;;  %v644_v29 = vld [vmem:[#allocation2 + $0x10d8] sm:$0xff] }
 0x3b3   :  { %7387 = vmatprep.subr.bf16.mxu0 %v11751_v21  ;;  %7428 = vmatprep.subr.bf16.mxu1 %v11879_v31  ;;  %v648_v60 = vld [vmem:[#allocation2 + $0x10f8] sm:$0xff] }
 0x3b4   :  { %v772_v28 = vld [vmem:[#allocation2 + $0x14d8] sm:$0xff]  ;;  %v11967_v61 = vcombine.high %v644_v29, %v648_v60  ;;  %v11966_v34 = vcombine.low %v644_v29, %v648_v60 }
 0x3b5   :  { %v636_v31 = vld [vmem:[#allocation2 + $0x1098] sm:$0xff] }
 0x3b6   :  { %7388 = vmatpush2.bf16.msra.mxu0 %v11750_v3  ;;  %7429 = vmatpush2.bf16.msra.mxu1 %v11878_v5  ;;  %v640_v63 = vld [vmem:[#allocation2 + $0x10b8] sm:$0xff] }
 0x3b7   :  { %7439 = vmatprep.subr.bf16.mxu0 %v11999_v7  ;;  %7480 = vmatprep.subr.bf16.mxu1 %v12127_v8  ;;  %v764_v12 = vld [vmem:[#allocation2 + $0x1498] sm:$0xff]  ;;  %v11959_v5 = vcombine.high %v636_v31, %v640_v63  ;;  %v11958_v13 = vcombine.low %v636_v31, %v640_v63 }
 0x3b8   :  { %v768_v1 = vld [vmem:[#allocation2 + $0x14b8] sm:$0xff] }
 0x3b9   :  { %v13338_v32 = vpop.f32.mrf.mxu0  ;;  %7390 = vmatmul.mubr.bf16.vlgmr.msra.gmra.mxu0 %v13156_v36  ;;  %v13341_v62 = vpop.f32.mrf.mxu1  ;;  %7431 = vmatmul.mubr.bf16.vlgmr.msra.gmra.mxu1 %v13161_v40  ;;  %v656_v36 = vld [vmem:[#allocation2 + $0x1138] sm:$0xff]  ;;  %v12087_v7 = vcombine.high %v764_v12, %v768_v1 }
 0x3ba   :  { %7440 = vmatpush1.bf16.msra.mxu0 %v11998_v15  ;;  %7481 = vmatpush1.bf16.msra.mxu1 %v12126_v17  ;;  %v11975_v24 = vcombine.high %v652_v45, %v656_v36  ;;  %v11974_v4 = vcombine.low %v652_v45, %v656_v36  ;;  %v628_v8 = vld [vmem:[#allocation2 + $0x1058] sm:$0xff]  ;;  %v12086_v15 = vcombine.low %v764_v12, %v768_v1 }
 0x3bb   :  { %v13344_v43 = vpop.f32.mrf.mxu0  ;;  %7441 = vmatprep.subr.bf16.mxu0 %v11991_v19  ;;  %v13346_v16 = vpop.f32.mrf.mxu1  ;;  %7482 = vmatprep.subr.bf16.mxu1 %v12119_v22  ;;  %v632_v9 = vld [vmem:[#allocation2 + $0x1078] sm:$0xff] }
 0x3bc   :  { %7471 = vmatprep.mubr.bf16.mxu0 %v13166_v48  ;;  %7512 = vmatprep.mubr.bf16.mxu1 %v13169_v51  ;;  %v776_v48 = vld [vmem:[#allocation2 + $0x14f8] sm:$0xff]  ;;  %v12102_v51 = vcombine.low %v780_v20, %v784_v59  ;;  %v11951_v17 = vcombine.high %v628_v8, %v632_v9  ;;  %v11950_v53 = vcombine.low %v628_v8, %v632_v9 }
 0x3bd   :  { %v7149_v10 = vpop.f32.mrf.mxu0  ;;  %v7190_v40 = vpop.f32.mrf.mxu1  ;;  %v12095_v21 = vcombine.high %v772_v28, %v776_v48  ;;  %v12094_v3 = vcombine.low %v772_v28, %v776_v48  ;;  %v756_v42 = vld [vmem:[#allocation2 + $0x1458] sm:$0xff] }
 0x3be   :  { %7442 = vmatpush1.bf16.msra.mxu0 %v11990_v35  ;;  %7483 = vmatpush1.bf16.msra.mxu1 %v12118_v58  ;;  %v760_v11 = vld [vmem:[#allocation2 + $0x1478] sm:$0xff] }
 0x3bf   :  { %v7150_v49 = vpop.f32.mrf.mxu0  ;;  %7443 = vmatprep.subr.bf16.mxu0 %v11983_v41  ;;  %v7191_v56 = vpop.f32.mrf.mxu1  ;;  %7484 = vmatprep.subr.bf16.mxu1 %v12111_v25  ;;  %v12079_v19 = vcombine.high %v756_v42, %v760_v11  ;;  %v620_v22 = vld [vmem:[#allocation2 + $0x1018] sm:$0xff]  ;;  %v12078_v35 = vcombine.low %v756_v42, %v760_v11 }
 0x3c0   :  { %v624_v23 = vld [vmem:[#allocation2 + $0x1038] sm:$0xff] }
 0x3c1   :  { %v748_v27 = vld [vmem:[#allocation2 + $0x1418] sm:$0xff]  ;;  %v11943_v58 = vcombine.high %v620_v22, %v624_v23  ;;  %v11942_v20 = vcombine.low %v620_v22, %v624_v23 }
 0x3c2   :  { %7444 = vmatpush1.bf16.msra.mxu0 %v11982_v47  ;;  %7485 = vmatpush1.bf16.msra.mxu1 %v12110_v52  ;;  %v752_v33 = vld [vmem:[#allocation2 + $0x1438] sm:$0xff] }
 0x3c3   :  { %7445 = vmatprep.subr.bf16.mxu0 %v11975_v24  ;;  %7486 = vmatprep.subr.bf16.mxu1 %v12103_v57  ;;  %v12071_v41 = vcombine.high %v748_v27, %v752_v33  ;;  %v740_v25 = vld [vmem:[#allocation2 + $0x13d8] sm:$0xff]  ;;  %v12070_v59 = vcombine.low %v748_v27, %v752_v33 }
 0x3c4   :  { %v744_v45 = vld [vmem:[#allocation2 + $0x13f8] sm:$0xff] }
 0x3c5   :  { %v868_v36 = vld [vmem:[#allocation2 + $0x17d8] sm:$0xff]  ;;  %v12063_v40 = vcombine.high %v740_v25, %v744_v45  ;;  %v12062_v57 = vcombine.low %v740_v25, %v744_v45 }
 0x3c6   :  { %7446 = vmatpush1.bf16.msra.mxu0 %v11974_v4  ;;  %7487 = vmatpush1.bf16.msra.mxu1 %v12102_v51  ;;  %v872_v10 = vld [vmem:[#allocation2 + $0x17f8] sm:$0xff] }
 0x3c7   :  { %7447 = vmatprep.subr.bf16.mxu0 %v11967_v61  ;;  %7488 = vmatprep.subr.bf16.mxu1 %v12095_v21  ;;  %v12191_v47 = vcombine.high %v868_v36, %v872_v10  ;;  %v732_v49 = vld [vmem:[#allocation2 + $0x1398] sm:$0xff]  ;;  %v12190_v29 = vcombine.low %v868_v36, %v872_v10 }
 0x3c8   :  { %v736_v52 = vld [vmem:[#allocation2 + $0x13b8] sm:$0xff] }
 0x3c9   :  { %v860_v24 = vld [vmem:[#allocation2 + $0x1798] sm:$0xff]  ;;  %v12055_v60 = vcombine.high %v732_v49, %v736_v52  ;;  %v12054_v21 = vcombine.low %v732_v49, %v736_v52 }
 0x3ca   :  { %7448 = vmatpush1.bf16.msra.mxu0 %v11966_v34  ;;  %7489 = vmatpush1.bf16.msra.mxu1 %v12094_v3  ;;  %v864_v56 = vld [vmem:[#allocation2 + $0x17b8] sm:$0xff] }
 0x3cb   :  { %7449 = vmatprep.subr.bf16.mxu0 %v11959_v5  ;;  %7490 = vmatprep.subr.bf16.mxu1 %v12087_v7  ;;  %v12183_v28 = vcombine.high %v860_v24, %v864_v56  ;;  %v724_v48 = vld [vmem:[#allocation2 + $0x1358] sm:$0xff]  ;;  %v12182_v31 = vcombine.low %v860_v24, %v864_v56 }
 0x3cc   :  { %v728_v4 = vld [vmem:[#allocation2 + $0x1378] sm:$0xff] }
 0x3cd   :  { %v852_v51 = vld [vmem:[#allocation2 + $0x1758] sm:$0xff]  ;;  %v12047_v63 = vcombine.high %v724_v48, %v728_v4  ;;  %v12046_v7 = vcombine.low %v724_v48, %v728_v4 }
 0x3ce   :  { %7450 = vmatpush1.bf16.msra.mxu0 %v11958_v13  ;;  %7491 = vmatpush1.bf16.msra.mxu1 %v12086_v15  ;;  %v856_v61 = vld [vmem:[#allocation2 + $0x1778] sm:$0xff] }
 0x3cf   :  { %7451 = vmatprep.subr.bf16.mxu0 %v11951_v17  ;;  %7492 = vmatprep.subr.bf16.mxu1 %v12079_v19  ;;  %v12175_v12 = vcombine.high %v852_v51, %v856_v61  ;;  %v716_v1 = vld [vmem:[#allocation2 + $0x1318] sm:$0xff]  ;;  %v12174_v8 = vcombine.low %v852_v51, %v856_v61 }
 0x3d0   :  { %v720_v34 = vld [vmem:[#allocation2 + $0x1338] sm:$0xff] }
 0x3d1   :  { %v844_v3 = vld [vmem:[#allocation2 + $0x1718] sm:$0xff]  ;;  %v12039_v9 = vcombine.high %v716_v1, %v720_v34  ;;  %v12038_v19 = vcombine.low %v716_v1, %v720_v34 }
 0x3d2   :  { %7452 = vmatpush1.bf16.msra.mxu0 %v11950_v53  ;;  %7493 = vmatpush1.bf16.msra.mxu1 %v12078_v35  ;;  %v848_v5 = vld [vmem:[#allocation2 + $0x1738] sm:$0xff] }
 0x3d3   :  { %7453 = vmatprep.subr.bf16.mxu0 %v11943_v58  ;;  %7494 = vmatprep.subr.bf16.mxu1 %v12071_v41  ;;  %v12167_v42 = vcombine.high %v844_v3, %v848_v5  ;;  %v708_v11 = vld [vmem:[#allocation2 + $0x12d8] sm:$0xff]  ;;  %v12166_v22 = vcombine.low %v844_v3, %v848_v5  ;;  %v7146_v3 = vadd.f32 %v13338_v32, %v13331_v44 }
 0x3d4   :  { %v712_v13 = vld [vmem:[#allocation2 + $0x12f8] sm:$0xff] }
 0x3d5   :  { %v836_v15 = vld [vmem:[#allocation2 + $0x16d8] sm:$0xff]  ;;  %v12031_v23 = vcombine.high %v708_v11, %v712_v13  ;;  %v12030_v41 = vcombine.low %v708_v11, %v712_v13  ;;  %v7148_v11 = vadd.f32 %v13344_v43, %v13336_v0 }
 0x3d6   :  { %7454 = vmatpush1.bf16.msra.mxu0 %v11942_v20  ;;  %7495 = vmatpush1.bf16.msra.mxu1 %v12070_v59  ;;  %v840_v17 = vld [vmem:[#allocation2 + $0x16f8] sm:$0xff] }
 0x3d7   :  { %7455 = vmatprep.subr.bf16.mxu0 %v12063_v40  ;;  %7496 = vmatprep.subr.bf16.mxu1 %v12191_v47  ;;  %v12159_v27 = vcombine.high %v836_v15, %v840_v17  ;;  %v700_v33 = vld [vmem:[#allocation2 + $0x1298] sm:$0xff]  ;;  %v12158_v25 = vcombine.low %v836_v15, %v840_v17 }
 0x3d8   :  { %v704_v53 = vld [vmem:[#allocation2 + $0x12b8] sm:$0xff] }
 0x3d9   :  { %v828_v35 = vld [vmem:[#allocation2 + $0x1698] sm:$0xff]  ;;  %v12023_v45 = vcombine.high %v700_v33, %v704_v53  ;;  %v12022_v47 = vcombine.low %v700_v33, %v704_v53  ;;  %v7189_v53 = vadd.f32 %v13346_v16, %v7148_v11 }
 0x3da   :  { %7456 = vmatpush2.bf16.msra.mxu0 %v12062_v57  ;;  %7497 = vmatpush2.bf16.msra.mxu1 %v12190_v29  ;;  %v832_v58 = vld [vmem:[#allocation2 + $0x16b8] sm:$0xff] }
 0x3db   :  { %7457 = vmatprep.subr.bf16.mxu0 %v12055_v60  ;;  %7498 = vmatprep.subr.bf16.mxu1 %v12183_v28  ;;  %v12151_v36 = vcombine.high %v828_v35, %v832_v58  ;;  %v692_v10 = vld [vmem:[#allocation2 + $0x1258] sm:$0xff]  ;;  %v12150_v49 = vcombine.low %v828_v35, %v832_v58 }
 0x3dc   :  { %v696_v20 = vld [vmem:[#allocation2 + $0x1278] sm:$0xff] }
 0x3dd   :  { %v820_v59 = vld [vmem:[#allocation2 + $0x1658] sm:$0xff]  ;;  %v12015_v52 = vcombine.high %v692_v10, %v696_v20  ;;  %v12014_v28 = vcombine.low %v692_v10, %v696_v20 }
 0x3de   :  { %7458 = vmatpush2.bf16.msra.mxu0 %v12054_v21  ;;  %7499 = vmatpush2.bf16.msra.mxu1 %v12182_v31  ;;  %v824_v40 = vld [vmem:[#allocation2 + $0x1678] sm:$0xff] }
 0x3df   :  { %7459 = vmatprep.subr.bf16.mxu0 %v12047_v63  ;;  %7500 = vmatprep.subr.bf16.mxu1 %v12175_v12  ;;  %v12143_v24 = vcombine.high %v820_v59, %v824_v40  ;;  %v684_v56 = vld [vmem:[#allocation2 + $0x1218] sm:$0xff]  ;;  %v12142_v48 = vcombine.low %v820_v59, %v824_v40 }
 0x3e0   :  { %v688_v57 = vld [vmem:[#allocation2 + $0x1238] sm:$0xff] }
 0x3e1   :  { %v812_v29 = vld [vmem:[#allocation2 + $0x1618] sm:$0xff]  ;;  %v12007_v4 = vcombine.high %v684_v56, %v688_v57  ;;  %v12006_v12 = vcombine.low %v684_v56, %v688_v57 }
 0x3e2   :  { %7460 = vmatpush2.bf16.msra.mxu0 %v12046_v7  ;;  %7501 = vmatpush2.bf16.msra.mxu1 %v12174_v8  ;;  %v816_v60 = vld [vmem:[#allocation2 + $0x1638] sm:$0xff] }
 0x3e3   :  { %7461 = vmatprep.subr.bf16.mxu0 %v12039_v9  ;;  %7502 = vmatprep.subr.bf16.mxu1 %v12167_v42  ;;  %v12135_v51 = vcombine.high %v812_v29, %v816_v60  ;;  %v932_v61 = vld [vmem:[#allocation2 + $0x19d8] sm:$0xff]  ;;  %v12134_v1 = vcombine.low %v812_v29, %v816_v60 }
 0x3e4   :  { %v936_v21 = vld [vmem:[#allocation2 + $0x19f8] sm:$0xff] }
 0x3e5   :  { %v1060_v31 = vld [vmem:[#allocation2 + $0x1dd8] sm:$0xff]  ;;  %v12255_v34 = vcombine.high %v932_v61, %v936_v21  ;;  %v12254_v13 = vcombine.low %v932_v61, %v936_v21 }
 0x3e6   :  { %7462 = vmatpush2.bf16.msra.mxu0 %v12038_v19  ;;  %7503 = vmatpush2.bf16.msra.mxu1 %v12166_v22  ;;  %v1064_v63 = vld [vmem:[#allocation2 + $0x1df8] sm:$0xff]  ;;  %v7187_v19 = vadd.f32 %v13341_v62, %v7146_v3 }
 0x3e7   :  { %7463 = vmatprep.subr.bf16.mxu0 %v12031_v23  ;;  %7504 = vmatprep.subr.bf16.mxu1 %v12159_v27  ;;  %v12383_v5 = vcombine.high %v1060_v31, %v1064_v63  ;;  %v924_v7 = vld [vmem:[#allocation2 + $0x1998] sm:$0xff]  ;;  %v12382_v15 = vcombine.low %v1060_v31, %v1064_v63 }
 0x3e8   :  { %v928_v8 = vld [vmem:[#allocation2 + $0x19b8] sm:$0xff] }
 0x3e9   :  { %v1052_v9 = vld [vmem:[#allocation2 + $0x1d98] sm:$0xff]  ;;  %v12247_v17 = vcombine.high %v924_v7, %v928_v8  ;;  %v12246_v35 = vcombine.low %v924_v7, %v928_v8 }
 0x3ea   :  { %7464 = vmatpush2.bf16.msra.mxu0 %v12030_v41  ;;  %7505 = vmatpush2.bf16.msra.mxu1 %v12158_v25  ;;  %v1056_v42 = vld [vmem:[#allocation2 + $0x1db8] sm:$0xff] }
 0x3eb   :  { %7465 = vmatprep.subr.bf16.mxu0 %v12023_v45  ;;  %7506 = vmatprep.subr.bf16.mxu1 %v12151_v36  ;;  %v12375_v22 = vcombine.high %v1052_v9, %v1056_v42  ;;  %v916_v44 = vld [vmem:[#allocation2 + $0x1958] sm:$0xff]  ;;  %v12374_v62 = vcombine.low %v1052_v9, %v1056_v42 }
 0x3ec   :  { %v920_v32 = vld [vmem:[#allocation2 + $0x1978] sm:$0xff] }
 0x3ed   :  { %v1044_v27 = vld [vmem:[#allocation2 + $0x1d58] sm:$0xff]  ;;  %v12239_v41 = vcombine.high %v916_v44, %v920_v32 }
 0x3ee   :  { %7466 = vmatpush2.bf16.msra.mxu0 %v12022_v47  ;;  %7507 = vmatpush2.bf16.msra.mxu1 %v12150_v49  ;;  %v1048_v33 = vld [vmem:[#allocation2 + $0x1d78] sm:$0xff] }
 0x3ef   :  { %7467 = vmatprep.subr.bf16.mxu0 %v12015_v52  ;;  %7508 = vmatprep.subr.bf16.mxu1 %v12143_v24  ;;  %v908_v10 = vld [vmem:[#allocation2 + $0x1918] sm:$0xff]  ;;  %v12238_v52 = vcombine.low %v916_v44, %v920_v32  ;;  %v12366_v56 = vcombine.low %v1044_v27, %v1048_v33 }
 0x3f0   :  { %v912_v20 = vld [vmem:[#allocation2 + $0x1938] sm:$0xff] }
 0x3f1   :  { %v1036_v59 = vld [vmem:[#allocation2 + $0x1d18] sm:$0xff]  ;;  %v12231_v57 = vcombine.high %v908_v10, %v912_v20 }
 0x3f2   :  { %7468 = vmatpush2.bf16.msra.mxu0 %v12014_v28  ;;  %7509 = vmatpush2.bf16.msra.mxu1 %v12142_v48  ;;  %v1040_v40 = vld [vmem:[#allocation2 + $0x1d38] sm:$0xff] }
 0x3f3   :  { %7469 = vmatprep.subr.bf16.mxu0 %v12007_v4  ;;  %7510 = vmatprep.subr.bf16.mxu1 %v12135_v51  ;;  %v12359_v60 = vcombine.high %v1036_v59, %v1040_v40  ;;  %v904_v28 = vld [vmem:[#allocation2 + $0x18f8] sm:$0xff]  ;;  %v12230_v51 = vcombine.low %v908_v10, %v912_v20  ;;  %v12358_v61 = vcombine.low %v1036_v59, %v1040_v40 }
 0x3f4   :  { %v1028_v48 = vld [vmem:[#allocation2 + $0x1cd8] sm:$0xff] }
 0x3f5   :  { %v1032_v4 = vld [vmem:[#allocation2 + $0x1cf8] sm:$0xff] }
 0x3f6   :  { %7470 = vmatpush2.bf16.msra.mxu0 %v12006_v12  ;;  %7511 = vmatpush2.bf16.msra.mxu1 %v12134_v1  ;;  %v12351_v31 = vcombine.high %v1028_v48, %v1032_v4  ;;  %v892_v63 = vld [vmem:[#allocation2 + $0x1898] sm:$0xff] }
 0x3f7   :  { %7521 = vmatprep.subr.bf16.mxu0 %v12255_v34  ;;  %7562 = vmatprep.subr.bf16.mxu1 %v12383_v5  ;;  %v896_v12 = vld [vmem:[#allocation2 + $0x18b8] sm:$0xff]  ;;  %v12350_v5 = vcombine.low %v1028_v48, %v1032_v4 }
 0x3f8   :  { %v1020_v1 = vld [vmem:[#allocation2 + $0x1c98] sm:$0xff]  ;;  %v12215_v7 = vcombine.high %v892_v63, %v896_v12 }
 0x3f9   :  { %v7227_v23 = vpop.f32.mrf.mxu0  ;;  %7472 = vmatmul.mubr.bf16.vlgmr.msra.gmra.mxu0 %v13180_v2  ;;  %v7268_v43 = vpop.f32.mrf.mxu1  ;;  %7513 = vmatmul.mubr.bf16.vlgmr.msra.gmra.mxu1 %v13185_v6  ;;  %v12367_v2 = vcombine.high %v1044_v27, %v1048_v33  ;;  %v1024_v34 = vld [vmem:[#allocation2 + $0x1cb8] sm:$0xff] }
 0x3fa   :  { %v7228_v0 = vadd.f32 %v7227_v23, %v7187_v19  ;;  %7522 = vmatpush1.bf16.msra.mxu0 %v12254_v13  ;;  %7563 = vmatpush1.bf16.msra.mxu1 %v12382_v15  ;;  %v12343_v8 = vcombine.high %v1020_v1, %v1024_v34  ;;  %v884_v9 = vld [vmem:[#allocation2 + $0x1858] sm:$0xff]  ;;  %v12214_v15 = vcombine.low %v892_v63, %v896_v12 }
 0x3fb   :  { %v7229_v58 = vpop.f32.mrf.mxu0  ;;  %7523 = vmatprep.subr.bf16.mxu0 %v12247_v17  ;;  %v7270_v36 = vpop.f32.mrf.mxu1  ;;  %7564 = vmatprep.subr.bf16.mxu1 %v12375_v22  ;;  %v888_v42 = vld [vmem:[#allocation2 + $0x1878] sm:$0xff]  ;;  %v12342_v17 = vcombine.low %v1020_v1, %v1024_v34 }
 0x3fc   :  { %v7269_v25 = vadd.f32 %v7268_v43, %v7228_v0  ;;  %v7230_v45 = vadd.f32 %v7229_v58, %v7189_v53  ;;  %7553 = vmatprep.mubr.bf16.mxu0 %v13190_v14  ;;  %7594 = vmatprep.mubr.bf16.mxu1 %v13193_v18  ;;  %v900_v18 = vld [vmem:[#allocation2 + $0x18d8] sm:$0xff]  ;;  %v12207_v19 = vcombine.high %v884_v9, %v888_v42 }
 0x3fd   :  { %v7231_v16 = vpop.f32.mrf.mxu0  ;;  %v7272_v49 = vpop.f32.mrf.mxu1  ;;  %v12223_v21 = vcombine.high %v900_v18, %v904_v28  ;;  %v12222_v3 = vcombine.low %v900_v18, %v904_v28  ;;  %v1012_v11 = vld [vmem:[#allocation2 + $0x1c58] sm:$0xff]  ;;  %v12206_v33 = vcombine.low %v884_v9, %v888_v42 }
 0x3fe   :  { %v7607_v6 = vmax.f32 %v7269_v25, 0.0  ;;  %v7271_v47 = vadd.f32 %v7270_v36, %v7230_v45  ;;  %7524 = vmatpush1.bf16.msra.mxu0 %v12246_v35  ;;  %7565 = vmatpush1.bf16.msra.mxu1 %v12374_v62  ;;  %v1016_v13 = vld [vmem:[#allocation2 + $0x1c78] sm:$0xff] }
 0x3ff   :  { %v7232_v24 = vpop.f32.mrf.mxu0  ;;  %7525 = vmatprep.subr.bf16.mxu0 %v12239_v41  ;;  %v7273_v29 = vpop.f32.mrf.mxu1  ;;  %7566 = vmatprep.subr.bf16.mxu1 %v12367_v2  ;;  %v12335_v22 = vcombine.high %v1012_v11, %v1016_v13  ;;  %v876_v44 = vld [vmem:[#allocation2 + $0x1818] sm:$0xff]  ;;  %v12334_v53 = vcombine.low %v1012_v11, %v1016_v13 }
 0x400   :  { %7615 = vst [vmem:[%s13569_s5 + $0x20] sm:$0xff] %v7607_v6  ;;  %v13363_v14 = vmax.f32 %v7271_v47, 0.0  ;;  %v880_v32 = vld [vmem:[#allocation2 + $0x1838] sm:$0xff] }
 0x401   :  { %v1004_v23 = vld [vmem:[#allocation2 + $0x1c18] sm:$0xff]  ;;  %v12199_v0 = vcombine.high %v876_v44, %v880_v32  ;;  %v12198_v25 = vcombine.low %v876_v44, %v880_v32 }
 0x402   :  { %7616 = vst [vmem:[%s13569_s5 + $0x28] sm:$0xff] %v13363_v14  ;;  %7526 = vmatpush1.bf16.msra.mxu0 %v12238_v52  ;;  %7567 = vmatpush1.bf16.msra.mxu1 %v12366_v56  ;;  %v1008_v27 = vld [vmem:[#allocation2 + $0x1c38] sm:$0xff] }
 0x403   :  { %7527 = vmatprep.subr.bf16.mxu0 %v12231_v57  ;;  %7568 = vmatprep.subr.bf16.mxu1 %v12359_v60  ;;  %v12327_v43 = vcombine.high %v1004_v23, %v1008_v27  ;;  %v996_v35 = vld [vmem:[#allocation2 + $0x1bd8] sm:$0xff]  ;;  %v12326_v45 = vcombine.low %v1004_v23, %v1008_v27 }
 0x404   :  { %v1000_v58 = vld [vmem:[#allocation2 + $0x1bf8] sm:$0xff] }
 0x405   :  { %v1124_v62 = vld [vmem:[#allocation2 + $0x1fd8] sm:$0xff]  ;;  %v12319_v36 = vcombine.high %v996_v35, %v1000_v58  ;;  %v12318_v40 = vcombine.low %v996_v35, %v1000_v58 }
 0x406   :  { %7528 = vmatpush1.bf16.msra.mxu0 %v12230_v51  ;;  %7569 = vmatpush1.bf16.msra.mxu1 %v12358_v61  ;;  %v1128_v41 = vld [vmem:[#allocation2 + $0x1ff8] sm:$0xff] }
 0x407   :  { %7529 = vmatprep.subr.bf16.mxu0 %v12223_v21  ;;  %7570 = vmatprep.subr.bf16.mxu1 %v12351_v31  ;;  %v12447_v2 = vcombine.high %v1124_v62, %v1128_v41  ;;  %v988_v10 = vld [vmem:[#allocation2 + $0x1b98] sm:$0xff]  ;;  %v12446_v6 = vcombine.low %v1124_v62, %v1128_v41 }
 0x408   :  { %v992_v20 = vld [vmem:[#allocation2 + $0x1bb8] sm:$0xff] }
 0x409   :  { %v1116_v16 = vld [vmem:[#allocation2 + $0x1f98] sm:$0xff]  ;;  %v12311_v47 = vcombine.high %v988_v10, %v992_v20  ;;  %v12310_v29 = vcombine.low %v988_v10, %v992_v20 }
 0x40a   :  { %7530 = vmatpush1.bf16.msra.mxu0 %v12222_v3  ;;  %7571 = vmatpush1.bf16.msra.mxu1 %v12350_v5  ;;  %v1120_v59 = vld [vmem:[#allocation2 + $0x1fb8] sm:$0xff] }
 0x40b   :  { %7531 = vmatprep.subr.bf16.mxu0 %v12215_v7  ;;  %7572 = vmatprep.subr.bf16.mxu1 %v12343_v8  ;;  %v12439_v49 = vcombine.high %v1116_v16, %v1120_v59  ;;  %v980_v52 = vld [vmem:[#allocation2 + $0x1b58] sm:$0xff]  ;;  %v12438_v60 = vcombine.low %v1116_v16, %v1120_v59  ;;  %v7683_v16 = vld [vmem:[#allocation6 + $0x1c0] sm:$0xff] }
 0x40c   :  { %v984_v24 = vld [vmem:[#allocation2 + $0x1b78] sm:$0xff]  ;;  %v7687_v59 = vld [vmem:[#allocation6 + $0x1e0] sm:$0xff] }
 0x40d   :  { %v1108_v56 = vld [vmem:[#allocation2 + $0x1f58] sm:$0xff]  ;;  %v12303_v18 = vcombine.high %v980_v52, %v984_v24  ;;  %v12302_v21 = vcombine.low %v980_v52, %v984_v24  ;;  %v12505_v24 = vcombine.high %v7683_v16, %v7687_v59 }
 0x40e   :  { %7532 = vmatpush1.bf16.msra.mxu0 %v12214_v15  ;;  %7573 = vmatpush1.bf16.msra.mxu1 %v12342_v17  ;;  %v1112_v57 = vld [vmem:[#allocation2 + $0x1f78] sm:$0xff] }
 0x40f   :  { %7533 = vmatprep.subr.bf16.mxu0 %v12207_v19  ;;  %7574 = vmatprep.subr.bf16.mxu1 %v12335_v22  ;;  %v12431_v28 = vcombine.high %v1108_v56, %v1112_v57  ;;  %v972_v48 = vld [vmem:[#allocation2 + $0x1b18] sm:$0xff]  ;;  %v12430_v31 = vcombine.low %v1108_v56, %v1112_v57  ;;  %v1161_v57 = vsub.s32 7, %v13198_v26 }
 0x410   :  { %v976_v4 = vld [vmem:[#allocation2 + $0x1b38] sm:$0xff] }
 0x411   :  { %v1100_v51 = vld [vmem:[#allocation2 + $0x1f18] sm:$0xff]  ;;  %v12295_v63 = vcombine.high %v972_v48, %v976_v4  ;;  %v12294_v7 = vcombine.low %v972_v48, %v976_v4  ;;  %v12504_v48 = vcombine.low %v7683_v16, %v7687_v59  ;;  %v7803_v4 = vld [vmem:[#allocation6 + $0x580] sm:$0xff] }
 0x412   :  { %7534 = vmatpush1.bf16.msra.mxu0 %v12206_v33  ;;  %7575 = vmatpush1.bf16.msra.mxu1 %v12334_v53  ;;  %v1104_v61 = vld [vmem:[#allocation2 + $0x1f38] sm:$0xff]  ;;  %v7783_v16 = vld [vmem:[#allocation6 + $0x4e0] sm:$0xff] }
 0x413   :  { %7535 = vmatprep.subr.bf16.mxu0 %v12199_v0  ;;  %7576 = vmatprep.subr.bf16.mxu1 %v12327_v43  ;;  %v12423_v12 = vcombine.high %v1100_v51, %v1104_v61  ;;  %v964_v1 = vld [vmem:[#allocation2 + $0x1ad8] sm:$0xff]  ;;  %v12422_v8 = vcombine.low %v1100_v51, %v1104_v61  ;;  %v7807_v51 = vld [vmem:[#allocation6 + $0x5a0] sm:$0xff] }
 0x414   :  { %v968_v34 = vld [vmem:[#allocation2 + $0x1af8] sm:$0xff] }
 0x415   :  { %v1092_v3 = vld [vmem:[#allocation2 + $0x1ed8] sm:$0xff]  ;;  %v12287_v9 = vcombine.high %v964_v1, %v968_v34  ;;  %v12286_v19 = vcombine.low %v964_v1, %v968_v34  ;;  %v12969_v1 = vld [vmem:[%s13569_s5 + $0x8] sm:$0xff] }
 0x416   :  { %7536 = vmatpush1.bf16.msra.mxu0 %v12198_v25  ;;  %7577 = vmatpush1.bf16.msra.mxu1 %v12326_v45  ;;  %v1096_v5 = vld [vmem:[#allocation2 + $0x1ef8] sm:$0xff]  ;;  %v13378_v34 = vpack.c.bf16 %v12969_v1, %v12969_v1 }
 0x417   :  { %7537 = vmatprep.subr.bf16.mxu0 %v12319_v36  ;;  %7578 = vmatprep.subr.bf16.mxu1 %v12447_v2  ;;  %v12415_v42 = vcombine.high %v1092_v3, %v1096_v5  ;;  %v956_v11 = vld [vmem:[#allocation2 + $0x1a98] sm:$0xff]  ;;  %v12414_v22 = vcombine.low %v1092_v3, %v1096_v5  ;;  %v12625_v5 = vcombine.high %v7803_v4, %v7807_v51 }
 0x418   :  { %v960_v13 = vld [vmem:[#allocation2 + $0x1ab8] sm:$0xff] }
 0x419   :  { %v1084_v15 = vld [vmem:[#allocation2 + $0x1e98] sm:$0xff]  ;;  %v12279_v44 = vcombine.high %v956_v11, %v960_v13  ;;  %v12278_v0 = vcombine.low %v956_v11, %v960_v13 }
 0x41a   :  { %7538 = vmatpush2.bf16.msra.mxu0 %v12318_v40  ;;  %7579 = vmatpush2.bf16.msra.mxu1 %v12446_v6  ;;  %v1088_v17 = vld [vmem:[#allocation2 + $0x1eb8] sm:$0xff]  ;;  %v7811_v40 = vld [vmem:[#allocation6 + $0x5c0] sm:$0xff] }
 0x41b   :  { %7539 = vmatprep.subr.bf16.mxu0 %v12311_v47  ;;  %7580 = vmatprep.subr.bf16.mxu1 %v12439_v49  ;;  %v12407_v32 = vcombine.high %v1084_v15, %v1088_v17  ;;  %v948_v23 = vld [vmem:[#allocation2 + $0x1a58] sm:$0xff]  ;;  %v12406_v43 = vcombine.low %v1084_v15, %v1088_v17  ;;  %v7815_v6 = vld [vmem:[#allocation6 + $0x5e0] sm:$0xff]  ;;  %v1157_v49 = vsub.s32 6, %v13198_v26 }
 0x41c   :  { %v952_v27 = vld [vmem:[#allocation2 + $0x1a78] sm:$0xff]  ;;  %v12633_v56 = vcombine.high %v7811_v40, %v7815_v6  ;;  %v12632_v61 = vcombine.low %v7811_v40, %v7815_v6 }
 0x41d   :  { %v1076_v33 = vld [vmem:[#allocation2 + $0x1e58] sm:$0xff]  ;;  %v12271_v35 = vcombine.high %v948_v23, %v952_v27  ;;  %v12270_v36 = vcombine.low %v948_v23, %v952_v27  ;;  %v7659_v27 = vld [vmem:[#allocation6 + $0x100] sm:$0xff] }
 0x41e   :  { %7540 = vmatpush2.bf16.msra.mxu0 %v12310_v29  ;;  %7581 = vmatpush2.bf16.msra.mxu1 %v12438_v60  ;;  %v1080_v53 = vld [vmem:[#allocation2 + $0x1e78] sm:$0xff]  ;;  %v7675_v29 = vld [vmem:[#allocation6 + $0x180] sm:$0xff] }
 0x41f   :  { %7541 = vmatprep.subr.bf16.mxu0 %v12303_v18  ;;  %7582 = vmatprep.subr.bf16.mxu1 %v12431_v28  ;;  %v12399_v58 = vcombine.high %v1076_v33, %v1080_v53  ;;  %v940_v62 = vld [vmem:[#allocation2 + $0x1a18] sm:$0xff]  ;;  %v12398_v2 = vcombine.low %v1076_v33, %v1080_v53  ;;  %v7679_v60 = vld [vmem:[#allocation6 + $0x1a0] sm:$0xff]  ;;  %v12968_v18 = vld [vmem:[#allocation4] sm:$0xff] }
 0x420   :  { %v944_v41 = vld [vmem:[#allocation2 + $0x1a38] sm:$0xff]  ;;  %v1158_v28 = vrot.slane %v12968_v18, %v1157_v49  ;;  %v12496_v15 = vcombine.low %v7675_v29, %v7679_v60  ;;  %v7663_v33 = vld [vmem:[#allocation6 + $0x120] sm:$0xff] }
 0x421   :  { %v1068_v25 = vld [vmem:[#allocation2 + $0x1e18] sm:$0xff]  ;;  %v12263_v10 = vcombine.high %v940_v62, %v944_v41  ;;  %v12262_v47 = vcombine.low %v940_v62, %v944_v41  ;;  %v12480_v59 = vcombine.low %v7659_v27, %v7663_v33 }
 0x422   :  { %7542 = vmatpush2.bf16.msra.mxu0 %v12302_v21  ;;  %7583 = vmatpush2.bf16.msra.mxu1 %v12430_v31  ;;  %v1072_v45 = vld [vmem:[#allocation2 + $0x1e38] sm:$0xff]  ;;  %v1162_v21 = vrot.slane %v12968_v18, %v1161_v57  ;;  %v12497_v31 = vcombine.high %v7675_v29, %v7679_v60  ;;  %v7775_v29 = vld [vmem:[#allocation6 + $0x4a0] sm:$0xff] }
 0x423   :  { %7543 = vmatprep.subr.bf16.mxu0 %v12295_v63  ;;  %7584 = vmatprep.subr.bf16.mxu1 %v12423_v12  ;;  %v12391_v20 = vcombine.high %v1068_v25, %v1072_v45  ;;  %v12390_v52 = vcombine.low %v1068_v25, %v1072_v45  ;;  %v7667_v63 = vld [vmem:[#allocation6 + $0x140] sm:$0xff]  ;;  %v12481_v25 = vcombine.high %v7659_v27, %v7663_v33 }
 0x424   :  { %v7671_v12 = vld [vmem:[#allocation6 + $0x160] sm:$0xff] }
 0x426   :  { %7544 = vmatpush2.bf16.msra.mxu0 %v12294_v7  ;;  %7585 = vmatpush2.bf16.msra.mxu1 %v12422_v8  ;;  %v7795_v7 = vld [vmem:[#allocation6 + $0x540] sm:$0xff] }
 0x427   :  { %7545 = vmatprep.subr.bf16.mxu0 %v12287_v9  ;;  %7586 = vmatprep.subr.bf16.mxu1 %v12415_v42  ;;  %v7799_v8 = vld [vmem:[#allocation6 + $0x560] sm:$0xff]  ;;  %v12970_v9 = vld [vmem:[%s13569_s5 + $0x18] sm:$0xff] }
 0x428   :  { %v13384_v42 = vpack.c.bf16 %v12970_v9, %v12970_v9  ;;  %v12617_v23 = vcombine.high %v7795_v7, %v7799_v8  ;;  %v12616_v41 = vcombine.low %v7795_v7, %v7799_v8  ;;  %v7755_v7 = vld [vmem:[#allocation6 + $0x400] sm:$0xff] }
 0x429   :  { %v7759_v8 = vld [vmem:[#allocation6 + $0x420] sm:$0xff] }
 0x42a   :  { %7546 = vmatpush2.bf16.msra.mxu0 %v12286_v19  ;;  %7587 = vmatpush2.bf16.msra.mxu1 %v12414_v22  ;;  %v12489_v19 = vcombine.high %v7667_v63, %v7671_v12 }
 0x42b   :  { %7547 = vmatprep.subr.bf16.mxu0 %v12279_v44  ;;  %7588 = vmatprep.subr.bf16.mxu1 %v12407_v32 }
 0x42e   :  { %7548 = vmatpush2.bf16.msra.mxu0 %v12278_v0  ;;  %7589 = vmatpush2.bf16.msra.mxu1 %v12406_v43  ;;  %v7791_v0 = vld [vmem:[#allocation6 + $0x520] sm:$0xff] }
 0x42f   :  { %7549 = vmatprep.subr.bf16.mxu0 %v12271_v35  ;;  %7590 = vmatprep.subr.bf16.mxu1 %v12399_v58  ;;  %v12488_v58 = vcombine.low %v7667_v63, %v7671_v12 }
 0x432   :  { %7550 = vmatpush2.bf16.msra.mxu0 %v12270_v36  ;;  %7591 = vmatpush2.bf16.msra.mxu1 %v12398_v2  ;;  %v7651_v2 = vld [vmem:[#allocation6 + $0xc0] sm:$0xff] }
 0x433   :  { %7551 = vmatprep.subr.bf16.mxu0 %v12263_v10  ;;  %7592 = vmatprep.subr.bf16.mxu1 %v12391_v20  ;;  %v7655_v10 = vld [vmem:[#allocation6 + $0xe0] sm:$0xff] }
 0x434   :  { %v7779_v20 = vld [vmem:[#allocation6 + $0x4c0] sm:$0xff]  ;;  %v12473_v6 = vcombine.high %v7651_v2, %v7655_v10  ;;  %v12472_v60 = vcombine.low %v7651_v2, %v7655_v10 }
 0x435   :  { %v12600_v18 = vcombine.low %v7779_v20, %v7783_v16  ;;  %v7859_v2 = vld [vmem:[#allocation6 + $0x740] sm:$0xff] }
 0x436   :  { %7552 = vmatpush2.bf16.msra.mxu0 %v12262_v47  ;;  %7593 = vmatpush2.bf16.msra.mxu1 %v12390_v52  ;;  %v12601_v47 = vcombine.high %v7779_v20, %v7783_v16  ;;  %v7643_v52 = vld [vmem:[#allocation6 + $0x80] sm:$0xff] }
 0x437   :  { %10741 = vmatprep.subr.bf16.mxu0 %v12505_v24  ;;  %10782 = vmatprep.subr.bf16.mxu1 %v12633_v56  ;;  %v7647_v24 = vld [vmem:[#allocation6 + $0xa0] sm:$0xff] }
 0x438   :  { %v7771_v56 = vld [vmem:[#allocation6 + $0x480] sm:$0xff] }
 0x439   :  { %v7309_v3 = vpop.f32.mrf.mxu0  ;;  %7554 = vmatmul.mubr.bf16.vlgmr.msra.gmra.mxu0 %v13208_v50  ;;  %v7350_v13 = vpop.f32.mrf.mxu1  ;;  %7595 = vmatmul.mubr.bf16.vlgmr.msra.gmra.mxu1 %v13212_v55  ;;  %v12624_v50 = vcombine.low %v7803_v4, %v7807_v51  ;;  %v7787_v55 = vld [vmem:[#allocation6 + $0x500] sm:$0xff]  ;;  %v12592_v63 = vcombine.low %v7771_v56, %v7775_v29 }
 0x43a   :  { %v7310_v11 = vadd.f32 %v7309_v3, %v1158_v28  ;;  %10742 = vmatpush1.bf16.msra.mxu0 %v12504_v48  ;;  %10773 = vmatprep.mubr.bf16.mxu0 %v13378_v34  ;;  %v12609_v36 = vcombine.high %v7787_v55, %v7791_v0  ;;  %v12608_v40 = vcombine.low %v7787_v55, %v7791_v0  ;;  %v7635_v4 = vld [vmem:[#allocation6 + $0x40] sm:$0xff] }
 0x43b   :  { %10783 = vmatpush1.bf16.msra.mxu1 %v12632_v61  ;;  %v7311_v17 = vpop.f32.mrf.mxu0  ;;  %10814 = vmatprep.mubr.bf16.mxu1 %v13384_v42  ;;  %v7352_v32 = vpop.f32.mrf.mxu1  ;;  %v12465_v28 = vcombine.high %v7643_v52, %v7647_v24  ;;  %v12593_v48 = vcombine.high %v7771_v56, %v7775_v29  ;;  %v7639_v51 = vld [vmem:[#allocation6 + $0x60] sm:$0xff] }
 0x43c   :  { %v13388_v22 = vadd.f32 %v7350_v13, %v7310_v11  ;;  %v7312_v44 = vadd.f32 %v7311_v17, %v1162_v21  ;;  %10743 = vmatprep.subr.bf16.mxu0 %v12497_v31  ;;  %10784 = vmatprep.subr.bf16.mxu1 %v12625_v5  ;;  %v7763_v61 = vld [vmem:[#allocation6 + $0x440] sm:$0xff]  ;;  %v12464_v31 = vcombine.low %v7643_v52, %v7647_v24 }
 0x43d   :  { %v7313_v53 = vpop.f32.mrf.mxu0  ;;  %v7354_v35 = vpop.f32.mrf.mxu1  ;;  %v7767_v21 = vld [vmem:[#allocation6 + $0x460] sm:$0xff]  ;;  %v12457_v12 = vcombine.high %v7635_v4, %v7639_v51  ;;  %v12456_v9 = vcombine.low %v7635_v4, %v7639_v51 }
 0x43e   :  { %v13391_v43 = vadd.f32 %v7352_v32, %v7312_v44  ;;  %10744 = vmatpush1.bf16.msra.mxu0 %v12496_v15  ;;  %v12585_v1 = vcombine.high %v7763_v61, %v7767_v21  ;;  %v7627_v3 = vld [vmem:[#allocation6] sm:$0xff]  ;;  %v12584_v11 = vcombine.low %v7763_v61, %v7767_v21  ;;  %v12577_v15 = vcombine.high %v7755_v7, %v7759_v8 }
 0x43f   :  { %10785 = vmatpush1.bf16.msra.mxu1 %v12624_v50  ;;  %v7314_v62 = vpop.f32.mrf.mxu0  ;;  %10745 = vmatprep.subr.bf16.mxu0 %v12489_v19  ;;  %v7355_v45 = vpop.f32.mrf.mxu1  ;;  %v7631_v5 = vld [vmem:[#allocation6 + $0x20] sm:$0xff] }
 0x440   :  { %10786 = vmatprep.subr.bf16.mxu1 %v12617_v23  ;;  %v12449_v13 = vcombine.high %v7627_v3, %v7631_v5  ;;  %v7747_v17 = vld [vmem:[#allocation6 + $0x3c0] sm:$0xff]  ;;  %v12448_v32 = vcombine.low %v7627_v3, %v7631_v5  ;;  %v12576_v23 = vcombine.low %v7755_v7, %v7759_v8 }
 0x441   :  { %v7751_v50 = vld [vmem:[#allocation6 + $0x3e0] sm:$0xff] }
 0x442   :  { %10746 = vmatpush1.bf16.msra.mxu0 %v12488_v58  ;;  %v7875_v19 = vld [vmem:[#allocation6 + $0x7c0] sm:$0xff]  ;;  %v12569_v27 = vcombine.high %v7747_v17, %v7751_v50  ;;  %v12568_v58 = vcombine.low %v7747_v17, %v7751_v50 }
 0x443   :  { %10787 = vmatpush1.bf16.msra.mxu1 %v12616_v41  ;;  %10747 = vmatprep.subr.bf16.mxu0 %v12481_v25  ;;  %v7879_v44 = vld [vmem:[#allocation6 + $0x7e0] sm:$0xff] }
 0x444   :  { %10788 = vmatprep.subr.bf16.mxu1 %v12609_v36  ;;  %v12697_v33 = vcombine.high %v7875_v19, %v7879_v44  ;;  %v7739_v53 = vld [vmem:[#allocation6 + $0x380] sm:$0xff]  ;;  %v12696_v62 = vcombine.low %v7875_v19, %v7879_v44 }
 0x445   :  { %v7743_v55 = vld [vmem:[#allocation6 + $0x3a0] sm:$0xff] }
 0x446   :  { %10748 = vmatpush1.bf16.msra.mxu0 %v12480_v59  ;;  %v7867_v0 = vld [vmem:[#allocation6 + $0x780] sm:$0xff]  ;;  %v12561_v41 = vcombine.high %v7739_v53, %v7743_v55  ;;  %v12560_v20 = vcombine.low %v7739_v53, %v7743_v55 }
 0x447   :  { %10789 = vmatpush1.bf16.msra.mxu1 %v12608_v40  ;;  %10749 = vmatprep.subr.bf16.mxu0 %v12473_v6  ;;  %v7871_v35 = vld [vmem:[#allocation6 + $0x7a0] sm:$0xff] }
 0x448   :  { %10790 = vmatprep.subr.bf16.mxu1 %v12601_v47  ;;  %v12689_v25 = vcombine.high %v7867_v0, %v7871_v35  ;;  %v7731_v45 = vld [vmem:[#allocation6 + $0x340] sm:$0xff]  ;;  %v12688_v16 = vcombine.low %v7867_v0, %v7871_v35 }
 0x449   :  { %v7735_v36 = vld [vmem:[#allocation6 + $0x360] sm:$0xff] }
 0x44a   :  { %10750 = vmatpush1.bf16.msra.mxu0 %v12472_v60  ;;  %v7863_v10 = vld [vmem:[#allocation6 + $0x760] sm:$0xff]  ;;  %v12553_v59 = vcombine.high %v7731_v45, %v7735_v36  ;;  %v12552_v56 = vcombine.low %v7731_v45, %v7735_v36 }
 0x44b   :  { %10791 = vmatpush1.bf16.msra.mxu1 %v12600_v18  ;;  %10751 = vmatprep.subr.bf16.mxu0 %v12465_v28  ;;  %v12681_v40 = vcombine.high %v7859_v2, %v7863_v10  ;;  %v7723_v6 = vld [vmem:[#allocation6 + $0x300] sm:$0xff]  ;;  %v12680_v29 = vcombine.low %v7859_v2, %v7863_v10 }
 0x44c   :  { %10792 = vmatprep.subr.bf16.mxu1 %v12593_v48  ;;  %v7727_v47 = vld [vmem:[#allocation6 + $0x320] sm:$0xff] }
 0x44d   :  { %v7851_v52 = vld [vmem:[#allocation6 + $0x700] sm:$0xff]  ;;  %v12545_v60 = vcombine.high %v7723_v6, %v7727_v47  ;;  %v12544_v61 = vcombine.low %v7723_v6, %v7727_v47 }
 0x44e   :  { %10752 = vmatpush1.bf16.msra.mxu0 %v12464_v31  ;;  %v7855_v24 = vld [vmem:[#allocation6 + $0x720] sm:$0xff] }
 0x44f   :  { %10793 = vmatpush1.bf16.msra.mxu1 %v12592_v63  ;;  %10753 = vmatprep.subr.bf16.mxu0 %v12457_v12  ;;  %v12673_v18 = vcombine.high %v7851_v52, %v7855_v24  ;;  %v7715_v28 = vld [vmem:[#allocation6 + $0x2c0] sm:$0xff]  ;;  %v12672_v21 = vcombine.low %v7851_v52, %v7855_v24  ;;  %v12971_v24 = vld [vmem:[%s13569_s5] sm:$0xff] }
 0x450   :  { %10794 = vmatprep.subr.bf16.mxu1 %v12585_v1  ;;  %v7719_v48 = vld [vmem:[#allocation6 + $0x2e0] sm:$0xff] }
 0x451   :  { %v7843_v4 = vld [vmem:[#allocation6 + $0x6c0] sm:$0xff]  ;;  %v12537_v31 = vcombine.high %v7715_v28, %v7719_v48  ;;  %v12536_v7 = vcombine.low %v7715_v28, %v7719_v48 }
 0x452   :  { %10754 = vmatpush1.bf16.msra.mxu0 %v12456_v9  ;;  %v7847_v51 = vld [vmem:[#allocation6 + $0x6e0] sm:$0xff] }
 0x453   :  { %10795 = vmatpush1.bf16.msra.mxu1 %v12584_v11  ;;  %10755 = vmatprep.subr.bf16.mxu0 %v12449_v13  ;;  %v12665_v63 = vcombine.high %v7843_v4, %v7847_v51  ;;  %v7707_v12 = vld [vmem:[#allocation6 + $0x280] sm:$0xff]  ;;  %v12664_v8 = vcombine.low %v7843_v4, %v7847_v51  ;;  %v13405_v51 = vpack.c.bf16 %v13363_v14, %v13363_v14 }
 0x454   :  { %10796 = vmatprep.subr.bf16.mxu1 %v12577_v15  ;;  %v7711_v1 = vld [vmem:[#allocation6 + $0x2a0] sm:$0xff] }
 0x455   :  { %v7835_v3 = vld [vmem:[#allocation6 + $0x680] sm:$0xff]  ;;  %v12529_v9 = vcombine.high %v7707_v12, %v7711_v1  ;;  %v12528_v19 = vcombine.low %v7707_v12, %v7711_v1 }
 0x456   :  { %10756 = vmatpush1.bf16.msra.mxu0 %v12448_v32  ;;  %v7839_v5 = vld [vmem:[#allocation6 + $0x6a0] sm:$0xff] }
 0x457   :  { %10797 = vmatpush1.bf16.msra.mxu1 %v12576_v23  ;;  %10757 = vmatprep.subr.bf16.mxu0 %v12569_v27  ;;  %v12657_v11 = vcombine.high %v7835_v3, %v7839_v5  ;;  %v7699_v13 = vld [vmem:[#allocation6 + $0x240] sm:$0xff]  ;;  %v12656_v44 = vcombine.low %v7835_v3, %v7839_v5 }
 0x458   :  { %10798 = vmatprep.subr.bf16.mxu1 %v12697_v33  ;;  %v7703_v15 = vld [vmem:[#allocation6 + $0x260] sm:$0xff] }
 0x459   :  { %v7827_v17 = vld [vmem:[#allocation6 + $0x640] sm:$0xff]  ;;  %v12521_v32 = vcombine.high %v7699_v13, %v7703_v15  ;;  %v12520_v0 = vcombine.low %v7699_v13, %v7703_v15 }
 0x45a   :  { %10758 = vmatpush2.bf16.msra.mxu0 %v12568_v58  ;;  %v7831_v50 = vld [vmem:[#allocation6 + $0x660] sm:$0xff] }
 0x45b   :  { %10799 = vmatpush2.bf16.msra.mxu1 %v12696_v62  ;;  %10759 = vmatprep.subr.bf16.mxu0 %v12561_v41  ;;  %v12649_v23 = vcombine.high %v7827_v17, %v7831_v50  ;;  %v7691_v27 = vld [vmem:[#allocation6 + $0x200] sm:$0xff]  ;;  %v12648_v35 = vcombine.low %v7827_v17, %v7831_v50 }
 0x45c   :  { %10800 = vmatprep.subr.bf16.mxu1 %v12689_v25  ;;  %v7695_v33 = vld [vmem:[#allocation6 + $0x220] sm:$0xff] }
 0x45d   :  { %v7819_v53 = vld [vmem:[#allocation6 + $0x600] sm:$0xff]  ;;  %v12513_v58 = vcombine.high %v7691_v27, %v7695_v33  ;;  %v12512_v2 = vcombine.low %v7691_v27, %v7695_v33 }
 0x45e   :  { %10760 = vmatpush2.bf16.msra.mxu0 %v12560_v20  ;;  %v7823_v55 = vld [vmem:[#allocation6 + $0x620] sm:$0xff] }
 0x45f   :  { %10801 = vmatpush2.bf16.msra.mxu1 %v12688_v16  ;;  %10761 = vmatprep.subr.bf16.mxu0 %v12553_v59  ;;  %v12641_v62 = vcombine.high %v7819_v53, %v7823_v55  ;;  %v7939_v41 = vld [vmem:[#allocation6 + $0x9c0] sm:$0xff]  ;;  %v12640_v10 = vcombine.low %v7819_v53, %v7823_v55 }
 0x460   :  { %10802 = vmatprep.subr.bf16.mxu1 %v12681_v40  ;;  %v7943_v25 = vld [vmem:[#allocation6 + $0x9e0] sm:$0xff] }
 0x461   :  { %v8067_v45 = vld [vmem:[#allocation6 + $0xdc0] sm:$0xff]  ;;  %v12761_v20 = vcombine.high %v7939_v41, %v7943_v25  ;;  %v12760_v6 = vcombine.low %v7939_v41, %v7943_v25 }
 0x462   :  { %10762 = vmatpush2.bf16.msra.mxu0 %v12552_v56  ;;  %v8071_v36 = vld [vmem:[#allocation6 + $0xde0] sm:$0xff]  ;;  %v13396_v56 = vpack.c.bf16 %v12971_v24, %v12971_v24 }
 0x463   :  { %10803 = vmatpush2.bf16.msra.mxu1 %v12680_v29  ;;  %10763 = vmatprep.subr.bf16.mxu0 %v12545_v60  ;;  %v7931_v16 = vld [vmem:[#allocation6 + $0x980] sm:$0xff]  ;;  %v12889_v40 = vcombine.high %v8067_v45, %v8071_v36  ;;  %v12972_v60 = vld [vmem:[%s13569_s5 + $0x10] sm:$0xff]  ;;  %v12888_v4 = vcombine.low %v8067_v45, %v8071_v36 }
 0x464   :  { %10804 = vmatprep.subr.bf16.mxu1 %v12673_v18  ;;  %v7935_v59 = vld [vmem:[#allocation6 + $0x9a0] sm:$0xff]  ;;  %v13401_v18 = vpack.c.bf16 %v12972_v60, %v12972_v60  ;;  %v13416_v45 = vld [vmem:[#allocation6 + $0x5c8] sm:$0xff] }
 0x465   :  { %v8059_v47 = vld [vmem:[#allocation6 + $0xd80] sm:$0xff]  ;;  %v12753_v29 = vcombine.high %v7931_v16, %v7935_v59  ;;  %v12752_v12 = vcombine.low %v7931_v16, %v7935_v59  ;;  %v13418_v36 = vld [vmem:[#allocation6 + $0x5e8] sm:$0xff] }
 0x466   :  { %10764 = vmatpush2.bf16.msra.mxu0 %v12544_v61  ;;  %v8063_v52 = vld [vmem:[#allocation6 + $0xda0] sm:$0xff]  ;;  %v12634_v16 = vcombine.low %v13416_v45, %v13418_v36 }
 0x467   :  { %10805 = vmatpush2.bf16.msra.mxu1 %v12672_v21  ;;  %10765 = vmatprep.subr.bf16.mxu0 %v12537_v31  ;;  %v7923_v28 = vld [vmem:[#allocation6 + $0x940] sm:$0xff]  ;;  %v12881_v21 = vcombine.high %v8059_v47, %v8063_v52 }
 0x468   :  { %10806 = vmatprep.subr.bf16.mxu1 %v12665_v63  ;;  %v7927_v48 = vld [vmem:[#allocation6 + $0x960] sm:$0xff] }
 0x469   :  { %v8051_v1 = vld [vmem:[#allocation6 + $0xd40] sm:$0xff] }
 0x46a   :  { %10766 = vmatpush2.bf16.msra.mxu0 %v12536_v7  ;;  %v8055_v3 = vld [vmem:[#allocation6 + $0xd60] sm:$0xff]  ;;  %v12745_v7 = vcombine.high %v7923_v28, %v7927_v48 }
 0x46b   :  { %10807 = vmatpush2.bf16.msra.mxu1 %v12664_v8  ;;  %10767 = vmatprep.subr.bf16.mxu0 %v12529_v9  ;;  %v7919_v13 = vld [vmem:[#allocation6 + $0x920] sm:$0xff]  ;;  %v12873_v17 = vcombine.high %v8051_v1, %v8055_v3 }
 0x46c   :  { %10808 = vmatprep.subr.bf16.mxu1 %v12657_v11  ;;  %v7915_v11 = vld [vmem:[#allocation6 + $0x900] sm:$0xff] }
 0x46d   :  { %v12737_v33 = vcombine.high %v7915_v11, %v7919_v13  ;;  %v7911_v55 = vld [vmem:[#allocation6 + $0x8e0] sm:$0xff] }
 0x46e   :  { %10768 = vmatpush2.bf16.msra.mxu0 %v12528_v19  ;;  %v8039_v41 = vld [vmem:[#allocation6 + $0xce0] sm:$0xff] }
 0x46f   :  { %10809 = vmatpush2.bf16.msra.mxu1 %v12656_v44  ;;  %10769 = vmatprep.subr.bf16.mxu0 %v12521_v32  ;;  %v12744_v44 = vcombine.low %v7923_v28, %v7927_v48  ;;  %v8043_v32 = vld [vmem:[#allocation6 + $0xd00] sm:$0xff] }
 0x470   :  { %10810 = vmatprep.subr.bf16.mxu1 %v12649_v23  ;;  %v8047_v23 = vld [vmem:[#allocation6 + $0xd20] sm:$0xff] }
 0x471   :  { %v7891_v24 = vld [vmem:[#allocation6 + $0x840] sm:$0xff] }
 0x472   :  { %10770 = vmatpush2.bf16.msra.mxu0 %v12520_v0  ;;  %v12872_v0 = vcombine.low %v8051_v1, %v8055_v3 }
 0x473   :  { %10811 = vmatpush2.bf16.msra.mxu1 %v12648_v35  ;;  %10771 = vmatprep.subr.bf16.mxu0 %v12513_v58  ;;  %v12865_v35 = vcombine.high %v8043_v32, %v8047_v23  ;;  %v12736_v58 = vcombine.low %v7915_v11, %v7919_v13  ;;  %v8007_v11 = vld [vmem:[#allocation6 + $0xbe0] sm:$0xff] }
 0x474   :  { %10812 = vmatprep.subr.bf16.mxu1 %v12641_v62  ;;  %v8035_v62 = vld [vmem:[#allocation6 + $0xcc0] sm:$0xff] }
 0x475   :  { %v12857_v59 = vcombine.high %v8035_v62, %v8039_v41  ;;  %v12856_v60 = vcombine.low %v8035_v62, %v8039_v41 }
 0x476   :  { %10772 = vmatpush2.bf16.msra.mxu0 %v12512_v2  ;;  %v7899_v2 = vld [vmem:[#allocation6 + $0x880] sm:$0xff] }
 0x477   :  { %10813 = vmatpush2.bf16.msra.mxu1 %v12640_v10  ;;  %10823 = vmatprep.subr.bf16.mxu0 %v12761_v20  ;;  %v7903_v10 = vld [vmem:[#allocation6 + $0x8a0] sm:$0xff]  ;;  %v12864_v20 = vcombine.low %v8043_v32, %v8047_v23 }
 0x478   :  { %10864 = vmatprep.subr.bf16.mxu1 %v12889_v40  ;;  %v12720_v48 = vcombine.low %v7899_v2, %v7903_v10  ;;  %v7995_v32 = vld [vmem:[#allocation6 + $0xb80] sm:$0xff] }
 0x479   :  { %v7391_v61 = vpop.f32.mrf.mxu0  ;;  %10774 = vmatmul.mubr.bf16.vlgmr.msra.gmra.mxu0 %v13396_v56  ;;  %v7432_v63 = vpop.f32.mrf.mxu1  ;;  %v7999_v23 = vld [vmem:[#allocation6 + $0xba0] sm:$0xff] }
 0x47a   :  { %v7392_v31 = vadd.f32 %v7391_v61, %v13388_v22  ;;  %10815 = vmatmul.mubr.bf16.vlgmr.msra.gmra.mxu1 %v13401_v18  ;;  %10824 = vmatpush1.bf16.msra.mxu0 %v12760_v6  ;;  %v12880_v22 = vcombine.low %v8059_v47, %v8063_v52  ;;  %v8027_v6 = vld [vmem:[#allocation6 + $0xc80] sm:$0xff]  ;;  %v12721_v52 = vcombine.high %v7899_v2, %v7903_v10 }
 0x47b   :  { %10855 = vmatprep.mubr.bf16.mxu0 %v13405_v51  ;;  %v7393_v5 = vpop.f32.mrf.mxu0  ;;  %10825 = vmatprep.subr.bf16.mxu0 %v12753_v29  ;;  %v7434_v9 = vpop.f32.mrf.mxu1  ;;  %v8031_v47 = vld [vmem:[#allocation6 + $0xca0] sm:$0xff] }
 0x47c   :  { %v13411_v14 = vadd.f32 %v7432_v63, %v7392_v31  ;;  %v7394_v8 = vadd.f32 %v7393_v5, %v13391_v43  ;;  %10865 = vmatpush1.bf16.msra.mxu1 %v12888_v4  ;;  %v7907_v43 = vld [vmem:[#allocation6 + $0x8c0] sm:$0xff]  ;;  %v12849_v28 = vcombine.high %v8027_v6, %v8031_v47 }
 0x47d   :  { %v7395_v15 = vpop.f32.mrf.mxu0  ;;  %10866 = vmatprep.subr.bf16.mxu1 %v12881_v21  ;;  %v7436_v19 = vpop.f32.mrf.mxu1  ;;  %v12729_v25 = vcombine.high %v7907_v43, %v7911_v55  ;;  %v12728_v40 = vcombine.low %v7907_v43, %v7911_v55  ;;  %v7895_v29 = vld [vmem:[#allocation6 + $0x860] sm:$0xff] }
 0x47e   :  { %v13414_v50 = vadd.f32 %v7434_v9, %v7394_v8  ;;  %10826 = vmatpush1.bf16.msra.mxu0 %v12752_v12  ;;  %v8019_v4 = vld [vmem:[#allocation6 + $0xc40] sm:$0xff]  ;;  %v12713_v21 = vcombine.high %v7891_v24, %v7895_v29  ;;  %v12848_v12 = vcombine.low %v8027_v6, %v8031_v47  ;;  %v12712_v3 = vcombine.low %v7891_v24, %v7895_v29 }
 0x47f   :  { %v7396_v27 = vpop.f32.mrf.mxu0  ;;  %10827 = vmatprep.subr.bf16.mxu0 %v12745_v7  ;;  %v7437_v53 = vpop.f32.mrf.mxu1  ;;  %v8023_v61 = vld [vmem:[#allocation6 + $0xc60] sm:$0xff] }
 0x480   :  { %10867 = vmatpush1.bf16.msra.mxu1 %v12880_v22  ;;  %v7883_v31 = vld [vmem:[#allocation6 + $0x800] sm:$0xff]  ;;  %v12841_v1 = vcombine.high %v8019_v4, %v8023_v61  ;;  %v12840_v13 = vcombine.low %v8019_v4, %v8023_v61 }
 0x481   :  { %10868 = vmatprep.subr.bf16.mxu1 %v12873_v17  ;;  %v7887_v63 = vld [vmem:[#allocation6 + $0x820] sm:$0xff] }
 0x482   :  { %10828 = vmatpush1.bf16.msra.mxu0 %v12744_v44  ;;  %v8011_v5 = vld [vmem:[#allocation6 + $0xc00] sm:$0xff]  ;;  %v12705_v8 = vcombine.high %v7883_v31, %v7887_v63  ;;  %v12704_v15 = vcombine.low %v7883_v31, %v7887_v63 }
 0x483   :  { %10829 = vmatprep.subr.bf16.mxu0 %v12737_v33  ;;  %v8015_v7 = vld [vmem:[#allocation6 + $0xc20] sm:$0xff] }
 0x484   :  { %10869 = vmatpush1.bf16.msra.mxu1 %v12872_v0  ;;  %v8003_v9 = vld [vmem:[#allocation6 + $0xbc0] sm:$0xff]  ;;  %v12833_v22 = vcombine.high %v8011_v5, %v8015_v7  ;;  %v12832_v27 = vcombine.low %v8011_v5, %v8015_v7  ;;  %v12817_v0 = vcombine.high %v7995_v32, %v7999_v23 }
 0x485   :  { %10870 = vmatprep.subr.bf16.mxu1 %v12865_v35  ;;  %v8131_v17 = vld [vmem:[#allocation6 + $0xfc0] sm:$0xff]  ;;  %v12825_v44 = vcombine.high %v8003_v9, %v8007_v11  ;;  %v12824_v53 = vcombine.low %v8003_v9, %v8007_v11 }
 0x486   :  { %10830 = vmatpush1.bf16.msra.mxu0 %v12736_v58  ;;  %v8135_v19 = vld [vmem:[#allocation6 + $0xfe0] sm:$0xff] }
 0x487   :  { %10831 = vmatprep.subr.bf16.mxu0 %v12729_v25  ;;  %v12953_v33 = vcombine.high %v8131_v17, %v8135_v19  ;;  %v8123_v43 = vld [vmem:[#allocation6 + $0xf80] sm:$0xff]  ;;  %v12952_v62 = vcombine.low %v8131_v17, %v8135_v19  ;;  %v12816_v25 = vcombine.low %v7995_v32, %v7999_v23 }
 0x488   :  { %10871 = vmatpush1.bf16.msra.mxu1 %v12864_v20  ;;  %v8127_v55 = vld [vmem:[#allocation6 + $0xfa0] sm:$0xff] }
 0x489   :  { %10872 = vmatprep.subr.bf16.mxu1 %v12857_v59  ;;  %v7987_v35 = vld [vmem:[#allocation6 + $0xb40] sm:$0xff]  ;;  %v12945_v41 = vcombine.high %v8123_v43, %v8127_v55  ;;  %v12944_v6 = vcombine.low %v8123_v43, %v8127_v55 }
 0x48a   :  { %10832 = vmatpush1.bf16.msra.mxu0 %v12728_v40  ;;  %v7991_v58 = vld [vmem:[#allocation6 + $0xb60] sm:$0xff] }
 0x48b   :  { %10833 = vmatprep.subr.bf16.mxu0 %v12721_v52  ;;  %v8115_v2 = vld [vmem:[#allocation6 + $0xf40] sm:$0xff]  ;;  %v12809_v20 = vcombine.high %v7987_v35, %v7991_v58  ;;  %v12808_v52 = vcombine.low %v7987_v35, %v7991_v58 }
 0x48c   :  { %10873 = vmatpush1.bf16.msra.mxu1 %v12856_v60  ;;  %v8119_v10 = vld [vmem:[#allocation6 + $0xf60] sm:$0xff] }
 0x48d   :  { %10874 = vmatprep.subr.bf16.mxu1 %v12849_v28  ;;  %v7979_v59 = vld [vmem:[#allocation6 + $0xb00] sm:$0xff]  ;;  %v12937_v47 = vcombine.high %v8115_v2, %v8119_v10  ;;  %v12936_v4 = vcombine.low %v8115_v2, %v8119_v10 }
 0x48e   :  { %10834 = vmatpush1.bf16.msra.mxu0 %v12720_v48  ;;  %v7983_v40 = vld [vmem:[#allocation6 + $0xb20] sm:$0xff] }
 0x48f   :  { %10835 = vmatprep.subr.bf16.mxu0 %v12713_v21  ;;  %v8107_v24 = vld [vmem:[#allocation6 + $0xf00] sm:$0xff]  ;;  %v12801_v60 = vcombine.high %v7979_v59, %v7983_v40  ;;  %v12800_v21 = vcombine.low %v7979_v59, %v7983_v40  ;;  %v7676_v40 = vld [vmem:[#allocation6 + $0x188] sm:$0xff] }
 0x490   :  { %10875 = vmatpush1.bf16.msra.mxu1 %v12848_v12  ;;  %v8111_v29 = vld [vmem:[#allocation6 + $0xf20] sm:$0xff] }
 0x491   :  { %10876 = vmatprep.subr.bf16.mxu1 %v12841_v1  ;;  %v7971_v28 = vld [vmem:[#allocation6 + $0xac0] sm:$0xff]  ;;  %v12929_v61 = vcombine.high %v8107_v24, %v8111_v29  ;;  %v12928_v5 = vcombine.low %v8107_v24, %v8111_v29  ;;  %v12973_v29 = vld [vmem:[%s13569_s5 + $0x20] sm:$0xff] }
 0x492   :  { %10836 = vmatpush1.bf16.msra.mxu0 %v12712_v3  ;;  %v7975_v48 = vld [vmem:[#allocation6 + $0xae0] sm:$0xff] }
 0x493   :  { %10837 = vmatprep.subr.bf16.mxu0 %v12705_v8  ;;  %v8099_v31 = vld [vmem:[#allocation6 + $0xec0] sm:$0xff]  ;;  %v12793_v12 = vcombine.high %v7971_v28, %v7975_v48  ;;  %v12792_v8 = vcombine.low %v7971_v28, %v7975_v48  ;;  %v7668_v48 = vld [vmem:[#allocation6 + $0x148] sm:$0xff] }
 0x494   :  { %10877 = vmatpush1.bf16.msra.mxu1 %v12840_v13  ;;  %v8103_v63 = vld [vmem:[#allocation6 + $0xee0] sm:$0xff] }
 0x495   :  { %10878 = vmatprep.subr.bf16.mxu1 %v12833_v22  ;;  %v7963_v1 = vld [vmem:[#allocation6 + $0xa80] sm:$0xff]  ;;  %v12921_v7 = vcombine.high %v8099_v31, %v8103_v63  ;;  %v12920_v17 = vcombine.low %v8099_v31, %v8103_v63 }
 0x496   :  { %10838 = vmatpush1.bf16.msra.mxu0 %v12704_v15  ;;  %v7967_v3 = vld [vmem:[#allocation6 + $0xaa0] sm:$0xff] }
 0x497   :  { %10839 = vmatprep.subr.bf16.mxu0 %v12825_v44  ;;  %v8091_v9 = vld [vmem:[#allocation6 + $0xe80] sm:$0xff]  ;;  %v12785_v13 = vcombine.high %v7963_v1, %v7967_v3  ;;  %v12784_v44 = vcombine.low %v7963_v1, %v7967_v3  ;;  %v7660_v3 = vld [vmem:[#allocation6 + $0x108] sm:$0xff] }
 0x498   :  { %10879 = vmatpush1.bf16.msra.mxu1 %v12832_v27  ;;  %v8095_v11 = vld [vmem:[#allocation6 + $0xea0] sm:$0xff] }
 0x499   :  { %10880 = vmatprep.subr.bf16.mxu1 %v12953_v33  ;;  %v7955_v22 = vld [vmem:[#allocation6 + $0xa40] sm:$0xff]  ;;  %v12913_v19 = vcombine.high %v8091_v9, %v8095_v11  ;;  %v12912_v43 = vcombine.low %v8091_v9, %v8095_v11 }
 0x49a   :  { %10840 = vmatpush2.bf16.msra.mxu0 %v12824_v53  ;;  %v7959_v15 = vld [vmem:[#allocation6 + $0xa60] sm:$0xff] }
 0x49b   :  { %10841 = vmatprep.subr.bf16.mxu0 %v12817_v0  ;;  %v8083_v32 = vld [vmem:[#allocation6 + $0xe40] sm:$0xff]  ;;  %v12777_v27 = vcombine.high %v7955_v22, %v7959_v15  ;;  %v12776_v0 = vcombine.low %v7955_v22, %v7959_v15  ;;  %v7652_v15 = vld [vmem:[#allocation6 + $0xc8] sm:$0xff] }
 0x49c   :  { %10881 = vmatpush2.bf16.msra.mxu1 %v12952_v62  ;;  %v8087_v23 = vld [vmem:[#allocation6 + $0xe60] sm:$0xff] }
 0x49d   :  { %10882 = vmatprep.subr.bf16.mxu1 %v12945_v41  ;;  %v7947_v33 = vld [vmem:[#allocation6 + $0xa00] sm:$0xff]  ;;  %v12905_v55 = vcombine.high %v8083_v32, %v8087_v23  ;;  %v7684_v41 = vld [vmem:[#allocation6 + $0x1c8] sm:$0xff]  ;;  %v12904_v2 = vcombine.low %v8083_v32, %v8087_v23 }
 0x49e   :  { %10842 = vmatpush2.bf16.msra.mxu0 %v12816_v25  ;;  %v7951_v53 = vld [vmem:[#allocation6 + $0xa20] sm:$0xff]  ;;  %v7688_v25 = vld [vmem:[#allocation6 + $0x1e8] sm:$0xff] }
 0x49f   :  { %10843 = vmatprep.subr.bf16.mxu0 %v12809_v20  ;;  %v8075_v35 = vld [vmem:[#allocation6 + $0xe00] sm:$0xff]  ;;  %v12769_v62 = vcombine.high %v7947_v33, %v7951_v53  ;;  %v12768_v20 = vcombine.low %v7947_v33, %v7951_v53  ;;  %v12507_v59 = vcombine.high %v7684_v41, %v7688_v25  ;;  %v12506_v24 = vcombine.low %v7684_v41, %v7688_v25  ;;  %v7644_v32 = vld [vmem:[#allocation6 + $0x88] sm:$0xff] }
 0x4a0   :  { %10883 = vmatpush2.bf16.msra.mxu1 %v12944_v6  ;;  %v8079_v58 = vld [vmem:[#allocation6 + $0xe20] sm:$0xff]  ;;  %v7680_v6 = vld [vmem:[#allocation6 + $0x1a8] sm:$0xff] }
 0x4a1   :  { %10884 = vmatprep.subr.bf16.mxu1 %v12937_v47  ;;  %v12897_v10 = vcombine.high %v8075_v35, %v8079_v58  ;;  %v12896_v47 = vcombine.low %v8075_v35, %v8079_v58  ;;  %v12499_v28 = vcombine.high %v7676_v40, %v7680_v6  ;;  %v12498_v31 = vcombine.low %v7676_v40, %v7680_v6  ;;  %v7648_v23 = vld [vmem:[#allocation6 + $0xa8] sm:$0xff] }
 0x4a2   :  { %10844 = vmatpush2.bf16.msra.mxu0 %v12808_v52  ;;  %v12635_v52 = vcombine.high %v13416_v45, %v13418_v36  ;;  %v12467_v33 = vcombine.high %v7644_v32, %v7648_v23  ;;  %v7636_v53 = vld [vmem:[#allocation6 + $0x48] sm:$0xff] }
 0x4a3   :  { %10845 = vmatprep.subr.bf16.mxu0 %v12801_v60  ;;  %v13427_v60 = vpack.c.bf16 %v12973_v29, %v12973_v29  ;;  %v7628_v35 = vld [vmem:[#allocation6 + $0x8] sm:$0xff] }
 0x4a4   :  { %10885 = vmatpush2.bf16.msra.mxu1 %v12936_v4  ;;  %v7672_v4 = vld [vmem:[#allocation6 + $0x168] sm:$0xff] }
 0x4a5   :  { %10886 = vmatprep.subr.bf16.mxu1 %v12929_v61  ;;  %v12490_v9 = vcombine.low %v7668_v48, %v7672_v4  ;;  %v7632_v58 = vld [vmem:[#allocation6 + $0x28] sm:$0xff] }
 0x4a6   :  { %10846 = vmatpush2.bf16.msra.mxu0 %v12800_v21  ;;  %v12451_v41 = vcombine.high %v7628_v35, %v7632_v58  ;;  %v7748_v25 = vld [vmem:[#allocation6 + $0x3c8] sm:$0xff] }
 0x4a7   :  { %10847 = vmatprep.subr.bf16.mxu0 %v12793_v12  ;;  %v12491_v12 = vcombine.high %v7668_v48, %v7672_v4  ;;  %v7744_v40 = vld [vmem:[#allocation6 + $0x3a8] sm:$0xff] }
 0x4a8   :  { %10887 = vmatpush2.bf16.msra.mxu1 %v12928_v5  ;;  %v7664_v5 = vld [vmem:[#allocation6 + $0x128] sm:$0xff] }
 0x4a9   :  { %10888 = vmatprep.subr.bf16.mxu1 %v12921_v7  ;;  %v7724_v48 = vld [vmem:[#allocation6 + $0x308] sm:$0xff] }
 0x4aa   :  { %10848 = vmatpush2.bf16.msra.mxu0 %v12792_v8  ;;  %v7728_v4 = vld [vmem:[#allocation6 + $0x328] sm:$0xff] }
 0x4ab   :  { %10849 = vmatprep.subr.bf16.mxu0 %v12785_v13  ;;  %v12483_v13 = vcombine.high %v7660_v3, %v7664_v5 }
 0x4ac   :  { %10889 = vmatpush2.bf16.msra.mxu1 %v12920_v17  ;;  %v7656_v17 = vld [vmem:[#allocation6 + $0xe8] sm:$0xff] }
 0x4ad   :  { %10890 = vmatprep.subr.bf16.mxu1 %v12913_v19  ;;  %v12482_v19 = vcombine.low %v7660_v3, %v7664_v5  ;;  %v7716_v3 = vld [vmem:[#allocation6 + $0x2c8] sm:$0xff] }
 0x4ae   :  { %10850 = vmatpush2.bf16.msra.mxu0 %v12784_v44  ;;  %v12475_v44 = vcombine.high %v7652_v15, %v7656_v17  ;;  %v7720_v5 = vld [vmem:[#allocation6 + $0x2e8] sm:$0xff] }
 0x4af   :  { %10851 = vmatprep.subr.bf16.mxu0 %v12777_v27  ;;  %v12474_v27 = vcombine.low %v7652_v15, %v7656_v17  ;;  %v7700_v15 = vld [vmem:[#allocation6 + $0x248] sm:$0xff] }
 0x4b0   :  { %10891 = vmatpush2.bf16.msra.mxu1 %v12912_v43  ;;  %v7640_v43 = vld [vmem:[#allocation6 + $0x68] sm:$0xff] }
 0x4b1   :  { %10892 = vmatprep.subr.bf16.mxu1 %v12905_v55  ;;  %v12466_v55 = vcombine.low %v7644_v32, %v7648_v23  ;;  %v7704_v17 = vld [vmem:[#allocation6 + $0x268] sm:$0xff] }
 0x4b2   :  { %10852 = vmatpush2.bf16.msra.mxu0 %v12776_v0  ;;  %v12459_v0 = vcombine.high %v7636_v53, %v7640_v43  ;;  %v7692_v32 = vld [vmem:[#allocation6 + $0x208] sm:$0xff] }
 0x4b3   :  { %10853 = vmatprep.subr.bf16.mxu0 %v12769_v62  ;;  %v12458_v62 = vcombine.low %v7636_v53, %v7640_v43  ;;  %v7696_v23 = vld [vmem:[#allocation6 + $0x228] sm:$0xff] }
 0x4b4   :  { %10893 = vmatpush2.bf16.msra.mxu1 %v12904_v2  ;;  %v7752_v2 = vld [vmem:[#allocation6 + $0x3e8] sm:$0xff] }
 0x4b5   :  { %10894 = vmatprep.subr.bf16.mxu1 %v12897_v10  ;;  %v12450_v10 = vcombine.low %v7628_v35, %v7632_v58  ;;  %v12570_v6 = vcombine.low %v7748_v25, %v7752_v2  ;;  %v7940_v53 = vld [vmem:[#allocation6 + $0x9c8] sm:$0xff] }
 0x4b6   :  { %10854 = vmatpush2.bf16.msra.mxu0 %v12768_v20  ;;  %v12571_v20 = vcombine.high %v7748_v25, %v7752_v2  ;;  %v7944_v43 = vld [vmem:[#allocation6 + $0x9e8] sm:$0xff] }
 0x4b7   :  { %10905 = vmatprep.subr.bf16.mxu0 %v12507_v59  ;;  %v7740_v59 = vld [vmem:[#allocation6 + $0x388] sm:$0xff]  ;;  %v12762_v25 = vcombine.low %v7940_v53, %v7944_v43 }
 0x4b8   :  { %10895 = vmatpush2.bf16.msra.mxu1 %v12896_v47  ;;  %v12563_v47 = vcombine.high %v7740_v59, %v7744_v40  ;;  %v12562_v29 = vcombine.low %v7740_v59, %v7744_v40  ;;  %v7932_v58 = vld [vmem:[#allocation6 + $0x988] sm:$0xff] }
 0x4b9   :  { %v13429_v61 = vpop.f32.mrf.mxu0  ;;  %10856 = vmatmul.mubr.bf16.vlgmr.msra.gmra.mxu0 %v13427_v60  ;;  %10946 = vmatprep.subr.bf16.mxu1 %v12635_v52  ;;  %v13432_v21 = vpop.f32.mrf.mxu1  ;;  %v7732_v52 = vld [vmem:[#allocation6 + $0x348] sm:$0xff] }
 0x4ba   :  { %10906 = vmatpush1.bf16.msra.mxu0 %v12506_v24  ;;  %10937 = vmatprep.mubr.bf16.mxu0 %v13378_v34  ;;  %v7736_v24 = vld [vmem:[#allocation6 + $0x368] sm:$0xff]  ;;  %v7474_v35 = vadd.f32 %v13429_v61, %v13411_v14 }
 0x4bb   :  { %v13435_v63 = vpop.f32.mrf.mxu0  ;;  %10907 = vmatprep.subr.bf16.mxu0 %v12499_v28  ;;  %v13437_v1 = vpop.f32.mrf.mxu1  ;;  %v12555_v28 = vcombine.high %v7732_v52, %v7736_v24  ;;  %v7928_v59 = vld [vmem:[#allocation6 + $0x968] sm:$0xff] }
 0x4bd   :  { %v7477_v7 = vpop.f32.mrf.mxu0  ;;  %v7518_v8 = vpop.f32.mrf.mxu1 }
 0x4be   :  { %10908 = vmatpush1.bf16.msra.mxu0 %v12498_v31  ;;  %v12554_v31 = vcombine.low %v7732_v52, %v7736_v24  ;;  %v12546_v7 = vcombine.low %v7724_v48, %v7728_v4  ;;  %v12539_v8 = vcombine.high %v7716_v3, %v7720_v5 }
 0x4bf   :  { %v7478_v11 = vpop.f32.mrf.mxu0  ;;  %10909 = vmatprep.subr.bf16.mxu0 %v12491_v12  ;;  %v7519_v22 = vpop.f32.mrf.mxu1  ;;  %v12547_v12 = vcombine.high %v7724_v48, %v7728_v4 }
 0x4c0   :  { %v7712_v11 = vld [vmem:[#allocation6 + $0x2a8] sm:$0xff] }
 0x4c2   :  { %10910 = vmatpush1.bf16.msra.mxu0 %v12490_v9  ;;  %v7708_v9 = vld [vmem:[#allocation6 + $0x288] sm:$0xff] }
 0x4c3   :  { %10911 = vmatprep.subr.bf16.mxu0 %v12483_v13  ;;  %v12538_v13 = vcombine.low %v7716_v3, %v7720_v5  ;;  %v12531_v22 = vcombine.high %v7708_v9, %v7712_v11 }
 0x4c6   :  { %10912 = vmatpush1.bf16.msra.mxu0 %v12482_v19  ;;  %v12530_v19 = vcombine.low %v7708_v9, %v7712_v11  ;;  %v7804_v9 = vld [vmem:[#allocation6 + $0x588] sm:$0xff] }
 0x4c7   :  { %10913 = vmatprep.subr.bf16.mxu0 %v12475_v44  ;;  %v12523_v44 = vcombine.high %v7700_v15, %v7704_v17  ;;  %v7808_v11 = vld [vmem:[#allocation6 + $0x5a8] sm:$0xff] }
 0x4ca   :  { %10914 = vmatpush1.bf16.msra.mxu0 %v12474_v27  ;;  %v12522_v27 = vcombine.low %v7700_v15, %v7704_v17 }
 0x4cb   :  { %10915 = vmatprep.subr.bf16.mxu0 %v12467_v33  ;;  %v12515_v33 = vcombine.high %v7692_v32, %v7696_v23 }
 0x4ce   :  { %10916 = vmatpush1.bf16.msra.mxu0 %v12466_v55  ;;  %v12514_v55 = vcombine.low %v7692_v32, %v7696_v23  ;;  %v7796_v23 = vld [vmem:[#allocation6 + $0x548] sm:$0xff] }
 0x4cf   :  { %10917 = vmatprep.subr.bf16.mxu0 %v12459_v0  ;;  %v12763_v0 = vcombine.high %v7940_v53, %v7944_v43  ;;  %v7904_v53 = vld [vmem:[#allocation6 + $0x8a8] sm:$0xff]  ;;  %v12626_v43 = vcombine.low %v7804_v9, %v7808_v11 }
 0x4d2   :  { %10918 = vmatpush1.bf16.msra.mxu0 %v12458_v62  ;;  %v7936_v62 = vld [vmem:[#allocation6 + $0x9a8] sm:$0xff] }
 0x4d3   :  { %10919 = vmatprep.subr.bf16.mxu0 %v12451_v41  ;;  %v7476_v41 = vadd.f32 %v13435_v63, %v13414_v50  ;;  %v12755_v2 = vcombine.high %v7932_v58, %v7936_v62  ;;  %v12754_v61 = vcombine.low %v7932_v58, %v7936_v62  ;;  %v7788_v58 = vld [vmem:[#allocation6 + $0x508] sm:$0xff] }
 0x4d4   :  { %v7792_v62 = vld [vmem:[#allocation6 + $0x528] sm:$0xff] }
 0x4d5   :  { %v12611_v45 = vcombine.high %v7788_v58, %v7792_v62 }
 0x4d6   :  { %10920 = vmatpush1.bf16.msra.mxu0 %v12450_v10  ;;  %v7515_v10 = vadd.f32 %v13432_v21, %v7474_v35  ;;  %v7916_v21 = vld [vmem:[#allocation6 + $0x908] sm:$0xff] }
 0x4d7   :  { %10921 = vmatprep.subr.bf16.mxu0 %v12571_v20  ;;  %v7924_v20 = vld [vmem:[#allocation6 + $0x948] sm:$0xff] }
 0x4d8   :  { %v12747_v63 = vcombine.high %v7924_v20, %v7928_v59 }
 0x4da   :  { %10922 = vmatpush2.bf16.msra.mxu0 %v12570_v6  ;;  %v7517_v6 = vadd.f32 %v13437_v1, %v7476_v41  ;;  %v12746_v1 = vcombine.low %v7924_v20, %v7928_v59  ;;  %v7892_v41 = vld [vmem:[#allocation6 + $0x848] sm:$0xff] }
 0x4db   :  { %10923 = vmatprep.subr.bf16.mxu0 %v12563_v47  ;;  %v7784_v20 = vld [vmem:[#allocation6 + $0x4e8] sm:$0xff] }
 0x4dc   :  { %v7884_v59 = vld [vmem:[#allocation6 + $0x808] sm:$0xff] }
 0x4de   :  { %10924 = vmatpush2.bf16.msra.mxu0 %v12562_v29 }
 0x4df   :  { %10925 = vmatprep.subr.bf16.mxu0 %v12555_v28  ;;  %v7920_v28 = vld [vmem:[#allocation6 + $0x928] sm:$0xff] }
 0x4e0   :  { %v12739_v5 = vcombine.high %v7916_v21, %v7920_v28 }
 0x4e2   :  { %10926 = vmatpush2.bf16.msra.mxu0 %v12554_v31 }
 0x4e3   :  { %10927 = vmatprep.subr.bf16.mxu0 %v12547_v12 }
 0x4e6   :  { %10928 = vmatpush2.bf16.msra.mxu0 %v12546_v7 }
 0x4e7   :  { %10929 = vmatprep.subr.bf16.mxu0 %v12539_v8 }
 0x4ea   :  { %10930 = vmatpush2.bf16.msra.mxu0 %v12538_v13  ;;  %v7908_v13 = vld [vmem:[#allocation6 + $0x8c8] sm:$0xff] }
 0x4eb   :  { %10931 = vmatprep.subr.bf16.mxu0 %v12531_v22  ;;  %v7912_v22 = vld [vmem:[#allocation6 + $0x8e8] sm:$0xff] }
 0x4ec   :  { %v12731_v32 = vcombine.high %v7908_v13, %v7912_v22 }
 0x4ee   :  { %10932 = vmatpush2.bf16.msra.mxu0 %v12530_v19  ;;  %v12738_v19 = vcombine.low %v7916_v21, %v7920_v28 }
 0x4ef   :  { %10933 = vmatprep.subr.bf16.mxu0 %v12523_v44  ;;  %v12627_v44 = vcombine.high %v7804_v9, %v7808_v11  ;;  %v7756_v9 = vld [vmem:[#allocation6 + $0x408] sm:$0xff] }
 0x4f0   :  { %v7760_v11 = vld [vmem:[#allocation6 + $0x428] sm:$0xff] }
 0x4f2   :  { %10934 = vmatpush2.bf16.msra.mxu0 %v12522_v27  ;;  %v7800_v27 = vld [vmem:[#allocation6 + $0x568] sm:$0xff] }
 0x4f3   :  { %10935 = vmatprep.subr.bf16.mxu0 %v12515_v33  ;;  %v7900_v33 = vld [vmem:[#allocation6 + $0x888] sm:$0xff] }
 0x4f4   :  { %v12723_v35 = vcombine.high %v7900_v33, %v7904_v53 }
 0x4f6   :  { %10936 = vmatpush2.bf16.msra.mxu0 %v12514_v55  ;;  %v12730_v55 = vcombine.low %v7908_v13, %v7912_v22  ;;  %v7988_v13 = vld [vmem:[#allocation6 + $0xb48] sm:$0xff] }
 0x4f7   :  { %10987 = vmatprep.subr.bf16.mxu0 %v12763_v0  ;;  %v12619_v0 = vcombine.high %v7796_v23, %v7800_v27  ;;  %v7992_v22 = vld [vmem:[#allocation6 + $0xb68] sm:$0xff] }
 0x4f9   :  { %v7555_v40 = vpop.f32.mrf.mxu0  ;;  %10938 = vmatmul.mubr.bf16.vlgmr.msra.gmra.mxu0 %v13396_v56  ;;  %v7596_v14 = vpop.f32.mrf.mxu1 }
 0x4fa   :  { %v7556_v47 = vadd.f32 %v7555_v40, %v7515_v10  ;;  %10988 = vmatpush1.bf16.msra.mxu0 %v12762_v25  ;;  %11019 = vmatprep.mubr.bf16.mxu0 %v13405_v51  ;;  %v7896_v25 = vld [vmem:[#allocation6 + $0x868] sm:$0xff]  ;;  %v12722_v10 = vcombine.low %v7900_v33, %v7904_v53 }
 0x4fb   :  { %v7557_v50 = vpop.f32.mrf.mxu0  ;;  %10989 = vmatprep.subr.bf16.mxu0 %v12755_v2  ;;  %v7598_v29 = vpop.f32.mrf.mxu1  ;;  %v12618_v2 = vcombine.low %v7796_v23, %v7800_v27  ;;  %v12715_v36 = vcombine.high %v7892_v41, %v7896_v25  ;;  %v7888_v40 = vld [vmem:[#allocation6 + $0x828] sm:$0xff]  ;;  %v12811_v23 = vcombine.high %v7988_v13, %v7992_v22 }
 0x4fc   :  { %v7597_v52 = vadd.f32 %v7596_v14, %v7556_v47  ;;  %v7558_v24 = vadd.f32 %v7557_v50, %v7517_v6  ;;  %v12610_v6 = vcombine.low %v7788_v58, %v7792_v62  ;;  %v12714_v47 = vcombine.low %v7892_v41, %v7896_v25  ;;  %v7772_v50 = vld [vmem:[#allocation6 + $0x488] sm:$0xff] }
 0x4fd   :  { %v7559_v48 = vpop.f32.mrf.mxu0  ;;  %v7600_v12 = vpop.f32.mrf.mxu1  ;;  %v12706_v21 = vcombine.low %v7884_v59, %v7888_v40  ;;  %v7876_v27 = vld [vmem:[#allocation6 + $0x7c8] sm:$0xff] }
 0x4fe   :  { %v7609_v4 = vmax.f32 %v7597_v52, 0.0  ;;  %v7599_v31 = vadd.f32 %v7598_v29, %v7558_v24  ;;  %10990 = vmatpush1.bf16.msra.mxu0 %v12754_v61  ;;  %v12707_v61 = vcombine.high %v7884_v59, %v7888_v40  ;;  %v8004_v52 = vld [vmem:[#allocation6 + $0xbc8] sm:$0xff] }
 0x4ff   :  { %v7560_v3 = vpop.f32.mrf.mxu0  ;;  %10991 = vmatprep.subr.bf16.mxu0 %v12747_v63  ;;  %v7601_v8 = vpop.f32.mrf.mxu1  ;;  %v7776_v63 = vld [vmem:[#allocation6 + $0x4a8] sm:$0xff] }
 0x500   :  { %7617 = vst [vmem:[%s13569_s5 + $0x30] sm:$0xff] %v7609_v4  ;;  %v7610_v7 = vmax.f32 %v7599_v31, 0.0  ;;  %v13455_v17 = vpack.c.bf16 %v7609_v4, %v7609_v4  ;;  %v8008_v24 = vld [vmem:[#allocation6 + $0xbe8] sm:$0xff]  ;;  %v12595_v28 = vcombine.high %v7772_v50, %v7776_v63  ;;  %v12594_v3 = vcombine.low %v7772_v50, %v7776_v63 }
 0x501   :  { %v12827_v48 = vcombine.high %v8004_v52, %v8008_v24  ;;  %v7764_v4 = vld [vmem:[#allocation6 + $0x448] sm:$0xff] }
 0x502   :  { %7618 = vst [vmem:[%s13569_s5 + $0x38] sm:$0xff] %v7610_v7  ;;  %v13453_v15 = vpack.c.bf16 %v7610_v7, %v7610_v7  ;;  %10992 = vmatpush1.bf16.msra.mxu0 %v12746_v1  ;;  %v7768_v31 = vld [vmem:[#allocation6 + $0x468] sm:$0xff] }
 0x503   :  { %10993 = vmatprep.subr.bf16.mxu0 %v12739_v5  ;;  %v7996_v12 = vld [vmem:[#allocation6 + $0xb88] sm:$0xff]  ;;  %v12826_v5 = vcombine.low %v8004_v52, %v8008_v24  ;;  %v12587_v7 = vcombine.high %v7764_v4, %v7768_v31 }
 0x504   :  { %10896 = vmatprep.mubr.bf16.mxu1 %v13453_v15  ;;  %v8000_v1 = vld [vmem:[#allocation6 + $0xba8] sm:$0xff] }
 0x505   :  { %10897 = vmatmul.mubr.bf16.vlgmr.msra.gmra.mxu1 %v13455_v17  ;;  %v12819_v8 = vcombine.high %v7996_v12, %v8000_v1  ;;  %v7880_v33 = vld [vmem:[#allocation6 + $0x7e8] sm:$0xff] }
 0x506   :  { %10947 = vmatpush1.bf16.msra.mxu1 %v12634_v16  ;;  %10978 = vmatprep.mubr.bf16.mxu1 %v13384_v42  ;;  %v7780_v16 = vld [vmem:[#allocation6 + $0x4c8] sm:$0xff] }
 0x507   :  { %10994 = vmatpush1.bf16.msra.mxu0 %v12738_v19  ;;  %10948 = vmatprep.subr.bf16.mxu1 %v12627_v44  ;;  %v12603_v14 = vcombine.high %v7780_v16, %v7784_v20  ;;  %v12602_v29 = vcombine.low %v7780_v16, %v7784_v20  ;;  %v12586_v19 = vcombine.low %v7764_v4, %v7768_v31  ;;  %v7980_v53 = vld [vmem:[#allocation6 + $0xb08] sm:$0xff] }
 0x508   :  { %10995 = vmatprep.subr.bf16.mxu0 %v12731_v32  ;;  %v12818_v44 = vcombine.low %v7996_v12, %v8000_v1  ;;  %v12579_v32 = vcombine.high %v7756_v9, %v7760_v11  ;;  %v7868_v62 = vld [vmem:[#allocation6 + $0x788] sm:$0xff] }
 0x509   :  { %v7872_v41 = vld [vmem:[#allocation6 + $0x7a8] sm:$0xff] }
 0x50a   :  { %10949 = vmatpush1.bf16.msra.mxu1 %v12626_v43  ;;  %v7984_v43 = vld [vmem:[#allocation6 + $0xb28] sm:$0xff] }
 0x50b   :  { %10996 = vmatpush1.bf16.msra.mxu0 %v12730_v55  ;;  %10950 = vmatprep.subr.bf16.mxu1 %v12619_v0  ;;  %v12578_v55 = vcombine.low %v7756_v9, %v7760_v11  ;;  %v12810_v0 = vcombine.low %v7988_v13, %v7992_v22  ;;  %v12803_v58 = vcombine.high %v7980_v53, %v7984_v43  ;;  %v7972_v25 = vld [vmem:[#allocation6 + $0xac8] sm:$0xff]  ;;  %v7685_v22 = vld [vmem:[#allocation6 + $0x1d0] sm:$0xff] }
 0x50c   :  { %10997 = vmatprep.subr.bf16.mxu0 %v12723_v35  ;;  %v12699_v35 = vcombine.high %v7876_v27, %v7880_v33  ;;  %v7860_v20 = vld [vmem:[#allocation6 + $0x748] sm:$0xff] }
 0x50d   :  { %v7864_v59 = vld [vmem:[#allocation6 + $0x768] sm:$0xff] }
 0x50e   :  { %10951 = vmatpush1.bf16.msra.mxu1 %v12618_v2  ;;  %v7976_v2 = vld [vmem:[#allocation6 + $0xae8] sm:$0xff] }
 0x50f   :  { %10998 = vmatpush1.bf16.msra.mxu0 %v12722_v10  ;;  %10952 = vmatprep.subr.bf16.mxu1 %v12611_v45  ;;  %v12698_v10 = vcombine.low %v7876_v27, %v7880_v33  ;;  %v12802_v45 = vcombine.low %v7980_v53, %v7984_v43  ;;  %v12795_v16 = vcombine.high %v7972_v25, %v7976_v2  ;;  %v7964_v40 = vld [vmem:[#allocation6 + $0xa88] sm:$0xff]  ;;  %v8139_v27 = vld [vmem:[#allocation7] sm:$0xff] }
 0x510   :  { %10999 = vmatprep.subr.bf16.mxu0 %v12715_v36  ;;  %v12691_v36 = vcombine.high %v7868_v62, %v7872_v41  ;;  %v7852_v63 = vld [vmem:[#allocation6 + $0x708] sm:$0xff] }
 0x511   :  { %v7856_v52 = vld [vmem:[#allocation6 + $0x728] sm:$0xff] }
 0x512   :  { %10953 = vmatpush1.bf16.msra.mxu1 %v12610_v6  ;;  %v7968_v6 = vld [vmem:[#allocation6 + $0xaa8] sm:$0xff] }
 0x513   :  { %11000 = vmatpush1.bf16.msra.mxu0 %v12714_v47  ;;  %10954 = vmatprep.subr.bf16.mxu1 %v12603_v14  ;;  %v12690_v47 = vcombine.low %v7868_v62, %v7872_v41  ;;  %v12794_v14 = vcombine.low %v7972_v25, %v7976_v2  ;;  %v12787_v50 = vcombine.high %v7964_v40, %v7968_v6  ;;  %v7956_v24 = vld [vmem:[#allocation6 + $0xa48] sm:$0xff] }
 0x514   :  { %11001 = vmatprep.subr.bf16.mxu0 %v12707_v61  ;;  %v12683_v61 = vcombine.high %v7860_v20, %v7864_v59  ;;  %v7844_v31 = vld [vmem:[#allocation6 + $0x6c8] sm:$0xff]  ;;  %v8148_v41 = vrot.slane %v8139_v27, %v1137_v46 }
 0x515   :  { %v7848_v12 = vld [vmem:[#allocation6 + $0x6e8] sm:$0xff] }
 0x516   :  { %10955 = vmatpush1.bf16.msra.mxu1 %v12602_v29  ;;  %v7960_v29 = vld [vmem:[#allocation6 + $0xa68] sm:$0xff] }
 0x517   :  { %11002 = vmatpush1.bf16.msra.mxu0 %v12706_v21  ;;  %10956 = vmatprep.subr.bf16.mxu1 %v12595_v28  ;;  %v12682_v21 = vcombine.low %v7860_v20, %v7864_v59  ;;  %v12786_v28 = vcombine.low %v7964_v40, %v7968_v6  ;;  %v12779_v4 = vcombine.high %v7956_v24, %v7960_v29  ;;  %v7948_v1 = vld [vmem:[#allocation6 + $0xa08] sm:$0xff]  ;;  %v7673_v20 = vld [vmem:[#allocation6 + $0x170] sm:$0xff] }
 0x518   :  { %11003 = vmatprep.subr.bf16.mxu0 %v12827_v48  ;;  %v12675_v48 = vcombine.high %v7852_v63, %v7856_v52  ;;  %v7836_v11 = vld [vmem:[#allocation6 + $0x688] sm:$0xff] }
 0x519   :  { %v7840_v13 = vld [vmem:[#allocation6 + $0x6a8] sm:$0xff] }
 0x51a   :  { %10957 = vmatpush1.bf16.msra.mxu1 %v12594_v3  ;;  %v7952_v3 = vld [vmem:[#allocation6 + $0xa28] sm:$0xff] }
 0x51b   :  { %11004 = vmatpush2.bf16.msra.mxu0 %v12826_v5  ;;  %10958 = vmatprep.subr.bf16.mxu1 %v12587_v7  ;;  %v12674_v5 = vcombine.low %v7852_v63, %v7856_v52  ;;  %v12778_v7 = vcombine.low %v7956_v24, %v7960_v29  ;;  %v12771_v9 = vcombine.high %v7948_v1, %v7952_v3  ;;  %v7828_v53 = vld [vmem:[#allocation6 + $0x648] sm:$0xff] }
 0x51c   :  { %11005 = vmatprep.subr.bf16.mxu0 %v12819_v8  ;;  %v12667_v8 = vcombine.high %v7844_v31, %v7848_v12  ;;  %v7832_v43 = vld [vmem:[#allocation6 + $0x668] sm:$0xff] }
 0x51d   :  { %v12651_v25 = vcombine.high %v7828_v53, %v7832_v43  ;;  %v8068_v52 = vld [vmem:[#allocation6 + $0xdc8] sm:$0xff] }
 0x51e   :  { %10959 = vmatpush1.bf16.msra.mxu1 %v12586_v19  ;;  %v7689_v19 = vld [vmem:[#allocation6 + $0x1f0] sm:$0xff]  ;;  %v8072_v24 = vld [vmem:[#allocation6 + $0xde8] sm:$0xff] }
 0x51f   :  { %11006 = vmatpush2.bf16.msra.mxu0 %v12818_v44  ;;  %10960 = vmatprep.subr.bf16.mxu1 %v12579_v32  ;;  %v12666_v44 = vcombine.low %v7844_v31, %v7848_v12  ;;  %v12770_v32 = vcombine.low %v7948_v1, %v7952_v3  ;;  %v12509_v33 = vcombine.high %v7685_v22, %v7689_v19 }
 0x520   :  { %11007 = vmatprep.subr.bf16.mxu0 %v12811_v23  ;;  %v12659_v23 = vcombine.high %v7836_v11, %v7840_v13  ;;  %v12508_v62 = vcombine.low %v7685_v22, %v7689_v19  ;;  %v12891_v3 = vcombine.high %v8068_v52, %v8072_v24  ;;  %v12890_v22 = vcombine.low %v8068_v52, %v8072_v24  ;;  %v7753_v52 = vld [vmem:[#allocation6 + $0x3f0] sm:$0xff] }
 0x522   :  { %10961 = vmatpush1.bf16.msra.mxu1 %v12578_v55  ;;  %v7677_v55 = vld [vmem:[#allocation6 + $0x190] sm:$0xff] }
 0x523   :  { %11008 = vmatpush2.bf16.msra.mxu0 %v12810_v0  ;;  %10962 = vmatprep.subr.bf16.mxu1 %v12699_v35  ;;  %v7681_v0 = vld [vmem:[#allocation6 + $0x1b0] sm:$0xff]  ;;  %v12658_v35 = vcombine.low %v7836_v11, %v7840_v13 }
 0x524   :  { %11009 = vmatprep.subr.bf16.mxu0 %v12803_v58  ;;  %v8144_v58 = vrot.slane %v8139_v27, %v1133_v38  ;;  %v12501_v2 = vcombine.high %v7677_v55, %v7681_v0  ;;  %v12650_v38 = vcombine.low %v7828_v53, %v7832_v43  ;;  %v7653_v11 = vld [vmem:[#allocation6 + $0xd0] sm:$0xff]  ;;  %v8056_v27 = vld [vmem:[#allocation6 + $0xd68] sm:$0xff] }
 0x525   :  { %v7657_v13 = vld [vmem:[#allocation6 + $0xf0] sm:$0xff] }
 0x526   :  { %10963 = vmatpush2.bf16.msra.mxu1 %v12698_v10  ;;  %v7820_v10 = vld [vmem:[#allocation6 + $0x608] sm:$0xff]  ;;  %v7649_v53 = vld [vmem:[#allocation6 + $0xb0] sm:$0xff] }
 0x527   :  { %11010 = vmatpush2.bf16.msra.mxu0 %v12802_v45  ;;  %10964 = vmatprep.subr.bf16.mxu1 %v12691_v36  ;;  %v7824_v45 = vld [vmem:[#allocation6 + $0x628] sm:$0xff] }
 0x528   :  { %11011 = vmatprep.subr.bf16.mxu0 %v12795_v16  ;;  %v7669_v16 = vld [vmem:[#allocation6 + $0x150] sm:$0xff]  ;;  %v12642_v31 = vcombine.low %v7820_v10, %v7824_v45 }
 0x529   :  { %v12493_v63 = vcombine.high %v7669_v16, %v7673_v20  ;;  %v12492_v1 = vcombine.low %v7669_v16, %v7673_v20  ;;  %v8036_v16 = vld [vmem:[#allocation6 + $0xcc8] sm:$0xff] }
 0x52a   :  { %10965 = vmatpush2.bf16.msra.mxu1 %v12690_v47  ;;  %v12500_v47 = vcombine.low %v7677_v55, %v7681_v0  ;;  %v12476_v55 = vcombine.low %v7653_v11, %v7657_v13  ;;  %v8040_v20 = vld [vmem:[#allocation6 + $0xce8] sm:$0xff] }
 0x52b   :  { %11012 = vmatpush2.bf16.msra.mxu0 %v12794_v14  ;;  %10966 = vmatprep.subr.bf16.mxu1 %v12683_v61  ;;  %v12643_v14 = vcombine.high %v7820_v10, %v7824_v45  ;;  %v12858_v24 = vcombine.low %v8036_v16, %v8040_v20 }
 0x52c   :  { %11013 = vmatprep.subr.bf16.mxu0 %v12787_v50 }
 0x52e   :  { %10967 = vmatpush2.bf16.msra.mxu1 %v12682_v21  ;;  %v7661_v21 = vld [vmem:[#allocation6 + $0x110] sm:$0xff] }
 0x52f   :  { %11014 = vmatpush2.bf16.msra.mxu0 %v12786_v28  ;;  %10968 = vmatprep.subr.bf16.mxu1 %v12675_v48  ;;  %v7665_v28 = vld [vmem:[#allocation6 + $0x130] sm:$0xff] }
 0x530   :  { %11015 = vmatprep.subr.bf16.mxu0 %v12779_v4  ;;  %v12484_v19 = vcombine.low %v7661_v21, %v7665_v28 }
 0x532   :  { %10969 = vmatpush2.bf16.msra.mxu1 %v12674_v5 }
 0x533   :  { %11016 = vmatpush2.bf16.msra.mxu0 %v12778_v7  ;;  %10970 = vmatprep.subr.bf16.mxu1 %v12667_v8  ;;  %v12485_v7 = vcombine.high %v7661_v21, %v7665_v28  ;;  %v8060_v8 = vld [vmem:[#allocation6 + $0xd88] sm:$0xff] }
 0x534   :  { %11017 = vmatprep.subr.bf16.mxu0 %v12771_v9  ;;  %v8064_v9 = vld [vmem:[#allocation6 + $0xda8] sm:$0xff] }
 0x535   :  { %v12882_v43 = vcombine.low %v8060_v8, %v8064_v9 }
 0x536   :  { %10971 = vmatpush2.bf16.msra.mxu1 %v12666_v44  ;;  %v12883_v44 = vcombine.high %v8060_v8, %v8064_v9  ;;  %v8012_v9 = vld [vmem:[#allocation6 + $0xc08] sm:$0xff] }
 0x537   :  { %11018 = vmatpush2.bf16.msra.mxu0 %v12770_v32  ;;  %10972 = vmatprep.subr.bf16.mxu1 %v12659_v23  ;;  %v12477_v32 = vcombine.high %v7653_v11, %v7657_v13  ;;  %v8052_v23 = vld [vmem:[#allocation6 + $0xd48] sm:$0xff]  ;;  %v7733_v13 = vld [vmem:[#allocation6 + $0x350] sm:$0xff] }
 0x538   :  { %11069 = vmatprep.subr.bf16.mxu0 %v12509_v33  ;;  %v7645_v33 = vld [vmem:[#allocation6 + $0x90] sm:$0xff]  ;;  %v12875_v0 = vcombine.high %v8052_v23, %v8056_v27  ;;  %v8016_v11 = vld [vmem:[#allocation6 + $0xc28] sm:$0xff] }
 0x539   :  { %v10775_v36 = vpop.f32.mrf.mxu0  ;;  %v12468_v10 = vcombine.low %v7645_v33, %v7649_v53 }
 0x53a   :  { %v10776_v59 = vadd.f32 %v10775_v36, %v8144_v58  ;;  %v10816_v40 = vpop.f32.mrf.mxu1  ;;  %10973 = vmatpush2.bf16.msra.mxu1 %v12658_v35  ;;  %11020 = vmatmul.mubr.bf16.vlgmr.msra.gmra.mxu0 %v13427_v60  ;;  %v12469_v35 = vcombine.high %v7645_v33, %v7649_v53  ;;  %v8044_v58 = vld [vmem:[#allocation6 + $0xd08] sm:$0xff]  ;;  %v7725_v53 = vld [vmem:[#allocation6 + $0x310] sm:$0xff] }
 0x53b   :  { %11070 = vmatpush1.bf16.msra.mxu0 %v12508_v62  ;;  %11101 = vmatprep.mubr.bf16.mxu0 %v13378_v34  ;;  %v10777_v6 = vpop.f32.mrf.mxu0  ;;  %v8048_v62 = vld [vmem:[#allocation6 + $0xd28] sm:$0xff] }
 0x53c   :  { %v13469_v46 = vadd.f32 %v10816_v40, %v10776_v59  ;;  %v10778_v61 = vadd.f32 %v10777_v6, %v8148_v41  ;;  %v10818_v50 = vpop.f32.mrf.mxu1  ;;  %10974 = vmatprep.subr.bf16.mxu1 %v12651_v25  ;;  %11071 = vmatprep.subr.bf16.mxu0 %v12501_v2  ;;  %v7637_v41 = vld [vmem:[#allocation6 + $0x50] sm:$0xff]  ;;  %v12874_v2 = vcombine.low %v8052_v23, %v8056_v27  ;;  %v8132_v27 = vld [vmem:[#allocation6 + $0xfc8] sm:$0xff] }
 0x53d   :  { %v10779_v29 = vpop.f32.mrf.mxu0  ;;  %v7641_v25 = vld [vmem:[#allocation6 + $0x70] sm:$0xff]  ;;  %v12867_v45 = vcombine.high %v8044_v58, %v8048_v62  ;;  %v8136_v33 = vld [vmem:[#allocation6 + $0xfe8] sm:$0xff] }
 0x53e   :  { %v13471_v48 = vadd.f32 %v10818_v50, %v10778_v61  ;;  %v10820_v4 = vpop.f32.mrf.mxu1  ;;  %10975 = vmatpush2.bf16.msra.mxu1 %v12650_v38  ;;  %v12461_v36 = vcombine.high %v7637_v41, %v7641_v25  ;;  %v7629_v59 = vld [vmem:[#allocation6 + $0x10] sm:$0xff]  ;;  %v12866_v38 = vcombine.low %v8044_v58, %v8048_v62  ;;  %v12460_v6 = vcombine.low %v7637_v41, %v7641_v25  ;;  %v8028_v61 = vld [vmem:[#allocation6 + $0xc88] sm:$0xff] }
 0x53f   :  { %11072 = vmatpush1.bf16.msra.mxu0 %v12500_v47  ;;  %v10780_v12 = vpop.f32.mrf.mxu0  ;;  %10976 = vmatprep.subr.bf16.mxu1 %v12643_v14  ;;  %v7633_v40 = vld [vmem:[#allocation6 + $0x30] sm:$0xff]  ;;  %v12859_v47 = vcombine.high %v8036_v16, %v8040_v20  ;;  %v8032_v50 = vld [vmem:[#allocation6 + $0xca8] sm:$0xff] }
 0x540   :  { %v10821_v5 = vpop.f32.mrf.mxu1  ;;  %11073 = vmatprep.subr.bf16.mxu0 %v12493_v63  ;;  %v12453_v14 = vcombine.high %v7629_v59, %v7633_v40  ;;  %v7749_v63 = vld [vmem:[#allocation6 + $0x3d0] sm:$0xff]  ;;  %v12452_v29 = vcombine.low %v7629_v59, %v7633_v40  ;;  %v12851_v21 = vcombine.high %v8028_v61, %v8032_v50  ;;  %v8020_v4 = vld [vmem:[#allocation6 + $0xc48] sm:$0xff] }
 0x541   :  { %v12573_v28 = vcombine.high %v7749_v63, %v7753_v52  ;;  %v7741_v12 = vld [vmem:[#allocation6 + $0x390] sm:$0xff]  ;;  %v12572_v5 = vcombine.low %v7749_v63, %v7753_v52  ;;  %v8124_v62 = vld [vmem:[#allocation6 + $0xf88] sm:$0xff] }
 0x542   :  { %10977 = vmatpush2.bf16.msra.mxu1 %v12642_v31  ;;  %v8024_v31 = vld [vmem:[#allocation6 + $0xc68] sm:$0xff]  ;;  %v7717_v25 = vld [vmem:[#allocation6 + $0x2d0] sm:$0xff] }
 0x543   :  { %11074 = vmatpush1.bf16.msra.mxu0 %v12492_v1  ;;  %11028 = vmatprep.subr.bf16.mxu1 %v12891_v3  ;;  %v7745_v1 = vld [vmem:[#allocation6 + $0x3b0] sm:$0xff]  ;;  %v12850_v3 = vcombine.low %v8028_v61, %v8032_v50  ;;  %v8128_v41 = vld [vmem:[#allocation6 + $0xfa8] sm:$0xff] }
 0x544   :  { %11075 = vmatprep.subr.bf16.mxu0 %v12485_v7  ;;  %v12843_v7 = vcombine.high %v8020_v4, %v8024_v31  ;;  %v12565_v8 = vcombine.high %v7741_v12, %v7745_v1  ;;  %v8116_v20 = vld [vmem:[#allocation6 + $0xf48] sm:$0xff]  ;;  %v7709_v40 = vld [vmem:[#allocation6 + $0x290] sm:$0xff] }
 0x545   :  { %10979 = vmatmul.mubr.bf16.vlgmr.msra.gmra.mxu1 %v13401_v18  ;;  %v8120_v59 = vld [vmem:[#allocation6 + $0xf68] sm:$0xff]  ;;  %v7701_v52 = vld [vmem:[#allocation6 + $0x250] sm:$0xff] }
 0x546   :  { %11029 = vmatpush1.bf16.msra.mxu1 %v12890_v22  ;;  %11060 = vmatprep.mubr.bf16.mxu1 %v13453_v15  ;;  %v7737_v22 = vld [vmem:[#allocation6 + $0x370] sm:$0xff]  ;;  %v8108_v50 = vld [vmem:[#allocation6 + $0xf08] sm:$0xff] }
 0x547   :  { %11076 = vmatpush1.bf16.msra.mxu0 %v12484_v19  ;;  %11030 = vmatprep.subr.bf16.mxu1 %v12883_v44  ;;  %v12842_v19 = vcombine.low %v8020_v4, %v8024_v31  ;;  %v12564_v44 = vcombine.low %v7741_v12, %v7745_v1  ;;  %v12557_v23 = vcombine.high %v7733_v13, %v7737_v22  ;;  %v8112_v63 = vld [vmem:[#allocation6 + $0xf28] sm:$0xff]  ;;  %v7693_v1 = vld [vmem:[#allocation6 + $0x210] sm:$0xff] }
 0x548   :  { %11077 = vmatprep.subr.bf16.mxu0 %v12477_v32  ;;  %v12835_v32 = vcombine.high %v8012_v9, %v8016_v11  ;;  %v8100_v31 = vld [vmem:[#allocation6 + $0xec8] sm:$0xff] }
 0x549   :  { %v8104_v12 = vld [vmem:[#allocation6 + $0xee8] sm:$0xff] }
 0x54a   :  { %11031 = vmatpush1.bf16.msra.mxu1 %v12882_v43  ;;  %v7729_v43 = vld [vmem:[#allocation6 + $0x330] sm:$0xff] }
 0x54b   :  { %11078 = vmatpush1.bf16.msra.mxu0 %v12476_v55  ;;  %11032 = vmatprep.subr.bf16.mxu1 %v12875_v0  ;;  %v12834_v55 = vcombine.low %v8012_v9, %v8016_v11  ;;  %v12556_v0 = vcombine.low %v7733_v13, %v7737_v22  ;;  %v12549_v58 = vcombine.high %v7725_v53, %v7729_v43  ;;  %v8092_v11 = vld [vmem:[#allocation6 + $0xe88] sm:$0xff]  ;;  %v7941_v22 = vld [vmem:[#allocation6 + $0x9d0] sm:$0xff] }
 0x54c   :  { %11079 = vmatprep.subr.bf16.mxu0 %v12469_v35  ;;  %v12955_v35 = vcombine.high %v8132_v27, %v8136_v33  ;;  %v8096_v13 = vld [vmem:[#allocation6 + $0xea8] sm:$0xff] }
 0x54e   :  { %11033 = vmatpush1.bf16.msra.mxu1 %v12874_v2  ;;  %v7721_v2 = vld [vmem:[#allocation6 + $0x2f0] sm:$0xff] }
 0x54f   :  { %11080 = vmatpush1.bf16.msra.mxu0 %v12468_v10  ;;  %11034 = vmatprep.subr.bf16.mxu1 %v12867_v45  ;;  %v12954_v10 = vcombine.low %v8132_v27, %v8136_v33  ;;  %v12548_v45 = vcombine.low %v7725_v53, %v7729_v43  ;;  %v12541_v16 = vcombine.high %v7717_v25, %v7721_v2  ;;  %v8084_v33 = vld [vmem:[#allocation6 + $0xe48] sm:$0xff]  ;;  %v7933_v43 = vld [vmem:[#allocation6 + $0x990] sm:$0xff] }
 0x550   :  { %11081 = vmatprep.subr.bf16.mxu0 %v12461_v36  ;;  %v12947_v36 = vcombine.high %v8124_v62, %v8128_v41  ;;  %v8088_v53 = vld [vmem:[#allocation6 + $0xe68] sm:$0xff] }
 0x552   :  { %11035 = vmatpush1.bf16.msra.mxu1 %v12866_v38  ;;  %v7713_v38 = vld [vmem:[#allocation6 + $0x2b0] sm:$0xff] }
 0x553   :  { %11082 = vmatpush1.bf16.msra.mxu0 %v12460_v6  ;;  %11036 = vmatprep.subr.bf16.mxu1 %v12859_v47  ;;  %v12946_v6 = vcombine.low %v8124_v62, %v8128_v41  ;;  %v12540_v47 = vcombine.low %v7717_v25, %v7721_v2  ;;  %v12533_v61 = vcombine.high %v7709_v40, %v7713_v38  ;;  %v8076_v41 = vld [vmem:[#allocation6 + $0xe08] sm:$0xff] }
 0x554   :  { %11083 = vmatprep.subr.bf16.mxu0 %v12453_v14  ;;  %v12939_v14 = vcombine.high %v8116_v20, %v8120_v59  ;;  %v8080_v25 = vld [vmem:[#allocation6 + $0xe28] sm:$0xff] }
 0x556   :  { %11037 = vmatpush1.bf16.msra.mxu1 %v12858_v24  ;;  %v7705_v24 = vld [vmem:[#allocation6 + $0x270] sm:$0xff] }
 0x557   :  { %11084 = vmatpush1.bf16.msra.mxu0 %v12452_v29  ;;  %11038 = vmatprep.subr.bf16.mxu1 %v12851_v21  ;;  %v12938_v29 = vcombine.low %v8116_v20, %v8120_v59  ;;  %v12532_v21 = vcombine.low %v7709_v40, %v7713_v38  ;;  %v12525_v4 = vcombine.high %v7701_v52, %v7705_v24 }
 0x558   :  { %11085 = vmatprep.subr.bf16.mxu0 %v12573_v28  ;;  %v12931_v28 = vcombine.high %v8108_v50, %v8112_v63  ;;  %v12899_v40 = vcombine.high %v8076_v41, %v8080_v25 }
 0x55a   :  { %11039 = vmatpush1.bf16.msra.mxu1 %v12850_v3  ;;  %v7697_v3 = vld [vmem:[#allocation6 + $0x230] sm:$0xff] }
 0x55b   :  { %11086 = vmatpush2.bf16.msra.mxu0 %v12572_v5  ;;  %11040 = vmatprep.subr.bf16.mxu1 %v12843_v7  ;;  %v12930_v5 = vcombine.low %v8108_v50, %v8112_v63  ;;  %v12524_v7 = vcombine.low %v7701_v52, %v7705_v24  ;;  %v12517_v9 = vcombine.high %v7693_v1, %v7697_v3  ;;  %v7921_v50 = vld [vmem:[#allocation6 + $0x930] sm:$0xff] }
 0x55c   :  { %11087 = vmatprep.subr.bf16.mxu0 %v12565_v8  ;;  %v12923_v8 = vcombine.high %v8100_v31, %v8104_v12  ;;  %v12898_v63 = vcombine.low %v8076_v41, %v8080_v25  ;;  %v7889_v41 = vld [vmem:[#allocation6 + $0x830] sm:$0xff] }
 0x55e   :  { %11041 = vmatpush1.bf16.msra.mxu1 %v12842_v19  ;;  %v7945_v19 = vld [vmem:[#allocation6 + $0x9f0] sm:$0xff] }
 0x55f   :  { %11088 = vmatpush2.bf16.msra.mxu0 %v12564_v44  ;;  %11042 = vmatprep.subr.bf16.mxu1 %v12835_v32  ;;  %v12922_v44 = vcombine.low %v8100_v31, %v8104_v12  ;;  %v12516_v32 = vcombine.low %v7693_v1, %v7697_v3  ;;  %v12765_v27 = vcombine.high %v7941_v22, %v7945_v19  ;;  %v7913_v31 = vld [vmem:[#allocation6 + $0x8f0] sm:$0xff] }
 0x560   :  { %11089 = vmatprep.subr.bf16.mxu0 %v12557_v23  ;;  %v12915_v23 = vcombine.high %v8092_v11, %v8096_v13 }
 0x562   :  { %11043 = vmatpush1.bf16.msra.mxu1 %v12834_v55  ;;  %v7937_v55 = vld [vmem:[#allocation6 + $0x9b0] sm:$0xff] }
 0x563   :  { %11090 = vmatpush2.bf16.msra.mxu0 %v12556_v0  ;;  %11044 = vmatprep.subr.bf16.mxu1 %v12955_v35  ;;  %v12914_v0 = vcombine.low %v8092_v11, %v8096_v13  ;;  %v12764_v35 = vcombine.low %v7941_v22, %v7945_v19  ;;  %v12757_v62 = vcombine.high %v7933_v43, %v7937_v55  ;;  %v7905_v11 = vld [vmem:[#allocation6 + $0x8b0] sm:$0xff] }
 0x564   :  { %11091 = vmatprep.subr.bf16.mxu0 %v12549_v58  ;;  %v12907_v58 = vcombine.high %v8084_v33, %v8088_v53  ;;  %v12756_v59 = vcombine.low %v7933_v43, %v7937_v55 }
 0x566   :  { %11045 = vmatpush2.bf16.msra.mxu1 %v12954_v10  ;;  %v7925_v10 = vld [vmem:[#allocation6 + $0x950] sm:$0xff] }
 0x567   :  { %11092 = vmatpush2.bf16.msra.mxu0 %v12548_v45  ;;  %11046 = vmatprep.subr.bf16.mxu1 %v12947_v36  ;;  %v7929_v45 = vld [vmem:[#allocation6 + $0x970] sm:$0xff] }
 0x568   :  { %11093 = vmatprep.subr.bf16.mxu0 %v12541_v16  ;;  %v12906_v16 = vcombine.low %v8084_v33, %v8088_v53  ;;  %v12748_v24 = vcombine.low %v7925_v10, %v7929_v45  ;;  %v7897_v33 = vld [vmem:[#allocation6 + $0x870] sm:$0xff] }
 0x56a   :  { %11047 = vmatpush2.bf16.msra.mxu1 %v12946_v6  ;;  %v12749_v6 = vcombine.high %v7925_v10, %v7929_v45 }
 0x56b   :  { %11094 = vmatpush2.bf16.msra.mxu0 %v12540_v47  ;;  %11048 = vmatprep.subr.bf16.mxu1 %v12939_v14  ;;  %v7813_v47 = vld [vmem:[#allocation6 + $0x5d0] sm:$0xff] }
 0x56c   :  { %11095 = vmatprep.subr.bf16.mxu0 %v12533_v61  ;;  %v7817_v14 = vld [vmem:[#allocation6 + $0x5f0] sm:$0xff] }
 0x56d   :  { %v7917_v61 = vld [vmem:[#allocation6 + $0x910] sm:$0xff]  ;;  %v12636_v12 = vcombine.low %v7813_v47, %v7817_v14 }
 0x56e   :  { %11049 = vmatpush2.bf16.msra.mxu1 %v12938_v29  ;;  %v12637_v29 = vcombine.high %v7813_v47, %v7817_v14  ;;  %v12740_v1 = vcombine.low %v7917_v61, %v7921_v50 }
 0x56f   :  { %11096 = vmatpush2.bf16.msra.mxu0 %v12532_v21  ;;  %11050 = vmatprep.subr.bf16.mxu1 %v12931_v28  ;;  %v12741_v21 = vcombine.high %v7917_v61, %v7921_v50  ;;  %v7805_v28 = vld [vmem:[#allocation6 + $0x590] sm:$0xff] }
 0x570   :  { %11097 = vmatprep.subr.bf16.mxu0 %v12525_v4  ;;  %v7909_v4 = vld [vmem:[#allocation6 + $0x8d0] sm:$0xff] }
 0x571   :  { %v12732_v22 = vcombine.low %v7909_v4, %v7913_v31  ;;  %v7765_v61 = vld [vmem:[#allocation6 + $0x450] sm:$0xff] }
 0x572   :  { %11051 = vmatpush2.bf16.msra.mxu1 %v12930_v5  ;;  %v12733_v5 = vcombine.high %v7909_v4, %v7913_v31  ;;  %v7769_v50 = vld [vmem:[#allocation6 + $0x470] sm:$0xff] }
 0x573   :  { %11098 = vmatpush2.bf16.msra.mxu0 %v12524_v7  ;;  %11052 = vmatprep.subr.bf16.mxu1 %v12923_v8  ;;  %v7797_v7 = vld [vmem:[#allocation6 + $0x550] sm:$0xff] }
 0x574   :  { %11099 = vmatprep.subr.bf16.mxu0 %v12517_v9  ;;  %v7801_v8 = vld [vmem:[#allocation6 + $0x570] sm:$0xff] }
 0x575   :  { %v7901_v9 = vld [vmem:[#allocation6 + $0x890] sm:$0xff]  ;;  %v12621_v19 = vcombine.high %v7797_v7, %v7801_v8  ;;  %v12620_v53 = vcombine.low %v7797_v7, %v7801_v8 }
 0x576   :  { %11053 = vmatpush2.bf16.msra.mxu1 %v12922_v44  ;;  %v12725_v44 = vcombine.high %v7901_v9, %v7905_v11  ;;  %v12724_v43 = vcombine.low %v7901_v9, %v7905_v11  ;;  %v7761_v4 = vld [vmem:[#allocation6 + $0x430] sm:$0xff] }
 0x577   :  { %11100 = vmatpush2.bf16.msra.mxu0 %v12516_v32  ;;  %11054 = vmatprep.subr.bf16.mxu1 %v12915_v23  ;;  %v7789_v32 = vld [vmem:[#allocation6 + $0x510] sm:$0xff] }
 0x578   :  { %11151 = vmatprep.subr.bf16.mxu0 %v12765_v27  ;;  %v7793_v23 = vld [vmem:[#allocation6 + $0x530] sm:$0xff] }
 0x579   :  { %v10857_v2 = vpop.f32.mrf.mxu0  ;;  %v7893_v27 = vld [vmem:[#allocation6 + $0x850] sm:$0xff]  ;;  %v12613_v55 = vcombine.high %v7789_v32, %v7793_v23  ;;  %v12612_v25 = vcombine.low %v7789_v32, %v7793_v23 }
 0x57a   :  { %v13476_v36 = vadd.f32 %v10857_v2, %v13469_v46  ;;  %11055 = vmatpush2.bf16.msra.mxu1 %v12914_v0  ;;  %11102 = vmatmul.mubr.bf16.vlgmr.msra.gmra.mxu0 %v13396_v56  ;;  %v12717_v0 = vcombine.high %v7893_v27, %v7897_v33  ;;  %v12716_v2 = vcombine.low %v7893_v27, %v7897_v33  ;;  %v7989_v31 = vld [vmem:[#allocation6 + $0xb50] sm:$0xff] }
 0x57b   :  { %11152 = vmatpush1.bf16.msra.mxu0 %v12764_v35  ;;  %11183 = vmatprep.mubr.bf16.mxu0 %v13405_v51  ;;  %v10859_v20 = vpop.f32.mrf.mxu0  ;;  %v7781_v35 = vld [vmem:[#allocation6 + $0x4d0] sm:$0xff] }
 0x57c   :  { %v13481_v38 = vadd.f32 %v10859_v20, %v13471_v48  ;;  %11056 = vmatprep.subr.bf16.mxu1 %v12907_v58  ;;  %11153 = vmatprep.subr.bf16.mxu0 %v12757_v62  ;;  %v7809_v48 = vld [vmem:[#allocation6 + $0x5b0] sm:$0xff] }
 0x57d   :  { %v10861_v46 = vpop.f32.mrf.mxu0  ;;  %v12629_v3 = vcombine.high %v7805_v28, %v7809_v48  ;;  %v12628_v13 = vcombine.low %v7805_v28, %v7809_v48  ;;  %v7785_v58 = vld [vmem:[#allocation6 + $0x4f0] sm:$0xff] }
 0x57e   :  { %11057 = vmatpush2.bf16.msra.mxu1 %v12906_v16  ;;  %v7885_v62 = vld [vmem:[#allocation6 + $0x810] sm:$0xff]  ;;  %v12605_v10 = vcombine.high %v7781_v35, %v7785_v58 }
 0x57f   :  { %11154 = vmatpush1.bf16.msra.mxu0 %v12756_v59  ;;  %v10862_v52 = vpop.f32.mrf.mxu0  ;;  %11058 = vmatprep.subr.bf16.mxu1 %v12899_v40  ;;  %v12709_v45 = vcombine.high %v7885_v62, %v7889_v41  ;;  %v7773_v16 = vld [vmem:[#allocation6 + $0x490] sm:$0xff]  ;;  %v12708_v47 = vcombine.low %v7885_v62, %v7889_v41 }
 0x580   :  { %11155 = vmatprep.subr.bf16.mxu0 %v12749_v6  ;;  %v7777_v20 = vld [vmem:[#allocation6 + $0x4b0] sm:$0xff]  ;;  %v12604_v6 = vcombine.low %v7781_v35, %v7785_v58 }
 0x581   :  { %v8005_v59 = vld [vmem:[#allocation6 + $0xbd0] sm:$0xff]  ;;  %v12597_v14 = vcombine.high %v7773_v16, %v7777_v20 }
 0x582   :  { %11059 = vmatpush2.bf16.msra.mxu1 %v12898_v63  ;;  %v8009_v40 = vld [vmem:[#allocation6 + $0xbf0] sm:$0xff] }
 0x583   :  { %11156 = vmatpush1.bf16.msra.mxu0 %v12748_v24  ;;  %11110 = vmatprep.subr.bf16.mxu1 %v12637_v29  ;;  %v12829_v46 = vcombine.high %v8005_v59, %v8009_v40  ;;  %v7997_v63 = vld [vmem:[#allocation6 + $0xb90] sm:$0xff]  ;;  %v12596_v24 = vcombine.low %v7773_v16, %v7777_v20  ;;  %v12828_v29 = vcombine.low %v8005_v59, %v8009_v40 }
 0x584   :  { %11157 = vmatprep.subr.bf16.mxu0 %v12741_v21  ;;  %v8001_v52 = vld [vmem:[#allocation6 + $0xbb0] sm:$0xff]  ;;  %v12589_v21 = vcombine.high %v7765_v61, %v7769_v50 }
 0x585   :  { %11061 = vmatmul.mubr.bf16.vlgmr.msra.gmra.mxu1 %v13455_v17  ;;  %v12821_v28 = vcombine.high %v7997_v63, %v8001_v52  ;;  %v7757_v48 = vld [vmem:[#allocation6 + $0x410] sm:$0xff] }
 0x586   :  { %11111 = vmatpush1.bf16.msra.mxu1 %v12636_v12  ;;  %11142 = vmatprep.mubr.bf16.mxu1 %v13384_v42  ;;  %v7993_v12 = vld [vmem:[#allocation6 + $0xb70] sm:$0xff] }
 0x587   :  { %11158 = vmatpush1.bf16.msra.mxu0 %v12740_v1  ;;  %11112 = vmatprep.subr.bf16.mxu1 %v12629_v3  ;;  %v12588_v1 = vcombine.low %v7765_v61, %v7769_v50  ;;  %v12820_v3 = vcombine.low %v7997_v63, %v8001_v52  ;;  %v12813_v7 = vcombine.high %v7989_v31, %v7993_v12  ;;  %v7877_v8 = vld [vmem:[#allocation6 + $0x7d0] sm:$0xff] }
 0x588   :  { %11159 = vmatprep.subr.bf16.mxu0 %v12733_v5  ;;  %v12581_v5 = vcombine.high %v7757_v48, %v7761_v4  ;;  %v7881_v9 = vld [vmem:[#allocation6 + $0x7f0] sm:$0xff] }
 0x589   :  { %v7981_v11 = vld [vmem:[#allocation6 + $0xb10] sm:$0xff] }
 0x58a   :  { %11113 = vmatpush1.bf16.msra.mxu1 %v12628_v13  ;;  %v7985_v13 = vld [vmem:[#allocation6 + $0xb30] sm:$0xff] }
 0x58b   :  { %11160 = vmatpush1.bf16.msra.mxu0 %v12732_v22  ;;  %11114 = vmatprep.subr.bf16.mxu1 %v12621_v19  ;;  %v12580_v22 = vcombine.low %v7757_v48, %v7761_v4  ;;  %v12812_v19 = vcombine.low %v7989_v31, %v7993_v12  ;;  %v12805_v32 = vcombine.high %v7981_v11, %v7985_v13  ;;  %v7869_v23 = vld [vmem:[#allocation6 + $0x790] sm:$0xff]  ;;  %v7686_v12 = vld [vmem:[#allocation6 + $0x1d8] sm:$0xff] }
 0x58c   :  { %11161 = vmatprep.subr.bf16.mxu0 %v12725_v44  ;;  %v12701_v44 = vcombine.high %v7877_v8, %v7881_v9  ;;  %v7873_v27 = vld [vmem:[#allocation6 + $0x7b0] sm:$0xff] }
 0x58d   :  { %v7973_v33 = vld [vmem:[#allocation6 + $0xad0] sm:$0xff] }
 0x58e   :  { %11115 = vmatpush1.bf16.msra.mxu1 %v12620_v53  ;;  %v7977_v53 = vld [vmem:[#allocation6 + $0xaf0] sm:$0xff] }
 0x58f   :  { %11162 = vmatpush1.bf16.msra.mxu0 %v12724_v43  ;;  %11116 = vmatprep.subr.bf16.mxu1 %v12613_v55  ;;  %v12700_v43 = vcombine.low %v7877_v8, %v7881_v9  ;;  %v12804_v55 = vcombine.low %v7981_v11, %v7985_v13  ;;  %v12797_v35 = vcombine.high %v7973_v33, %v7977_v53  ;;  %v7861_v58 = vld [vmem:[#allocation6 + $0x750] sm:$0xff]  ;;  %v7678_v13 = vld [vmem:[#allocation6 + $0x198] sm:$0xff] }
 0x590   :  { %11163 = vmatprep.subr.bf16.mxu0 %v12717_v0  ;;  %v12693_v0 = vcombine.high %v7869_v23, %v7873_v27  ;;  %v7865_v62 = vld [vmem:[#allocation6 + $0x770] sm:$0xff] }
 0x591   :  { %v7965_v41 = vld [vmem:[#allocation6 + $0xa90] sm:$0xff] }
 0x592   :  { %11117 = vmatpush1.bf16.msra.mxu1 %v12612_v25  ;;  %v7969_v25 = vld [vmem:[#allocation6 + $0xab0] sm:$0xff] }
 0x593   :  { %11164 = vmatpush1.bf16.msra.mxu0 %v12716_v2  ;;  %11118 = vmatprep.subr.bf16.mxu1 %v12605_v10  ;;  %v12692_v2 = vcombine.low %v7869_v23, %v7873_v27  ;;  %v12796_v10 = vcombine.low %v7973_v33, %v7977_v53  ;;  %v12789_v16 = vcombine.high %v7965_v41, %v7969_v25  ;;  %v7853_v20 = vld [vmem:[#allocation6 + $0x710] sm:$0xff] }
 0x594   :  { %11165 = vmatprep.subr.bf16.mxu0 %v12709_v45  ;;  %v12685_v45 = vcombine.high %v7861_v58, %v7865_v62  ;;  %v7857_v59 = vld [vmem:[#allocation6 + $0x730] sm:$0xff] }
 0x595   :  { %v7957_v40 = vld [vmem:[#allocation6 + $0xa50] sm:$0xff] }
 0x596   :  { %11119 = vmatpush1.bf16.msra.mxu1 %v12604_v6  ;;  %v7961_v6 = vld [vmem:[#allocation6 + $0xa70] sm:$0xff] }
 0x597   :  { %11166 = vmatpush1.bf16.msra.mxu0 %v12708_v47  ;;  %11120 = vmatprep.subr.bf16.mxu1 %v12597_v14  ;;  %v12684_v47 = vcombine.low %v7861_v58, %v7865_v62  ;;  %v12788_v14 = vcombine.low %v7965_v41, %v7969_v25  ;;  %v12781_v61 = vcombine.high %v7957_v40, %v7961_v6  ;;  %v7845_v50 = vld [vmem:[#allocation6 + $0x6d0] sm:$0xff] }
 0x598   :  { %11167 = vmatprep.subr.bf16.mxu0 %v12829_v46  ;;  %v12677_v46 = vcombine.high %v7853_v20, %v7857_v59  ;;  %v7849_v63 = vld [vmem:[#allocation6 + $0x6f0] sm:$0xff] }
 0x599   :  { %v7949_v52 = vld [vmem:[#allocation6 + $0xa10] sm:$0xff] }
 0x59a   :  { %11121 = vmatpush1.bf16.msra.mxu1 %v12596_v24  ;;  %v7953_v24 = vld [vmem:[#allocation6 + $0xa30] sm:$0xff] }
 0x59b   :  { %11168 = vmatpush2.bf16.msra.mxu0 %v12828_v29  ;;  %11122 = vmatprep.subr.bf16.mxu1 %v12589_v21  ;;  %v12676_v29 = vcombine.low %v7853_v20, %v7857_v59  ;;  %v12780_v21 = vcombine.low %v7957_v40, %v7961_v6  ;;  %v12773_v48 = vcombine.high %v7949_v52, %v7953_v24  ;;  %v7837_v4 = vld [vmem:[#allocation6 + $0x690] sm:$0xff] }
 0x59c   :  { %11169 = vmatprep.subr.bf16.mxu0 %v12821_v28  ;;  %v12669_v28 = vcombine.high %v7845_v50, %v7849_v63  ;;  %v7841_v31 = vld [vmem:[#allocation6 + $0x6b0] sm:$0xff] }
 0x59d   :  { %v7829_v9 = vld [vmem:[#allocation6 + $0x650] sm:$0xff] }
 0x59e   :  { %11123 = vmatpush1.bf16.msra.mxu1 %v12588_v1  ;;  %v7690_v1 = vld [vmem:[#allocation6 + $0x1f8] sm:$0xff]  ;;  %v7833_v11 = vld [vmem:[#allocation6 + $0x670] sm:$0xff] }
 0x59f   :  { %11170 = vmatpush2.bf16.msra.mxu0 %v12820_v3  ;;  %11124 = vmatprep.subr.bf16.mxu1 %v12581_v5  ;;  %v12668_v3 = vcombine.low %v7845_v50, %v7849_v63  ;;  %v12772_v5 = vcombine.low %v7949_v52, %v7953_v24  ;;  %v12511_v8 = vcombine.high %v7686_v12, %v7690_v1  ;;  %v7821_v27 = vld [vmem:[#allocation6 + $0x610] sm:$0xff] }
 0x5a0   :  { %11171 = vmatprep.subr.bf16.mxu0 %v12813_v7  ;;  %v12661_v7 = vcombine.high %v7837_v4, %v7841_v31  ;;  %v7825_v33 = vld [vmem:[#allocation6 + $0x630] sm:$0xff] }
 0x5a1   :  { %v12645_v62 = vcombine.high %v7821_v27, %v7825_v33  ;;  %v8069_v25 = vld [vmem:[#allocation6 + $0xdd0] sm:$0xff]  ;;  %v12644_v20 = vcombine.low %v7821_v27, %v7825_v33 }
 0x5a2   :  { %11125 = vmatpush1.bf16.msra.mxu1 %v12580_v22  ;;  %v7682_v22 = vld [vmem:[#allocation6 + $0x1b8] sm:$0xff] }
 0x5a3   :  { %11172 = vmatpush2.bf16.msra.mxu0 %v12812_v19  ;;  %11126 = vmatprep.subr.bf16.mxu1 %v12701_v44  ;;  %v12660_v19 = vcombine.low %v7837_v4, %v7841_v31  ;;  %v12510_v44 = vcombine.low %v7686_v12, %v7690_v1  ;;  %v12503_v23 = vcombine.high %v7678_v13, %v7682_v22  ;;  %v7650_v4 = vld [vmem:[#allocation6 + $0xb8] sm:$0xff] }
 0x5a4   :  { %11173 = vmatprep.subr.bf16.mxu0 %v12805_v32  ;;  %v12653_v32 = vcombine.high %v7829_v9, %v7833_v11  ;;  %v12502_v58 = vcombine.low %v7678_v13, %v7682_v22  ;;  %v8049_v13 = vld [vmem:[#allocation6 + $0xd30] sm:$0xff] }
 0x5a6   :  { %11127 = vmatpush2.bf16.msra.mxu1 %v12700_v43  ;;  %v7670_v43 = vld [vmem:[#allocation6 + $0x158] sm:$0xff] }
 0x5a7   :  { %11174 = vmatpush2.bf16.msra.mxu0 %v12804_v55  ;;  %11128 = vmatprep.subr.bf16.mxu1 %v12693_v0  ;;  %v7674_v55 = vld [vmem:[#allocation6 + $0x178] sm:$0xff]  ;;  %v12652_v0 = vcombine.low %v7829_v9, %v7833_v11  ;;  %v8045_v11 = vld [vmem:[#allocation6 + $0xd10] sm:$0xff] }
 0x5a8   :  { %11175 = vmatprep.subr.bf16.mxu0 %v12797_v35  ;;  %v12495_v41 = vcombine.high %v7670_v43, %v7674_v55  ;;  %v12494_v40 = vcombine.low %v7670_v43, %v7674_v55  ;;  %v12869_v33 = vcombine.high %v8045_v11, %v8049_v13  ;;  %v8037_v43 = vld [vmem:[#allocation6 + $0xcd0] sm:$0xff] }
 0x5a9   :  { %v8041_v55 = vld [vmem:[#allocation6 + $0xcf0] sm:$0xff] }
 0x5aa   :  { %11129 = vmatpush2.bf16.msra.mxu1 %v12692_v2  ;;  %v8073_v2 = vld [vmem:[#allocation6 + $0xdf0] sm:$0xff] }
 0x5ab   :  { %11176 = vmatpush2.bf16.msra.mxu0 %v12796_v10  ;;  %11130 = vmatprep.subr.bf16.mxu1 %v12685_v45  ;;  %v7662_v45 = vld [vmem:[#allocation6 + $0x118] sm:$0xff]  ;;  %v12893_v6 = vcombine.high %v8069_v25, %v8073_v2  ;;  %v12892_v50 = vcombine.low %v8069_v25, %v8073_v2  ;;  %v12861_v25 = vcombine.high %v8037_v43, %v8041_v55 }
 0x5ac   :  { %11177 = vmatprep.subr.bf16.mxu0 %v12789_v16  ;;  %v7666_v16 = vld [vmem:[#allocation6 + $0x138] sm:$0xff] }
 0x5ad   :  { %v12486_v63 = vcombine.low %v7662_v45, %v7666_v16 }
 0x5ae   :  { %11131 = vmatpush2.bf16.msra.mxu1 %v12684_v47  ;;  %v8061_v47 = vld [vmem:[#allocation6 + $0xd90] sm:$0xff] }
 0x5af   :  { %11178 = vmatpush2.bf16.msra.mxu0 %v12788_v14  ;;  %11132 = vmatprep.subr.bf16.mxu1 %v12677_v46  ;;  %v8065_v14 = vld [vmem:[#allocation6 + $0xdb0] sm:$0xff]  ;;  %v7654_v46 = vld [vmem:[#allocation6 + $0xd8] sm:$0xff] }
 0x5b0   :  { %11179 = vmatprep.subr.bf16.mxu0 %v12781_v61  ;;  %v7658_v61 = vld [vmem:[#allocation6 + $0xf8] sm:$0xff]  ;;  %v12885_v52 = vcombine.high %v8061_v47, %v8065_v14  ;;  %v12884_v12 = vcombine.low %v8061_v47, %v8065_v14  ;;  %v8021_v47 = vld [vmem:[#allocation6 + $0xc50] sm:$0xff] }
 0x5b1   :  { %v12479_v24 = vcombine.high %v7654_v46, %v7658_v61  ;;  %v8025_v14 = vld [vmem:[#allocation6 + $0xc70] sm:$0xff] }
 0x5b2   :  { %11133 = vmatpush2.bf16.msra.mxu1 %v12676_v29  ;;  %v8053_v29 = vld [vmem:[#allocation6 + $0xd50] sm:$0xff] }
 0x5b3   :  { %11180 = vmatpush2.bf16.msra.mxu0 %v12780_v21  ;;  %11134 = vmatprep.subr.bf16.mxu1 %v12669_v28  ;;  %v8057_v21 = vld [vmem:[#allocation6 + $0xd70] sm:$0xff] }
 0x5b4   :  { %11181 = vmatprep.subr.bf16.mxu0 %v12773_v48  ;;  %v7646_v48 = vld [vmem:[#allocation6 + $0x98] sm:$0xff] }
 0x5b5   :  { %v12471_v9 = vcombine.high %v7646_v48, %v7650_v4  ;;  %v12470_v27 = vcombine.low %v7646_v48, %v7650_v4  ;;  %v7738_v48 = vld [vmem:[#allocation6 + $0x378] sm:$0xff]  ;;  %v12844_v4 = vcombine.low %v8021_v47, %v8025_v14 }
 0x5b6   :  { %11135 = vmatpush2.bf16.msra.mxu1 %v12668_v3  ;;  %v12478_v3 = vcombine.low %v7654_v46, %v7658_v61  ;;  %v7742_v46 = vld [vmem:[#allocation6 + $0x398] sm:$0xff] }
 0x5b7   :  { %11182 = vmatpush2.bf16.msra.mxu0 %v12772_v5  ;;  %11136 = vmatprep.subr.bf16.mxu1 %v12661_v7  ;;  %v12877_v5 = vcombine.high %v8053_v29, %v8057_v21  ;;  %v7746_v61 = vld [vmem:[#allocation6 + $0x3b8] sm:$0xff] }
 0x5b8   :  { %11233 = vmatprep.subr.bf16.mxu0 %v12511_v8 }
 0x5b9   :  { %v13485_v53 = vpop.f32.mrf.mxu0 }
 0x5ba   :  { %11137 = vmatpush2.bf16.msra.mxu1 %v12660_v19  ;;  %11184 = vmatmul.mubr.bf16.vlgmr.msra.gmra.mxu0 %v13427_v60  ;;  %v7638_v19 = vld [vmem:[#allocation6 + $0x58] sm:$0xff] }
 0x5bb   :  { %11234 = vmatpush1.bf16.msra.mxu0 %v12510_v44  ;;  %11265 = vmatprep.mubr.bf16.mxu0 %v13378_v34  ;;  %v13489_v35 = vpop.f32.mrf.mxu0  ;;  %v12487_v34 = vcombine.high %v7662_v45, %v7666_v16  ;;  %v7642_v44 = vld [vmem:[#allocation6 + $0x78] sm:$0xff]  ;;  %v8033_v45 = vld [vmem:[#allocation6 + $0xcb0] sm:$0xff] }
 0x5bc   :  { %11138 = vmatprep.subr.bf16.mxu1 %v12653_v32  ;;  %11235 = vmatprep.subr.bf16.mxu0 %v12503_v23  ;;  %v12876_v32 = vcombine.low %v8053_v29, %v8057_v21  ;;  %v7750_v16 = vld [vmem:[#allocation6 + $0x3d8] sm:$0xff]  ;;  %v8013_v29 = vld [vmem:[#allocation6 + $0xc10] sm:$0xff] }
 0x5bd   :  { %v10943_v10 = vpop.f32.mrf.mxu0  ;;  %v8017_v21 = vld [vmem:[#allocation6 + $0xc30] sm:$0xff] }
 0x5be   :  { %11139 = vmatpush2.bf16.msra.mxu1 %v12652_v0  ;;  %v7630_v0 = vld [vmem:[#allocation6 + $0x18] sm:$0xff]  ;;  %v8029_v10 = vld [vmem:[#allocation6 + $0xc90] sm:$0xff] }
 0x5bf   :  { %11236 = vmatpush1.bf16.msra.mxu0 %v12502_v58  ;;  %v10944_v59 = vpop.f32.mrf.mxu0  ;;  %11140 = vmatprep.subr.bf16.mxu1 %v12645_v62  ;;  %v7634_v58 = vld [vmem:[#allocation6 + $0x38] sm:$0xff]  ;;  %v12868_v62 = vcombine.low %v8045_v11, %v8049_v13 }
 0x5c0   :  { %11237 = vmatprep.subr.bf16.mxu0 %v12495_v41  ;;  %v12462_v41 = vcombine.low %v7638_v19, %v7642_v44  ;;  %v12455_v2 = vcombine.high %v7630_v0, %v7634_v58  ;;  %v12860_v59 = vcombine.low %v8037_v43, %v8041_v55  ;;  %v8117_v43 = vld [vmem:[#allocation6 + $0xf50] sm:$0xff] }
 0x5c1   :  { %v8121_v55 = vld [vmem:[#allocation6 + $0xf70] sm:$0xff] }
 0x5c2   :  { %11141 = vmatpush2.bf16.msra.mxu1 %v12644_v20  ;;  %v7754_v20 = vld [vmem:[#allocation6 + $0x3f8] sm:$0xff] }
 0x5c3   :  { %11238 = vmatpush1.bf16.msra.mxu0 %v12494_v40  ;;  %11192 = vmatprep.subr.bf16.mxu1 %v12893_v6  ;;  %v12454_v40 = vcombine.low %v7630_v0, %v7634_v58  ;;  %v12853_v6 = vcombine.high %v8029_v10, %v8033_v45  ;;  %v7710_v0 = vld [vmem:[#allocation6 + $0x298] sm:$0xff] }
 0x5c4   :  { %11239 = vmatprep.subr.bf16.mxu0 %v12487_v34  ;;  %v12575_v34 = vcombine.high %v7750_v16, %v7754_v20  ;;  %v7714_v58 = vld [vmem:[#allocation6 + $0x2b8] sm:$0xff] }
 0x5c5   :  { %11143 = vmatmul.mubr.bf16.vlgmr.msra.gmra.mxu1 %v13401_v18  ;;  %v10898_v28 = vpop.f32.mrf.mxu1 }
 0x5c6   :  { %v10899_v31 = vadd.f32 %v10898_v28, %v13476_v36  ;;  %11193 = vmatpush1.bf16.msra.mxu1 %v12892_v50  ;;  %11224 = vmatprep.mubr.bf16.mxu1 %v13453_v15  ;;  %v12852_v50 = vcombine.low %v8029_v10, %v8033_v45  ;;  %v7734_v28 = vld [vmem:[#allocation6 + $0x358] sm:$0xff]  ;;  %v8109_v10 = vld [vmem:[#allocation6 + $0xf10] sm:$0xff] }
 0x5c7   :  { %11240 = vmatpush1.bf16.msra.mxu0 %v12486_v63  ;;  %v10900_v1 = vpop.f32.mrf.mxu1  ;;  %11194 = vmatprep.subr.bf16.mxu1 %v12885_v52  ;;  %v12574_v63 = vcombine.low %v7750_v16, %v7754_v20  ;;  %v12845_v52 = vcombine.high %v8021_v47, %v8025_v14  ;;  %v12558_v11 = vcombine.low %v7734_v28, %v7738_v48  ;;  %v8113_v45 = vld [vmem:[#allocation6 + $0xf30] sm:$0xff]  ;;  %v7702_v16 = vld [vmem:[#allocation6 + $0x258] sm:$0xff] }
 0x5c8   :  { %v11397_v7 = vmax.f32 %v10899_v31, 0.0  ;;  %v10901_v8 = vadd.f32 %v10900_v1, %v13481_v38  ;;  %11241 = vmatprep.subr.bf16.mxu0 %v12479_v24  ;;  %v12463_v38 = vcombine.high %v7638_v19, %v7642_v44  ;;  %v12567_v24 = vcombine.high %v7742_v46, %v7746_v61  ;;  %v8125_v19 = vld [vmem:[#allocation6 + $0xf90] sm:$0xff]  ;;  %v7706_v20 = vld [vmem:[#allocation6 + $0x278] sm:$0xff] }
 0x5c9   :  { %v10902_v22 = vpop.f32.mrf.mxu1  ;;  %v12566_v31 = vcombine.low %v7742_v46, %v7746_v61  ;;  %v12559_v1 = vcombine.high %v7734_v28, %v7738_v48  ;;  %v8129_v44 = vld [vmem:[#allocation6 + $0xfb0] sm:$0xff]  ;;  %v7694_v46 = vld [vmem:[#allocation6 + $0x218] sm:$0xff] }
 0x5ca   :  { %11405 = vst [vmem:[%s13570_s6] sm:$0xff] %v11397_v7  ;;  %v11398_v36 = vmax.f32 %v10901_v8, 0.0  ;;  %11195 = vmatpush1.bf16.msra.mxu1 %v12884_v12  ;;  %v12837_v12 = vcombine.high %v8013_v29, %v8017_v21  ;;  %v7726_v7 = vld [vmem:[#allocation6 + $0x318] sm:$0xff]  ;;  %v8101_v47 = vld [vmem:[#allocation6 + $0xed0] sm:$0xff] }
 0x5cb   :  { %11242 = vmatpush1.bf16.msra.mxu0 %v12478_v3  ;;  %v10903_v23 = vpop.f32.mrf.mxu1  ;;  %11196 = vmatprep.subr.bf16.mxu1 %v12877_v5  ;;  %v8133_v3 = vld [vmem:[#allocation6 + $0xfd0] sm:$0xff]  ;;  %v7730_v8 = vld [vmem:[#allocation6 + $0x338] sm:$0xff] }
 0x5cc   :  { %11406 = vst [vmem:[%s13570_s6 + $0x8] sm:$0xff] %v11398_v36  ;;  %11243 = vmatprep.subr.bf16.mxu0 %v12471_v9  ;;  %v8137_v5 = vld [vmem:[#allocation6 + $0xff0] sm:$0xff]  ;;  %v12836_v9 = vcombine.low %v8013_v29, %v8017_v21  ;;  %v12551_v22 = vcombine.high %v7726_v7, %v7730_v8  ;;  %v7718_v36 = vld [vmem:[#allocation6 + $0x2d8] sm:$0xff] }
 0x5cd   :  { %v12957_v13 = vcombine.high %v8133_v3, %v8137_v5  ;;  %v12956_v23 = vcombine.low %v8133_v3, %v8137_v5  ;;  %v8105_v14 = vld [vmem:[#allocation6 + $0xef0] sm:$0xff]  ;;  %v7698_v61 = vld [vmem:[#allocation6 + $0x238] sm:$0xff] }
 0x5ce   :  { %11197 = vmatpush1.bf16.msra.mxu1 %v12876_v32  ;;  %v7722_v32 = vld [vmem:[#allocation6 + $0x2f8] sm:$0xff]  ;;  %v8093_v29 = vld [vmem:[#allocation6 + $0xe90] sm:$0xff] }
 0x5cf   :  { %11244 = vmatpush1.bf16.msra.mxu0 %v12470_v27  ;;  %11198 = vmatprep.subr.bf16.mxu1 %v12869_v33  ;;  %v12550_v27 = vcombine.low %v7726_v7, %v7730_v8  ;;  %v12949_v33 = vcombine.high %v8125_v19, %v8129_v44  ;;  %v8097_v21 = vld [vmem:[#allocation6 + $0xeb0] sm:$0xff]  ;;  %v7942_v28 = vld [vmem:[#allocation6 + $0x9d8] sm:$0xff] }
 0x5d0   :  { %11245 = vmatprep.subr.bf16.mxu0 %v12463_v38  ;;  %v12543_v38 = vcombine.high %v7718_v36, %v7722_v32  ;;  %v7946_v48 = vld [vmem:[#allocation6 + $0x9f8] sm:$0xff]  ;;  %v8085_v3 = vld [vmem:[#allocation6 + $0xe50] sm:$0xff] }
 0x5d1   :  { %v8089_v5 = vld [vmem:[#allocation6 + $0xe70] sm:$0xff]  ;;  %v7934_v7 = vld [vmem:[#allocation6 + $0x998] sm:$0xff] }
 0x5d2   :  { %11199 = vmatpush1.bf16.msra.mxu1 %v12868_v62  ;;  %v12948_v62 = vcombine.low %v8125_v19, %v8129_v44  ;;  %v7938_v8 = vld [vmem:[#allocation6 + $0x9b8] sm:$0xff]  ;;  %v8077_v19 = vld [vmem:[#allocation6 + $0xe10] sm:$0xff] }
 0x5d3   :  { %11246 = vmatpush1.bf16.msra.mxu0 %v12462_v41  ;;  %11200 = vmatprep.subr.bf16.mxu1 %v12861_v25  ;;  %v12542_v41 = vcombine.low %v7718_v36, %v7722_v32  ;;  %v12941_v25 = vcombine.high %v8117_v43, %v8121_v55  ;;  %v8081_v44 = vld [vmem:[#allocation6 + $0xe30] sm:$0xff]  ;;  %v7926_v36 = vld [vmem:[#allocation6 + $0x958] sm:$0xff] }
 0x5d4   :  { %11247 = vmatprep.subr.bf16.mxu0 %v12455_v2  ;;  %v12535_v2 = vcombine.high %v7710_v0, %v7714_v58  ;;  %v7930_v32 = vld [vmem:[#allocation6 + $0x978] sm:$0xff] }
 0x5d6   :  { %11201 = vmatpush1.bf16.msra.mxu1 %v12860_v59  ;;  %v12940_v59 = vcombine.low %v8117_v43, %v8121_v55  ;;  %v12751_v55 = vcombine.high %v7926_v36, %v7930_v32 }
 0x5d7   :  { %11248 = vmatpush1.bf16.msra.mxu0 %v12454_v40  ;;  %11202 = vmatprep.subr.bf16.mxu1 %v12853_v6  ;;  %v12534_v40 = vcombine.low %v7710_v0, %v7714_v58  ;;  %v12933_v6 = vcombine.high %v8109_v10, %v8113_v45  ;;  %v7814_v0 = vld [vmem:[#allocation6 + $0x5d8] sm:$0xff] }
 0x5d8   :  { %11249 = vmatprep.subr.bf16.mxu0 %v12575_v34  ;;  %v12527_v34 = vcombine.high %v7702_v16, %v7706_v20  ;;  %v7818_v58 = vld [vmem:[#allocation6 + $0x5f8] sm:$0xff] }
 0x5da   :  { %11203 = vmatpush1.bf16.msra.mxu1 %v12852_v50  ;;  %v12932_v50 = vcombine.low %v8109_v10, %v8113_v45  ;;  %v12639_v10 = vcombine.high %v7814_v0, %v7818_v58  ;;  %v13505_v45 = vld [vmem:[#allocation7] sm:$0xff] }
 0x5db   :  { %11250 = vmatpush2.bf16.msra.mxu0 %v12574_v63  ;;  %11204 = vmatprep.subr.bf16.mxu1 %v12845_v52  ;;  %v12526_v63 = vcombine.low %v7702_v16, %v7706_v20  ;;  %v12925_v52 = vcombine.high %v8101_v47, %v8105_v14 }
 0x5dc   :  { %11251 = vmatprep.subr.bf16.mxu0 %v12567_v24  ;;  %v12519_v24 = vcombine.high %v7694_v46, %v7698_v61 }
 0x5de   :  { %11205 = vmatpush1.bf16.msra.mxu1 %v12844_v4  ;;  %v12924_v4 = vcombine.low %v8101_v47, %v8105_v14  ;;  %v8156_v47 = vrot.slane %v13505_v45, %v1145_v30  ;;  %v12638_v14 = vcombine.low %v7814_v0, %v7818_v58  ;;  %v7774_v0 = vld [vmem:[#allocation6 + $0x498] sm:$0xff] }
 0x5df   :  { %11252 = vmatpush2.bf16.msra.mxu0 %v12566_v31  ;;  %11206 = vmatprep.subr.bf16.mxu1 %v12837_v12  ;;  %v12518_v31 = vcombine.low %v7694_v46, %v7698_v61  ;;  %v12917_v12 = vcombine.high %v8093_v29, %v8097_v21  ;;  %v7778_v58 = vld [vmem:[#allocation6 + $0x4b8] sm:$0xff] }
 0x5e0   :  { %11253 = vmatprep.subr.bf16.mxu0 %v12559_v1  ;;  %v12767_v1 = vcombine.high %v7942_v28, %v7946_v48 }
 0x5e2   :  { %11207 = vmatpush1.bf16.msra.mxu1 %v12836_v9  ;;  %v12916_v9 = vcombine.low %v8093_v29, %v8097_v21  ;;  %v7902_v29 = vld [vmem:[#allocation6 + $0x898] sm:$0xff] }
 0x5e3   :  { %11254 = vmatpush2.bf16.msra.mxu0 %v12558_v11  ;;  %11208 = vmatprep.subr.bf16.mxu1 %v12957_v13  ;;  %v12766_v11 = vcombine.low %v7942_v28, %v7946_v48  ;;  %v12909_v13 = vcombine.high %v8085_v3, %v8089_v5  ;;  %v7906_v21 = vld [vmem:[#allocation6 + $0x8b8] sm:$0xff]  ;;  %v10942_v28 = vadd.f32 %v13489_v35, %v8156_v47 }
 0x5e4   :  { %11255 = vmatprep.subr.bf16.mxu0 %v12551_v22  ;;  %v12759_v22 = vcombine.high %v7934_v7, %v7938_v8  ;;  %v7894_v35 = vld [vmem:[#allocation6 + $0x858] sm:$0xff] }
 0x5e6   :  { %11209 = vmatpush2.bf16.msra.mxu1 %v12956_v23 }
 0x5e7   :  { %11256 = vmatpush2.bf16.msra.mxu0 %v12550_v27  ;;  %11210 = vmatprep.subr.bf16.mxu1 %v12949_v33  ;;  %v12908_v27 = vcombine.low %v8085_v3, %v8089_v5  ;;  %v12758_v33 = vcombine.low %v7934_v7, %v7938_v8  ;;  %v7790_v3 = vld [vmem:[#allocation6 + $0x518] sm:$0xff] }
 0x5e8   :  { %11257 = vmatprep.subr.bf16.mxu0 %v12543_v38  ;;  %v12901_v38 = vcombine.high %v8077_v19, %v8081_v44  ;;  %v7794_v5 = vld [vmem:[#allocation6 + $0x538] sm:$0xff] }
 0x5ea   :  { %11211 = vmatpush2.bf16.msra.mxu1 %v12948_v62  ;;  %v7918_v62 = vld [vmem:[#allocation6 + $0x918] sm:$0xff] }
 0x5eb   :  { %11258 = vmatpush2.bf16.msra.mxu0 %v12542_v41  ;;  %11212 = vmatprep.subr.bf16.mxu1 %v12941_v25  ;;  %v7922_v41 = vld [vmem:[#allocation6 + $0x938] sm:$0xff] }
 0x5ec   :  { %11259 = vmatprep.subr.bf16.mxu0 %v12535_v2  ;;  %v12900_v2 = vcombine.low %v8077_v19, %v8081_v44  ;;  %v12743_v20 = vcombine.high %v7918_v62, %v7922_v41  ;;  %v12742_v46 = vcombine.low %v7918_v62, %v7922_v41  ;;  %v12615_v19 = vcombine.high %v7790_v3, %v7794_v5  ;;  %v8006_v62 = vld [vmem:[#allocation6 + $0xbd8] sm:$0xff] }
 0x5ed   :  { %v8010_v41 = vld [vmem:[#allocation6 + $0xbf8] sm:$0xff] }
 0x5ee   :  { %11213 = vmatpush2.bf16.msra.mxu1 %v12940_v59  ;;  %v7806_v59 = vld [vmem:[#allocation6 + $0x598] sm:$0xff] }
 0x5ef   :  { %11260 = vmatpush2.bf16.msra.mxu0 %v12534_v40  ;;  %11214 = vmatprep.subr.bf16.mxu1 %v12933_v6  ;;  %v7810_v40 = vld [vmem:[#allocation6 + $0x5b8] sm:$0xff] }
 0x5f0   :  { %11261 = vmatprep.subr.bf16.mxu0 %v12527_v34  ;;  %v7910_v6 = vld [vmem:[#allocation6 + $0x8d8] sm:$0xff]  ;;  %v12631_v61 = vcombine.high %v7806_v59, %v7810_v40  ;;  %v12630_v48 = vcombine.low %v7806_v59, %v7810_v40  ;;  %v12598_v40 = vcombine.low %v7774_v0, %v7778_v58 }
 0x5f1   :  { %v7914_v34 = vld [vmem:[#allocation6 + $0x8f8] sm:$0xff] }
 0x5f2   :  { %11215 = vmatpush2.bf16.msra.mxu1 %v12932_v50  ;;  %v8002_v59 = vld [vmem:[#allocation6 + $0xbb8] sm:$0xff] }
 0x5f3   :  { %11262 = vmatpush2.bf16.msra.mxu0 %v12526_v63  ;;  %11216 = vmatprep.subr.bf16.mxu1 %v12925_v52  ;;  %v7798_v63 = vld [vmem:[#allocation6 + $0x558] sm:$0xff] }
 0x5f4   :  { %11263 = vmatprep.subr.bf16.mxu0 %v12519_v24  ;;  %v7802_v52 = vld [vmem:[#allocation6 + $0x578] sm:$0xff] }
 0x5f6   :  { %11217 = vmatpush2.bf16.msra.mxu1 %v12924_v4 }
 0x5f7   :  { %11264 = vmatpush2.bf16.msra.mxu0 %v12518_v31  ;;  %11218 = vmatprep.subr.bf16.mxu1 %v12917_v12  ;;  %v12623_v31 = vcombine.high %v7798_v63, %v7802_v52 }
 0x5f8   :  { %11315 = vmatprep.subr.bf16.mxu0 %v12767_v1  ;;  %v12727_v1 = vcombine.high %v7902_v29, %v7906_v21 }
 0x5fa   :  { %v13501_v23 = vpop.f32.mrf.mxu0  ;;  %11219 = vmatpush2.bf16.msra.mxu1 %v12916_v9  ;;  %11266 = vmatmul.mubr.bf16.vlgmr.msra.gmra.mxu0 %v13396_v56  ;;  %v12750_v56 = vcombine.low %v7926_v36, %v7930_v32  ;;  %v7898_v9 = vld [vmem:[#allocation6 + $0x878] sm:$0xff] }
 0x5fb   :  { %11316 = vmatpush1.bf16.msra.mxu0 %v12766_v11  ;;  %11347 = vmatprep.mubr.bf16.mxu0 %v13405_v51  ;;  %v8152_v51 = vrot.slane %v13505_v45, %v1141_v54  ;;  %v12735_v54 = vcombine.high %v7910_v6, %v7914_v34  ;;  %v12622_v11 = vcombine.low %v7798_v63, %v7802_v52  ;;  %v7782_v36 = vld [vmem:[#allocation6 + $0x4d8] sm:$0xff] }
 0x5fc   :  { %v11023_v43 = vpop.f32.mrf.mxu0  ;;  %11220 = vmatprep.subr.bf16.mxu1 %v12909_v13  ;;  %11317 = vmatprep.subr.bf16.mxu0 %v12759_v22  ;;  %v12726_v22 = vcombine.low %v7902_v29, %v7906_v21  ;;  %v12719_v44 = vcombine.high %v7894_v35, %v7898_v9  ;;  %v7786_v32 = vld [vmem:[#allocation6 + $0x4f8] sm:$0xff] }
 0x5fd   :  { %v10940_v50 = vadd.f32 %v13485_v53, %v8152_v51  ;;  %v12734_v53 = vcombine.low %v7910_v6, %v7914_v34  ;;  %v7766_v51 = vld [vmem:[#allocation6 + $0x458] sm:$0xff]  ;;  %v12830_v6 = vcombine.low %v8006_v62, %v8010_v41 }
 0x5fe   :  { %v11025_v25 = vpop.f32.mrf.mxu0  ;;  %11221 = vmatpush2.bf16.msra.mxu1 %v12908_v27  ;;  %v7886_v27 = vld [vmem:[#allocation6 + $0x818] sm:$0xff] }
 0x5ff   :  { %11318 = vmatpush1.bf16.msra.mxu0 %v12758_v33  ;;  %11222 = vmatprep.subr.bf16.mxu1 %v12901_v38  ;;  %v7890_v33 = vld [vmem:[#allocation6 + $0x838] sm:$0xff]  ;;  %v12718_v38 = vcombine.low %v7894_v35, %v7898_v9  ;;  %v12606_v25 = vcombine.low %v7782_v36, %v7786_v32 }
 0x600   :  { %v11026_v16 = vpop.f32.mrf.mxu0  ;;  %11319 = vmatprep.subr.bf16.mxu0 %v12751_v55  ;;  %v12607_v55 = vcombine.high %v7782_v36, %v7786_v32  ;;  %v7878_v29 = vld [vmem:[#allocation6 + $0x7d8] sm:$0xff] }
 0x601   :  { %v7770_v16 = vld [vmem:[#allocation6 + $0x478] sm:$0xff] }
 0x602   :  { %11223 = vmatpush2.bf16.msra.mxu1 %v12900_v2  ;;  %v12710_v2 = vcombine.low %v7886_v27, %v7890_v33  ;;  %v12591_v34 = vcombine.high %v7766_v51, %v7770_v16  ;;  %v7882_v21 = vld [vmem:[#allocation6 + $0x7f8] sm:$0xff] }
 0x603   :  { %11320 = vmatpush1.bf16.msra.mxu0 %v12750_v56  ;;  %11274 = vmatprep.subr.bf16.mxu1 %v12639_v10  ;;  %v12599_v56 = vcombine.high %v7774_v0, %v7778_v58  ;;  %v12831_v10 = vcombine.high %v8006_v62, %v8010_v41 }
 0x604   :  { %11321 = vmatprep.subr.bf16.mxu0 %v12743_v20  ;;  %v7998_v20 = vld [vmem:[#allocation6 + $0xb98] sm:$0xff] }
 0x605   :  { %v10980_v24 = vpop.f32.mrf.mxu1  ;;  %11225 = vmatmul.mubr.bf16.vlgmr.msra.gmra.mxu1 %v13455_v17  ;;  %v12823_v47 = vcombine.high %v7998_v20, %v8002_v59  ;;  %v12822_v63 = vcombine.low %v7998_v20, %v8002_v59 }
 0x606   :  { %v10981_v30 = vadd.f32 %v10980_v24, %v10940_v50  ;;  %11275 = vmatpush1.bf16.msra.mxu1 %v12638_v14  ;;  %11306 = vmatprep.mubr.bf16.mxu1 %v13384_v42  ;;  %v7758_v14 = vld [vmem:[#allocation6 + $0x418] sm:$0xff] }
 0x607   :  { %v10982_v4 = vpop.f32.mrf.mxu1  ;;  %11322 = vmatpush1.bf16.msra.mxu0 %v12742_v46  ;;  %11276 = vmatprep.subr.bf16.mxu1 %v12631_v61  ;;  %v7762_v46 = vld [vmem:[#allocation6 + $0x438] sm:$0xff] }
 0x608   :  { %v10983_v12 = vadd.f32 %v10982_v4, %v10942_v28  ;;  %11323 = vmatprep.subr.bf16.mxu0 %v12735_v54  ;;  %v13518_v7 = vadd.f32 %v13501_v23, %v10981_v30  ;;  %v12614_v23 = vcombine.low %v7790_v3, %v7794_v5  ;;  %v7990_v61 = vld [vmem:[#allocation6 + $0xb58] sm:$0xff]  ;;  %v12590_v54 = vcombine.low %v7766_v51, %v7770_v16 }
 0x609   :  { %v10984_v8 = vpop.f32.mrf.mxu1  ;;  %v7994_v50 = vld [vmem:[#allocation6 + $0xb78] sm:$0xff]  ;;  %v12583_v52 = vcombine.high %v7758_v14, %v7762_v46 }
 0x60a   :  { %11277 = vmatpush1.bf16.msra.mxu1 %v12630_v48  ;;  %v13520_v42 = vadd.f32 %v11023_v43, %v10983_v12  ;;  %v12711_v43 = vcombine.high %v7886_v27, %v7890_v33  ;;  %v12815_v24 = vcombine.high %v7990_v61, %v7994_v50  ;;  %v7982_v28 = vld [vmem:[#allocation6 + $0xb18] sm:$0xff]  ;;  %v12582_v48 = vcombine.low %v7758_v14, %v7762_v46 }
 0x60b   :  { %v10985_v13 = vpop.f32.mrf.mxu1  ;;  %11324 = vmatpush1.bf16.msra.mxu0 %v12734_v53  ;;  %11278 = vmatprep.subr.bf16.mxu1 %v12623_v31  ;;  %v7986_v30 = vld [vmem:[#allocation6 + $0xb38] sm:$0xff]  ;;  %v12814_v4 = vcombine.low %v7990_v61, %v7994_v50  ;;  %v12703_v53 = vcombine.high %v7878_v29, %v7882_v21  ;;  %v12702_v8 = vcombine.low %v7878_v29, %v7882_v21 }
 0x60c   :  { %11325 = vmatprep.subr.bf16.mxu0 %v12727_v1  ;;  %v12807_v31 = vcombine.high %v7982_v28, %v7986_v30  ;;  %v7870_v12 = vld [vmem:[#allocation6 + $0x798] sm:$0xff]  ;;  %v12806_v35 = vcombine.low %v7982_v28, %v7986_v30 }
 0x60d   :  { %v7874_v1 = vld [vmem:[#allocation6 + $0x7b8] sm:$0xff] }
 0x60e   :  { %11279 = vmatpush1.bf16.msra.mxu1 %v12622_v11  ;;  %v7974_v3 = vld [vmem:[#allocation6 + $0xad8] sm:$0xff]  ;;  %v12695_v9 = vcombine.high %v7870_v12, %v7874_v1  ;;  %v12694_v36 = vcombine.low %v7870_v12, %v7874_v1 }
 0x60f   :  { %11326 = vmatpush1.bf16.msra.mxu0 %v12726_v22  ;;  %11280 = vmatprep.subr.bf16.mxu1 %v12615_v19  ;;  %v7978_v5 = vld [vmem:[#allocation6 + $0xaf8] sm:$0xff] }
 0x610   :  { %11327 = vmatprep.subr.bf16.mxu0 %v12719_v44  ;;  %v12799_v11 = vcombine.high %v7974_v3, %v7978_v5  ;;  %v7862_v13 = vld [vmem:[#allocation6 + $0x758] sm:$0xff]  ;;  %v12798_v32 = vcombine.low %v7974_v3, %v7978_v5 }
 0x611   :  { %v7866_v22 = vld [vmem:[#allocation6 + $0x778] sm:$0xff] }
 0x612   :  { %11281 = vmatpush1.bf16.msra.mxu1 %v12614_v23  ;;  %v7966_v19 = vld [vmem:[#allocation6 + $0xa98] sm:$0xff]  ;;  %v12687_v27 = vcombine.high %v7862_v13, %v7866_v22  ;;  %v12686_v0 = vcombine.low %v7862_v13, %v7866_v22 }
 0x613   :  { %11328 = vmatpush1.bf16.msra.mxu0 %v12718_v38  ;;  %11282 = vmatprep.subr.bf16.mxu1 %v12607_v55  ;;  %v7970_v44 = vld [vmem:[#allocation6 + $0xab8] sm:$0xff] }
 0x614   :  { %11329 = vmatprep.subr.bf16.mxu0 %v12711_v43  ;;  %v12791_v33 = vcombine.high %v7966_v19, %v7970_v44  ;;  %v7854_v23 = vld [vmem:[#allocation6 + $0x718] sm:$0xff]  ;;  %v12790_v58 = vcombine.low %v7966_v19, %v7970_v44 }
 0x615   :  { %v7858_v38 = vld [vmem:[#allocation6 + $0x738] sm:$0xff] }
 0x616   :  { %11283 = vmatpush1.bf16.msra.mxu1 %v12606_v25  ;;  %v7958_v55 = vld [vmem:[#allocation6 + $0xa58] sm:$0xff]  ;;  %v12679_v62 = vcombine.high %v7854_v23, %v7858_v38  ;;  %v12678_v51 = vcombine.low %v7854_v23, %v7858_v38 }
 0x617   :  { %11330 = vmatpush1.bf16.msra.mxu0 %v12710_v2  ;;  %11284 = vmatprep.subr.bf16.mxu1 %v12599_v56  ;;  %v7962_v43 = vld [vmem:[#allocation6 + $0xa78] sm:$0xff] }
 0x618   :  { %11331 = vmatprep.subr.bf16.mxu0 %v12831_v10  ;;  %v12783_v41 = vcombine.high %v7958_v55, %v7962_v43  ;;  %v7846_v25 = vld [vmem:[#allocation6 + $0x6d8] sm:$0xff]  ;;  %v12782_v16 = vcombine.low %v7958_v55, %v7962_v43 }
 0x619   :  { %v7850_v2 = vld [vmem:[#allocation6 + $0x6f8] sm:$0xff] }
 0x61a   :  { %11285 = vmatpush1.bf16.msra.mxu1 %v12598_v40  ;;  %v7950_v56 = vld [vmem:[#allocation6 + $0xa18] sm:$0xff]  ;;  %v12671_v20 = vcombine.high %v7846_v25, %v7850_v2 }
 0x61b   :  { %11332 = vmatpush2.bf16.msra.mxu0 %v12830_v6  ;;  %11286 = vmatprep.subr.bf16.mxu1 %v12591_v34  ;;  %v7954_v10 = vld [vmem:[#allocation6 + $0xa38] sm:$0xff]  ;;  %v12670_v34 = vcombine.low %v7846_v25, %v7850_v2 }
 0x61c   :  { %11333 = vmatprep.subr.bf16.mxu0 %v12823_v47  ;;  %v12775_v59 = vcombine.high %v7950_v56, %v7954_v10  ;;  %v7838_v40 = vld [vmem:[#allocation6 + $0x698] sm:$0xff]  ;;  %v12774_v47 = vcombine.low %v7950_v56, %v7954_v10 }
 0x61d   :  { %v7842_v6 = vld [vmem:[#allocation6 + $0x6b8] sm:$0xff] }
 0x61e   :  { %11287 = vmatpush1.bf16.msra.mxu1 %v12590_v54  ;;  %v12663_v14 = vcombine.high %v7838_v40, %v7842_v6  ;;  %v7830_v46 = vld [vmem:[#allocation6 + $0x658] sm:$0xff]  ;;  %v12662_v50 = vcombine.low %v7838_v40, %v7842_v6 }
 0x61f   :  { %11334 = vmatpush2.bf16.msra.mxu0 %v12822_v63  ;;  %11288 = vmatprep.subr.bf16.mxu1 %v12583_v52  ;;  %v7834_v61 = vld [vmem:[#allocation6 + $0x678] sm:$0xff] }
 0x620   :  { %11335 = vmatprep.subr.bf16.mxu0 %v12815_v24  ;;  %v12655_v54 = vcombine.high %v7830_v46, %v7834_v61  ;;  %v7822_v63 = vld [vmem:[#allocation6 + $0x618] sm:$0xff]  ;;  %v12654_v29 = vcombine.low %v7830_v46, %v7834_v61 }
 0x621   :  { %v7826_v52 = vld [vmem:[#allocation6 + $0x638] sm:$0xff] }
 0x622   :  { %11289 = vmatpush1.bf16.msra.mxu1 %v12582_v48  ;;  %v12647_v21 = vcombine.high %v7822_v63, %v7826_v52  ;;  %v8070_v30 = vld [vmem:[#allocation6 + $0xdd8] sm:$0xff] }
 0x623   :  { %11336 = vmatpush2.bf16.msra.mxu0 %v12814_v4  ;;  %11290 = vmatprep.subr.bf16.mxu1 %v12703_v53  ;;  %v8074_v48 = vld [vmem:[#allocation6 + $0xdf8] sm:$0xff]  ;;  %v12646_v53 = vcombine.low %v7822_v63, %v7826_v52 }
 0x624   :  { %11337 = vmatprep.subr.bf16.mxu0 %v12807_v31  ;;  %v12895_v31 = vcombine.high %v8070_v30, %v8074_v48  ;;  %v8062_v1 = vld [vmem:[#allocation6 + $0xd98] sm:$0xff]  ;;  %v12894_v5 = vcombine.low %v8070_v30, %v8074_v48 }
 0x625   :  { %v8066_v3 = vld [vmem:[#allocation6 + $0xdb8] sm:$0xff] }
 0x626   :  { %11291 = vmatpush2.bf16.msra.mxu1 %v12702_v8  ;;  %v12887_v8 = vcombine.high %v8062_v1, %v8066_v3  ;;  %v12886_v13 = vcombine.low %v8062_v1, %v8066_v3  ;;  %v8038_v38 = vld [vmem:[#allocation6 + $0xcd8] sm:$0xff] }
 0x627   :  { %11338 = vmatpush2.bf16.msra.mxu0 %v12806_v35  ;;  %11292 = vmatprep.subr.bf16.mxu1 %v12695_v9  ;;  %v8058_v35 = vld [vmem:[#allocation6 + $0xd78] sm:$0xff] }
 0x628   :  { %11339 = vmatprep.subr.bf16.mxu0 %v12799_v11  ;;  %v8042_v55 = vld [vmem:[#allocation6 + $0xcf8] sm:$0xff] }
 0x629   :  { %v12863_v43 = vcombine.high %v8038_v38, %v8042_v55  ;;  %v8022_v25 = vld [vmem:[#allocation6 + $0xc58] sm:$0xff] }
 0x62a   :  { %11293 = vmatpush2.bf16.msra.mxu1 %v12694_v36  ;;  %v8026_v2 = vld [vmem:[#allocation6 + $0xc78] sm:$0xff] }
 0x62b   :  { %11340 = vmatpush2.bf16.msra.mxu0 %v12798_v32  ;;  %11294 = vmatprep.subr.bf16.mxu1 %v12687_v27  ;;  %v8046_v32 = vld [vmem:[#allocation6 + $0xd18] sm:$0xff]  ;;  %v12847_v10 = vcombine.high %v8022_v25, %v8026_v2 }
 0x62c   :  { %11341 = vmatprep.subr.bf16.mxu0 %v12791_v33  ;;  %v8050_v27 = vld [vmem:[#allocation6 + $0xd38] sm:$0xff] }
 0x62d   :  { %v8134_v40 = vld [vmem:[#allocation6 + $0xfd8] sm:$0xff] }
 0x62e   :  { %11295 = vmatpush2.bf16.msra.mxu1 %v12686_v0  ;;  %v8030_v0 = vld [vmem:[#allocation6 + $0xc98] sm:$0xff] }
 0x62f   :  { %11342 = vmatpush2.bf16.msra.mxu0 %v12790_v58  ;;  %11296 = vmatprep.subr.bf16.mxu1 %v12679_v62  ;;  %v8034_v58 = vld [vmem:[#allocation6 + $0xcb8] sm:$0xff]  ;;  %v12862_v62 = vcombine.low %v8038_v38, %v8042_v55 }
 0x630   :  { %11343 = vmatprep.subr.bf16.mxu0 %v12783_v41  ;;  %v12855_v41 = vcombine.high %v8030_v0, %v8034_v58  ;;  %v12854_v56 = vcombine.low %v8030_v0, %v8034_v58  ;;  %v8138_v6 = vld [vmem:[#allocation6 + $0xff8] sm:$0xff] }
 0x631   :  { %v8130_v46 = vld [vmem:[#allocation6 + $0xfb8] sm:$0xff]  ;;  %v12958_v61 = vcombine.low %v8134_v40, %v8138_v6 }
 0x632   :  { %11297 = vmatpush2.bf16.msra.mxu1 %v12678_v51  ;;  %v8014_v51 = vld [vmem:[#allocation6 + $0xc18] sm:$0xff] }
 0x633   :  { %11344 = vmatpush2.bf16.msra.mxu0 %v12782_v16  ;;  %11298 = vmatprep.subr.bf16.mxu1 %v12671_v20  ;;  %v8018_v16 = vld [vmem:[#allocation6 + $0xc38] sm:$0xff]  ;;  %v12846_v20 = vcombine.low %v8022_v25, %v8026_v2 }
 0x634   :  { %11345 = vmatprep.subr.bf16.mxu0 %v12775_v59  ;;  %v12839_v59 = vcombine.high %v8014_v51, %v8018_v16  ;;  %v8122_v63 = vld [vmem:[#allocation6 + $0xf78] sm:$0xff] }
 0x635   :  { %v8114_v30 = vld [vmem:[#allocation6 + $0xf38] sm:$0xff] }
 0x636   :  { %11299 = vmatpush2.bf16.msra.mxu1 %v12670_v34  ;;  %v12838_v34 = vcombine.low %v8014_v51, %v8018_v16  ;;  %v8094_v3 = vld [vmem:[#allocation6 + $0xe98] sm:$0xff] }
 0x637   :  { %11346 = vmatpush2.bf16.msra.mxu0 %v12774_v47  ;;  %11300 = vmatprep.subr.bf16.mxu1 %v12663_v14  ;;  %v12959_v47 = vcombine.high %v8134_v40, %v8138_v6  ;;  %v8126_v14 = vld [vmem:[#allocation6 + $0xf98] sm:$0xff] }
 0x638   :  { %v12950_v52 = vcombine.low %v8126_v14, %v8130_v46 }
 0x63a   :  { %v13522_v24 = vpop.f32.mrf.mxu0  ;;  %11301 = vmatpush2.bf16.msra.mxu1 %v12662_v50  ;;  %11348 = vmatmul.mubr.bf16.vlgmr.msra.gmra.mxu0 %v13427_v60  ;;  %v8054_v60 = vld [vmem:[#allocation6 + $0xd58] sm:$0xff]  ;;  %v12951_v50 = vcombine.high %v8126_v14, %v8130_v46  ;;  %v8168_v14 = vrot.slane %v13505_v45, %v1157_v49 }
 0x63b   :  { %11302 = vmatprep.subr.bf16.mxu1 %v12655_v54  ;;  %v12879_v19 = vcombine.high %v8054_v60, %v8058_v35  ;;  %v8118_v54 = vld [vmem:[#allocation6 + $0xf58] sm:$0xff] }
 0x63c   :  { %v13525_v28 = vpop.f32.mrf.mxu0  ;;  %v12942_v48 = vcombine.low %v8118_v54, %v8122_v63 }
 0x63e   :  { %v11107_v4 = vpop.f32.mrf.mxu0  ;;  %11303 = vmatpush2.bf16.msra.mxu1 %v12654_v29  ;;  %v12943_v29 = vcombine.high %v8118_v54, %v8122_v63 }
 0x63f   :  { %11304 = vmatprep.subr.bf16.mxu1 %v12647_v21  ;;  %v8110_v21 = vld [vmem:[#allocation6 + $0xf18] sm:$0xff] }
 0x640   :  { %v11108_v12 = vpop.f32.mrf.mxu0  ;;  %v12935_v4 = vcombine.high %v8110_v21, %v8114_v30 }
 0x641   :  { %v12934_v12 = vcombine.low %v8110_v21, %v8114_v30 }
 0x642   :  { %11305 = vmatpush2.bf16.msra.mxu1 %v12646_v53  ;;  %v8102_v53 = vld [vmem:[#allocation6 + $0xed8] sm:$0xff] }
 0x643   :  { %11356 = vmatprep.subr.bf16.mxu1 %v12895_v31  ;;  %v8106_v31 = vld [vmem:[#allocation6 + $0xef8] sm:$0xff] }
 0x644   :  { %v12927_v1 = vcombine.high %v8102_v53, %v8106_v31 }
 0x645   :  { %v11062_v9 = vpop.f32.mrf.mxu1  ;;  %11307 = vmatmul.mubr.bf16.vlgmr.msra.gmra.mxu1 %v13401_v18 }
 0x646   :  { %v11063_v11 = vadd.f32 %v11062_v9, %v13518_v7  ;;  %11357 = vmatpush1.bf16.msra.mxu1 %v12894_v5  ;;  %11388 = vmatprep.mubr.bf16.mxu1 %v13453_v15  ;;  %v12878_v7 = vcombine.low %v8054_v60, %v8058_v35  ;;  %v12871_v15 = vcombine.high %v8046_v32, %v8050_v27  ;;  %v8098_v5 = vld [vmem:[#allocation6 + $0xeb8] sm:$0xff] }
 0x647   :  { %v11064_v22 = vpop.f32.mrf.mxu1  ;;  %11358 = vmatprep.subr.bf16.mxu1 %v12887_v8  ;;  %v12926_v8 = vcombine.low %v8102_v53, %v8106_v31  ;;  %v12919_v60 = vcombine.high %v8094_v3, %v8098_v5  ;;  %v8086_v35 = vld [vmem:[#allocation6 + $0xe58] sm:$0xff] }
 0x648   :  { %v11399_v44 = vmax.f32 %v11063_v11, 0.0  ;;  %v11065_v36 = vadd.f32 %v11064_v22, %v13520_v42  ;;  %v12870_v42 = vcombine.low %v8046_v32, %v8050_v27  ;;  %v8090_v9 = vld [vmem:[#allocation6 + $0xe78] sm:$0xff]  ;;  %v12918_v11 = vcombine.low %v8094_v3, %v8098_v5 }
 0x649   :  { %v11066_v33 = vpop.f32.mrf.mxu1  ;;  %v8078_v22 = vld [vmem:[#allocation6 + $0xe18] sm:$0xff] }
 0x64a   :  { %11407 = vst [vmem:[%s13570_s6 + $0x10] sm:$0xff] %v11399_v44  ;;  %v11400_v18 = vmax.f32 %v11065_v36, 0.0  ;;  %11359 = vmatpush1.bf16.msra.mxu1 %v12886_v13  ;;  %v12911_v13 = vcombine.high %v8086_v35, %v8090_v9  ;;  %v12910_v36 = vcombine.low %v8086_v35, %v8090_v9 }
 0x64b   :  { %v11067_v23 = vpop.f32.mrf.mxu1  ;;  %11360 = vmatprep.subr.bf16.mxu1 %v12879_v19  ;;  %v8082_v19 = vld [vmem:[#allocation6 + $0xe38] sm:$0xff] }
 0x64c   :  { %11408 = vst [vmem:[%s13570_s6 + $0x18] sm:$0xff] %v11400_v18  ;;  %v12903_v32 = vcombine.high %v8078_v22, %v8082_v19  ;;  %v12902_v18 = vcombine.low %v8078_v22, %v8082_v19 }
 0x64e   :  { %11361 = vmatpush1.bf16.msra.mxu1 %v12878_v7  ;;  %v8160_v7 = vrot.slane %v13505_v45, %v1149_v37 }
 0x64f   :  { %11362 = vmatprep.subr.bf16.mxu1 %v12871_v15  ;;  %v8164_v15 = vrot.slane %v13505_v45, %v1153_v39 }
 0x650   :  { %v11104_v38 = vadd.f32 %v13522_v24, %v8160_v7 }
 0x652   :  { %11363 = vmatpush1.bf16.msra.mxu1 %v12870_v42  ;;  %v11106_v42 = vadd.f32 %v13525_v28, %v8164_v15 }
 0x653   :  { %11364 = vmatprep.subr.bf16.mxu1 %v12863_v43 }
 0x656   :  { %11365 = vmatpush1.bf16.msra.mxu1 %v12862_v62 }
 0x657   :  { %11366 = vmatprep.subr.bf16.mxu1 %v12855_v41 }
 0x65a   :  { %11367 = vmatpush1.bf16.msra.mxu1 %v12854_v56 }
 0x65b   :  { %11368 = vmatprep.subr.bf16.mxu1 %v12847_v10 }
 0x65e   :  { %11369 = vmatpush1.bf16.msra.mxu1 %v12846_v20 }
 0x65f   :  { %11370 = vmatprep.subr.bf16.mxu1 %v12839_v59 }
 0x662   :  { %11371 = vmatpush1.bf16.msra.mxu1 %v12838_v34 }
 0x663   :  { %11372 = vmatprep.subr.bf16.mxu1 %v12959_v47 }
 0x666   :  { %11373 = vmatpush2.bf16.msra.mxu1 %v12958_v61  ;;  %v8172_v61 = vrot.slane %v13505_v45, %v1161_v57 }
 0x667   :  { %11374 = vmatprep.subr.bf16.mxu1 %v12951_v50 }
 0x66a   :  { %11375 = vmatpush2.bf16.msra.mxu1 %v12950_v52 }
 0x66b   :  { %11376 = vmatprep.subr.bf16.mxu1 %v12943_v29 }
 0x66e   :  { %11377 = vmatpush2.bf16.msra.mxu1 %v12942_v48 }
 0x66f   :  { %11378 = vmatprep.subr.bf16.mxu1 %v12935_v4 }
 0x672   :  { %11379 = vmatpush2.bf16.msra.mxu1 %v12934_v12 }
 0x673   :  { %11380 = vmatprep.subr.bf16.mxu1 %v12927_v1 }
 0x676   :  { %11381 = vmatpush2.bf16.msra.mxu1 %v12926_v8 }
 0x677   :  { %11382 = vmatprep.subr.bf16.mxu1 %v12919_v60 }
 0x67a   :  { %v11185_v44 = vpop.f32.mrf.mxu0  ;;  %11383 = vmatpush2.bf16.msra.mxu1 %v12918_v11 }
 0x67b   :  { %11384 = vmatprep.subr.bf16.mxu1 %v12911_v13 }
 0x67c   :  { %v11187_v27 = vpop.f32.mrf.mxu0 }
 0x67e   :  { %v11189_v33 = vpop.f32.mrf.mxu0  ;;  %11385 = vmatpush2.bf16.msra.mxu1 %v12910_v36 }
 0x67f   :  { %11386 = vmatprep.subr.bf16.mxu1 %v12903_v32 }
 0x680   :  { %v11190_v23 = vpop.f32.mrf.mxu0 }
 0x682   :  { %11387 = vmatpush2.bf16.msra.mxu1 %v12902_v18 }
 0x685   :  { %v11144_v55 = vpop.f32.mrf.mxu1  ;;  %11389 = vmatmul.mubr.bf16.vlgmr.msra.gmra.mxu1 %v13455_v17 }
 0x686   :  { %v11145_v43 = vadd.f32 %v11144_v55, %v11104_v38 }
 0x687   :  { %v11146_v0 = vpop.f32.mrf.mxu1 }
 0x688   :  { %v11147_v58 = vadd.f32 %v11146_v0, %v11106_v42  ;;  %v11186_v62 = vadd.f32 %v11185_v44, %v11145_v43 }
 0x689   :  { %v11148_v41 = vpop.f32.mrf.mxu1 }
 0x68a   :  { %v11188_v25 = vadd.f32 %v11187_v27, %v11147_v58 }
 0x68b   :  { %v11149_v37 = vpop.f32.mrf.mxu1 }
 0x6ba   :  { %v11267_v2 = vpop.f32.mrf.mxu0 }
 0x6bb   :  { %v11268_v50 = vadd.f32 %v11267_v2, %v8168_v14 }
 0x6bc   :  { %v11269_v56 = vpop.f32.mrf.mxu0 }
 0x6bd   :  { %v11270_v63 = vadd.f32 %v11269_v56, %v8172_v61 }
 0x6be   :  { %v11271_v10 = vpop.f32.mrf.mxu0 }
 0x6c0   :  { %v11272_v51 = vpop.f32.mrf.mxu0 }
 0x6c5   :  { %v11226_v39 = vpop.f32.mrf.mxu1 }
 0x6c6   :  { %v11227_v16 = vadd.f32 %v11226_v39, %v11186_v62 }
 0x6c7   :  { %v11228_v20 = vpop.f32.mrf.mxu1 }
 0x6c8   :  { %v11401_v24 = vmax.f32 %v11227_v16, 0.0  ;;  %v11229_v59 = vadd.f32 %v11228_v20, %v11188_v25 }
 0x6c9   :  { %v11230_v40 = vpop.f32.mrf.mxu1 }
 0x6ca   :  { %11409 = vst [vmem:[%s13570_s6 + $0x20] sm:$0xff] %v11401_v24  ;;  %v11402_v17 = vmax.f32 %v11229_v59, 0.0 }
 0x6cb   :  { %v11231_v28 = vpop.f32.mrf.mxu1 }
 0x6cc   :  { %11410 = vst [vmem:[%s13570_s6 + $0x28] sm:$0xff] %v11402_v17 }
 0x6fa   :  { %v11349_v6 = vpop.f32.mrf.mxu0 }
 0x6fc   :  { %v11351_v34 = vpop.f32.mrf.mxu0 }
 0x6fe   :  { %v11353_v47 = vpop.f32.mrf.mxu0 }
 0x700   :  { %v11354_v46 = vpop.f32.mrf.mxu0 }
 0x705   :  { %v11308_v54 = vpop.f32.mrf.mxu1 }
 0x706   :  { %v11309_v52 = vadd.f32 %v11308_v54, %v11268_v50 }
 0x707   :  { %v11310_v29 = vpop.f32.mrf.mxu1 }
 0x708   :  { %v11311_v21 = vadd.f32 %v11310_v29, %v11270_v63  ;;  %v11350_v30 = vadd.f32 %v11349_v6, %v11309_v52 }
 0x709   :  { %v11312_v48 = vpop.f32.mrf.mxu1 }
 0x70a   :  { %v11352_v4 = vadd.f32 %v11351_v34, %v11311_v21 }
 0x70b   :  { %v11313_v53 = vpop.f32.mrf.mxu1 }
 0x745   :  { %v11390_v31 = vpop.f32.mrf.mxu1 }
 0x746   :  { %v11391_v12 = vadd.f32 %v11390_v31, %v11350_v30 }
 0x747   :  { %v11392_v1 = vpop.f32.mrf.mxu1 }
 0x748   :  { %v11403_v3 = vmax.f32 %v11391_v12, 0.0  ;;  %v11393_v49 = vadd.f32 %v11392_v1, %v11352_v4 }
 0x749   :  { %v11394_v5 = vpop.f32.mrf.mxu1 }
 0x74a   :  { %11411 = vst [vmem:[%s13570_s6 + $0x30] sm:$0xff] %v11403_v3  ;;  %v11404_v26 = vmax.f32 %v11393_v49, 0.0 }
 0x74b   :  { %v11395_v57 = vpop.f32.mrf.mxu1 }
 0x74c   :  { %11412 = vst [vmem:[%s13570_s6 + $0x38] sm:$0xff] %v11404_v26 }
 0x74d   :  { %11421 = vsyncpa [#allocation3], 1 }
 0x74e   :  { %11422 = vsyncpa [#allocation5], 1 }
 0x74f   :  { %11423 = vsyncpa [#allocation8], 1 }

</bundles_post_ra>
